<compile_context>
chip_gen: v6e
topology: v6e:2x2x1
jax: 0.10.0
libtpu: 0.0.40
codegen_flags: <defaults>
</compile_context>

<pallas_src>
import math

import numpy as np

import jax
import jax.numpy as jnp
from jax.experimental import pallas as pl
from jax.experimental.pallas import tpu as pltpu

# ------------------------------ static config -------------------------------

DIM = 64                        # feature channels (module default)
NUM_CLASSES = 10
LAYER_DEPTH = 4
DELTAT = 6.0 / LAYER_DEPTH
SQRT_DT = math.sqrt(DELTAT)
SIGMA = 500.0
GROUPS = min(32, DIM)           # GroupNorm(min(32, dim), dim)
CG = DIM // GROUPS              # channels per group (= 2)
GN_EPS = 1e-5
LANE = 128                      # lane-dense output padding

# spatial sizes for a 16x16 single-channel input
H0 = 16
K1 = 3                          # conv1: 3x3 stride 1
K23 = 4                         # conv2/conv3: 4x4 stride 2
H1 = H0 - K1 + 1                # 14
H2 = (H1 - K23) // 2 + 1        # 6
H3 = (H2 - K23) // 2 + 1        # 2
S1, S2, S3 = H1 * H1, H2 * H2, H3 * H3        # 196, 36, 4
KK = K23 * K23                  # 16 taps for conv2/conv3


# --------------------- constant gather / selector matrices ------------------

def _gather_matrix(hin, hout, k, stride):
    """g[t, out_pos, in_pos] = 1 iff input pixel feeds tap t of out_pos."""
    g = np.zeros((k * k, hout * hout, hin * hin), np.float32)
    for kh in range(k):
        for kw in range(k):
            t = kh * k + kw
            for ho in range(hout):
                for wo in range(hout):
                    y = stride * ho + kh
                    x = stride * wo + kw
                    g[t, ho * hout + wo, y * hin + x] = 1.0
    return g


_G2_NP = _gather_matrix(H1, H2, K23, 2)                        # (16, 36, 196)
_G3_NP = _gather_matrix(H2, H3, K23, 2)                        # (16,  4,  36)
_GSEL_NP = np.kron(np.eye(GROUPS, dtype=np.float32),
                   np.ones((CG, CG), np.float32))              # (64, 64)


# ------------------------------- fused kernel -------------------------------

def _gn_relu(a, gamma, beta, gsel, n_per_group):
    """GroupNorm(min(32,C), C) + ReLU on a (S, C) tile, one sample."""
    s1 = jnp.sum(a, axis=0, keepdims=True)                     # (1, C)
    s2 = jnp.sum(a * a, axis=0, keepdims=True)                 # (1, C)
    gs1 = jnp.dot(s1, gsel, preferred_element_type=jnp.float32)   # per-channel group sums
    gs2 = jnp.dot(s2, gsel, preferred_element_type=jnp.float32)
    inv_n = 1.0 / float(n_per_group)
    mean = gs1 * inv_n
    var = gs2 * inv_n - mean * mean
    inv = jax.lax.rsqrt(var + GN_EPS)
    return jnp.maximum((a - mean) * (inv * gamma) + beta, 0.0)


def fused_sdenet_kernel(patches_ref, w1_ref, g2_ref, w2_ref, g3_ref, w3_ref,
                        cb_ref, gng_ref, gnb_ref, gsel_ref, diffp_ref,
                        fcw_ref, fcb_ref, noise_ref, scal_ref,
                        logits_ref, diff_ref):
    gsel = gsel_ref[...]

    # ---- conv1 (1->64, 3x3, s=1) via im2col GEMM, + GN1 + ReLU -------------
    a = jnp.dot(patches_ref[0], w1_ref[...],
                preferred_element_type=jnp.float32)            # (196, 64)
    a = _gn_relu(a + cb_ref[0], gng_ref[0], gnb_ref[0], gsel, S1 * CG)

    # ---- conv2 (64->64, 4x4, s=2): per-tap gather matmul + tap GEMM --------
    acc = jnp.zeros((S2, DIM), jnp.float32)
    for t in range(KK):
        pt = jnp.dot(g2_ref[t], a, preferred_element_type=jnp.float32)   # (36, 64)
        acc = acc + jnp.dot(pt, w2_ref[t], preferred_element_type=jnp.float32)
    a = _gn_relu(acc + cb_ref[1], gng_ref[1], gnb_ref[1], gsel, S2 * CG)

    # ---- conv3 (64->64, 4x4, s=2) ------------------------------------------
    acc = jnp.zeros((S3, DIM), jnp.float32)
    for t in range(KK):
        pt = jnp.dot(g3_ref[t], a, preferred_element_type=jnp.float32)   # (4, 64)
        acc = acc + jnp.dot(pt, w3_ref[t], preferred_element_type=jnp.float32)
    feat = acc + cb_ref[2]                                     # (4, 64) = (H*W, C)

    # ---- diffusion head: mean -> Linear(1,100) -> ReLU -> Linear(100,1) ----
    s_ch = jnp.sum(feat, axis=0, keepdims=True)                # (1, 64)
    pooled = jnp.sum(s_ch, axis=1, keepdims=True) * (1.0 / (S3 * DIM))   # (1, 1)
    h = jnp.maximum(pooled * diffp_ref[0] + diffp_ref[1], 0.0)           # (1, 100)
    z = jnp.sum(h * diffp_ref[2], axis=1, keepdims=True) + scal_ref[2]   # (1, 1)
    sig = 1.0 / (1.0 + jnp.exp(-z))                                      # sigmoid
    diff_ref[0] = sig
    diff_coef = (SIGMA * SQRT_DT) * sig                        # (1,1), broadcast below

    # ---- Euler-Maruyama SDE loop; drift = per-element Linear(1,1) + ReLU ---
    drift_w = scal_ref[0]
    drift_b = scal_ref[1]
    out = feat
    for i in range(LAYER_DEPTH):
        drift = jnp.maximum(drift_w * out + drift_b, 0.0)
        out = out + drift * DELTAT + diff_coef * noise_ref[i, 0]

    # ---- fc_layers: GN3 + ReLU + global avg pool + Linear(64, 10) ----------
    out = _gn_relu(out, gng_ref[2], gnb_ref[2], gsel, S3 * CG)
    pooled2 = jnp.sum(out, axis=0, keepdims=True) * (1.0 / S3)           # (1, 64)
    logits_ref[0] = (jnp.dot(pooled2, fcw_ref[...],
                             preferred_element_type=jnp.float32) + fcb_ref[...])


# --------------------------------- wrapper ----------------------------------

def sdenet_forward(params, x, noise, training_diffusion=False):
    N = x.shape[0]

    # conv1 im2col on the *raw input* only (pure data movement, tiny, fused by
    # XLA before the kernel -- no activation ever round-trips through HBM).
    cols = [x[:, 0, kh:kh + H1, kw:kw + H1]
            for kh in range(K1) for kw in range(K1)]
    patches1 = jnp.stack(cols, axis=-1).reshape(N, S1, K1 * K1)

    # Weight-side packing (no activation-sized tensors involved).
    w1 = params["conv1_w"].transpose(2, 3, 1, 0).reshape(K1 * K1, DIM)
    w2 = params["conv2_w"].transpose(2, 3, 1, 0).reshape(KK, DIM, DIM)
    w3 = params["conv3_w"].transpose(2, 3, 1, 0).reshape(KK, DIM, DIM)
    cb = jnp.stack([params["conv1_b"], params["conv2_b"],
                    params["conv3_b"]]).reshape(3, 1, DIM)
    gng = jnp.stack([params["gn1_g"], params["gn2_g"],
                     params["gn3_g"]]).reshape(3, 1, DIM)
    gnb = jnp.stack([params["gn1_b"], params["gn2_b"],
                     params["gn3_b"]]).reshape(3, 1, DIM)
    diffp = jnp.stack([params["diff_w1"], params["diff_b1"],
                       params["diff_w2"]]).reshape(3, 1, 100)
    fcw = jnp.pad(params["fc_w"], ((0, 0), (0, LANE - NUM_CLASSES)))
    fcb = jnp.pad(params["fc_b"].reshape(1, NUM_CLASSES),
                  ((0, 0), (0, LANE - NUM_CLASSES)))
    # SMEM scalars: [drift_w, drift_b, diffusion_fc2_bias, unused]
    scal = jnp.stack([params["drift_w"], params["drift_b"],
                      params["diff_b2"], jnp.zeros((), jnp.float32)])

    g2 = jnp.asarray(_G2_NP)
    g3 = jnp.asarray(_G3_NP)
    gsel = jnp.asarray(_GSEL_NP)

    flops = N * 2 * (S1 * K1 * K1 * DIM
                     + KK * (S2 * S1 * DIM + S2 * DIM * DIM)
                     + KK * (S3 * S2 * DIM + S3 * DIM * DIM)
                     + DIM * LANE)
    bytes_accessed = 4 * (patches1.size + w1.size + g2.size + w2.size
                          + g3.size + w3.size + cb.size + gng.size + gnb.size
                          + gsel.size + diffp.size + fcw.size + fcb.size
                          + noise.size + 4 + N * (LANE + 1))

    in_specs = [
        pl.BlockSpec((1, S1, K1 * K1), lambda n: (n, 0, 0)),             # patches1
        pl.BlockSpec((K1 * K1, DIM), lambda n: (0, 0)),                  # w1
        pl.BlockSpec((KK, S2, S1), lambda n: (0, 0, 0)),                 # G2
        pl.BlockSpec((KK, DIM, DIM), lambda n: (0, 0, 0)),               # w2
        pl.BlockSpec((KK, S3, S2), lambda n: (0, 0, 0)),                 # G3
        pl.BlockSpec((KK, DIM, DIM), lambda n: (0, 0, 0)),               # w3
        pl.BlockSpec((3, 1, DIM), lambda n: (0, 0, 0)),                  # conv biases
        pl.BlockSpec((3, 1, DIM), lambda n: (0, 0, 0)),                  # gn gammas
        pl.BlockSpec((3, 1, DIM), lambda n: (0, 0, 0)),                  # gn betas
        pl.BlockSpec((DIM, DIM), lambda n: (0, 0)),                      # group selector
        pl.BlockSpec((3, 1, 100), lambda n: (0, 0, 0)),                  # diffusion MLP
        pl.BlockSpec((DIM, LANE), lambda n: (0, 0)),                     # fc weight (padded)
        pl.BlockSpec((1, LANE), lambda n: (0, 0)),                       # fc bias (padded)
        pl.BlockSpec((LAYER_DEPTH, 1, S3, DIM), lambda n: (0, n, 0, 0)), # noise
        pl.BlockSpec((4,), lambda n: (0,),
                     memory_space=pltpu.MemorySpace.SMEM),               # drift/diff scalars
    ]
    out_specs = [
        pl.BlockSpec((1, 1, LANE), lambda n: (n, 0, 0)),                 # padded logits
        pl.BlockSpec((1, 1, 1), lambda n: (n, 0, 0)),                    # diffusion sigmoid
    ]
    out_shape = [
        jax.ShapeDtypeStruct((N, 1, LANE), jnp.float32),
        jax.ShapeDtypeStruct((N, 1, 1), jnp.float32),
    ]

    logits_pad, diff = pl.pallas_call(
        fused_sdenet_kernel,
        grid=(N,),
        in_specs=in_specs,
        out_specs=out_specs,
        out_shape=out_shape,
        compiler_params=pltpu.CompilerParams(
            dimension_semantics=("parallel",)),
        cost_estimate=pl.CostEstimate(flops=int(flops),
                                      transcendentals=int(N * 512),
                                      bytes_accessed=int(bytes_accessed)),
    )(patches1, w1, g2, w2, g3, w3, cb, gng, gnb, gsel, diffp, fcw, fcb,
      noise, scal)

    if training_diffusion:
        return diff[:, 0, :]                       # (N, 1) diffusion-net output
    return logits_pad[:, 0, :NUM_CLASSES]          # (N, 10) logits


# ------------------------------ parameter init ------------------------------

def init_parameters(key):
    ks = jax.random.split(key, 8)

    def kaiming(k, shape):  # kaiming_normal_, mode='fan_out' (fan_out = Cout*kh*kw)
        fan_out = shape[0] * shape[2] * shape[3]
        return jax.random.normal(k, shape, jnp.float32) * math.sqrt(2.0 / fan_out)

    p = {}
    p["conv1_w"] = kaiming(ks[0], (DIM, 1, K1, K1))
    p["conv1_b"] = jnp.zeros((DIM,), jnp.float32)
    p["conv2_w"] = kaiming(ks[1], (DIM, DIM, K23, K23))
    p["conv2_b"] = jnp.zeros((DIM,), jnp.float32)
    p["conv3_w"] = kaiming(ks[2], (DIM, DIM, K23, K23))
    p["conv3_b"] = jnp.zeros((DIM,), jnp.float32)
    # GroupNorm affine params keep PyTorch defaults (weight=1, bias=0).
    for name in ("gn1", "gn2", "gn3"):
        p[name + "_g"] = jnp.ones((DIM,), jnp.float32)
        p[name + "_b"] = jnp.zeros((DIM,), jnp.float32)
    # Drift: Linear(1,1) -> per-element affine; normal(std=1e-3), bias=0.
    # (kept as device scalars -- no host sync, no constant baked into the trace)
    p["drift_w"] = jax.random.normal(ks[3], (), jnp.float32) * 1e-3
    p["drift_b"] = jnp.zeros((), jnp.float32)
    # Diffusion: Linear(1,100), Linear(100,1); normal(std=1e-3), bias=0.
    p["diff_w1"] = jax.random.normal(ks[4], (100,), jnp.float32) * 1e-3
    p["diff_b1"] = jnp.zeros((100,), jnp.float32)
    p["diff_w2"] = jax.random.normal(ks[5], (100,), jnp.float32) * 1e-3
    p["diff_b2"] = jnp.zeros((), jnp.float32)
    # Classifier: Linear(dim, 10); normal(std=1e-3), bias=0 (stored as (in,out)).
    p["fc_w"] = jax.random.normal(ks[6], (DIM, NUM_CLASSES), jnp.float32) * 1e-3
    p["fc_b"] = jnp.zeros((NUM_CLASSES,), jnp.float32)
    return p


# ----------------------------------- main -----------------------------------

if __name__ == "__main__":
    key = jax.random.PRNGKey(0)
    pkey, xkey, nkey = jax.random.split(key, 3)

    params = init_parameters(pkey)

    N = 2
    x = jax.random.normal(xkey, (N, 1, H0, H0), jnp.float32)   # NCHW, 1 input channel
    # torch.randn_like inside the SDE loop -> pre-sampled standard normals,
    # laid out as (steps, batch, spatial, channel) to match the kernel layout.
    noise = jax.random.normal(nkey, (LAYER_DEPTH, N, S3, DIM), jnp.float32)

    fwd = jax.jit(sdenet_forward, static_argnames=("training_diffusion",))

    logits = fwd(params, x, noise)
    logits = jax.block_until_ready(logits)
    assert logits.shape == (N, NUM_CLASSES)
    assert bool(jnp.all(jnp.isfinite(logits)))

    diff = fwd(params, x, noise, training_diffusion=True)
    diff = jax.block_until_ready(diff)
    assert diff.shape == (N, 1)
    assert bool(jnp.all(jnp.isfinite(diff)))

    print("KERNEL_OK")
</pallas_src>

<mosaic_0001>
module attributes {stable_mosaic.version = 11 : i64} {
  func.func @fused_sdenet_kernel(%arg0: i32, %arg1: memref<1x196x9xf32, #tpu.memory_space<vmem>>, %arg2: memref<9x64xf32, #tpu.memory_space<vmem>>, %arg3: memref<16x36x196xf32, #tpu.memory_space<vmem>>, %arg4: memref<16x64x64xf32, #tpu.memory_space<vmem>>, %arg5: memref<16x4x36xf32, #tpu.memory_space<vmem>>, %arg6: memref<16x64x64xf32, #tpu.memory_space<vmem>>, %arg7: memref<3x1x64xf32, #tpu.memory_space<vmem>>, %arg8: memref<3x1x64xf32, #tpu.memory_space<vmem>>, %arg9: memref<3x1x64xf32, #tpu.memory_space<vmem>>, %arg10: memref<64x64xf32, #tpu.memory_space<vmem>>, %arg11: memref<3x1x100xf32, #tpu.memory_space<vmem>>, %arg12: memref<64x128xf32, #tpu.memory_space<vmem>>, %arg13: memref<1x128xf32, #tpu.memory_space<vmem>>, %arg14: memref<4x1x4x64xf32, #tpu.memory_space<vmem>>, %arg15: memref<4xf32, #tpu.memory_space<smem>>, %arg16: memref<1x1x128xf32, #tpu.memory_space<vmem>>, %arg17: memref<1x1x1xf32, #tpu.memory_space<vmem>>) attributes {dimension_semantics = [#tpu.dimension_semantics<parallel>], iteration_bounds = array<i64: 2>, scalar_prefetch = 0 : i64, scratch_operands = 0 : i64, tpu.core_type = #tpu.core_type<tc>, window_params = [{transform_indices = @transform_0, window_bounds = array<i64: 1, 196, 9>}, {pipeline_mode = #tpu.pipeline_mode<synchronous>, transform_indices = @transform_1, window_bounds = array<i64: 9, 64>}, {pipeline_mode = #tpu.pipeline_mode<synchronous>, transform_indices = @transform_2, window_bounds = array<i64: 16, 36, 196>}, {pipeline_mode = #tpu.pipeline_mode<synchronous>, transform_indices = @transform_3, window_bounds = array<i64: 16, 64, 64>}, {pipeline_mode = #tpu.pipeline_mode<synchronous>, transform_indices = @transform_4, window_bounds = array<i64: 16, 4, 36>}, {pipeline_mode = #tpu.pipeline_mode<synchronous>, transform_indices = @transform_5, window_bounds = array<i64: 16, 64, 64>}, {pipeline_mode = #tpu.pipeline_mode<synchronous>, transform_indices = @transform_6, window_bounds = array<i64: 3, 1, 64>}, {pipeline_mode = #tpu.pipeline_mode<synchronous>, transform_indices = @transform_7, window_bounds = array<i64: 3, 1, 64>}, {pipeline_mode = #tpu.pipeline_mode<synchronous>, transform_indices = @transform_8, window_bounds = array<i64: 3, 1, 64>}, {pipeline_mode = #tpu.pipeline_mode<synchronous>, transform_indices = @transform_9, window_bounds = array<i64: 64, 64>}, {pipeline_mode = #tpu.pipeline_mode<synchronous>, transform_indices = @transform_10, window_bounds = array<i64: 3, 1, 100>}, {pipeline_mode = #tpu.pipeline_mode<synchronous>, transform_indices = @transform_11, window_bounds = array<i64: 64, 128>}, {pipeline_mode = #tpu.pipeline_mode<synchronous>, transform_indices = @transform_12, window_bounds = array<i64: 1, 128>}, {transform_indices = @transform_13, window_bounds = array<i64: 4, 1, 4, 64>}, {transform_indices = @transform_14, window_bounds = array<i64: 4>}, {transform_indices = @transform_15, window_bounds = array<i64: 1, 1, 128>}, {transform_indices = @transform_16, window_bounds = array<i64: 1, 1, 1>}]} {
    %c0 = arith.constant 0 : index
    %c0_0 = arith.constant 0 : index
    %0 = vector.load %arg10[%c0, %c0_0] : memref<64x64xf32, #tpu.memory_space<vmem>>, vector<64x64xf32>
    %c0_1 = arith.constant 0 : index
    %c0_2 = arith.constant 0 : index
    %c0_3 = arith.constant 0 : index
    %1 = vector.load %arg1[%c0_1, %c0_2, %c0_3] : memref<1x196x9xf32, #tpu.memory_space<vmem>>, vector<1x196x9xf32>
    %2 = vector.shape_cast %1 : vector<1x196x9xf32> to vector<196x9xf32>
    %c0_4 = arith.constant 0 : index
    %c0_5 = arith.constant 0 : index
    %3 = vector.load %arg2[%c0_4, %c0_5] : memref<9x64xf32, #tpu.memory_space<vmem>>, vector<9x64xf32>
    %cst = arith.constant dense<0.000000e+00> : vector<196x64xf32>
    %4 = tpu.matmul %2, %3, %cst {dimension_numbers = #tpu.dot_dimension_numbers<[1], [0], [0], [1], [0, 0, 1, 1], [], []>} : vector<196x9xf32>, vector<9x64xf32>, vector<196x64xf32> -> vector<196x64xf32>
    %c0_6 = arith.constant 0 : index
    %c0_7 = arith.constant 0 : index
    %c0_8 = arith.constant 0 : index
    %5 = vector.load %arg7[%c0_6, %c0_7, %c0_8] : memref<3x1x64xf32, #tpu.memory_space<vmem>>, vector<1x1x64xf32>
    %6 = vector.shape_cast %5 : vector<1x1x64xf32> to vector<1x64xf32>
    %7 = vector.broadcast %6 : vector<1x64xf32> to vector<196x64xf32>
    %8 = arith.addf %4, %7 : vector<196x64xf32>
    %c0_9 = arith.constant 0 : index
    %c0_10 = arith.constant 0 : index
    %c0_11 = arith.constant 0 : index
    %9 = vector.load %arg8[%c0_9, %c0_10, %c0_11] : memref<3x1x64xf32, #tpu.memory_space<vmem>>, vector<1x1x64xf32>
    %10 = vector.shape_cast %9 : vector<1x1x64xf32> to vector<1x64xf32>
    %c0_12 = arith.constant 0 : index
    %c0_13 = arith.constant 0 : index
    %c0_14 = arith.constant 0 : index
    %11 = vector.load %arg9[%c0_12, %c0_13, %c0_14] : memref<3x1x64xf32, #tpu.memory_space<vmem>>, vector<1x1x64xf32>
    %12 = vector.shape_cast %11 : vector<1x1x64xf32> to vector<1x64xf32>
    %cst_15 = arith.constant dense<0.000000e+00> : vector<64xf32>
    %13 = vector.multi_reduction <add>, %8, %cst_15 [0] : vector<196x64xf32> to vector<64xf32>
    %14 = vector.shape_cast %13 : vector<64xf32> to vector<1x64xf32>
    %15 = arith.mulf %8, %8 : vector<196x64xf32>
    %cst_16 = arith.constant dense<0.000000e+00> : vector<64xf32>
    %16 = vector.multi_reduction <add>, %15, %cst_16 [0] : vector<196x64xf32> to vector<64xf32>
    %17 = vector.shape_cast %16 : vector<64xf32> to vector<1x64xf32>
    %cst_17 = arith.constant dense<0.000000e+00> : vector<1x64xf32>
    %18 = tpu.matmul %14, %0, %cst_17 {dimension_numbers = #tpu.dot_dimension_numbers<[1], [0], [0], [1], [0, 0, 1, 1], [], []>} : vector<1x64xf32>, vector<64x64xf32>, vector<1x64xf32> -> vector<1x64xf32>
    %cst_18 = arith.constant dense<0.000000e+00> : vector<1x64xf32>
    %19 = tpu.matmul %17, %0, %cst_18 {dimension_numbers = #tpu.dot_dimension_numbers<[1], [0], [0], [1], [0, 0, 1, 1], [], []>} : vector<1x64xf32>, vector<64x64xf32>, vector<1x64xf32> -> vector<1x64xf32>
    %cst_19 = arith.constant 0.00255102036 : f32
    %20 = vector.broadcast %cst_19 : f32 to vector<1x64xf32>
    %21 = arith.mulf %18, %20 : vector<1x64xf32>
    %cst_20 = arith.constant 0.00255102036 : f32
    %22 = vector.broadcast %cst_20 : f32 to vector<1x64xf32>
    %23 = arith.mulf %19, %22 : vector<1x64xf32>
    %24 = arith.mulf %21, %21 : vector<1x64xf32>
    %25 = arith.subf %23, %24 : vector<1x64xf32>
    %cst_21 = arith.constant 9.99999974E-6 : f32
    %26 = vector.broadcast %cst_21 : f32 to vector<1x64xf32>
    %27 = arith.addf %25, %26 : vector<1x64xf32>
    %28 = math.rsqrt %27 : vector<1x64xf32>
    %29 = vector.broadcast %21 : vector<1x64xf32> to vector<196x64xf32>
    %30 = arith.subf %8, %29 : vector<196x64xf32>
    %31 = arith.mulf %28, %10 : vector<1x64xf32>
    %32 = vector.broadcast %31 : vector<1x64xf32> to vector<196x64xf32>
    %33 = arith.mulf %30, %32 : vector<196x64xf32>
    %34 = vector.broadcast %12 : vector<1x64xf32> to vector<196x64xf32>
    %35 = arith.addf %33, %34 : vector<196x64xf32>
    %cst_22 = arith.constant 0.000000e+00 : f32
    %36 = vector.broadcast %cst_22 : f32 to vector<196x64xf32>
    %37 = arith.maximumf %35, %36 : vector<196x64xf32>
    %cst_23 = arith.constant 0.000000e+00 : f32
    %38 = vector.broadcast %cst_23 : f32 to vector<36x64xf32>
    %c0_24 = arith.constant 0 : index
    %c0_25 = arith.constant 0 : index
    %c0_26 = arith.constant 0 : index
    %39 = vector.load %arg3[%c0_24, %c0_25, %c0_26] : memref<16x36x196xf32, #tpu.memory_space<vmem>>, vector<1x36x196xf32>
    %40 = vector.shape_cast %39 : vector<1x36x196xf32> to vector<36x196xf32>
    %cst_27 = arith.constant dense<0.000000e+00> : vector<36x64xf32>
    %41 = tpu.matmul %40, %37, %cst_27 {dimension_numbers = #tpu.dot_dimension_numbers<[1], [0], [0], [1], [0, 0, 1, 1], [], []>} : vector<36x196xf32>, vector<196x64xf32>, vector<36x64xf32> -> vector<36x64xf32>
    %c0_28 = arith.constant 0 : index
    %c0_29 = arith.constant 0 : index
    %c0_30 = arith.constant 0 : index
    %42 = vector.load %arg4[%c0_28, %c0_29, %c0_30] : memref<16x64x64xf32, #tpu.memory_space<vmem>>, vector<1x64x64xf32>
    %43 = vector.shape_cast %42 : vector<1x64x64xf32> to vector<64x64xf32>
    %cst_31 = arith.constant dense<0.000000e+00> : vector<36x64xf32>
    %44 = tpu.matmul %41, %43, %cst_31 {dimension_numbers = #tpu.dot_dimension_numbers<[1], [0], [0], [1], [0, 0, 1, 1], [], []>} : vector<36x64xf32>, vector<64x64xf32>, vector<36x64xf32> -> vector<36x64xf32>
    %45 = arith.addf %38, %44 : vector<36x64xf32>
    %c1 = arith.constant 1 : index
    %c0_32 = arith.constant 0 : index
    %c0_33 = arith.constant 0 : index
    %46 = vector.load %arg3[%c1, %c0_32, %c0_33] : memref<16x36x196xf32, #tpu.memory_space<vmem>>, vector<1x36x196xf32>
    %47 = vector.shape_cast %46 : vector<1x36x196xf32> to vector<36x196xf32>
    %cst_34 = arith.constant dense<0.000000e+00> : vector<36x64xf32>
    %48 = tpu.matmul %47, %37, %cst_34 {dimension_numbers = #tpu.dot_dimension_numbers<[1], [0], [0], [1], [0, 0, 1, 1], [], []>} : vector<36x196xf32>, vector<196x64xf32>, vector<36x64xf32> -> vector<36x64xf32>
    %c1_35 = arith.constant 1 : index
    %c0_36 = arith.constant 0 : index
    %c0_37 = arith.constant 0 : index
    %49 = vector.load %arg4[%c1_35, %c0_36, %c0_37] : memref<16x64x64xf32, #tpu.memory_space<vmem>>, vector<1x64x64xf32>
    %50 = vector.shape_cast %49 : vector<1x64x64xf32> to vector<64x64xf32>
    %cst_38 = arith.constant dense<0.000000e+00> : vector<36x64xf32>
    %51 = tpu.matmul %48, %50, %cst_38 {dimension_numbers = #tpu.dot_dimension_numbers<[1], [0], [0], [1], [0, 0, 1, 1], [], []>} : vector<36x64xf32>, vector<64x64xf32>, vector<36x64xf32> -> vector<36x64xf32>
    %52 = arith.addf %45, %51 : vector<36x64xf32>
    %c2 = arith.constant 2 : index
    %c0_39 = arith.constant 0 : index
    %c0_40 = arith.constant 0 : index
    %53 = vector.load %arg3[%c2, %c0_39, %c0_40] : memref<16x36x196xf32, #tpu.memory_space<vmem>>, vector<1x36x196xf32>
    %54 = vector.shape_cast %53 : vector<1x36x196xf32> to vector<36x196xf32>
    %cst_41 = arith.constant dense<0.000000e+00> : vector<36x64xf32>
    %55 = tpu.matmul %54, %37, %cst_41 {dimension_numbers = #tpu.dot_dimension_numbers<[1], [0], [0], [1], [0, 0, 1, 1], [], []>} : vector<36x196xf32>, vector<196x64xf32>, vector<36x64xf32> -> vector<36x64xf32>
    %c2_42 = arith.constant 2 : index
    %c0_43 = arith.constant 0 : index
    %c0_44 = arith.constant 0 : index
    %56 = vector.load %arg4[%c2_42, %c0_43, %c0_44] : memref<16x64x64xf32, #tpu.memory_space<vmem>>, vector<1x64x64xf32>
    %57 = vector.shape_cast %56 : vector<1x64x64xf32> to vector<64x64xf32>
    %cst_45 = arith.constant dense<0.000000e+00> : vector<36x64xf32>
    %58 = tpu.matmul %55, %57, %cst_45 {dimension_numbers = #tpu.dot_dimension_numbers<[1], [0], [0], [1], [0, 0, 1, 1], [], []>} : vector<36x64xf32>, vector<64x64xf32>, vector<36x64xf32> -> vector<36x64xf32>
    %59 = arith.addf %52, %58 : vector<36x64xf32>
    %c3 = arith.constant 3 : index
    %c0_46 = arith.constant 0 : index
    %c0_47 = arith.constant 0 : index
    %60 = vector.load %arg3[%c3, %c0_46, %c0_47] : memref<16x36x196xf32, #tpu.memory_space<vmem>>, vector<1x36x196xf32>
    %61 = vector.shape_cast %60 : vector<1x36x196xf32> to vector<36x196xf32>
    %cst_48 = arith.constant dense<0.000000e+00> : vector<36x64xf32>
    %62 = tpu.matmul %61, %37, %cst_48 {dimension_numbers = #tpu.dot_dimension_numbers<[1], [0], [0], [1], [0, 0, 1, 1], [], []>} : vector<36x196xf32>, vector<196x64xf32>, vector<36x64xf32> -> vector<36x64xf32>
    %c3_49 = arith.constant 3 : index
    %c0_50 = arith.constant 0 : index
    %c0_51 = arith.constant 0 : index
    %63 = vector.load %arg4[%c3_49, %c0_50, %c0_51] : memref<16x64x64xf32, #tpu.memory_space<vmem>>, vector<1x64x64xf32>
    %64 = vector.shape_cast %63 : vector<1x64x64xf32> to vector<64x64xf32>
    %cst_52 = arith.constant dense<0.000000e+00> : vector<36x64xf32>
    %65 = tpu.matmul %62, %64, %cst_52 {dimension_numbers = #tpu.dot_dimension_numbers<[1], [0], [0], [1], [0, 0, 1, 1], [], []>} : vector<36x64xf32>, vector<64x64xf32>, vector<36x64xf32> -> vector<36x64xf32>
    %66 = arith.addf %59, %65 : vector<36x64xf32>
    %c4 = arith.constant 4 : index
    %c0_53 = arith.constant 0 : index
    %c0_54 = arith.constant 0 : index
    %67 = vector.load %arg3[%c4, %c0_53, %c0_54] : memref<16x36x196xf32, #tpu.memory_space<vmem>>, vector<1x36x196xf32>
    %68 = vector.shape_cast %67 : vector<1x36x196xf32> to vector<36x196xf32>
    %cst_55 = arith.constant dense<0.000000e+00> : vector<36x64xf32>
    %69 = tpu.matmul %68, %37, %cst_55 {dimension_numbers = #tpu.dot_dimension_numbers<[1], [0], [0], [1], [0, 0, 1, 1], [], []>} : vector<36x196xf32>, vector<196x64xf32>, vector<36x64xf32> -> vector<36x64xf32>
    %c4_56 = arith.constant 4 : index
    %c0_57 = arith.constant 0 : index
    %c0_58 = arith.constant 0 : index
    %70 = vector.load %arg4[%c4_56, %c0_57, %c0_58] : memref<16x64x64xf32, #tpu.memory_space<vmem>>, vector<1x64x64xf32>
    %71 = vector.shape_cast %70 : vector<1x64x64xf32> to vector<64x64xf32>
    %cst_59 = arith.constant dense<0.000000e+00> : vector<36x64xf32>
    %72 = tpu.matmul %69, %71, %cst_59 {dimension_numbers = #tpu.dot_dimension_numbers<[1], [0], [0], [1], [0, 0, 1, 1], [], []>} : vector<36x64xf32>, vector<64x64xf32>, vector<36x64xf32> -> vector<36x64xf32>
    %73 = arith.addf %66, %72 : vector<36x64xf32>
    %c5 = arith.constant 5 : index
    %c0_60 = arith.constant 0 : index
    %c0_61 = arith.constant 0 : index
    %74 = vector.load %arg3[%c5, %c0_60, %c0_61] : memref<16x36x196xf32, #tpu.memory_space<vmem>>, vector<1x36x196xf32>
    %75 = vector.shape_cast %74 : vector<1x36x196xf32> to vector<36x196xf32>
    %cst_62 = arith.constant dense<0.000000e+00> : vector<36x64xf32>
    %76 = tpu.matmul %75, %37, %cst_62 {dimension_numbers = #tpu.dot_dimension_numbers<[1], [0], [0], [1], [0, 0, 1, 1], [], []>} : vector<36x196xf32>, vector<196x64xf32>, vector<36x64xf32> -> vector<36x64xf32>
    %c5_63 = arith.constant 5 : index
    %c0_64 = arith.constant 0 : index
    %c0_65 = arith.constant 0 : index
    %77 = vector.load %arg4[%c5_63, %c0_64, %c0_65] : memref<16x64x64xf32, #tpu.memory_space<vmem>>, vector<1x64x64xf32>
    %78 = vector.shape_cast %77 : vector<1x64x64xf32> to vector<64x64xf32>
    %cst_66 = arith.constant dense<0.000000e+00> : vector<36x64xf32>
    %79 = tpu.matmul %76, %78, %cst_66 {dimension_numbers = #tpu.dot_dimension_numbers<[1], [0], [0], [1], [0, 0, 1, 1], [], []>} : vector<36x64xf32>, vector<64x64xf32>, vector<36x64xf32> -> vector<36x64xf32>
    %80 = arith.addf %73, %79 : vector<36x64xf32>
    %c6 = arith.constant 6 : index
    %c0_67 = arith.constant 0 : index
    %c0_68 = arith.constant 0 : index
    %81 = vector.load %arg3[%c6, %c0_67, %c0_68] : memref<16x36x196xf32, #tpu.memory_space<vmem>>, vector<1x36x196xf32>
    %82 = vector.shape_cast %81 : vector<1x36x196xf32> to vector<36x196xf32>
    %cst_69 = arith.constant dense<0.000000e+00> : vector<36x64xf32>
    %83 = tpu.matmul %82, %37, %cst_69 {dimension_numbers = #tpu.dot_dimension_numbers<[1], [0], [0], [1], [0, 0, 1, 1], [], []>} : vector<36x196xf32>, vector<196x64xf32>, vector<36x64xf32> -> vector<36x64xf32>
    %c6_70 = arith.constant 6 : index
    %c0_71 = arith.constant 0 : index
    %c0_72 = arith.constant 0 : index
    %84 = vector.load %arg4[%c6_70, %c0_71, %c0_72] : memref<16x64x64xf32, #tpu.memory_space<vmem>>, vector<1x64x64xf32>
    %85 = vector.shape_cast %84 : vector<1x64x64xf32> to vector<64x64xf32>
    %cst_73 = arith.constant dense<0.000000e+00> : vector<36x64xf32>
    %86 = tpu.matmul %83, %85, %cst_73 {dimension_numbers = #tpu.dot_dimension_numbers<[1], [0], [0], [1], [0, 0, 1, 1], [], []>} : vector<36x64xf32>, vector<64x64xf32>, vector<36x64xf32> -> vector<36x64xf32>
    %87 = arith.addf %80, %86 : vector<36x64xf32>
    %c7 = arith.constant 7 : index
    %c0_74 = arith.constant 0 : index
    %c0_75 = arith.constant 0 : index
    %88 = vector.load %arg3[%c7, %c0_74, %c0_75] : memref<16x36x196xf32, #tpu.memory_space<vmem>>, vector<1x36x196xf32>
    %89 = vector.shape_cast %88 : vector<1x36x196xf32> to vector<36x196xf32>
    %cst_76 = arith.constant dense<0.000000e+00> : vector<36x64xf32>
    %90 = tpu.matmul %89, %37, %cst_76 {dimension_numbers = #tpu.dot_dimension_numbers<[1], [0], [0], [1], [0, 0, 1, 1], [], []>} : vector<36x196xf32>, vector<196x64xf32>, vector<36x64xf32> -> vector<36x64xf32>
    %c7_77 = arith.constant 7 : index
    %c0_78 = arith.constant 0 : index
    %c0_79 = arith.constant 0 : index
    %91 = vector.load %arg4[%c7_77, %c0_78, %c0_79] : memref<16x64x64xf32, #tpu.memory_space<vmem>>, vector<1x64x64xf32>
    %92 = vector.shape_cast %91 : vector<1x64x64xf32> to vector<64x64xf32>
    %cst_80 = arith.constant dense<0.000000e+00> : vector<36x64xf32>
    %93 = tpu.matmul %90, %92, %cst_80 {dimension_numbers = #tpu.dot_dimension_numbers<[1], [0], [0], [1], [0, 0, 1, 1], [], []>} : vector<36x64xf32>, vector<64x64xf32>, vector<36x64xf32> -> vector<36x64xf32>
    %94 = arith.addf %87, %93 : vector<36x64xf32>
    %c8 = arith.constant 8 : index
    %c0_81 = arith.constant 0 : index
    %c0_82 = arith.constant 0 : index
    %95 = vector.load %arg3[%c8, %c0_81, %c0_82] : memref<16x36x196xf32, #tpu.memory_space<vmem>>, vector<1x36x196xf32>
    %96 = vector.shape_cast %95 : vector<1x36x196xf32> to vector<36x196xf32>
    %cst_83 = arith.constant dense<0.000000e+00> : vector<36x64xf32>
    %97 = tpu.matmul %96, %37, %cst_83 {dimension_numbers = #tpu.dot_dimension_numbers<[1], [0], [0], [1], [0, 0, 1, 1], [], []>} : vector<36x196xf32>, vector<196x64xf32>, vector<36x64xf32> -> vector<36x64xf32>
    %c8_84 = arith.constant 8 : index
    %c0_85 = arith.constant 0 : index
    %c0_86 = arith.constant 0 : index
    %98 = vector.load %arg4[%c8_84, %c0_85, %c0_86] : memref<16x64x64xf32, #tpu.memory_space<vmem>>, vector<1x64x64xf32>
    %99 = vector.shape_cast %98 : vector<1x64x64xf32> to vector<64x64xf32>
    %cst_87 = arith.constant dense<0.000000e+00> : vector<36x64xf32>
    %100 = tpu.matmul %97, %99, %cst_87 {dimension_numbers = #tpu.dot_dimension_numbers<[1], [0], [0], [1], [0, 0, 1, 1], [], []>} : vector<36x64xf32>, vector<64x64xf32>, vector<36x64xf32> -> vector<36x64xf32>
    %101 = arith.addf %94, %100 : vector<36x64xf32>
    %c9 = arith.constant 9 : index
    %c0_88 = arith.constant 0 : index
    %c0_89 = arith.constant 0 : index
    %102 = vector.load %arg3[%c9, %c0_88, %c0_89] : memref<16x36x196xf32, #tpu.memory_space<vmem>>, vector<1x36x196xf32>
    %103 = vector.shape_cast %102 : vector<1x36x196xf32> to vector<36x196xf32>
    %cst_90 = arith.constant dense<0.000000e+00> : vector<36x64xf32>
    %104 = tpu.matmul %103, %37, %cst_90 {dimension_numbers = #tpu.dot_dimension_numbers<[1], [0], [0], [1], [0, 0, 1, 1], [], []>} : vector<36x196xf32>, vector<196x64xf32>, vector<36x64xf32> -> vector<36x64xf32>
    %c9_91 = arith.constant 9 : index
    %c0_92 = arith.constant 0 : index
    %c0_93 = arith.constant 0 : index
    %105 = vector.load %arg4[%c9_91, %c0_92, %c0_93] : memref<16x64x64xf32, #tpu.memory_space<vmem>>, vector<1x64x64xf32>
    %106 = vector.shape_cast %105 : vector<1x64x64xf32> to vector<64x64xf32>
    %cst_94 = arith.constant dense<0.000000e+00> : vector<36x64xf32>
    %107 = tpu.matmul %104, %106, %cst_94 {dimension_numbers = #tpu.dot_dimension_numbers<[1], [0], [0], [1], [0, 0, 1, 1], [], []>} : vector<36x64xf32>, vector<64x64xf32>, vector<36x64xf32> -> vector<36x64xf32>
    %108 = arith.addf %101, %107 : vector<36x64xf32>
    %c10 = arith.constant 10 : index
    %c0_95 = arith.constant 0 : index
    %c0_96 = arith.constant 0 : index
    %109 = vector.load %arg3[%c10, %c0_95, %c0_96] : memref<16x36x196xf32, #tpu.memory_space<vmem>>, vector<1x36x196xf32>
    %110 = vector.shape_cast %109 : vector<1x36x196xf32> to vector<36x196xf32>
    %cst_97 = arith.constant dense<0.000000e+00> : vector<36x64xf32>
    %111 = tpu.matmul %110, %37, %cst_97 {dimension_numbers = #tpu.dot_dimension_numbers<[1], [0], [0], [1], [0, 0, 1, 1], [], []>} : vector<36x196xf32>, vector<196x64xf32>, vector<36x64xf32> -> vector<36x64xf32>
    %c10_98 = arith.constant 10 : index
    %c0_99 = arith.constant 0 : index
    %c0_100 = arith.constant 0 : index
    %112 = vector.load %arg4[%c10_98, %c0_99, %c0_100] : memref<16x64x64xf32, #tpu.memory_space<vmem>>, vector<1x64x64xf32>
    %113 = vector.shape_cast %112 : vector<1x64x64xf32> to vector<64x64xf32>
    %cst_101 = arith.constant dense<0.000000e+00> : vector<36x64xf32>
    %114 = tpu.matmul %111, %113, %cst_101 {dimension_numbers = #tpu.dot_dimension_numbers<[1], [0], [0], [1], [0, 0, 1, 1], [], []>} : vector<36x64xf32>, vector<64x64xf32>, vector<36x64xf32> -> vector<36x64xf32>
    %115 = arith.addf %108, %114 : vector<36x64xf32>
    %c11 = arith.constant 11 : index
    %c0_102 = arith.constant 0 : index
    %c0_103 = arith.constant 0 : index
    %116 = vector.load %arg3[%c11, %c0_102, %c0_103] : memref<16x36x196xf32, #tpu.memory_space<vmem>>, vector<1x36x196xf32>
    %117 = vector.shape_cast %116 : vector<1x36x196xf32> to vector<36x196xf32>
    %cst_104 = arith.constant dense<0.000000e+00> : vector<36x64xf32>
    %118 = tpu.matmul %117, %37, %cst_104 {dimension_numbers = #tpu.dot_dimension_numbers<[1], [0], [0], [1], [0, 0, 1, 1], [], []>} : vector<36x196xf32>, vector<196x64xf32>, vector<36x64xf32> -> vector<36x64xf32>
    %c11_105 = arith.constant 11 : index
    %c0_106 = arith.constant 0 : index
    %c0_107 = arith.constant 0 : index
    %119 = vector.load %arg4[%c11_105, %c0_106, %c0_107] : memref<16x64x64xf32, #tpu.memory_space<vmem>>, vector<1x64x64xf32>
    %120 = vector.shape_cast %119 : vector<1x64x64xf32> to vector<64x64xf32>
    %cst_108 = arith.constant dense<0.000000e+00> : vector<36x64xf32>
    %121 = tpu.matmul %118, %120, %cst_108 {dimension_numbers = #tpu.dot_dimension_numbers<[1], [0], [0], [1], [0, 0, 1, 1], [], []>} : vector<36x64xf32>, vector<64x64xf32>, vector<36x64xf32> -> vector<36x64xf32>
    %122 = arith.addf %115, %121 : vector<36x64xf32>
    %c12 = arith.constant 12 : index
    %c0_109 = arith.constant 0 : index
    %c0_110 = arith.constant 0 : index
    %123 = vector.load %arg3[%c12, %c0_109, %c0_110] : memref<16x36x196xf32, #tpu.memory_space<vmem>>, vector<1x36x196xf32>
    %124 = vector.shape_cast %123 : vector<1x36x196xf32> to vector<36x196xf32>
    %cst_111 = arith.constant dense<0.000000e+00> : vector<36x64xf32>
    %125 = tpu.matmul %124, %37, %cst_111 {dimension_numbers = #tpu.dot_dimension_numbers<[1], [0], [0], [1], [0, 0, 1, 1], [], []>} : vector<36x196xf32>, vector<196x64xf32>, vector<36x64xf32> -> vector<36x64xf32>
    %c12_112 = arith.constant 12 : index
    %c0_113 = arith.constant 0 : index
    %c0_114 = arith.constant 0 : index
    %126 = vector.load %arg4[%c12_112, %c0_113, %c0_114] : memref<16x64x64xf32, #tpu.memory_space<vmem>>, vector<1x64x64xf32>
    %127 = vector.shape_cast %126 : vector<1x64x64xf32> to vector<64x64xf32>
    %cst_115 = arith.constant dense<0.000000e+00> : vector<36x64xf32>
    %128 = tpu.matmul %125, %127, %cst_115 {dimension_numbers = #tpu.dot_dimension_numbers<[1], [0], [0], [1], [0, 0, 1, 1], [], []>} : vector<36x64xf32>, vector<64x64xf32>, vector<36x64xf32> -> vector<36x64xf32>
    %129 = arith.addf %122, %128 : vector<36x64xf32>
    %c13 = arith.constant 13 : index
    %c0_116 = arith.constant 0 : index
    %c0_117 = arith.constant 0 : index
    %130 = vector.load %arg3[%c13, %c0_116, %c0_117] : memref<16x36x196xf32, #tpu.memory_space<vmem>>, vector<1x36x196xf32>
    %131 = vector.shape_cast %130 : vector<1x36x196xf32> to vector<36x196xf32>
    %cst_118 = arith.constant dense<0.000000e+00> : vector<36x64xf32>
    %132 = tpu.matmul %131, %37, %cst_118 {dimension_numbers = #tpu.dot_dimension_numbers<[1], [0], [0], [1], [0, 0, 1, 1], [], []>} : vector<36x196xf32>, vector<196x64xf32>, vector<36x64xf32> -> vector<36x64xf32>
    %c13_119 = arith.constant 13 : index
    %c0_120 = arith.constant 0 : index
    %c0_121 = arith.constant 0 : index
    %133 = vector.load %arg4[%c13_119, %c0_120, %c0_121] : memref<16x64x64xf32, #tpu.memory_space<vmem>>, vector<1x64x64xf32>
    %134 = vector.shape_cast %133 : vector<1x64x64xf32> to vector<64x64xf32>
    %cst_122 = arith.constant dense<0.000000e+00> : vector<36x64xf32>
    %135 = tpu.matmul %132, %134, %cst_122 {dimension_numbers = #tpu.dot_dimension_numbers<[1], [0], [0], [1], [0, 0, 1, 1], [], []>} : vector<36x64xf32>, vector<64x64xf32>, vector<36x64xf32> -> vector<36x64xf32>
    %136 = arith.addf %129, %135 : vector<36x64xf32>
    %c14 = arith.constant 14 : index
    %c0_123 = arith.constant 0 : index
    %c0_124 = arith.constant 0 : index
    %137 = vector.load %arg3[%c14, %c0_123, %c0_124] : memref<16x36x196xf32, #tpu.memory_space<vmem>>, vector<1x36x196xf32>
    %138 = vector.shape_cast %137 : vector<1x36x196xf32> to vector<36x196xf32>
    %cst_125 = arith.constant dense<0.000000e+00> : vector<36x64xf32>
    %139 = tpu.matmul %138, %37, %cst_125 {dimension_numbers = #tpu.dot_dimension_numbers<[1], [0], [0], [1], [0, 0, 1, 1], [], []>} : vector<36x196xf32>, vector<196x64xf32>, vector<36x64xf32> -> vector<36x64xf32>
    %c14_126 = arith.constant 14 : index
    %c0_127 = arith.constant 0 : index
    %c0_128 = arith.constant 0 : index
    %140 = vector.load %arg4[%c14_126, %c0_127, %c0_128] : memref<16x64x64xf32, #tpu.memory_space<vmem>>, vector<1x64x64xf32>
    %141 = vector.shape_cast %140 : vector<1x64x64xf32> to vector<64x64xf32>
    %cst_129 = arith.constant dense<0.000000e+00> : vector<36x64xf32>
    %142 = tpu.matmul %139, %141, %cst_129 {dimension_numbers = #tpu.dot_dimension_numbers<[1], [0], [0], [1], [0, 0, 1, 1], [], []>} : vector<36x64xf32>, vector<64x64xf32>, vector<36x64xf32> -> vector<36x64xf32>
    %143 = arith.addf %136, %142 : vector<36x64xf32>
    %c15 = arith.constant 15 : index
    %c0_130 = arith.constant 0 : index
    %c0_131 = arith.constant 0 : index
    %144 = vector.load %arg3[%c15, %c0_130, %c0_131] : memref<16x36x196xf32, #tpu.memory_space<vmem>>, vector<1x36x196xf32>
    %145 = vector.shape_cast %144 : vector<1x36x196xf32> to vector<36x196xf32>
    %cst_132 = arith.constant dense<0.000000e+00> : vector<36x64xf32>
    %146 = tpu.matmul %145, %37, %cst_132 {dimension_numbers = #tpu.dot_dimension_numbers<[1], [0], [0], [1], [0, 0, 1, 1], [], []>} : vector<36x196xf32>, vector<196x64xf32>, vector<36x64xf32> -> vector<36x64xf32>
    %c15_133 = arith.constant 15 : index
    %c0_134 = arith.constant 0 : index
    %c0_135 = arith.constant 0 : index
    %147 = vector.load %arg4[%c15_133, %c0_134, %c0_135] : memref<16x64x64xf32, #tpu.memory_space<vmem>>, vector<1x64x64xf32>
    %148 = vector.shape_cast %147 : vector<1x64x64xf32> to vector<64x64xf32>
    %cst_136 = arith.constant dense<0.000000e+00> : vector<36x64xf32>
    %149 = tpu.matmul %146, %148, %cst_136 {dimension_numbers = #tpu.dot_dimension_numbers<[1], [0], [0], [1], [0, 0, 1, 1], [], []>} : vector<36x64xf32>, vector<64x64xf32>, vector<36x64xf32> -> vector<36x64xf32>
    %150 = arith.addf %143, %149 : vector<36x64xf32>
    %c1_137 = arith.constant 1 : index
    %c0_138 = arith.constant 0 : index
    %c0_139 = arith.constant 0 : index
    %151 = vector.load %arg7[%c1_137, %c0_138, %c0_139] : memref<3x1x64xf32, #tpu.memory_space<vmem>>, vector<1x1x64xf32>
    %152 = vector.shape_cast %151 : vector<1x1x64xf32> to vector<1x64xf32>
    %153 = vector.broadcast %152 : vector<1x64xf32> to vector<36x64xf32>
    %154 = arith.addf %150, %153 : vector<36x64xf32>
    %c1_140 = arith.constant 1 : index
    %c0_141 = arith.constant 0 : index
    %c0_142 = arith.constant 0 : index
    %155 = vector.load %arg8[%c1_140, %c0_141, %c0_142] : memref<3x1x64xf32, #tpu.memory_space<vmem>>, vector<1x1x64xf32>
    %156 = vector.shape_cast %155 : vector<1x1x64xf32> to vector<1x64xf32>
    %c1_143 = arith.constant 1 : index
    %c0_144 = arith.constant 0 : index
    %c0_145 = arith.constant 0 : index
    %157 = vector.load %arg9[%c1_143, %c0_144, %c0_145] : memref<3x1x64xf32, #tpu.memory_space<vmem>>, vector<1x1x64xf32>
    %158 = vector.shape_cast %157 : vector<1x1x64xf32> to vector<1x64xf32>
    %cst_146 = arith.constant dense<0.000000e+00> : vector<64xf32>
    %159 = vector.multi_reduction <add>, %154, %cst_146 [0] : vector<36x64xf32> to vector<64xf32>
    %160 = vector.shape_cast %159 : vector<64xf32> to vector<1x64xf32>
    %161 = arith.mulf %154, %154 : vector<36x64xf32>
    %cst_147 = arith.constant dense<0.000000e+00> : vector<64xf32>
    %162 = vector.multi_reduction <add>, %161, %cst_147 [0] : vector<36x64xf32> to vector<64xf32>
    %163 = vector.shape_cast %162 : vector<64xf32> to vector<1x64xf32>
    %cst_148 = arith.constant dense<0.000000e+00> : vector<1x64xf32>
    %164 = tpu.matmul %160, %0, %cst_148 {dimension_numbers = #tpu.dot_dimension_numbers<[1], [0], [0], [1], [0, 0, 1, 1], [], []>} : vector<1x64xf32>, vector<64x64xf32>, vector<1x64xf32> -> vector<1x64xf32>
    %cst_149 = arith.constant dense<0.000000e+00> : vector<1x64xf32>
    %165 = tpu.matmul %163, %0, %cst_149 {dimension_numbers = #tpu.dot_dimension_numbers<[1], [0], [0], [1], [0, 0, 1, 1], [], []>} : vector<1x64xf32>, vector<64x64xf32>, vector<1x64xf32> -> vector<1x64xf32>
    %cst_150 = arith.constant 0.013888889 : f32
    %166 = vector.broadcast %cst_150 : f32 to vector<1x64xf32>
    %167 = arith.mulf %164, %166 : vector<1x64xf32>
    %cst_151 = arith.constant 0.013888889 : f32
    %168 = vector.broadcast %cst_151 : f32 to vector<1x64xf32>
    %169 = arith.mulf %165, %168 : vector<1x64xf32>
    %170 = arith.mulf %167, %167 : vector<1x64xf32>
    %171 = arith.subf %169, %170 : vector<1x64xf32>
    %cst_152 = arith.constant 9.99999974E-6 : f32
    %172 = vector.broadcast %cst_152 : f32 to vector<1x64xf32>
    %173 = arith.addf %171, %172 : vector<1x64xf32>
    %174 = math.rsqrt %173 : vector<1x64xf32>
    %175 = vector.broadcast %167 : vector<1x64xf32> to vector<36x64xf32>
    %176 = arith.subf %154, %175 : vector<36x64xf32>
    %177 = arith.mulf %174, %156 : vector<1x64xf32>
    %178 = vector.broadcast %177 : vector<1x64xf32> to vector<36x64xf32>
    %179 = arith.mulf %176, %178 : vector<36x64xf32>
    %180 = vector.broadcast %158 : vector<1x64xf32> to vector<36x64xf32>
    %181 = arith.addf %179, %180 : vector<36x64xf32>
    %cst_153 = arith.constant 0.000000e+00 : f32
    %182 = vector.broadcast %cst_153 : f32 to vector<36x64xf32>
    %183 = arith.maximumf %181, %182 : vector<36x64xf32>
    %cst_154 = arith.constant 0.000000e+00 : f32
    %184 = vector.broadcast %cst_154 : f32 to vector<4x64xf32>
    %c0_155 = arith.constant 0 : index
    %c0_156 = arith.constant 0 : index
    %c0_157 = arith.constant 0 : index
    %185 = vector.load %arg5[%c0_155, %c0_156, %c0_157] : memref<16x4x36xf32, #tpu.memory_space<vmem>>, vector<1x4x36xf32>
    %186 = vector.shape_cast %185 : vector<1x4x36xf32> to vector<4x36xf32>
    %cst_158 = arith.constant dense<0.000000e+00> : vector<4x64xf32>
    %187 = tpu.matmul %186, %183, %cst_158 {dimension_numbers = #tpu.dot_dimension_numbers<[1], [0], [0], [1], [0, 0, 1, 1], [], []>} : vector<4x36xf32>, vector<36x64xf32>, vector<4x64xf32> -> vector<4x64xf32>
    %c0_159 = arith.constant 0 : index
    %c0_160 = arith.constant 0 : index
    %c0_161 = arith.constant 0 : index
    %188 = vector.load %arg6[%c0_159, %c0_160, %c0_161] : memref<16x64x64xf32, #tpu.memory_space<vmem>>, vector<1x64x64xf32>
    %189 = vector.shape_cast %188 : vector<1x64x64xf32> to vector<64x64xf32>
    %cst_162 = arith.constant dense<0.000000e+00> : vector<4x64xf32>
    %190 = tpu.matmul %187, %189, %cst_162 {dimension_numbers = #tpu.dot_dimension_numbers<[1], [0], [0], [1], [0, 0, 1, 1], [], []>} : vector<4x64xf32>, vector<64x64xf32>, vector<4x64xf32> -> vector<4x64xf32>
    %191 = arith.addf %184, %190 : vector<4x64xf32>
    %c1_163 = arith.constant 1 : index
    %c0_164 = arith.constant 0 : index
    %c0_165 = arith.constant 0 : index
    %192 = vector.load %arg5[%c1_163, %c0_164, %c0_165] : memref<16x4x36xf32, #tpu.memory_space<vmem>>, vector<1x4x36xf32>
    %193 = vector.shape_cast %192 : vector<1x4x36xf32> to vector<4x36xf32>
    %cst_166 = arith.constant dense<0.000000e+00> : vector<4x64xf32>
    %194 = tpu.matmul %193, %183, %cst_166 {dimension_numbers = #tpu.dot_dimension_numbers<[1], [0], [0], [1], [0, 0, 1, 1], [], []>} : vector<4x36xf32>, vector<36x64xf32>, vector<4x64xf32> -> vector<4x64xf32>
    %c1_167 = arith.constant 1 : index
    %c0_168 = arith.constant 0 : index
    %c0_169 = arith.constant 0 : index
    %195 = vector.load %arg6[%c1_167, %c0_168, %c0_169] : memref<16x64x64xf32, #tpu.memory_space<vmem>>, vector<1x64x64xf32>
    %196 = vector.shape_cast %195 : vector<1x64x64xf32> to vector<64x64xf32>
    %cst_170 = arith.constant dense<0.000000e+00> : vector<4x64xf32>
    %197 = tpu.matmul %194, %196, %cst_170 {dimension_numbers = #tpu.dot_dimension_numbers<[1], [0], [0], [1], [0, 0, 1, 1], [], []>} : vector<4x64xf32>, vector<64x64xf32>, vector<4x64xf32> -> vector<4x64xf32>
    %198 = arith.addf %191, %197 : vector<4x64xf32>
    %c2_171 = arith.constant 2 : index
    %c0_172 = arith.constant 0 : index
    %c0_173 = arith.constant 0 : index
    %199 = vector.load %arg5[%c2_171, %c0_172, %c0_173] : memref<16x4x36xf32, #tpu.memory_space<vmem>>, vector<1x4x36xf32>
    %200 = vector.shape_cast %199 : vector<1x4x36xf32> to vector<4x36xf32>
    %cst_174 = arith.constant dense<0.000000e+00> : vector<4x64xf32>
    %201 = tpu.matmul %200, %183, %cst_174 {dimension_numbers = #tpu.dot_dimension_numbers<[1], [0], [0], [1], [0, 0, 1, 1], [], []>} : vector<4x36xf32>, vector<36x64xf32>, vector<4x64xf32> -> vector<4x64xf32>
    %c2_175 = arith.constant 2 : index
    %c0_176 = arith.constant 0 : index
    %c0_177 = arith.constant 0 : index
    %202 = vector.load %arg6[%c2_175, %c0_176, %c0_177] : memref<16x64x64xf32, #tpu.memory_space<vmem>>, vector<1x64x64xf32>
    %203 = vector.shape_cast %202 : vector<1x64x64xf32> to vector<64x64xf32>
    %cst_178 = arith.constant dense<0.000000e+00> : vector<4x64xf32>
    %204 = tpu.matmul %201, %203, %cst_178 {dimension_numbers = #tpu.dot_dimension_numbers<[1], [0], [0], [1], [0, 0, 1, 1], [], []>} : vector<4x64xf32>, vector<64x64xf32>, vector<4x64xf32> -> vector<4x64xf32>
    %205 = arith.addf %198, %204 : vector<4x64xf32>
    %c3_179 = arith.constant 3 : index
    %c0_180 = arith.constant 0 : index
    %c0_181 = arith.constant 0 : index
    %206 = vector.load %arg5[%c3_179, %c0_180, %c0_181] : memref<16x4x36xf32, #tpu.memory_space<vmem>>, vector<1x4x36xf32>
    %207 = vector.shape_cast %206 : vector<1x4x36xf32> to vector<4x36xf32>
    %cst_182 = arith.constant dense<0.000000e+00> : vector<4x64xf32>
    %208 = tpu.matmul %207, %183, %cst_182 {dimension_numbers = #tpu.dot_dimension_numbers<[1], [0], [0], [1], [0, 0, 1, 1], [], []>} : vector<4x36xf32>, vector<36x64xf32>, vector<4x64xf32> -> vector<4x64xf32>
    %c3_183 = arith.constant 3 : index
    %c0_184 = arith.constant 0 : index
    %c0_185 = arith.constant 0 : index
    %209 = vector.load %arg6[%c3_183, %c0_184, %c0_185] : memref<16x64x64xf32, #tpu.memory_space<vmem>>, vector<1x64x64xf32>
    %210 = vector.shape_cast %209 : vector<1x64x64xf32> to vector<64x64xf32>
    %cst_186 = arith.constant dense<0.000000e+00> : vector<4x64xf32>
    %211 = tpu.matmul %208, %210, %cst_186 {dimension_numbers = #tpu.dot_dimension_numbers<[1], [0], [0], [1], [0, 0, 1, 1], [], []>} : vector<4x64xf32>, vector<64x64xf32>, vector<4x64xf32> -> vector<4x64xf32>
    %212 = arith.addf %205, %211 : vector<4x64xf32>
    %c4_187 = arith.constant 4 : index
    %c0_188 = arith.constant 0 : index
    %c0_189 = arith.constant 0 : index
    %213 = vector.load %arg5[%c4_187, %c0_188, %c0_189] : memref<16x4x36xf32, #tpu.memory_space<vmem>>, vector<1x4x36xf32>
    %214 = vector.shape_cast %213 : vector<1x4x36xf32> to vector<4x36xf32>
    %cst_190 = arith.constant dense<0.000000e+00> : vector<4x64xf32>
    %215 = tpu.matmul %214, %183, %cst_190 {dimension_numbers = #tpu.dot_dimension_numbers<[1], [0], [0], [1], [0, 0, 1, 1], [], []>} : vector<4x36xf32>, vector<36x64xf32>, vector<4x64xf32> -> vector<4x64xf32>
    %c4_191 = arith.constant 4 : index
    %c0_192 = arith.constant 0 : index
    %c0_193 = arith.constant 0 : index
    %216 = vector.load %arg6[%c4_191, %c0_192, %c0_193] : memref<16x64x64xf32, #tpu.memory_space<vmem>>, vector<1x64x64xf32>
    %217 = vector.shape_cast %216 : vector<1x64x64xf32> to vector<64x64xf32>
    %cst_194 = arith.constant dense<0.000000e+00> : vector<4x64xf32>
    %218 = tpu.matmul %215, %217, %cst_194 {dimension_numbers = #tpu.dot_dimension_numbers<[1], [0], [0], [1], [0, 0, 1, 1], [], []>} : vector<4x64xf32>, vector<64x64xf32>, vector<4x64xf32> -> vector<4x64xf32>
    %219 = arith.addf %212, %218 : vector<4x64xf32>
    %c5_195 = arith.constant 5 : index
    %c0_196 = arith.constant 0 : index
    %c0_197 = arith.constant 0 : index
    %220 = vector.load %arg5[%c5_195, %c0_196, %c0_197] : memref<16x4x36xf32, #tpu.memory_space<vmem>>, vector<1x4x36xf32>
    %221 = vector.shape_cast %220 : vector<1x4x36xf32> to vector<4x36xf32>
    %cst_198 = arith.constant dense<0.000000e+00> : vector<4x64xf32>
    %222 = tpu.matmul %221, %183, %cst_198 {dimension_numbers = #tpu.dot_dimension_numbers<[1], [0], [0], [1], [0, 0, 1, 1], [], []>} : vector<4x36xf32>, vector<36x64xf32>, vector<4x64xf32> -> vector<4x64xf32>
    %c5_199 = arith.constant 5 : index
    %c0_200 = arith.constant 0 : index
    %c0_201 = arith.constant 0 : index
    %223 = vector.load %arg6[%c5_199, %c0_200, %c0_201] : memref<16x64x64xf32, #tpu.memory_space<vmem>>, vector<1x64x64xf32>
    %224 = vector.shape_cast %223 : vector<1x64x64xf32> to vector<64x64xf32>
    %cst_202 = arith.constant dense<0.000000e+00> : vector<4x64xf32>
    %225 = tpu.matmul %222, %224, %cst_202 {dimension_numbers = #tpu.dot_dimension_numbers<[1], [0], [0], [1], [0, 0, 1, 1], [], []>} : vector<4x64xf32>, vector<64x64xf32>, vector<4x64xf32> -> vector<4x64xf32>
    %226 = arith.addf %219, %225 : vector<4x64xf32>
    %c6_203 = arith.constant 6 : index
    %c0_204 = arith.constant 0 : index
    %c0_205 = arith.constant 0 : index
    %227 = vector.load %arg5[%c6_203, %c0_204, %c0_205] : memref<16x4x36xf32, #tpu.memory_space<vmem>>, vector<1x4x36xf32>
    %228 = vector.shape_cast %227 : vector<1x4x36xf32> to vector<4x36xf32>
    %cst_206 = arith.constant dense<0.000000e+00> : vector<4x64xf32>
    %229 = tpu.matmul %228, %183, %cst_206 {dimension_numbers = #tpu.dot_dimension_numbers<[1], [0], [0], [1], [0, 0, 1, 1], [], []>} : vector<4x36xf32>, vector<36x64xf32>, vector<4x64xf32> -> vector<4x64xf32>
    %c6_207 = arith.constant 6 : index
    %c0_208 = arith.constant 0 : index
    %c0_209 = arith.constant 0 : index
    %230 = vector.load %arg6[%c6_207, %c0_208, %c0_209] : memref<16x64x64xf32, #tpu.memory_space<vmem>>, vector<1x64x64xf32>
    %231 = vector.shape_cast %230 : vector<1x64x64xf32> to vector<64x64xf32>
    %cst_210 = arith.constant dense<0.000000e+00> : vector<4x64xf32>
    %232 = tpu.matmul %229, %231, %cst_210 {dimension_numbers = #tpu.dot_dimension_numbers<[1], [0], [0], [1], [0, 0, 1, 1], [], []>} : vector<4x64xf32>, vector<64x64xf32>, vector<4x64xf32> -> vector<4x64xf32>
    %233 = arith.addf %226, %232 : vector<4x64xf32>
    %c7_211 = arith.constant 7 : index
    %c0_212 = arith.constant 0 : index
    %c0_213 = arith.constant 0 : index
    %234 = vector.load %arg5[%c7_211, %c0_212, %c0_213] : memref<16x4x36xf32, #tpu.memory_space<vmem>>, vector<1x4x36xf32>
    %235 = vector.shape_cast %234 : vector<1x4x36xf32> to vector<4x36xf32>
    %cst_214 = arith.constant dense<0.000000e+00> : vector<4x64xf32>
    %236 = tpu.matmul %235, %183, %cst_214 {dimension_numbers = #tpu.dot_dimension_numbers<[1], [0], [0], [1], [0, 0, 1, 1], [], []>} : vector<4x36xf32>, vector<36x64xf32>, vector<4x64xf32> -> vector<4x64xf32>
    %c7_215 = arith.constant 7 : index
    %c0_216 = arith.constant 0 : index
    %c0_217 = arith.constant 0 : index
    %237 = vector.load %arg6[%c7_215, %c0_216, %c0_217] : memref<16x64x64xf32, #tpu.memory_space<vmem>>, vector<1x64x64xf32>
    %238 = vector.shape_cast %237 : vector<1x64x64xf32> to vector<64x64xf32>
    %cst_218 = arith.constant dense<0.000000e+00> : vector<4x64xf32>
    %239 = tpu.matmul %236, %238, %cst_218 {dimension_numbers = #tpu.dot_dimension_numbers<[1], [0], [0], [1], [0, 0, 1, 1], [], []>} : vector<4x64xf32>, vector<64x64xf32>, vector<4x64xf32> -> vector<4x64xf32>
    %240 = arith.addf %233, %239 : vector<4x64xf32>
    %c8_219 = arith.constant 8 : index
    %c0_220 = arith.constant 0 : index
    %c0_221 = arith.constant 0 : index
    %241 = vector.load %arg5[%c8_219, %c0_220, %c0_221] : memref<16x4x36xf32, #tpu.memory_space<vmem>>, vector<1x4x36xf32>
    %242 = vector.shape_cast %241 : vector<1x4x36xf32> to vector<4x36xf32>
    %cst_222 = arith.constant dense<0.000000e+00> : vector<4x64xf32>
    %243 = tpu.matmul %242, %183, %cst_222 {dimension_numbers = #tpu.dot_dimension_numbers<[1], [0], [0], [1], [0, 0, 1, 1], [], []>} : vector<4x36xf32>, vector<36x64xf32>, vector<4x64xf32> -> vector<4x64xf32>
    %c8_223 = arith.constant 8 : index
    %c0_224 = arith.constant 0 : index
    %c0_225 = arith.constant 0 : index
    %244 = vector.load %arg6[%c8_223, %c0_224, %c0_225] : memref<16x64x64xf32, #tpu.memory_space<vmem>>, vector<1x64x64xf32>
    %245 = vector.shape_cast %244 : vector<1x64x64xf32> to vector<64x64xf32>
    %cst_226 = arith.constant dense<0.000000e+00> : vector<4x64xf32>
    %246 = tpu.matmul %243, %245, %cst_226 {dimension_numbers = #tpu.dot_dimension_numbers<[1], [0], [0], [1], [0, 0, 1, 1], [], []>} : vector<4x64xf32>, vector<64x64xf32>, vector<4x64xf32> -> vector<4x64xf32>
    %247 = arith.addf %240, %246 : vector<4x64xf32>
    %c9_227 = arith.constant 9 : index
    %c0_228 = arith.constant 0 : index
    %c0_229 = arith.constant 0 : index
    %248 = vector.load %arg5[%c9_227, %c0_228, %c0_229] : memref<16x4x36xf32, #tpu.memory_space<vmem>>, vector<1x4x36xf32>
    %249 = vector.shape_cast %248 : vector<1x4x36xf32> to vector<4x36xf32>
    %cst_230 = arith.constant dense<0.000000e+00> : vector<4x64xf32>
    %250 = tpu.matmul %249, %183, %cst_230 {dimension_numbers = #tpu.dot_dimension_numbers<[1], [0], [0], [1], [0, 0, 1, 1], [], []>} : vector<4x36xf32>, vector<36x64xf32>, vector<4x64xf32> -> vector<4x64xf32>
    %c9_231 = arith.constant 9 : index
    %c0_232 = arith.constant 0 : index
    %c0_233 = arith.constant 0 : index
    %251 = vector.load %arg6[%c9_231, %c0_232, %c0_233] : memref<16x64x64xf32, #tpu.memory_space<vmem>>, vector<1x64x64xf32>
    %252 = vector.shape_cast %251 : vector<1x64x64xf32> to vector<64x64xf32>
    %cst_234 = arith.constant dense<0.000000e+00> : vector<4x64xf32>
    %253 = tpu.matmul %250, %252, %cst_234 {dimension_numbers = #tpu.dot_dimension_numbers<[1], [0], [0], [1], [0, 0, 1, 1], [], []>} : vector<4x64xf32>, vector<64x64xf32>, vector<4x64xf32> -> vector<4x64xf32>
    %254 = arith.addf %247, %253 : vector<4x64xf32>
    %c10_235 = arith.constant 10 : index
    %c0_236 = arith.constant 0 : index
    %c0_237 = arith.constant 0 : index
    %255 = vector.load %arg5[%c10_235, %c0_236, %c0_237] : memref<16x4x36xf32, #tpu.memory_space<vmem>>, vector<1x4x36xf32>
    %256 = vector.shape_cast %255 : vector<1x4x36xf32> to vector<4x36xf32>
    %cst_238 = arith.constant dense<0.000000e+00> : vector<4x64xf32>
    %257 = tpu.matmul %256, %183, %cst_238 {dimension_numbers = #tpu.dot_dimension_numbers<[1], [0], [0], [1], [0, 0, 1, 1], [], []>} : vector<4x36xf32>, vector<36x64xf32>, vector<4x64xf32> -> vector<4x64xf32>
    %c10_239 = arith.constant 10 : index
    %c0_240 = arith.constant 0 : index
    %c0_241 = arith.constant 0 : index
    %258 = vector.load %arg6[%c10_239, %c0_240, %c0_241] : memref<16x64x64xf32, #tpu.memory_space<vmem>>, vector<1x64x64xf32>
    %259 = vector.shape_cast %258 : vector<1x64x64xf32> to vector<64x64xf32>
    %cst_242 = arith.constant dense<0.000000e+00> : vector<4x64xf32>
    %260 = tpu.matmul %257, %259, %cst_242 {dimension_numbers = #tpu.dot_dimension_numbers<[1], [0], [0], [1], [0, 0, 1, 1], [], []>} : vector<4x64xf32>, vector<64x64xf32>, vector<4x64xf32> -> vector<4x64xf32>
    %261 = arith.addf %254, %260 : vector<4x64xf32>
    %c11_243 = arith.constant 11 : index
    %c0_244 = arith.constant 0 : index
    %c0_245 = arith.constant 0 : index
    %262 = vector.load %arg5[%c11_243, %c0_244, %c0_245] : memref<16x4x36xf32, #tpu.memory_space<vmem>>, vector<1x4x36xf32>
    %263 = vector.shape_cast %262 : vector<1x4x36xf32> to vector<4x36xf32>
    %cst_246 = arith.constant dense<0.000000e+00> : vector<4x64xf32>
    %264 = tpu.matmul %263, %183, %cst_246 {dimension_numbers = #tpu.dot_dimension_numbers<[1], [0], [0], [1], [0, 0, 1, 1], [], []>} : vector<4x36xf32>, vector<36x64xf32>, vector<4x64xf32> -> vector<4x64xf32>
    %c11_247 = arith.constant 11 : index
    %c0_248 = arith.constant 0 : index
    %c0_249 = arith.constant 0 : index
    %265 = vector.load %arg6[%c11_247, %c0_248, %c0_249] : memref<16x64x64xf32, #tpu.memory_space<vmem>>, vector<1x64x64xf32>
    %266 = vector.shape_cast %265 : vector<1x64x64xf32> to vector<64x64xf32>
    %cst_250 = arith.constant dense<0.000000e+00> : vector<4x64xf32>
    %267 = tpu.matmul %264, %266, %cst_250 {dimension_numbers = #tpu.dot_dimension_numbers<[1], [0], [0], [1], [0, 0, 1, 1], [], []>} : vector<4x64xf32>, vector<64x64xf32>, vector<4x64xf32> -> vector<4x64xf32>
    %268 = arith.addf %261, %267 : vector<4x64xf32>
    %c12_251 = arith.constant 12 : index
    %c0_252 = arith.constant 0 : index
    %c0_253 = arith.constant 0 : index
    %269 = vector.load %arg5[%c12_251, %c0_252, %c0_253] : memref<16x4x36xf32, #tpu.memory_space<vmem>>, vector<1x4x36xf32>
    %270 = vector.shape_cast %269 : vector<1x4x36xf32> to vector<4x36xf32>
    %cst_254 = arith.constant dense<0.000000e+00> : vector<4x64xf32>
    %271 = tpu.matmul %270, %183, %cst_254 {dimension_numbers = #tpu.dot_dimension_numbers<[1], [0], [0], [1], [0, 0, 1, 1], [], []>} : vector<4x36xf32>, vector<36x64xf32>, vector<4x64xf32> -> vector<4x64xf32>
    %c12_255 = arith.constant 12 : index
    %c0_256 = arith.constant 0 : index
    %c0_257 = arith.constant 0 : index
    %272 = vector.load %arg6[%c12_255, %c0_256, %c0_257] : memref<16x64x64xf32, #tpu.memory_space<vmem>>, vector<1x64x64xf32>
    %273 = vector.shape_cast %272 : vector<1x64x64xf32> to vector<64x64xf32>
    %cst_258 = arith.constant dense<0.000000e+00> : vector<4x64xf32>
    %274 = tpu.matmul %271, %273, %cst_258 {dimension_numbers = #tpu.dot_dimension_numbers<[1], [0], [0], [1], [0, 0, 1, 1], [], []>} : vector<4x64xf32>, vector<64x64xf32>, vector<4x64xf32> -> vector<4x64xf32>
    %275 = arith.addf %268, %274 : vector<4x64xf32>
    %c13_259 = arith.constant 13 : index
    %c0_260 = arith.constant 0 : index
    %c0_261 = arith.constant 0 : index
    %276 = vector.load %arg5[%c13_259, %c0_260, %c0_261] : memref<16x4x36xf32, #tpu.memory_space<vmem>>, vector<1x4x36xf32>
    %277 = vector.shape_cast %276 : vector<1x4x36xf32> to vector<4x36xf32>
    %cst_262 = arith.constant dense<0.000000e+00> : vector<4x64xf32>
    %278 = tpu.matmul %277, %183, %cst_262 {dimension_numbers = #tpu.dot_dimension_numbers<[1], [0], [0], [1], [0, 0, 1, 1], [], []>} : vector<4x36xf32>, vector<36x64xf32>, vector<4x64xf32> -> vector<4x64xf32>
    %c13_263 = arith.constant 13 : index
    %c0_264 = arith.constant 0 : index
    %c0_265 = arith.constant 0 : index
    %279 = vector.load %arg6[%c13_263, %c0_264, %c0_265] : memref<16x64x64xf32, #tpu.memory_space<vmem>>, vector<1x64x64xf32>
    %280 = vector.shape_cast %279 : vector<1x64x64xf32> to vector<64x64xf32>
    %cst_266 = arith.constant dense<0.000000e+00> : vector<4x64xf32>
    %281 = tpu.matmul %278, %280, %cst_266 {dimension_numbers = #tpu.dot_dimension_numbers<[1], [0], [0], [1], [0, 0, 1, 1], [], []>} : vector<4x64xf32>, vector<64x64xf32>, vector<4x64xf32> -> vector<4x64xf32>
    %282 = arith.addf %275, %281 : vector<4x64xf32>
    %c14_267 = arith.constant 14 : index
    %c0_268 = arith.constant 0 : index
    %c0_269 = arith.constant 0 : index
    %283 = vector.load %arg5[%c14_267, %c0_268, %c0_269] : memref<16x4x36xf32, #tpu.memory_space<vmem>>, vector<1x4x36xf32>
    %284 = vector.shape_cast %283 : vector<1x4x36xf32> to vector<4x36xf32>
    %cst_270 = arith.constant dense<0.000000e+00> : vector<4x64xf32>
    %285 = tpu.matmul %284, %183, %cst_270 {dimension_numbers = #tpu.dot_dimension_numbers<[1], [0], [0], [1], [0, 0, 1, 1], [], []>} : vector<4x36xf32>, vector<36x64xf32>, vector<4x64xf32> -> vector<4x64xf32>
    %c14_271 = arith.constant 14 : index
    %c0_272 = arith.constant 0 : index
    %c0_273 = arith.constant 0 : index
    %286 = vector.load %arg6[%c14_271, %c0_272, %c0_273] : memref<16x64x64xf32, #tpu.memory_space<vmem>>, vector<1x64x64xf32>
    %287 = vector.shape_cast %286 : vector<1x64x64xf32> to vector<64x64xf32>
    %cst_274 = arith.constant dense<0.000000e+00> : vector<4x64xf32>
    %288 = tpu.matmul %285, %287, %cst_274 {dimension_numbers = #tpu.dot_dimension_numbers<[1], [0], [0], [1], [0, 0, 1, 1], [], []>} : vector<4x64xf32>, vector<64x64xf32>, vector<4x64xf32> -> vector<4x64xf32>
    %289 = arith.addf %282, %288 : vector<4x64xf32>
    %c15_275 = arith.constant 15 : index
    %c0_276 = arith.constant 0 : index
    %c0_277 = arith.constant 0 : index
    %290 = vector.load %arg5[%c15_275, %c0_276, %c0_277] : memref<16x4x36xf32, #tpu.memory_space<vmem>>, vector<1x4x36xf32>
    %291 = vector.shape_cast %290 : vector<1x4x36xf32> to vector<4x36xf32>
    %cst_278 = arith.constant dense<0.000000e+00> : vector<4x64xf32>
    %292 = tpu.matmul %291, %183, %cst_278 {dimension_numbers = #tpu.dot_dimension_numbers<[1], [0], [0], [1], [0, 0, 1, 1], [], []>} : vector<4x36xf32>, vector<36x64xf32>, vector<4x64xf32> -> vector<4x64xf32>
    %c15_279 = arith.constant 15 : index
    %c0_280 = arith.constant 0 : index
    %c0_281 = arith.constant 0 : index
    %293 = vector.load %arg6[%c15_279, %c0_280, %c0_281] : memref<16x64x64xf32, #tpu.memory_space<vmem>>, vector<1x64x64xf32>
    %294 = vector.shape_cast %293 : vector<1x64x64xf32> to vector<64x64xf32>
    %cst_282 = arith.constant dense<0.000000e+00> : vector<4x64xf32>
    %295 = tpu.matmul %292, %294, %cst_282 {dimension_numbers = #tpu.dot_dimension_numbers<[1], [0], [0], [1], [0, 0, 1, 1], [], []>} : vector<4x64xf32>, vector<64x64xf32>, vector<4x64xf32> -> vector<4x64xf32>
    %296 = arith.addf %289, %295 : vector<4x64xf32>
    %c2_283 = arith.constant 2 : index
    %c0_284 = arith.constant 0 : index
    %c0_285 = arith.constant 0 : index
    %297 = vector.load %arg7[%c2_283, %c0_284, %c0_285] : memref<3x1x64xf32, #tpu.memory_space<vmem>>, vector<1x1x64xf32>
    %298 = vector.shape_cast %297 : vector<1x1x64xf32> to vector<1x64xf32>
    %299 = vector.broadcast %298 : vector<1x64xf32> to vector<4x64xf32>
    %300 = arith.addf %296, %299 : vector<4x64xf32>
    %cst_286 = arith.constant dense<0.000000e+00> : vector<64xf32>
    %301 = vector.multi_reduction <add>, %300, %cst_286 [0] : vector<4x64xf32> to vector<64xf32>
    %302 = vector.shape_cast %301 : vector<64xf32> to vector<1x64xf32>
    %cst_287 = arith.constant dense<0.000000e+00> : vector<1xf32>
    %303 = vector.multi_reduction <add>, %302, %cst_287 [1] : vector<1x64xf32> to vector<1xf32>
    %304 = vector.shape_cast %303 : vector<1xf32> to vector<1x1xf32>
    %cst_288 = arith.constant 3.906250e-03 : f32
    %305 = vector.broadcast %cst_288 : f32 to vector<1x1xf32>
    %306 = arith.mulf %304, %305 : vector<1x1xf32>
    %c0_289 = arith.constant 0 : index
    %c0_290 = arith.constant 0 : index
    %c0_291 = arith.constant 0 : index
    %307 = vector.load %arg11[%c0_289, %c0_290, %c0_291] : memref<3x1x100xf32, #tpu.memory_space<vmem>>, vector<1x1x100xf32>
    %308 = vector.shape_cast %307 : vector<1x1x100xf32> to vector<1x100xf32>
    %309 = vector.broadcast %306 : vector<1x1xf32> to vector<1x100xf32>
    %310 = arith.mulf %309, %308 : vector<1x100xf32>
    %c1_292 = arith.constant 1 : index
    %c0_293 = arith.constant 0 : index
    %c0_294 = arith.constant 0 : index
    %311 = vector.load %arg11[%c1_292, %c0_293, %c0_294] : memref<3x1x100xf32, #tpu.memory_space<vmem>>, vector<1x1x100xf32>
    %312 = vector.shape_cast %311 : vector<1x1x100xf32> to vector<1x100xf32>
    %313 = arith.addf %310, %312 : vector<1x100xf32>
    %cst_295 = arith.constant 0.000000e+00 : f32
    %314 = vector.broadcast %cst_295 : f32 to vector<1x100xf32>
    %315 = arith.maximumf %313, %314 : vector<1x100xf32>
    %c2_296 = arith.constant 2 : index
    %c0_297 = arith.constant 0 : index
    %c0_298 = arith.constant 0 : index
    %316 = vector.load %arg11[%c2_296, %c0_297, %c0_298] : memref<3x1x100xf32, #tpu.memory_space<vmem>>, vector<1x1x100xf32>
    %317 = vector.shape_cast %316 : vector<1x1x100xf32> to vector<1x100xf32>
    %318 = arith.mulf %315, %317 : vector<1x100xf32>
    %cst_299 = arith.constant dense<0.000000e+00> : vector<1xf32>
    %319 = vector.multi_reduction <add>, %318, %cst_299 [1] : vector<1x100xf32> to vector<1xf32>
    %320 = vector.shape_cast %319 : vector<1xf32> to vector<1x1xf32>
    %c2_300 = arith.constant 2 : index
    %321 = memref.load %arg15[%c2_300] : memref<4xf32, #tpu.memory_space<smem>>
    %322 = vector.broadcast %321 : f32 to vector<1x1xf32>
    %323 = arith.addf %320, %322 : vector<1x1xf32>
    %cst_301 = arith.constant 0.000000e+00 : f32
    %324 = vector.broadcast %cst_301 : f32 to vector<1x1xf32>
    %325 = arith.subf %324, %323 : vector<1x1xf32>
    %326 = math.exp %325 : vector<1x1xf32>
    %cst_302 = arith.constant 1.000000e+00 : f32
    %327 = vector.broadcast %cst_302 : f32 to vector<1x1xf32>
    %328 = arith.addf %327, %326 : vector<1x1xf32>
    %cst_303 = arith.constant 1.000000e+00 : f32
    %329 = vector.broadcast %cst_303 : f32 to vector<1x1xf32>
    %330 = arith.divf %329, %328 : vector<1x1xf32>
    %c0_304 = arith.constant 0 : index
    %c0_305 = arith.constant 0 : index
    %c0_306 = arith.constant 0 : index
    %331 = vector.load %arg17[%c0_304, %c0_305, %c0_306] : memref<1x1x1xf32, #tpu.memory_space<vmem>>, vector<1x1x1xf32>
    %332 = vector.shape_cast %331 : vector<1x1x1xf32> to vector<1x1xf32>
    %333 = vector.shape_cast %330 : vector<1x1xf32> to vector<1x1x1xf32>
    tpu.vector_store %arg17[%c0_304, %c0_305, %c0_306], %333 {strides = array<i32>} : memref<1x1x1xf32, #tpu.memory_space<vmem>>, vector<1x1x1xf32>,
    %cst_307 = arith.constant 612.372437 : f32
    %334 = vector.broadcast %cst_307 : f32 to vector<1x1xf32>
    %335 = arith.mulf %334, %330 : vector<1x1xf32>
    %c0_308 = arith.constant 0 : index
    %336 = memref.load %arg15[%c0_308] : memref<4xf32, #tpu.memory_space<smem>>
    %c1_309 = arith.constant 1 : index
    %337 = memref.load %arg15[%c1_309] : memref<4xf32, #tpu.memory_space<smem>>
    %338 = vector.broadcast %336 : f32 to vector<4x64xf32>
    %339 = arith.mulf %338, %300 : vector<4x64xf32>
    %340 = vector.broadcast %337 : f32 to vector<4x64xf32>
    %341 = arith.addf %339, %340 : vector<4x64xf32>
    %cst_310 = arith.constant 0.000000e+00 : f32
    %342 = vector.broadcast %cst_310 : f32 to vector<4x64xf32>
    %343 = arith.maximumf %341, %342 : vector<4x64xf32>
    %cst_311 = arith.constant 1.500000e+00 : f32
    %344 = vector.broadcast %cst_311 : f32 to vector<4x64xf32>
    %345 = arith.mulf %343, %344 : vector<4x64xf32>
    %346 = arith.addf %300, %345 : vector<4x64xf32>
    %c0_312 = arith.constant 0 : index
    %c0_313 = arith.constant 0 : index
    %c0_314 = arith.constant 0 : index
    %c0_315 = arith.constant 0 : index
    %347 = vector.load %arg14[%c0_312, %c0_313, %c0_314, %c0_315] : memref<4x1x4x64xf32, #tpu.memory_space<vmem>>, vector<1x1x4x64xf32>
    %348 = vector.shape_cast %347 : vector<1x1x4x64xf32> to vector<4x64xf32>
    %349 = vector.broadcast %335 : vector<1x1xf32> to vector<4x64xf32>
    %350 = arith.mulf %349, %348 : vector<4x64xf32>
    %351 = arith.addf %346, %350 : vector<4x64xf32>
    %352 = vector.broadcast %336 : f32 to vector<4x64xf32>
    %353 = arith.mulf %352, %351 : vector<4x64xf32>
    %354 = vector.broadcast %337 : f32 to vector<4x64xf32>
    %355 = arith.addf %353, %354 : vector<4x64xf32>
    %cst_316 = arith.constant 0.000000e+00 : f32
    %356 = vector.broadcast %cst_316 : f32 to vector<4x64xf32>
    %357 = arith.maximumf %355, %356 : vector<4x64xf32>
    %cst_317 = arith.constant 1.500000e+00 : f32
    %358 = vector.broadcast %cst_317 : f32 to vector<4x64xf32>
    %359 = arith.mulf %357, %358 : vector<4x64xf32>
    %360 = arith.addf %351, %359 : vector<4x64xf32>
    %c1_318 = arith.constant 1 : index
    %c0_319 = arith.constant 0 : index
    %c0_320 = arith.constant 0 : index
    %c0_321 = arith.constant 0 : index
    %361 = vector.load %arg14[%c1_318, %c0_319, %c0_320, %c0_321] : memref<4x1x4x64xf32, #tpu.memory_space<vmem>>, vector<1x1x4x64xf32>
    %362 = vector.shape_cast %361 : vector<1x1x4x64xf32> to vector<4x64xf32>
    %363 = vector.broadcast %335 : vector<1x1xf32> to vector<4x64xf32>
    %364 = arith.mulf %363, %362 : vector<4x64xf32>
    %365 = arith.addf %360, %364 : vector<4x64xf32>
    %366 = vector.broadcast %336 : f32 to vector<4x64xf32>
    %367 = arith.mulf %366, %365 : vector<4x64xf32>
    %368 = vector.broadcast %337 : f32 to vector<4x64xf32>
    %369 = arith.addf %367, %368 : vector<4x64xf32>
    %cst_322 = arith.constant 0.000000e+00 : f32
    %370 = vector.broadcast %cst_322 : f32 to vector<4x64xf32>
    %371 = arith.maximumf %369, %370 : vector<4x64xf32>
    %cst_323 = arith.constant 1.500000e+00 : f32
    %372 = vector.broadcast %cst_323 : f32 to vector<4x64xf32>
    %373 = arith.mulf %371, %372 : vector<4x64xf32>
    %374 = arith.addf %365, %373 : vector<4x64xf32>
    %c2_324 = arith.constant 2 : index
    %c0_325 = arith.constant 0 : index
    %c0_326 = arith.constant 0 : index
    %c0_327 = arith.constant 0 : index
    %375 = vector.load %arg14[%c2_324, %c0_325, %c0_326, %c0_327] : memref<4x1x4x64xf32, #tpu.memory_space<vmem>>, vector<1x1x4x64xf32>
    %376 = vector.shape_cast %375 : vector<1x1x4x64xf32> to vector<4x64xf32>
    %377 = vector.broadcast %335 : vector<1x1xf32> to vector<4x64xf32>
    %378 = arith.mulf %377, %376 : vector<4x64xf32>
    %379 = arith.addf %374, %378 : vector<4x64xf32>
    %380 = vector.broadcast %336 : f32 to vector<4x64xf32>
    %381 = arith.mulf %380, %379 : vector<4x64xf32>
    %382 = vector.broadcast %337 : f32 to vector<4x64xf32>
    %383 = arith.addf %381, %382 : vector<4x64xf32>
    %cst_328 = arith.constant 0.000000e+00 : f32
    %384 = vector.broadcast %cst_328 : f32 to vector<4x64xf32>
    %385 = arith.maximumf %383, %384 : vector<4x64xf32>
    %cst_329 = arith.constant 1.500000e+00 : f32
    %386 = vector.broadcast %cst_329 : f32 to vector<4x64xf32>
    %387 = arith.mulf %385, %386 : vector<4x64xf32>
    %388 = arith.addf %379, %387 : vector<4x64xf32>
    %c3_330 = arith.constant 3 : index
    %c0_331 = arith.constant 0 : index
    %c0_332 = arith.constant 0 : index
    %c0_333 = arith.constant 0 : index
    %389 = vector.load %arg14[%c3_330, %c0_331, %c0_332, %c0_333] : memref<4x1x4x64xf32, #tpu.memory_space<vmem>>, vector<1x1x4x64xf32>
    %390 = vector.shape_cast %389 : vector<1x1x4x64xf32> to vector<4x64xf32>
    %391 = vector.broadcast %335 : vector<1x1xf32> to vector<4x64xf32>
    %392 = arith.mulf %391, %390 : vector<4x64xf32>
    %393 = arith.addf %388, %392 : vector<4x64xf32>
    %c2_334 = arith.constant 2 : index
    %c0_335 = arith.constant 0 : index
    %c0_336 = arith.constant 0 : index
    %394 = vector.load %arg8[%c2_334, %c0_335, %c0_336] : memref<3x1x64xf32, #tpu.memory_space<vmem>>, vector<1x1x64xf32>
    %395 = vector.shape_cast %394 : vector<1x1x64xf32> to vector<1x64xf32>
    %c2_337 = arith.constant 2 : index
    %c0_338 = arith.constant 0 : index
    %c0_339 = arith.constant 0 : index
    %396 = vector.load %arg9[%c2_337, %c0_338, %c0_339] : memref<3x1x64xf32, #tpu.memory_space<vmem>>, vector<1x1x64xf32>
    %397 = vector.shape_cast %396 : vector<1x1x64xf32> to vector<1x64xf32>
    %cst_340 = arith.constant dense<0.000000e+00> : vector<64xf32>
    %398 = vector.multi_reduction <add>, %393, %cst_340 [0] : vector<4x64xf32> to vector<64xf32>
    %399 = vector.shape_cast %398 : vector<64xf32> to vector<1x64xf32>
    %400 = arith.mulf %393, %393 : vector<4x64xf32>
    %cst_341 = arith.constant dense<0.000000e+00> : vector<64xf32>
    %401 = vector.multi_reduction <add>, %400, %cst_341 [0] : vector<4x64xf32> to vector<64xf32>
    %402 = vector.shape_cast %401 : vector<64xf32> to vector<1x64xf32>
    %cst_342 = arith.constant dense<0.000000e+00> : vector<1x64xf32>
    %403 = tpu.matmul %399, %0, %cst_342 {dimension_numbers = #tpu.dot_dimension_numbers<[1], [0], [0], [1], [0, 0, 1, 1], [], []>} : vector<1x64xf32>, vector<64x64xf32>, vector<1x64xf32> -> vector<1x64xf32>
    %cst_343 = arith.constant dense<0.000000e+00> : vector<1x64xf32>
    %404 = tpu.matmul %402, %0, %cst_343 {dimension_numbers = #tpu.dot_dimension_numbers<[1], [0], [0], [1], [0, 0, 1, 1], [], []>} : vector<1x64xf32>, vector<64x64xf32>, vector<1x64xf32> -> vector<1x64xf32>
    %cst_344 = arith.constant 1.250000e-01 : f32
    %405 = vector.broadcast %cst_344 : f32 to vector<1x64xf32>
    %406 = arith.mulf %403, %405 : vector<1x64xf32>
    %cst_345 = arith.constant 1.250000e-01 : f32
    %407 = vector.broadcast %cst_345 : f32 to vector<1x64xf32>
    %408 = arith.mulf %404, %407 : vector<1x64xf32>
    %409 = arith.mulf %406, %406 : vector<1x64xf32>
    %410 = arith.subf %408, %409 : vector<1x64xf32>
    %cst_346 = arith.constant 9.99999974E-6 : f32
    %411 = vector.broadcast %cst_346 : f32 to vector<1x64xf32>
    %412 = arith.addf %410, %411 : vector<1x64xf32>
    %413 = math.rsqrt %412 : vector<1x64xf32>
    %414 = vector.broadcast %406 : vector<1x64xf32> to vector<4x64xf32>
    %415 = arith.subf %393, %414 : vector<4x64xf32>
    %416 = arith.mulf %413, %395 : vector<1x64xf32>
    %417 = vector.broadcast %416 : vector<1x64xf32> to vector<4x64xf32>
    %418 = arith.mulf %415, %417 : vector<4x64xf32>
    %419 = vector.broadcast %397 : vector<1x64xf32> to vector<4x64xf32>
    %420 = arith.addf %418, %419 : vector<4x64xf32>
    %cst_347 = arith.constant 0.000000e+00 : f32
    %421 = vector.broadcast %cst_347 : f32 to vector<4x64xf32>
    %422 = arith.maximumf %420, %421 : vector<4x64xf32>
    %cst_348 = arith.constant dense<0.000000e+00> : vector<64xf32>
    %423 = vector.multi_reduction <add>, %422, %cst_348 [0] : vector<4x64xf32> to vector<64xf32>
    %424 = vector.shape_cast %423 : vector<64xf32> to vector<1x64xf32>
    %cst_349 = arith.constant 2.500000e-01 : f32
    %425 = vector.broadcast %cst_349 : f32 to vector<1x64xf32>
    %426 = arith.mulf %424, %425 : vector<1x64xf32>
    %c0_350 = arith.constant 0 : index
    %c0_351 = arith.constant 0 : index
    %427 = vector.load %arg12[%c0_350, %c0_351] : memref<64x128xf32, #tpu.memory_space<vmem>>, vector<64x128xf32>
    %cst_352 = arith.constant dense<0.000000e+00> : vector<1x128xf32>
    %428 = tpu.matmul %426, %427, %cst_352 {dimension_numbers = #tpu.dot_dimension_numbers<[1], [0], [0], [1], [0, 0, 1, 1], [], []>} : vector<1x64xf32>, vector<64x128xf32>, vector<1x128xf32> -> vector<1x128xf32>
    %c0_353 = arith.constant 0 : index
    %c0_354 = arith.constant 0 : index
    %429 = vector.load %arg13[%c0_353, %c0_354] : memref<1x128xf32, #tpu.memory_space<vmem>>, vector<1x128xf32>
    %430 = arith.addf %428, %429 : vector<1x128xf32>
    %c0_355 = arith.constant 0 : index
    %c0_356 = arith.constant 0 : index
    %c0_357 = arith.constant 0 : index
    %431 = vector.load %arg16[%c0_355, %c0_356, %c0_357] : memref<1x1x128xf32, #tpu.memory_space<vmem>>, vector<1x1x128xf32>
    %432 = vector.shape_cast %431 : vector<1x1x128xf32> to vector<1x128xf32>
    %433 = vector.shape_cast %430 : vector<1x128xf32> to vector<1x1x128xf32>
    tpu.vector_store %arg16[%c0_355, %c0_356, %c0_357], %433 {strides = array<i32>} : memref<1x1x128xf32, #tpu.memory_space<vmem>>, vector<1x1x128xf32>,
    return
  }
  func.func @transform_0(%arg0: i32) -> (i32, i32, i32) {
    %c0_i32 = arith.constant 0 : i32
    %c0_i32_0 = arith.constant 0 : i32
    %c0_i32_1 = arith.constant 0 : i32
    return %arg0, %c0_i32, %c0_i32_0 : i32, i32, i32
  }
  func.func @transform_1(%arg0: i32) -> (i32, i32) {
    %c0_i32 = arith.constant 0 : i32
    %c0_i32_0 = arith.constant 0 : i32
    %c0_i32_1 = arith.constant 0 : i32
    return %c0_i32, %c0_i32_0 : i32, i32
  }
  func.func @transform_2(%arg0: i32) -> (i32, i32, i32) {
    %c0_i32 = arith.constant 0 : i32
    %c0_i32_0 = arith.constant 0 : i32
    %c0_i32_1 = arith.constant 0 : i32
    %c0_i32_2 = arith.constant 0 : i32
    return %c0_i32, %c0_i32_0, %c0_i32_1 : i32, i32, i32
  }
  func.func @transform_3(%arg0: i32) -> (i32, i32, i32) {
    %c0_i32 = arith.constant 0 : i32
    %c0_i32_0 = arith.constant 0 : i32
    %c0_i32_1 = arith.constant 0 : i32
    %c0_i32_2 = arith.constant 0 : i32
    return %c0_i32, %c0_i32_0, %c0_i32_1 : i32, i32, i32
  }
  func.func @transform_4(%arg0: i32) -> (i32, i32, i32) {
    %c0_i32 = arith.constant 0 : i32
    %c0_i32_0 = arith.constant 0 : i32
    %c0_i32_1 = arith.constant 0 : i32
    %c0_i32_2 = arith.constant 0 : i32
    return %c0_i32, %c0_i32_0, %c0_i32_1 : i32, i32, i32
  }
  func.func @transform_5(%arg0: i32) -> (i32, i32, i32) {
    %c0_i32 = arith.constant 0 : i32
    %c0_i32_0 = arith.constant 0 : i32
    %c0_i32_1 = arith.constant 0 : i32
    %c0_i32_2 = arith.constant 0 : i32
    return %c0_i32, %c0_i32_0, %c0_i32_1 : i32, i32, i32
  }
  func.func @transform_6(%arg0: i32) -> (i32, i32, i32) {
    %c0_i32 = arith.constant 0 : i32
    %c0_i32_0 = arith.constant 0 : i32
    %c0_i32_1 = arith.constant 0 : i32
    %c0_i32_2 = arith.constant 0 : i32
    return %c0_i32, %c0_i32_0, %c0_i32_1 : i32, i32, i32
  }
  func.func @transform_7(%arg0: i32) -> (i32, i32, i32) {
    %c0_i32 = arith.constant 0 : i32
    %c0_i32_0 = arith.constant 0 : i32
    %c0_i32_1 = arith.constant 0 : i32
    %c0_i32_2 = arith.constant 0 : i32
    return %c0_i32, %c0_i32_0, %c0_i32_1 : i32, i32, i32
  }
  func.func @transform_8(%arg0: i32) -> (i32, i32, i32) {
    %c0_i32 = arith.constant 0 : i32
    %c0_i32_0 = arith.constant 0 : i32
    %c0_i32_1 = arith.constant 0 : i32
    %c0_i32_2 = arith.constant 0 : i32
    return %c0_i32, %c0_i32_0, %c0_i32_1 : i32, i32, i32
  }
  func.func @transform_9(%arg0: i32) -> (i32, i32) {
    %c0_i32 = arith.constant 0 : i32
    %c0_i32_0 = arith.constant 0 : i32
    %c0_i32_1 = arith.constant 0 : i32
    return %c0_i32, %c0_i32_0 : i32, i32
  }
  func.func @transform_10(%arg0: i32) -> (i32, i32, i32) {
    %c0_i32 = arith.constant 0 : i32
    %c0_i32_0 = arith.constant 0 : i32
    %c0_i32_1 = arith.constant 0 : i32
    %c0_i32_2 = arith.constant 0 : i32
    return %c0_i32, %c0_i32_0, %c0_i32_1 : i32, i32, i32
  }
  func.func @transform_11(%arg0: i32) -> (i32, i32) {
    %c0_i32 = arith.constant 0 : i32
    %c0_i32_0 = arith.constant 0 : i32
    %c0_i32_1 = arith.constant 0 : i32
    return %c0_i32, %c0_i32_0 : i32, i32
  }
  func.func @transform_12(%arg0: i32) -> (i32, i32) {
    %c0_i32 = arith.constant 0 : i32
    %c0_i32_0 = arith.constant 0 : i32
    %c0_i32_1 = arith.constant 0 : i32
    return %c0_i32, %c0_i32_0 : i32, i32
  }
  func.func @transform_13(%arg0: i32) -> (i32, i32, i32, i32) {
    %c0_i32 = arith.constant 0 : i32
    %c0_i32_0 = arith.constant 0 : i32
    %c0_i32_1 = arith.constant 0 : i32
    %c0_i32_2 = arith.constant 0 : i32
    return %c0_i32, %arg0, %c0_i32_0, %c0_i32_1 : i32, i32, i32, i32
  }
  func.func @transform_14(%arg0: i32) -> i32 {
    %c0_i32 = arith.constant 0 : i32
    %c0_i32_0 = arith.constant 0 : i32
    return %c0_i32 : i32
  }
  func.func @transform_15(%arg0: i32) -> (i32, i32, i32) {
    %c0_i32 = arith.constant 0 : i32
    %c0_i32_0 = arith.constant 0 : i32
    %c0_i32_1 = arith.constant 0 : i32
    return %arg0, %c0_i32, %c0_i32_0 : i32, i32, i32
  }
  func.func @transform_16(%arg0: i32) -> (i32, i32, i32) {
    %c0_i32 = arith.constant 0 : i32
    %c0_i32_0 = arith.constant 0 : i32
    %c0_i32_1 = arith.constant 0 : i32
    return %arg0, %c0_i32, %c0_i32_0 : i32, i32, i32
  }
}

</mosaic_0001>

<bundles_post_ra>
// kernel: sdenet_forward.1
= control target key start
LH: loop header
LB: loop body
LE: loop exit
PB: predicated region body
PF: predicated region fallthrough
CT: control target
= control target key end

     0   :  { %s15250_s0 = inlined_call_operand.vmem [shape: f32[2,196,9], index: 0, kind: input, shape index: {}]   ;;  %s15251_s1 = inlined_call_operand.vmem [shape: f32[9,64], index: 1, kind: input, shape index: {}]   ;;  %s15252_s2 = inlined_call_operand.vmem [shape: f32[16,36,196], index: 2, kind: input, shape index: {}]   ;;  %s15253_s3 = inlined_call_operand.vmem [shape: f32[16,64,64], index: 3, kind: input, shape index: {}]   ;;  %s15254_s4 = inlined_call_operand.vmem [shape: f32[16,4,36], index: 4, kind: input, shape index: {}]   ;;  %s15255_s5 = inlined_call_operand.vmem [shape: f32[16,64,64], index: 5, kind: input, shape index: {}]   ;;  %s15256_s6 = inlined_call_operand.vmem [shape: f32[3,1,64], index: 6, kind: input, shape index: {}]   ;;  %s15257_s7 = inlined_call_operand.vmem [shape: f32[3,1,64], index: 7, kind: input, shape index: {}]   ;;  %s15258_s8 = inlined_call_operand.vmem [shape: f32[3,1,64], index: 8, kind: input, shape index: {}]   ;;  %s15259_s9 = inlined_call_operand.vmem [shape: f32[64,64], index: 9, kind: input, shape index: {}]   ;;  %s15260_s10 = inlined_call_operand.vmem [shape: f32[3,1,100], index: 10, kind: input, shape index: {}]   ;;  %s15261_s11 = inlined_call_operand.vmem [shape: f32[64,128], index: 11, kind: input, shape index: {}]   ;;  %s15262_s12 = inlined_call_operand.vmem [shape: f32[1,128], index: 12, kind: input, shape index: {}]   ;;  %s15263_s13 = inlined_call_operand.vmem [shape: f32[4,2,4,64], index: 13, kind: input, shape index: {}]   ;;  %s15264_s14 = inlined_call_operand.vmem [shape: f32[4], index: 14, kind: input, shape index: {}]   ;;  %s15265_s15 = inlined_call_operand.hbm [shape: f32[2,1,128], index: 15, kind: output, shape index: {0}]   ;;  %s15266_s16 = inlined_call_operand.hbm [shape: f32[2,1,1], index: 16, kind: output, shape index: {1}]  }
   0x1   :  { %15272 = sst [smem:[#allocation15_spill]] %s15250_s0 }
   0x2   :  { %15273 = sst [smem:[#allocation16_spill]] %s15251_s1 }
   0x3   :  { %15274 = sst [smem:[#allocation17_spill]] %s15252_s2 }
   0x4   :  { %15275 = sst [smem:[#allocation18_spill]] %s15253_s3 }
   0x5   :  { %15276 = sst [smem:[#allocation19_spill]] %s15254_s4 }
   0x6   :  { %15277 = sst [smem:[#allocation20_spill]] %s15264_s14 }
   0x7   :  { %22 = vsyncpa [#allocation5], 0 }
   0x8   :  { %23 = vsyncpa [#allocation4], 0 }
   0x9   :  { %25 = vsyncpa [#allocation4 + $0x1], 0 }
   0xa   :  { %26 = vsyncpa [#allocation8], 0 }
   0xb   :  { %28 = vsyncpa [#allocation8 + $0x1], 0  ;;  %s11106_s21 = smov 0   ;;  %s11108_s22 = smov 0  }
   0xc   :  { %s11110_s23 = smov 0   ;;  %s11112_s24 = smov 0  }
   0xd LB: > { %s11127_s25 = sadd.s32 4294967295, %s11014_s24   ;;  %s8368_s26 = sadd.s32 4294967294, %s11014_s24   ;;  %s11014_s24 = sphi %s11112_s24, %s15295_s24   ;;  %s11010_s23 = sphi %s11110_s23, %s15299_s23   ;;  %s11006_s22 = sphi %s11108_s22, %s15298_s22   ;;  %s11002_s21 = sphi %s11106_s21, %s15297_s21  }
   0xe   : > { %s11131_s27 = sadd.s32 1, %s11014_s24   ;;  %s319_s28 = sadd.s32 1, %s11010_s23 }
   0xf   : > { %15278 = sst [smem:[#allocation12_spill]] %s11131_s27  ;;  %s316_s29 = ssub.s32 %s11014_s24, %s11131_s27 }
  0x10   : > { %p326_p0 = scmp.ne.s32.totalorder %s11010_s23, %s11006_s22  ;;  %p317_p1 = scmp.eq.s32.totalorder %s316_s29, 0 }
  0x11   : > { %p327_p2 = scmp.eq.s32.totalorder %s11014_s24, 0  ;;  %p377_p3 = scmp.eq.s32.totalorder %s11127_s25, 1 }
  0x12   : > { %p382_p4 = scmp.ne.s32.totalorder %s11006_s22, %s11002_s21  ;;  %p383_p7 = scmp.eq.s32.totalorder %s8368_s26, 1 }
  0x13   : > { %s11143_s30 = scalar_select %p317_p1, %s11010_s23, %s319_s28  }
  0x14   : > { %p11145_p5 = por %p327_p2, %p326_p0  ;;  %p11149_p6 = por %p377_p3, %p326_p0 }
  0x15   : > { %15279 = sst [smem:[#allocation13_spill]] %s11143_s30  ;;  %p8369_p8 = scmp.ge.s32.totalorder %s11014_s24, 1 }
  0x16   : > { %s15281_s17 = scalar_select %p11149_p6, 1, 0 }
  0x17   : > { %p416_p9 = scmp.lt.s32.totalorder %s11014_s24, 3  ;;  %p11155_p10 = por %p383_p7, %p382_p4 }
  0x18   : > { %p10841_p11 = scmp.eq.s32.totalorder %s11127_s25, 0  ;;  %s15285_s14 = sld [smem:[#allocation20_spill]] }
  0x19   : > { %s15282_s18 = scalar_select %p11155_p10, 1, 0 }
  0x1a   : > { %p11160_p12 = pnand %p8369_p8, %p416_p9 }
  0x1b   : > { %15283 = sst [smem:[#allocation14_spill]] %s15282_s18 }
  0x1c   : > { %p10830_p13 = pneg %p11160_p12 }
  0x1e   : > { %s465_s29 = sshll.u32 %s15285_s14, 4  ;;  %p10831_p0 = pnand %p10841_p11, %p10830_p13  ;;  %s466_s29 = int_to_ptr.vmem [resolvable:$true] %s465_s29 }
  0x1f   : > { %s10905_s26 = scalar_lea.vmem %s466_s29, 16  ;;  %p10913_p7 = scmp.lt.s32.totalorder %s466_s29, %s466_s29 }
  0x20   : > { %p10906_p1 = scmp.ne.s32.totalorder %s466_s29, %s10905_s26  ;;  %p10907_p2 = pneg %p10831_p0 }
  0x21   : > { %p10914_p8 = scmp.lt.s32.totalorder %s10905_s26, %s10905_s26 }
  0x22   : > { %p10908_p3 = pnand %p10907_p2, %p10906_p1 }
  0x23   : > { %p10915_p9 = por %p10914_p8, %p10913_p7 }
  0x24   : > { %p10909_p4 = pneg %p10908_p3 }
  0x26   : > { %p10916_p10 = pnand %p10915_p9, %p10909_p4 }
  0x28   : > { %10919 = shalt.err (!%p10916_p10)
}
  0x29   : > { %s11016_s30 = smov [#allocation3]   ;;  %p8371_p6 = scmp.ge.s32.totalorder %s11014_s24, 2 }
  0x2a   : > { %10833 = dma.vmem_to_smem (!%p10831_p0), %s466_s29, 16, %s11016_s30, [#allocation5]  }
  0x2b   : > { %472 = sbr.rel (%p8371_p6) target bundleno = 54 (0x36), region = 68 }
  0x30   : > { %483 = sbr.rel (!%p11145_p5) target bundleno = 54 (0x36), region = 76  ;;  %s485_s20 = sand.u32 (%p11145_p5), 1, %s11010_s23  }
  0x31   : > { %s8373_s28 = sshll.u32 (%p11145_p5), %s11014_s24, 2  ;;  %s8372_s14 = sshll.u32 (%p11145_p5), %s485_s20, 4 }
  0x32   : > { %s489_s18 = scalar_lea.vmem (%p11145_p5), %s15263_s13, %s8373_s28  ;;  %s487_s30 = scalar_lea.vmem (%p11145_p5), [#allocation2], %s8372_s14 }
  0x33   : > { %v506_v0 = vld [vmem:[%s489_s18] sm:$0xf] (%p11145_p5)  ;;  %v508_v1 = vld [vmem:[%s489_s18 + $0x8] sm:$0xf] (%p11145_p5)  ;;  %v510_v2 = vld [vmem:[%s489_s18 + $0x10] sm:$0xf] (%p11145_p5) }
  0x34   : > { %507 = vst [vmem:[%s487_s30] sm:$0xf] (%p11145_p5), %v506_v0  ;;  %509 = vst [vmem:[%s487_s30 + $0x4] sm:$0xf] (%p11145_p5), %v508_v1  ;;  %v512_v3 = vld [vmem:[%s489_s18 + $0x18] sm:$0xf] (%p11145_p5) }
  0x35   : > { %511 = vst [vmem:[%s487_s30 + $0x8] sm:$0xf] %v510_v2  ;;  %513 = vst [vmem:[%s487_s30 + $0xc] sm:$0xf] %v512_v3 }
  0x36 PF: > { %548 = sbr.rel (%p11160_p12) target bundleno = 7207 (0x1c27), region = 117  ;;  %s11184_s0 = sand.u32 (!%p11160_p12), 1, %s11006_s22  }
  0x37   : > { %s8375_s27 = sshll.u32 (!%p11160_p12), %s11184_s0, 4 }
  0x38   : > { %s11187_s29 = scalar_lea.vmem (!%p11160_p12), [#allocation2], %s8375_s27 }
  0x3b   : > { %10989 = dma.done.wait (%p10841_p11), [#allocation5], 16  }
  0x3c   : > { %10991 = vsyncadd (%p10841_p11), [#allocation5], 4294967280 }
  0x3d   : > { %561 = sfence }
  0x3e   : > { %s15286_s1 = sld [smem:[#allocation16_spill]]  ;;  %vm736_vm0 = vcmask 1040384   ;;  %v11017_v5 = vmov 0.0   ;;  %vm11018_vm1 = vmmov 0   ;;  %p613_p5 = scmp.lt.s32.totalorder %s11127_s25, 1  ;;  %vm660_vm2 = vcmask 72704  }
  0x3f   : > { %9601 = vmatprep.subr.mxu0 %v11017_v5  ;;  %9605 = vmatprep.mubr.msk.f32.mxu0 %vm11018_vm1, %v11017_v5  ;;  %s15287_s14 = sld [smem:[#allocation15_spill]]  ;;  %v11315_v32 = vld [vmem:[%s15259_s9 + $0x38] sm:$0xff]  ;;  %v11322_v33 = vld [vmem:[%s15259_s9 + $0x30] sm:$0xff]  ;;  %v11329_v34 = vld [vmem:[%s15259_s9 + $0x28] sm:$0xff]  ;;  %vm932_vm3 = vcmask 523264   ;;  %vm980_vm4 = vcmask 519168  }
  0x40   : > { %9680 = vmatprep.subr.mxu1 %v11017_v5  ;;  %s614_s28 = scalar_select %p613_p5, %s11127_s25, 1  ;;  %9696 = vmatprep.mubr.msk.f32.mxu1 %vm11018_vm1, %v11017_v5  ;;  %v11336_v35 = vld [vmem:[%s15259_s9 + $0x20] sm:$0xff]  ;;  %v11343_v36 = vld [vmem:[%s15259_s9 + $0x18] sm:$0xff]  ;;  %v11350_v37 = vld [vmem:[%s15259_s9 + $0x10] sm:$0xff]  ;;  %vm1346_vm5 = vcmask 556032   ;;  %vm1362_vm6 = vcmask 1043456  }
  0x41   : > { %9681 = vmatpush3.msra.mxu1 %v11315_v32  ;;  %v11357_v38 = vld [vmem:[%s15259_s9 + $0x8] sm:$0xff]  ;;  %v11363_v39 = vld [vmem:[%s15259_s9] sm:$0xff]  ;;  %s15288_s2 = sld [smem:[#allocation17_spill]]  ;;  %vm5329_vm7 = vcmask 293888   ;;  %vm7885_vm8 = vcmask 811008   ;;  %vm7898_vm9 = vcmask 0  }
  0x42   : > { %s10821_s26 = smul.u32 200, %s614_s28  ;;  %9682 = vmatprep.subr.mxu1 %v11017_v5  ;;  %v11373_v63 = vld [vmem:[%s15256_s6] ss:$0 sm:$0xff]  ;;  %s15289_s3 = sld [smem:[#allocation18_spill]] }
  0x43   : > { %9683 = vmatpush3.msra.mxu1 %v11322_v33  ;;  %s15290_s4 = sld [smem:[#allocation19_spill]]  ;;  %s612_s20 = scalar_lea.vmem [#allocation7], %s11184_s0 }
  0x44   : > { %v652_v4 = vld [vmem:[%s15286_s1 + $0x8] sm:$0x1]  ;;  %v651_v6 = vld [vmem:[%s15286_s1] sm:$0xff]  ;;  %9684 = vmatprep.subr.mxu1 %v11017_v5  ;;  %s9049_s19 = sld [smem:[#allocation3 + $0x1]]  ;;  %s8230_s30 = scalar_lea.sflag [#allocation8], %s11184_s0 }
  0x45   : > { %9602 = vmatpush3.msk.msra.mxu0 %vm736_vm0, %v652_v4  ;;  %s11212_s18 = scalar_lea.vmem %s15287_s14, %s10821_s26  ;;  %9685 = vmatpush3.msra.mxu1 %v11329_v34  ;;  %s9048_s14 = sld [smem:[#allocation3 + $0x2]] }
  0x46   : > { %9603 = vmatprep.subr.mxu0 %v11017_v5  ;;  %v626_v7 = vld [vmem:[%s11212_s18] sm:$0xff]  ;;  %v627_v8 = vld [vmem:[%s11212_s18 + $0x8] sm:$0xff]  ;;  %v628_v9 = vld [vmem:[%s11212_s18 + $0x10] sm:$0xff]  ;;  %9686 = vmatprep.subr.mxu1 %v11017_v5  ;;  %s8255_s26 = sshll.u32 %s612_s20, 4  ;;  %p15291_p11 = scmp.ne.s32.totalorder %s15281_s17, 0  ;;  %s8256_s26 = int_to_ptr.vmem [resolvable:$true] %s8255_s26 }
  0x47   : > { %9604 = vmatpush3.msra.mxu0 %v651_v6  ;;  %v629_v10 = vld [vmem:[%s11212_s18 + $0x18] sm:$0xff]  ;;  %v630_v11 = vld [vmem:[%s11212_s18 + $0x20] sm:$0xff]  ;;  %v631_v12 = vld [vmem:[%s11212_s18 + $0x28] sm:$0xff]  ;;  %9687 = vmatpush3.msra.mxu1 %v11336_v35  ;;  %s10920_s27 = scalar_lea.vmem %s8256_s26, 16 }
  0x48   : > { %1490 = vmatprep.subr.mxu0 %v11017_v5  ;;  %9606 = vmatmul.mubr.msk.f32.vlgmr.msra.gmra.mxu0 %vm660_vm2, %v626_v7  ;;  %v632_v13 = vld [vmem:[%s11212_s18 + $0x30] sm:$0xff]  ;;  %v633_v14 = vld [vmem:[%s11212_s18 + $0x38] sm:$0xff]  ;;  %v634_v15 = vld [vmem:[%s11212_s18 + $0x40] sm:$0xff]  ;;  %p10921_p10 = scmp.ne.s32.totalorder %s8256_s26, %s10920_s27 }
  0x49   : > { %9608 = vmatprep.mubr.msk.f32.mxu0 %vm11018_vm1, %v11017_v5  ;;  %v635_v16 = vld [vmem:[%s11212_s18 + $0x48] sm:$0xff]  ;;  %v636_v17 = vld [vmem:[%s11212_s18 + $0x50] sm:$0xff]  ;;  %v637_v18 = vld [vmem:[%s11212_s18 + $0x58] sm:$0xff]  ;;  %9688 = vmatprep.subr.mxu1 %v11017_v5 }
  0x4a   : > { %v638_v19 = vld [vmem:[%s11212_s18 + $0x60] sm:$0xff]  ;;  %v639_v20 = vld [vmem:[%s11212_s18 + $0x68] sm:$0xff]  ;;  %v640_v21 = vld [vmem:[%s11212_s18 + $0x70] sm:$0xff]  ;;  %9689 = vmatpush3.msra.mxu1 %v11343_v36  ;;  %p10922_p12 = pnand %p10921_p10, %p15291_p11 }
  0x4b   : > { %v641_v22 = vld [vmem:[%s11212_s18 + $0x78] sm:$0xff]  ;;  %v642_v23 = vld [vmem:[%s11212_s18 + $0x80] sm:$0xff]  ;;  %v643_v24 = vld [vmem:[%s11212_s18 + $0x88] sm:$0xff]  ;;  %9690 = vmatprep.subr.mxu1 %v11017_v5 }
  0x4c   : > { %9609 = vmatmul.mubr.msk.f32.gmra.mxu0 %vm660_vm2, %v627_v8  ;;  %v644_v25 = vld [vmem:[%s11212_s18 + $0x90] sm:$0xff]  ;;  %v645_v26 = vld [vmem:[%s11212_s18 + $0x98] sm:$0xff]  ;;  %v646_v27 = vld [vmem:[%s11212_s18 + $0xa0] sm:$0xff]  ;;  %9691 = vmatpush3.msra.mxu1 %v11350_v37  ;;  %p10923_p13 = pneg %p10922_p12 }
  0x4d   : > { %9611 = vmatprep.mubr.msk.f32.mxu0 %vm11018_vm1, %v11017_v5  ;;  %v647_v28 = vld [vmem:[%s11212_s18 + $0xa8] sm:$0xff]  ;;  %v648_v29 = vld [vmem:[%s11212_s18 + $0xb0] sm:$0xff]  ;;  %v649_v30 = vld [vmem:[%s11212_s18 + $0xb8] sm:$0xff]  ;;  %9692 = vmatprep.subr.mxu1 %v11017_v5 }
  0x4e   : > { %v650_v31 = vld [vmem:[%s11212_s18 + $0xc0] sm:$0xf]  ;;  %9693 = vmatpush3.msra.mxu1 %v11357_v38  ;;  %s7901_s18 = sld [smem:[#allocation3]] }
  0x4f   : > { %9694 = vmatprep.subr.mxu1 %v11017_v5 }
  0x50   : > { %9612 = vmatmul.mubr.msk.f32.gmra.mxu0 %vm660_vm2, %v628_v9  ;;  %9695 = vmatpush3.msra.mxu1 %v11363_v39 }
  0x51   : > { %9614 = vmatprep.mubr.msk.f32.mxu0 %vm11018_vm1, %v11017_v5  ;;  %9699 = vmatprep.subr.mxu1 %v11017_v5 }
  0x54   : > { %9615 = vmatmul.mubr.msk.f32.gmra.mxu0 %vm660_vm2, %v629_v10 }
  0x55   : > { %9617 = vmatprep.mubr.msk.f32.mxu0 %vm11018_vm1, %v11017_v5 }
  0x58   : > { %9618 = vmatmul.mubr.msk.f32.gmra.mxu0 %vm660_vm2, %v630_v11 }
  0x59   : > { %9620 = vmatprep.mubr.msk.f32.mxu0 %vm11018_vm1, %v11017_v5 }
  0x5c   : > { %9621 = vmatmul.mubr.msk.f32.gmra.mxu0 %vm660_vm2, %v631_v12 }
  0x5d   : > { %9623 = vmatprep.mubr.msk.f32.mxu0 %vm11018_vm1, %v11017_v5 }
  0x60   : > { %9624 = vmatmul.mubr.msk.f32.gmra.mxu0 %vm660_vm2, %v632_v13 }
  0x61   : > { %9626 = vmatprep.mubr.msk.f32.mxu0 %vm11018_vm1, %v11017_v5 }
  0x64   : > { %9627 = vmatmul.mubr.msk.f32.gmra.mxu0 %vm660_vm2, %v633_v14 }
  0x65   : > { %9629 = vmatprep.mubr.msk.f32.mxu0 %vm11018_vm1, %v11017_v5 }
  0x68   : > { %9630 = vmatmul.mubr.msk.f32.gmra.mxu0 %vm660_vm2, %v634_v15 }
  0x69   : > { %9632 = vmatprep.mubr.msk.f32.mxu0 %vm11018_vm1, %v11017_v5 }
  0x6c   : > { %9633 = vmatmul.mubr.msk.f32.gmra.mxu0 %vm660_vm2, %v635_v16 }
  0x6d   : > { %9635 = vmatprep.mubr.msk.f32.mxu0 %vm11018_vm1, %v11017_v5 }
  0x70   : > { %9636 = vmatmul.mubr.msk.f32.gmra.mxu0 %vm660_vm2, %v636_v17 }
  0x71   : > { %9638 = vmatprep.mubr.msk.f32.mxu0 %vm11018_vm1, %v11017_v5 }
  0x74   : > { %9639 = vmatmul.mubr.msk.f32.gmra.mxu0 %vm660_vm2, %v637_v18 }
  0x75   : > { %9641 = vmatprep.mubr.msk.f32.mxu0 %vm11018_vm1, %v11017_v5 }
  0x78   : > { %9642 = vmatmul.mubr.msk.f32.gmra.mxu0 %vm660_vm2, %v638_v19 }
  0x79   : > { %9644 = vmatprep.mubr.msk.f32.mxu0 %vm11018_vm1, %v11017_v5 }
  0x7c   : > { %9645 = vmatmul.mubr.msk.f32.gmra.mxu0 %vm660_vm2, %v639_v20 }
  0x7d   : > { %9647 = vmatprep.mubr.msk.f32.mxu0 %vm11018_vm1, %v11017_v5 }
  0x80   : > { %9648 = vmatmul.mubr.msk.f32.gmra.mxu0 %vm660_vm2, %v640_v21 }
  0x81   : > { %9650 = vmatprep.mubr.msk.f32.mxu0 %vm11018_vm1, %v11017_v5 }
  0x84   : > { %9651 = vmatmul.mubr.msk.f32.gmra.mxu0 %vm660_vm2, %v641_v22 }
  0x85   : > { %9653 = vmatprep.mubr.msk.f32.mxu0 %vm11018_vm1, %v11017_v5 }
  0x88   : > { %9654 = vmatmul.mubr.msk.f32.gmra.mxu0 %vm660_vm2, %v642_v23 }
  0x89   : > { %9656 = vmatprep.mubr.msk.f32.mxu0 %vm11018_vm1, %v11017_v5 }
  0x8c   : > { %9657 = vmatmul.mubr.msk.f32.gmra.mxu0 %vm660_vm2, %v643_v24 }
  0x8d   : > { %9659 = vmatprep.mubr.msk.f32.mxu0 %vm11018_vm1, %v11017_v5 }
  0x90   : > { %9660 = vmatmul.mubr.msk.f32.gmra.mxu0 %vm660_vm2, %v644_v25 }
  0x91   : > { %9662 = vmatprep.mubr.msk.f32.mxu0 %vm11018_vm1, %v11017_v5 }
  0x94   : > { %9663 = vmatmul.mubr.msk.f32.gmra.mxu0 %vm660_vm2, %v645_v26 }
  0x95   : > { %9665 = vmatprep.mubr.msk.f32.mxu0 %vm11018_vm1, %v11017_v5 }
  0x98   : > { %9666 = vmatmul.mubr.msk.f32.gmra.mxu0 %vm660_vm2, %v646_v27 }
  0x99   : > { %9668 = vmatprep.mubr.msk.f32.mxu0 %vm11018_vm1, %v11017_v5 }
  0x9c   : > { %9669 = vmatmul.mubr.msk.f32.gmra.mxu0 %vm660_vm2, %v647_v28 }
  0x9d   : > { %9671 = vmatprep.mubr.msk.f32.mxu0 %vm11018_vm1, %v11017_v5 }
  0xa0   : > { %9672 = vmatmul.mubr.msk.f32.gmra.mxu0 %vm660_vm2, %v648_v29 }
  0xa1   : > { %9674 = vmatprep.mubr.msk.f32.mxu0 %vm11018_vm1, %v11017_v5 }
  0xa4   : > { %9675 = vmatmul.mubr.msk.f32.gmra.mxu0 %vm660_vm2, %v649_v30 }
  0xa5   : > { %9677 = vmatprep.mubr.msk.f32.mxu0 %vm11018_vm1, %v11017_v5 }
  0xa8   : > { %9678 = vmatmul.mubr.msk.f32.gmra.mxu0 %vm660_vm2, %v650_v31 }
 0x108   : > { %v806_v40 = vpop.f32.mrf.mxu0 }
 0x109   : > { %v11379_v2 = vadd.f32 %v11373_v63, %v806_v40 }
 0x10a   : > { %v9607_v41 = vpop.f32.mrf.mxu0 }
 0x10b   : > { %v989_v10 = vmul.f32 %v11379_v2, %v11379_v2  ;;  %v933_v12 = vsel %vm932_vm3, %v11379_v2, 0.0 }
 0x10c   : > { %v811_v42 = vpop.f32.mrf.mxu0 }
 0x10d   : > { %v11376_v1 = vadd.f32 %v11373_v63, %v811_v42  ;;  %v1014_v22 = vsel %vm932_vm3, %v989_v10, 0.0 }
 0x10e   : > { %v9610_v43 = vpop.f32.mrf.mxu0 }
 0x10f   : > { %v934_v7 = vsel %vm932_vm3, %v11376_v1, 0.0  ;;  %v990_v8 = vmul.f32 %v11376_v1, %v11376_v1 }
 0x110   : > { %v816_v44 = vpop.f32.mrf.mxu0  ;;  %v935_v16 = vadd.f32 %v934_v7, %v933_v12 }
 0x111   : > { %v11384_v4 = vadd.f32 %v11373_v63, %v816_v44  ;;  %v1015_v18 = vsel %vm932_vm3, %v990_v8, 0.0 }
 0x112   : > { %v9613_v45 = vpop.f32.mrf.mxu0  ;;  %v1016_v29 = vadd.f32 %v1015_v18, %v1014_v22 }
 0x113   : > { %v936_v13 = vsel %vm932_vm3, %v11384_v4, 0.0  ;;  %v991_v14 = vmul.f32 %v11384_v4, %v11384_v4 }
 0x114   : > { %v821_v46 = vpop.f32.mrf.mxu0  ;;  %v937_v23 = vadd.f32 %v936_v13, %v935_v16 }
 0x115   : > { %v11391_v9 = vadd.f32 %v11373_v63, %v821_v46  ;;  %v1017_v25 = vsel %vm932_vm3, %v991_v14, 0.0 }
 0x116   : > { %v9616_v47 = vpop.f32.mrf.mxu0  ;;  %v1018_v44 = vadd.f32 %v1017_v25, %v1016_v29 }
 0x117   : > { %v938_v19 = vsel %vm932_vm3, %v11391_v9, 0.0  ;;  %v992_v20 = vmul.f32 %v11391_v9, %v11391_v9 }
 0x118   : > { %v826_v48 = vpop.f32.mrf.mxu0  ;;  %v939_v30 = vadd.f32 %v938_v19, %v937_v23 }
 0x119   : > { %v11404_v15 = vadd.f32 %v11373_v63, %v826_v48  ;;  %v1019_v40 = vsel %vm932_vm3, %v992_v20, 0.0 }
 0x11a   : > { %v9619_v49 = vpop.f32.mrf.mxu0 }
 0x11b   : > { %v940_v26 = vsel %vm932_vm3, %v11404_v15, 0.0  ;;  %v993_v27 = vmul.f32 %v11404_v15, %v11404_v15 }
 0x11c   : > { %v831_v50 = vpop.f32.mrf.mxu0  ;;  %v941_v45 = vadd.f32 %v940_v26, %v939_v30 }
 0x11d   : > { %v11412_v21 = vadd.f32 %v11373_v63, %v831_v50  ;;  %v1021_v47 = vsel %vm932_vm3, %v993_v27, 0.0 }
 0x11e   : > { %v9622_v51 = vpop.f32.mrf.mxu0 }
 0x11f   : > { %v942_v41 = vsel %vm932_vm3, %v11412_v21, 0.0  ;;  %v994_v42 = vmul.f32 %v11412_v21, %v11412_v21  ;;  %v1020_v51 = vadd.f32 %v1019_v40, %v1018_v44 }
 0x120   : > { %v836_v52 = vpop.f32.mrf.mxu0 }
 0x121   : > { %v11421_v28 = vadd.f32 %v11373_v63, %v836_v52  ;;  %v943_v52 = vadd.f32 %v942_v41, %v941_v45 }
 0x122   : > { %v9625_v53 = vpop.f32.mrf.mxu0 }
 0x123   : > { %v944_v48 = vsel %vm932_vm3, %v11421_v28, 0.0  ;;  %v995_v49 = vmul.f32 %v11421_v28, %v11421_v28 }
 0x124   : > { %v841_v54 = vpop.f32.mrf.mxu0 }
 0x125   : > { %v11429_v43 = vadd.f32 %v11373_v63, %v841_v54  ;;  %v1023_v54 = vsel %vm932_vm3, %v994_v42, 0.0 }
 0x126   : > { %v9628_v55 = vpop.f32.mrf.mxu0 }
 0x127   : > { %v946_v55 = vsel %vm932_vm3, %v11429_v43, 0.0 }
 0x128   : > { %v846_v56 = vpop.f32.mrf.mxu0 }
 0x129   : > { %v11437_v50 = vadd.f32 %v11373_v63, %v846_v56  ;;  %v1025_v56 = vsel %vm932_vm3, %v995_v49, 0.0 }
 0x12a   : > { %v9631_v57 = vpop.f32.mrf.mxu0 }
 0x12b   : > { %v996_v57 = vmul.f32 %v11429_v43, %v11429_v43  ;;  %v948_v7 = vsel %vm932_vm3, %v11437_v50, 0.0  ;;  %v997_v8 = vmul.f32 %v11437_v50, %v11437_v50 }
 0x12c   : > { %v851_v58 = vpop.f32.mrf.mxu0 }
 0x12e   : > { %v9634_v59 = vpop.f32.mrf.mxu0 }
 0x12f   : > { %v11445_v59 = vadd.f32 %v11373_v63, %v851_v58  ;;  %v1027_v58 = vsel %vm932_vm3, %v996_v57, 0.0 }
 0x130   : > { %v856_v60 = vpop.f32.mrf.mxu0 }
 0x131   : > { %v11453_v10 = vadd.f32 %v11373_v63, %v856_v60  ;;  %v950_v16 = vsel %vm932_vm3, %v11445_v59, 0.0  ;;  %v1029_v60 = vsel %vm932_vm3, %v997_v8, 0.0 }
 0x132   : > { %v9637_v61 = vpop.f32.mrf.mxu0 }
 0x133   : > { %v1022_v61 = vadd.f32 %v1021_v47, %v1020_v51  ;;  %v952_v23 = vsel %vm932_vm3, %v11453_v10, 0.0  ;;  %v999_v25 = vmul.f32 %v11453_v10, %v11453_v10 }
 0x134   : > { %v11368_v62 = vpop.f32.mrf.mxu0 }
 0x135   : > { %v1024_v12 = vadd.f32 %v1023_v54, %v1022_v61  ;;  %v11462_v18 = vadd.f32 %v11373_v63, %v11368_v62 }
 0x136   : > { %v9640_v0 = vpop.f32.mrf.mxu0 }
 0x137   : > { %v945_v0 = vadd.f32 %v944_v48, %v943_v52  ;;  %v1026_v19 = vadd.f32 %v1025_v56, %v1024_v12  ;;  %v1000_v40 = vmul.f32 %v11462_v18, %v11462_v18 }
 0x138   : > { %v11381_v3 = vpop.f32.mrf.mxu0 }
 0x139   : > { %v947_v13 = vadd.f32 %v946_v55, %v945_v0  ;;  %v11471_v26 = vadd.f32 %v11373_v63, %v11381_v3  ;;  %v1028_v27 = vadd.f32 %v1027_v58, %v1026_v19  ;;  %v1033_v3 = vsel %vm932_vm3, %v999_v25, 0.0 }
 0x13a   : > { %v9643_v6 = vpop.f32.mrf.mxu0 }
 0x13b   : > { %v949_v20 = vadd.f32 %v948_v7, %v947_v13  ;;  %v1030_v42 = vadd.f32 %v1029_v60, %v1028_v27  ;;  %v956_v47 = vsel %vm932_vm3, %v11471_v26, 0.0  ;;  %v1001_v48 = vmul.f32 %v11471_v26, %v11471_v26 }
 0x13c   : > { %v11395_v11 = vpop.f32.mrf.mxu0 }
 0x13d   : > { %v951_v29 = vadd.f32 %v950_v16, %v949_v20  ;;  %v11480_v41 = vadd.f32 %v11373_v63, %v11395_v11  ;;  %v1035_v11 = vsel %vm932_vm3, %v1000_v40, 0.0 }
 0x13e   : > { %v9646_v17 = vpop.f32.mrf.mxu0 }
 0x13f   : > { %v998_v17 = vmul.f32 %v11445_v59, %v11445_v59  ;;  %v953_v44 = vadd.f32 %v952_v23, %v951_v29  ;;  %v958_v54 = vsel %vm932_vm3, %v11480_v41, 0.0  ;;  %v1002_v55 = vmul.f32 %v11480_v41, %v11480_v41 }
 0x140   : > { %v876_v24 = vpop.f32.mrf.mxu0 }
 0x141   : > { %v1031_v62 = vsel %vm932_vm3, %v998_v17, 0.0  ;;  %v11488_v49 = vadd.f32 %v11373_v63, %v876_v24  ;;  %v1037_v24 = vsel %vm932_vm3, %v1001_v48, 0.0 }
 0x142   : > { %v9649_v31 = vpop.f32.mrf.mxu0  ;;  %v1032_v51 = vadd.f32 %v1031_v62, %v1030_v42 }
 0x143   : > { %v954_v31 = vsel %vm932_vm3, %v11462_v18, 0.0  ;;  %v960_v7 = vsel %vm932_vm3, %v11488_v49, 0.0  ;;  %v1003_v8 = vmul.f32 %v11488_v49, %v11488_v49 }
 0x144   : > { %v881_v46 = vpop.f32.mrf.mxu0  ;;  %v955_v52 = vadd.f32 %v954_v31, %v953_v44  ;;  %v1034_v61 = vadd.f32 %v1033_v3, %v1032_v51 }
 0x145   : > { %v11496_v57 = vadd.f32 %v11373_v63, %v881_v46  ;;  %v1039_v46 = vsel %vm932_vm3, %v1002_v55, 0.0 }
 0x146   : > { %v9652_v53 = vpop.f32.mrf.mxu0  ;;  %v957_v0 = vadd.f32 %v956_v47, %v955_v52  ;;  %v1036_v13 = vadd.f32 %v1035_v11, %v1034_v61 }
 0x147   : > { %v962_v16 = vsel %vm932_vm3, %v11496_v57, 0.0  ;;  %v1004_v17 = vmul.f32 %v11496_v57, %v11496_v57 }
 0x148   : > { %v886_v6 = vpop.f32.mrf.mxu0  ;;  %v1038_v20 = vadd.f32 %v1037_v24, %v1036_v13 }
 0x149   : > { %v11504_v12 = vadd.f32 %v11373_v63, %v886_v6  ;;  %v1041_v6 = vsel %vm932_vm3, %v1003_v8, 0.0 }
 0x14a   : > { %v9655_v14 = vpop.f32.mrf.mxu0 }
 0x14b   : > { %v959_v14 = vadd.f32 %v958_v54, %v957_v0  ;;  %v964_v25 = vsel %vm932_vm3, %v11504_v12, 0.0  ;;  %v1005_v27 = vmul.f32 %v11504_v12, %v11504_v12 }
 0x14c   : > { %v891_v22 = vpop.f32.mrf.mxu0 }
 0x14d   : > { %v11512_v19 = vadd.f32 %v11373_v63, %v891_v22  ;;  %v961_v60 = vadd.f32 %v960_v7, %v959_v14  ;;  %v1043_v22 = vsel %vm932_vm3, %v1004_v17, 0.0 }
 0x14e   : > { %v9658_v30 = vpop.f32.mrf.mxu0 }
 0x14f   : > { %v1040_v30 = vadd.f32 %v1039_v46, %v1038_v20  ;;  %v963_v62 = vadd.f32 %v962_v16, %v961_v60  ;;  %v966_v40 = vsel %vm932_vm3, %v11512_v19, 0.0  ;;  %v1006_v42 = vmul.f32 %v11512_v19, %v11512_v19 }
 0x150   : > { %v896_v45 = vpop.f32.mrf.mxu0 }
 0x151   : > { %v11520_v29 = vadd.f32 %v11373_v63, %v896_v45  ;;  %v1042_v3 = vadd.f32 %v1041_v6, %v1040_v30  ;;  %v965_v47 = vadd.f32 %v964_v25, %v963_v62  ;;  %v1045_v45 = vsel %vm932_vm3, %v1005_v27, 0.0 }
 0x152   : > { %v9661_v53 = vpop.f32.mrf.mxu0  ;;  %v1047_v61 = vsel %vm932_vm3, %v1006_v42, 0.0 }
 0x153   : > { %v968_v51 = vsel %vm932_vm3, %v11520_v29, 0.0  ;;  %v1007_v52 = vmul.f32 %v11520_v29, %v11520_v29  ;;  %v1044_v11 = vadd.f32 %v1043_v22, %v1042_v3  ;;  %v967_v54 = vadd.f32 %v966_v40, %v965_v47 }
 0x154   : > { %v901_v56 = vpop.f32.mrf.mxu0 }
 0x155   : > { %v11528_v44 = vadd.f32 %v11373_v63, %v901_v56  ;;  %v1046_v7 = vadd.f32 %v1045_v45, %v1044_v11  ;;  %v969_v8 = vadd.f32 %v968_v51, %v967_v54  ;;  %v1049_v14 = vsel %vm932_vm3, %v1007_v52, 0.0 }
 0x156   : > { %v9664_v58 = vpop.f32.mrf.mxu0 }
 0x157   : > { %v970_v0 = vsel %vm932_vm3, %v11528_v44, 0.0  ;;  %v1008_v56 = vmul.f32 %v11528_v44, %v11528_v44  ;;  %v1048_v17 = vadd.f32 %v1047_v61, %v1046_v7 }
 0x158   : > { %v906_v23 = vpop.f32.mrf.mxu0  ;;  %v971_v20 = vadd.f32 %v970_v0, %v969_v8 }
 0x159   : > { %v11536_v53 = vadd.f32 %v11373_v63, %v906_v23  ;;  %v1051_v23 = vsel %vm932_vm3, %v1008_v56, 0.0  ;;  %v1050_v27 = vadd.f32 %v1049_v14, %v1048_v17 }
 0x15a   : > { %v9667_v31 = vpop.f32.mrf.mxu0 }
 0x15b   : > { %v972_v58 = vsel %vm932_vm3, %v11536_v53, 0.0  ;;  %v1009_v46 = vmul.f32 %v11536_v53, %v11536_v53  ;;  %v1052_v3 = vadd.f32 %v1051_v23, %v1050_v27 }
 0x15c   : > { %v911_v48 = vpop.f32.mrf.mxu0  ;;  %v973_v30 = vadd.f32 %v972_v58, %v971_v20 }
 0x15d   : > { %v11544_v24 = vadd.f32 %v11373_v63, %v911_v48  ;;  %v1053_v31 = vsel %vm932_vm3, %v1009_v46, 0.0 }
 0x15e   : > { %v9670_v55 = vpop.f32.mrf.mxu0  ;;  %v1054_v11 = vadd.f32 %v1053_v31, %v1052_v3 }
 0x15f   : > { %v974_v6 = vsel %vm932_vm3, %v11544_v24, 0.0  ;;  %v1010_v25 = vmul.f32 %v11544_v24, %v11544_v24 }
 0x160   : > { %v916_v13 = vpop.f32.mrf.mxu0  ;;  %v975_v47 = vadd.f32 %v974_v6, %v973_v30 }
 0x161   : > { %v11552_v16 = vadd.f32 %v11373_v63, %v916_v13  ;;  %v1055_v45 = vsel %vm932_vm3, %v1010_v25, 0.0 }
 0x162   : > { %v9673_v60 = vpop.f32.mrf.mxu0  ;;  %v1056_v56 = vadd.f32 %v1055_v45, %v1054_v11  ;;  %v1221_v11 = vlaneseq }
 0x163   : > { %v976_v22 = vsel %vm932_vm3, %v11552_v16, 0.0  ;;  %v1011_v40 = vmul.f32 %v11552_v16, %v11552_v16 }
 0x164   : > { %v921_v62 = vpop.f32.mrf.mxu0  ;;  %v977_v54 = vadd.f32 %v976_v22, %v975_v47 }
 0x165   : > { %v11565_v42 = vadd.f32 %v11373_v63, %v921_v62  ;;  %v1057_v61 = vsel %vm932_vm3, %v1011_v40, 0.0 }
 0x166   : > { %v9676_v48 = vpop.f32.mrf.mxu0  ;;  %v1058_v46 = vadd.f32 %v1057_v61, %v1056_v56  ;;  %v930_v61 = vld [vmem:[%s15257_s7] sm:$0x1] }
 0x167   : > { %v978_v51 = vsel %vm932_vm3, %v11565_v42, 0.0  ;;  %v1012_v52 = vmul.f32 %v11565_v42, %v11565_v42 }
 0x168   : > { %v926_v55 = vpop.f32.mrf.mxu0  ;;  %v979_v7 = vadd.f32 %v978_v51, %v977_v54  ;;  %v1222_v54 = vshrl.u32 %v1221_v11, 7 }
 0x169   : > { %v11574_v0 = vadd.f32 %v11373_v63, %v926_v55  ;;  %v1059_v13 = vsel %vm932_vm3, %v1012_v52, 0.0 }
 0x16a   : > { %v9679_v8 = vpop.f32.mrf.mxu0  ;;  %v1060_v60 = vadd.f32 %v1059_v13, %v1058_v46  ;;  %v11610_v55 = vsub.s32 0, %v1222_v54 }
 0x16b   : > { %v981_v14 = vsel %vm980_vm4, %v11574_v0, 0.0  ;;  %v1013_v58 = vmul.f32 %v11574_v0, %v11574_v0 }
 0x16c   : > { %v982_v17 = vadd.f32 %v981_v14, %v979_v7 }
 0x16d   : > { %v1061_v20 = vsel %vm980_vm4, %v1013_v58, 0.0 }
 0x16e   : > { %v983_v23 = vrot.slane %v982_v17, 4  ;;  %v1062_v63 = vadd.f32 %v1061_v20, %v1060_v60 }
 0x170   : > { %v984_v6 = vadd.f32 %v983_v23, %v982_v17  ;;  %v1063_v27 = vrot.slane %v1062_v63, 4  ;;  %v11630_v17 = vld [vmem:[%s15258_s8] ss:$0 sm:$0xff] }
 0x172   : > { %v985_v25 = vrot.slane %v984_v6, 2  ;;  %v1064_v31 = vadd.f32 %v1063_v27, %v1062_v63 }
 0x174   : > { %v986_v30 = vadd.f32 %v985_v25, %v984_v6  ;;  %v1065_v40 = vrot.slane %v1064_v31, 2 }
 0x176   : > { %v987_v62 = vrot.slane %v986_v30, 1  ;;  %v1066_v3 = vadd.f32 %v1065_v40, %v1064_v31 }
 0x178   : > { %v988_v22 = vadd.f32 %v987_v62, %v986_v30 }
 0x17a   : > { %9697 = vmatmul.mubr.msk.f32.vlgmr.msra.gmra.mxu1 %vm932_vm3, %v988_v22 }
 0x17b   : > { %9700 = vmatpush3.msra.mxu1 %v11315_v32  ;;  %9715 = vmatprep.mubr.msk.f32.mxu1 %vm11018_vm1, %v11017_v5  ;;  %v1067_v32 = vrot.slane %v1066_v3, 1 }
 0x17c   : > { %9701 = vmatprep.subr.mxu1 %v11017_v5 }
 0x17d   : > { %9702 = vmatpush3.msra.mxu1 %v11322_v33  ;;  %v1068_v33 = vadd.f32 %v1067_v32, %v1066_v3 }
 0x17e   : > { %9703 = vmatprep.subr.mxu1 %v11017_v5 }
 0x17f   : > { %9704 = vmatpush3.msra.mxu1 %v11329_v34  ;;  %v8415_v34 = vld [vmem:[%s15288_s2 + $0x58] sm:$0xff] }
 0x180   : > { %9705 = vmatprep.subr.mxu1 %v11017_v5  ;;  %8425 = vmatprep.mubr.msk.f32.mxu0 %vm1346_vm5, %v8415_v34 }
 0x181   : > { %9706 = vmatpush3.msra.mxu1 %v11336_v35  ;;  %v1337_v35 = vld [vmem:[%s15288_s2 + $0x8] sm:$0xff] }
 0x182   : > { %9707 = vmatprep.subr.mxu1 %v11017_v5 }
 0x183   : > { %9708 = vmatpush3.msra.mxu1 %v11343_v36 }
 0x184   : > { %9709 = vmatprep.subr.mxu1 %v11017_v5 }
 0x185   : > { %9710 = vmatpush3.msra.mxu1 %v11350_v37 }
 0x186   : > { %9711 = vmatprep.subr.mxu1 %v11017_v5 }
 0x187   : > { %9712 = vmatpush3.msra.mxu1 %v11357_v38 }
 0x188   : > { %9713 = vmatprep.subr.mxu1 %v11017_v5 }
 0x189   : > { %9714 = vmatpush3.msra.mxu1 %v11363_v39 }
 0x18a   : > { %9716 = vmatmul.mubr.msk.f32.vlgmr.msra.gmra.mxu1 %vm932_vm3, %v1068_v33  ;;  %1366 = vmatprep.subr.mxu1 %v11017_v5 }
 0x18b   : > { %8409 = vmatprep.mubr.msk.f32.mxu1 %vm1346_vm5, %v1337_v35 }
 0x23a   : > { %v1138_v36 = vpop.f32.mrf.mxu1 }
 0x23b   : > { %v1215_v38 = vmul.f32 0.0025510204, %v1138_v36 }
 0x23c   : > { %v9698_v37 = vpop.f32.mrf.mxu1 }
 0x23d   : > { %v1217_v47 = vmul.f32 %v1215_v38, %v1215_v38  ;;  %v11616_v56 = vrot.slane %v1215_v38, %v11610_v55 }
 0x23f   : > { %v1240_v14 = vsub.f32 %v11496_v57, %v11616_v56  ;;  %v1239_v58 = vsub.f32 %v11488_v49, %v11616_v56  ;;  %v1238_v46 = vsub.f32 %v11480_v41, %v11616_v56  ;;  %v1237_v57 = vsub.f32 %v11471_v26, %v11616_v56 }
 0x240   : > { %v1236_v63 = vsub.f32 %v11462_v18, %v11616_v56  ;;  %v1235_v62 = vsub.f32 %v11453_v10, %v11616_v56  ;;  %v1234_v18 = vsub.f32 %v11445_v59, %v11616_v56  ;;  %v1233_v32 = vsub.f32 %v11437_v50, %v11616_v56 }
 0x241   : > { %v1232_v35 = vsub.f32 %v11429_v43, %v11616_v56  ;;  %v1231_v38 = vsub.f32 %v11421_v28, %v11616_v56 }
 0x24a   : > { %v1211_v39 = vpop.f32.mrf.mxu1 }
 0x24b   : > { %v1216_v48 = vmul.f32 0.0025510204, %v1211_v39 }
 0x24c   : > { %v9717_v45 = vpop.f32.mrf.mxu1 }
 0x24d   : > { %v1218_v51 = vsub.f32 %v1216_v48, %v1217_v47  ;;  %v1230_v48 = vsub.f32 %v11412_v21, %v11616_v56 }
 0x24f   : > { %v1219_v52 = vadd.f32 1e-05, %v1218_v51 }
 0x251   : > { %10879 = vrsqrt.f32 %v1219_v52  ;;  %v1229_v52 = vsub.f32 %v11404_v15, %v11616_v56 }
 0x25e   : > { %v10880_v7 = vpop.eup %10879 }
 0x25f   : > { %v1250_v8 = vmul.f32 %v10880_v7, %v930_v61  ;;  %v1228_v61 = vsub.f32 %v11391_v9, %v11616_v56 }
 0x261   : > { %v11619_v13 = vrot.slane %v1250_v8, %v11610_v55 }
 0x263   : > { %v1270_v20 = vmul.f32 %v11619_v13, %v1240_v14  ;;  %v1269_v60 = vmul.f32 %v11619_v13, %v1239_v58  ;;  %v1268_v23 = vmul.f32 %v11619_v13, %v1238_v46  ;;  %v1267_v41 = vmul.f32 %v11619_v13, %v1237_v57 }
 0x264   : > { %v1266_v30 = vmul.f32 %v11619_v13, %v1236_v63  ;;  %v1265_v22 = vmul.f32 %v11619_v13, %v1235_v62  ;;  %v1264_v3 = vmul.f32 %v11619_v13, %v1234_v18  ;;  %v1263_v34 = vmul.f32 %v11619_v13, %v1233_v32 }
 0x265   : > { %v1301_v6 = vadd.f32 %v11630_v17, %v1270_v20  ;;  %v1300_v49 = vadd.f32 %v11630_v17, %v1269_v60  ;;  %v1299_v27 = vadd.f32 %v11630_v17, %v1268_v23  ;;  %v1298_v31 = vadd.f32 %v11630_v17, %v1267_v41 }
 0x266   : > { %v1297_v40 = vadd.f32 %v11630_v17, %v1266_v30  ;;  %v1296_v33 = vadd.f32 %v11630_v17, %v1265_v22  ;;  %v1295_v36 = vadd.f32 %v11630_v17, %v1264_v3  ;;  %v1262_v37 = vmul.f32 %v11619_v13, %v1232_v35 }
 0x267   : > { %v11642_v25 = vmax.f32 %v1301_v6, 0.0  ;;  %v11650_v26 = vmax.f32 %v1300_v49, 0.0  ;;  %v11660_v10 = vmax.f32 %v1299_v27, 0.0  ;;  %v11670_v59 = vmax.f32 %v1298_v31, 0.0 }
 0x268   : > { %v11680_v50 = vmax.f32 %v1297_v40, 0.0  ;;  %v11690_v43 = vmax.f32 %v1296_v33, 0.0  ;;  %v1294_v39 = vadd.f32 %v11630_v17, %v1263_v34  ;;  %v1261_v47 = vmul.f32 %v11619_v13, %v1231_v38 }
 0x269   : > { %1367 = vmatpush1.msra.mxu1 %v11642_v25  ;;  %1491 = vmatpush1.msra.mxu0 %v11642_v25  ;;  %v11700_v28 = vmax.f32 %v1295_v36, 0.0  ;;  %v1293_v45 = vadd.f32 %v11630_v17, %v1262_v37  ;;  %v1260_v51 = vmul.f32 %v11619_v13, %v1230_v48  ;;  %v1259_v54 = vmul.f32 %v11619_v13, %v1229_v52 }
 0x26a   : > { %1368 = vmatprep.subr.mxu1 %v11017_v5  ;;  %1492 = vmatprep.subr.mxu0 %v11017_v5  ;;  %v11710_v21 = vmax.f32 %v1294_v39, 0.0  ;;  %v1292_v11 = vadd.f32 %v11630_v17, %v1261_v47  ;;  %v1258_v8 = vmul.f32 %v11619_v13, %v1228_v61  ;;  %v1227_v14 = vsub.f32 %v11384_v4, %v11616_v56 }
 0x26b   : > { %1369 = vmatpush1.msra.mxu1 %v11650_v26  ;;  %1493 = vmatpush1.msra.mxu0 %v11650_v26  ;;  %v11720_v15 = vmax.f32 %v1293_v45, 0.0  ;;  %v1291_v7 = vadd.f32 %v11630_v17, %v1260_v51  ;;  %v1290_v58 = vadd.f32 %v11630_v17, %v1259_v54  ;;  %v1226_v20 = vsub.f32 %v11376_v1, %v11616_v56 }
 0x26c   : > { %1370 = vmatprep.subr.mxu1 %v11017_v5  ;;  %1494 = vmatprep.subr.mxu0 %v11017_v5  ;;  %v11730_v9 = vmax.f32 %v1292_v11, 0.0  ;;  %v1257_v46 = vmul.f32 %v11619_v13, %v1227_v14  ;;  %v1289_v60 = vadd.f32 %v11630_v17, %v1258_v8  ;;  %v1225_v57 = vsub.f32 %v11379_v2, %v11616_v56 }
 0x26d   : > { %1371 = vmatpush1.msra.mxu1 %v11660_v10  ;;  %1495 = vmatpush1.msra.mxu0 %v11660_v10  ;;  %v11740_v4 = vmax.f32 %v1291_v7, 0.0  ;;  %v1256_v23 = vmul.f32 %v11619_v13, %v1226_v20  ;;  %v11750_v1 = vmax.f32 %v1290_v58, 0.0  ;;  %v1249_v41 = vsub.f32 %v11574_v0, %v11616_v56  ;;  %v1336_v20 = vld [vmem:[%s15288_s2] sm:$0xff] }
 0x26e   : > { %1372 = vmatprep.subr.mxu1 %v11017_v5  ;;  %1496 = vmatprep.subr.mxu0 %v11017_v5  ;;  %v1288_v6 = vadd.f32 %v11630_v17, %v1257_v46  ;;  %v1255_v49 = vmul.f32 %v11619_v13, %v1225_v57  ;;  %v11760_v2 = vmax.f32 %v1289_v60, 0.0  ;;  %v1248_v30 = vsub.f32 %v11565_v42, %v11616_v56  ;;  %v8417_v46 = vld [vmem:[%s15288_s2 + $0x68] sm:$0xff]  ;;  %v1339_v60 = vld [vmem:[%s15288_s2 + $0x18] sm:$0xff] }
 0x26f   : > { %1373 = vmatpush1.msra.mxu1 %v11670_v59  ;;  %1497 = vmatpush1.msra.mxu0 %v11670_v59  ;;  %v1287_v63 = vadd.f32 %v11630_v17, %v1256_v23  ;;  %v1279_v27 = vmul.f32 %v11619_v13, %v1249_v41  ;;  %v1247_v22 = vsub.f32 %v11552_v16, %v11616_v56  ;;  %v8416_v23 = vld [vmem:[%s15288_s2 + $0x60] sm:$0xff]  ;;  %v8419_v57 = vld [vmem:[%s15288_s2 + $0x78] sm:$0xff]  ;;  %v8418_v41 = vld [vmem:[%s15288_s2 + $0x70] sm:$0xff] }
 0x270   : > { %1374 = vmatprep.subr.mxu1 %v11017_v5  ;;  %1498 = vmatprep.subr.mxu0 %v11017_v5  ;;  %v11770_v0 = vmax.f32 %v1288_v6, 0.0  ;;  %v1286_v62 = vadd.f32 %v11630_v17, %v1255_v49  ;;  %v1278_v31 = vmul.f32 %v11619_v13, %v1248_v30  ;;  %v1246_v3 = vsub.f32 %v11544_v24, %v11616_v56  ;;  %v1338_v6 = vld [vmem:[%s15288_s2 + $0x10] sm:$0xff]  ;;  %v1341_v49 = vld [vmem:[%s15288_s2 + $0x28] sm:$0xff]  ;;  %v1343_v30 = vld [vmem:[%s15288_s2 + $0x38] sm:$0xff] }
 0x271   : > { %1375 = vmatpush1.msra.mxu1 %v11680_v50  ;;  %1499 = vmatpush1.msra.mxu0 %v11680_v50  ;;  %v11780_v42 = vmax.f32 %v1287_v63, 0.0  ;;  %v1310_v18 = vadd.f32 %v11630_v17, %v1279_v27  ;;  %v1277_v40 = vmul.f32 %v11619_v13, %v1247_v22  ;;  %v1245_v34 = vsub.f32 %v11536_v53, %v11616_v56  ;;  %v8421_v63 = vld [vmem:[%s15288_s2 + $0x88] sm:$0xff]  ;;  %v1340_v27 = vld [vmem:[%s15288_s2 + $0x20] sm:$0xff]  ;;  %v1342_v22 = vld [vmem:[%s15288_s2 + $0x30] sm:$0xff] }
 0x272   : > { %1376 = vmatprep.subr.mxu1 %v11017_v5  ;;  %1500 = vmatprep.subr.mxu0 %v11017_v5  ;;  %v11790_v16 = vmax.f32 %v1286_v62, 0.0  ;;  %v1309_v32 = vadd.f32 %v11630_v17, %v1278_v31  ;;  %v1276_v33 = vmul.f32 %v11619_v13, %v1246_v3  ;;  %v1244_v37 = vsub.f32 %v11528_v44, %v11616_v56  ;;  %v8420_v62 = vld [vmem:[%s15288_s2 + $0x80] sm:$0xff]  ;;  %v8423_v31 = vld [vmem:[%s15288_s2 + $0x98] sm:$0xf]  ;;  %v8449_v3 = vld [vmem:[%s15288_s2 + $0xa8] sm:$0xff] }
 0x273   : > { %1377 = vmatpush1.msra.mxu1 %v11690_v43  ;;  %1501 = vmatpush1.msra.mxu0 %v11690_v43  ;;  %v11800_v24 = vmax.f32 %v1310_v18, 0.0  ;;  %v1308_v35 = vadd.f32 %v11630_v17, %v1277_v40  ;;  %v1275_v36 = vmul.f32 %v11619_v13, %v1245_v34  ;;  %v1243_v47 = vsub.f32 %v11520_v29, %v11616_v56  ;;  %v1345_v18 = vld [vmem:[%s15288_s2 + $0x48] sm:$0xf]  ;;  %v8422_v40 = vld [vmem:[%s15288_s2 + $0x90] sm:$0xf] }
 0x274   : > { %1378 = vmatprep.subr.mxu1 %v11017_v5  ;;  %1502 = vmatprep.subr.mxu0 %v11017_v5  ;;  %v11812_v53 = vmax.f32 %v1309_v32, 0.0  ;;  %v1307_v38 = vadd.f32 %v11630_v17, %v1276_v33  ;;  %v1274_v39 = vmul.f32 %v11619_v13, %v1244_v37  ;;  %v1242_v51 = vsub.f32 %v11512_v19, %v11616_v56  ;;  %v1344_v32 = vld [vmem:[%s15288_s2 + $0x40] sm:$0xf]  ;;  %v8437_v33 = vld [vmem:[%s15289_s3 + $0x78] sm:$0xff]  ;;  %v8436_v34 = vld [vmem:[%s15289_s3 + $0x70] sm:$0xff] }
 0x275   : > { %1379 = vmatpush1.msra.mxu1 %v11700_v28  ;;  %1503 = vmatpush1.msra.mxu0 %v11700_v28  ;;  %v11822_v44 = vmax.f32 %v1308_v35, 0.0  ;;  %v1306_v48 = vadd.f32 %v11630_v17, %v1275_v36  ;;  %v1273_v45 = vmul.f32 %v11619_v13, %v1243_v47  ;;  %v1241_v54 = vsub.f32 %v11504_v12, %v11616_v56  ;;  %v8435_v35 = vld [vmem:[%s15289_s3 + $0x68] sm:$0xff]  ;;  %v8434_v36 = vld [vmem:[%s15289_s3 + $0x60] sm:$0xff]  ;;  %v8433_v37 = vld [vmem:[%s15289_s3 + $0x58] sm:$0xff] }
 0x276   : > { %1380 = vmatprep.subr.mxu1 %v11017_v5  ;;  %1504 = vmatprep.subr.mxu0 %v11017_v5  ;;  %v11832_v29 = vmax.f32 %v1307_v38, 0.0  ;;  %v1305_v52 = vadd.f32 %v11630_v17, %v1274_v39  ;;  %v1272_v11 = vmul.f32 %v11619_v13, %v1242_v51  ;;  %v8432_v38 = vld [vmem:[%s15289_s3 + $0x50] sm:$0xff]  ;;  %v8431_v39 = vld [vmem:[%s15289_s3 + $0x48] sm:$0xff]  ;;  %v8448_v47 = vld [vmem:[%s15288_s2 + $0xa0] sm:$0xff] }
 0x277   : > { %1381 = vmatpush1.msra.mxu1 %v11710_v21  ;;  %1505 = vmatpush1.msra.mxu0 %v11710_v21  ;;  %v11842_v19 = vmax.f32 %v1306_v48, 0.0  ;;  %v1304_v61 = vadd.f32 %v11630_v17, %v1273_v45  ;;  %v1271_v7 = vmul.f32 %v11619_v13, %v1241_v54  ;;  %v8451_v48 = vld [vmem:[%s15288_s2 + $0xb8] sm:$0xff]  ;;  %v8450_v45 = vld [vmem:[%s15288_s2 + $0xb0] sm:$0xff]  ;;  %v8453_v51 = vld [vmem:[%s15288_s2 + $0xc8] sm:$0xff] }
 0x278   : > { %1382 = vmatprep.subr.mxu1 %v11017_v5  ;;  %1506 = vmatprep.subr.mxu0 %v11017_v5  ;;  %v11850_v12 = vmax.f32 %v1305_v52, 0.0  ;;  %v1303_v56 = vadd.f32 %v11630_v17, %v1272_v11  ;;  %v8452_v52 = vld [vmem:[%s15288_s2 + $0xc0] sm:$0xff]  ;;  %v8455_v11 = vld [vmem:[%s15288_s2 + $0xd8] sm:$0xff]  ;;  %v8454_v54 = vld [vmem:[%s15288_s2 + $0xd0] sm:$0xff] }
 0x279   : > { %1383 = vmatpush1.msra.mxu1 %v11720_v15  ;;  %1507 = vmatpush1.msra.mxu0 %v11720_v15  ;;  %v11857_v13 = vmax.f32 %v1304_v61, 0.0  ;;  %v1302_v8 = vadd.f32 %v11630_v17, %v1271_v7  ;;  %v8414_v17 = vld [vmem:[%s15288_s2 + $0x50] sm:$0xff]  ;;  %v8457_v61 = vld [vmem:[%s15288_s2 + $0xe8] sm:$0xf]  ;;  %v8456_v7 = vld [vmem:[%s15288_s2 + $0xe0] sm:$0xf] }
 0x27a   : > { %1384 = vmatprep.subr.mxu1 %v11017_v5  ;;  %1508 = vmatprep.subr.mxu0 %v11017_v5  ;;  %v11864_v14 = vmax.f32 %v1303_v56, 0.0  ;;  %v8430_v56 = vld [vmem:[%s15289_s3 + $0x40] sm:$0xff] }
 0x27b   : > { %1385 = vmatpush1.msra.mxu1 %v11730_v9  ;;  %1509 = vmatpush1.msra.mxu0 %v11730_v9  ;;  %v11870_v58 = vmax.f32 %v1302_v8, 0.0  ;;  %v1463_v8 = vld [vmem:[%s15289_s3 + $0x38] sm:$0xff] }
 0x27c   : > { %1386 = vmatprep.subr.mxu1 %v11017_v5  ;;  %1510 = vmatprep.subr.mxu0 %v11017_v5 }
 0x27d   : > { %1387 = vmatpush1.msra.mxu1 %v11740_v4  ;;  %1511 = vmatpush1.msra.mxu0 %v11740_v4 }
 0x27e   : > { %1388 = vmatprep.subr.mxu1 %v11017_v5  ;;  %1512 = vmatprep.subr.mxu0 %v11017_v5 }
 0x27f   : > { %1389 = vmatpush1.msra.mxu1 %v11750_v1  ;;  %1513 = vmatpush1.msra.mxu0 %v11750_v1 }
 0x280   : > { %1390 = vmatprep.subr.mxu1 %v11017_v5  ;;  %1514 = vmatprep.subr.mxu0 %v11017_v5 }
 0x281   : > { %1391 = vmatpush1.msra.mxu1 %v11760_v2  ;;  %1515 = vmatpush1.msra.mxu0 %v11760_v2 }
 0x282   : > { %1392 = vmatprep.subr.mxu1 %v11017_v5  ;;  %1516 = vmatprep.subr.mxu0 %v11017_v5 }
 0x283   : > { %1393 = vmatpush1.msra.mxu1 %v11770_v0  ;;  %1517 = vmatpush1.msra.mxu0 %v11770_v0 }
 0x284   : > { %1394 = vmatprep.subr.mxu1 %v11017_v5  ;;  %1518 = vmatprep.subr.mxu0 %v11017_v5 }
 0x285   : > { %1395 = vmatpush1.msra.mxu1 %v11780_v42  ;;  %1519 = vmatpush1.msra.mxu0 %v11780_v42 }
 0x286   : > { %1396 = vmatprep.subr.mxu1 %v11017_v5  ;;  %1520 = vmatprep.subr.mxu0 %v11017_v5 }
 0x287   : > { %1397 = vmatpush1.msra.mxu1 %v11790_v16  ;;  %1521 = vmatpush1.msra.mxu0 %v11790_v16 }
 0x288   : > { %1412 = vmatprep.subr.mxu1 %v11017_v5  ;;  %1536 = vmatprep.subr.mxu0 %v11017_v5 }
 0x289   : > { %8408 = vmatpush2.msk.msra.mxu1 %vm1362_vm6, %v11800_v24  ;;  %8424 = vmatpush2.msk.msra.mxu0 %vm1362_vm6, %v11800_v24 }
 0x28a   : > { %1414 = vmatprep.subr.mxu1 %v11017_v5  ;;  %1538 = vmatprep.subr.mxu0 %v11017_v5 }
 0x28b   : > { %1415 = vmatpush2.msra.mxu1 %v11812_v53  ;;  %1539 = vmatpush2.msra.mxu0 %v11812_v53 }
 0x28c   : > { %1416 = vmatprep.subr.mxu1 %v11017_v5  ;;  %1540 = vmatprep.subr.mxu0 %v11017_v5 }
 0x28d   : > { %1417 = vmatpush2.msra.mxu1 %v11822_v44  ;;  %1541 = vmatpush2.msra.mxu0 %v11822_v44 }
 0x28e   : > { %1418 = vmatprep.subr.mxu1 %v11017_v5  ;;  %1542 = vmatprep.subr.mxu0 %v11017_v5 }
 0x28f   : > { %1419 = vmatpush2.msra.mxu1 %v11832_v29  ;;  %1543 = vmatpush2.msra.mxu0 %v11832_v29 }
 0x290   : > { %1420 = vmatprep.subr.mxu1 %v11017_v5  ;;  %1544 = vmatprep.subr.mxu0 %v11017_v5 }
 0x291   : > { %1421 = vmatpush2.msra.mxu1 %v11842_v19  ;;  %1545 = vmatpush2.msra.mxu0 %v11842_v19 }
 0x292   : > { %1422 = vmatprep.subr.mxu1 %v11017_v5  ;;  %1546 = vmatprep.subr.mxu0 %v11017_v5 }
 0x293   : > { %1423 = vmatpush2.msra.mxu1 %v11850_v12  ;;  %1547 = vmatpush2.msra.mxu0 %v11850_v12 }
 0x294   : > { %1424 = vmatprep.subr.mxu1 %v11017_v5  ;;  %1548 = vmatprep.subr.mxu0 %v11017_v5 }
 0x295   : > { %1425 = vmatpush2.msra.mxu1 %v11857_v13  ;;  %1549 = vmatpush2.msra.mxu0 %v11857_v13 }
 0x296   : > { %1426 = vmatprep.subr.mxu1 %v11017_v5  ;;  %1550 = vmatprep.subr.mxu0 %v11017_v5 }
 0x297   : > { %1427 = vmatpush2.msra.mxu1 %v11864_v14  ;;  %1551 = vmatpush2.msra.mxu0 %v11864_v14 }
 0x298   : > { %1428 = vmatprep.subr.mxu1 %v11017_v5  ;;  %1552 = vmatprep.subr.mxu0 %v11017_v5 }
 0x299   : > { %1429 = vmatpush2.msra.mxu1 %v11870_v58  ;;  %1553 = vmatpush2.msra.mxu0 %v11870_v58 }
 0x29a   : > { %1825 = vmatprep.subr.mxu0 %v11017_v5  ;;  %1555 = vmatmul.mubr.f32.vlgmr.msra.gmra.mxu0 %v8414_v17 }
 0x29b   : > { %1826 = vmatpush1.msra.mxu0 %v11642_v25  ;;  %8426 = vmatprep.mubr.msk.f32.mxu0 %vm1346_vm5, %v8417_v46  ;;  %v1462_v46 = vld [vmem:[%s15289_s3 + $0x30] sm:$0xff] }
 0x29c   : > { %1827 = vmatprep.subr.mxu0 %v11017_v5  ;;  %1431 = vmatmul.mubr.f32.vlgmr.msra.gmra.mxu1 %v1336_v20 }
 0x29d   : > { %1828 = vmatpush1.msra.mxu0 %v11650_v26  ;;  %8410 = vmatprep.mubr.msk.f32.mxu1 %vm1346_vm5, %v1339_v60 }
 0x29e   : > { %1829 = vmatprep.subr.mxu0 %v11017_v5  ;;  %1560 = vmatmul.mubr.f32.gmra.mxu0 %v8416_v23  ;;  %v1461_v23 = vld [vmem:[%s15289_s3 + $0x28] sm:$0xff] }
 0x29f   : > { %1830 = vmatpush1.msra.mxu0 %v11660_v10  ;;  %8427 = vmatprep.mubr.msk.f32.mxu0 %vm1346_vm5, %v8419_v57 }
 0x2a0   : > { %1831 = vmatprep.subr.mxu0 %v11017_v5  ;;  %1436 = vmatmul.mubr.f32.gmra.mxu1 %v1338_v6 }
 0x2a1   : > { %1832 = vmatpush1.msra.mxu0 %v11670_v59  ;;  %8411 = vmatprep.mubr.msk.f32.mxu1 %vm1346_vm5, %v1341_v49  ;;  %v1460_v49 = vld [vmem:[%s15289_s3 + $0x20] sm:$0xff] }
 0x2a2   : > { %1833 = vmatprep.subr.mxu0 %v11017_v5  ;;  %1565 = vmatmul.mubr.f32.gmra.mxu0 %v8418_v41 }
 0x2a3   : > { %1834 = vmatpush1.msra.mxu0 %v11680_v50  ;;  %8428 = vmatprep.mubr.msk.f32.mxu0 %vm1346_vm5, %v8421_v63 }
 0x2a4   : > { %1835 = vmatprep.subr.mxu0 %v11017_v5  ;;  %1441 = vmatmul.mubr.f32.gmra.mxu1 %v1340_v27  ;;  %v1459_v27 = vld [vmem:[%s15289_s3 + $0x18] sm:$0xff] }
 0x2a5   : > { %1836 = vmatpush1.msra.mxu0 %v11690_v43  ;;  %8412 = vmatprep.mubr.msk.f32.mxu1 %vm1346_vm5, %v1343_v30 }
 0x2a6   : > { %1837 = vmatprep.subr.mxu0 %v11017_v5  ;;  %1570 = vmatmul.mubr.f32.gmra.mxu0 %v8420_v62 }
 0x2a7   : > { %1838 = vmatpush1.msra.mxu0 %v11700_v28  ;;  %8429 = vmatprep.mubr.msk.f32.mxu0 %vm1346_vm5, %v8423_v31  ;;  %v1458_v31 = vld [vmem:[%s15289_s3 + $0x10] sm:$0xff] }
 0x2a8   : > { %1839 = vmatprep.subr.mxu0 %v11017_v5  ;;  %1446 = vmatmul.mubr.f32.gmra.mxu1 %v1342_v22 }
 0x2a9   : > { %1840 = vmatpush1.msra.mxu0 %v11710_v21  ;;  %8413 = vmatprep.mubr.msk.f32.mxu1 %vm1346_vm5, %v1345_v18 }
 0x2aa   : > { %1841 = vmatprep.subr.mxu0 %v11017_v5  ;;  %1575 = vmatmul.mubr.f32.gmra.mxu0 %v8422_v40  ;;  %v1457_v40 = vld [vmem:[%s15289_s3 + $0x8] sm:$0xff] }
 0x2ab   : > { %1842 = vmatpush1.msra.mxu0 %v11720_v15  ;;  %8459 = vmatprep.mubr.msk.f32.mxu0 %vm1346_vm5, %v8449_v3 }
 0x2ac   : > { %1843 = vmatprep.subr.mxu0 %v11017_v5  ;;  %1451 = vmatmul.mubr.f32.gmra.mxu1 %v1344_v32 }
 0x2ad   : > { %1844 = vmatpush1.msra.mxu0 %v11730_v9  ;;  %9718 = vmatprep.subr.mxu1 %v11017_v5 }
 0x2ae   : > { %1845 = vmatprep.subr.mxu0 %v11017_v5  ;;  %9719 = vmatpush3.msra.mxu1 %v8437_v33  ;;  %v1456_v33 = vld [vmem:[%s15289_s3] sm:$0xff] }
 0x2af   : > { %1846 = vmatpush1.msra.mxu0 %v11740_v4  ;;  %9720 = vmatprep.subr.mxu1 %v11017_v5 }
 0x2b0   : > { %1847 = vmatprep.subr.mxu0 %v11017_v5  ;;  %9721 = vmatpush3.msra.mxu1 %v8436_v34 }
 0x2b1   : > { %1848 = vmatpush1.msra.mxu0 %v11750_v1  ;;  %9722 = vmatprep.subr.mxu1 %v11017_v5 }
 0x2b2   : > { %1849 = vmatprep.subr.mxu0 %v11017_v5  ;;  %9723 = vmatpush3.msra.mxu1 %v8435_v35 }
 0x2b3   : > { %1850 = vmatpush1.msra.mxu0 %v11760_v2  ;;  %9724 = vmatprep.subr.mxu1 %v11017_v5 }
 0x2b4   : > { %1851 = vmatprep.subr.mxu0 %v11017_v5  ;;  %9725 = vmatpush3.msra.mxu1 %v8434_v36 }
 0x2b5   : > { %1852 = vmatpush1.msra.mxu0 %v11770_v0  ;;  %9726 = vmatprep.subr.mxu1 %v11017_v5 }
 0x2b6   : > { %1853 = vmatprep.subr.mxu0 %v11017_v5  ;;  %9727 = vmatpush3.msra.mxu1 %v8433_v37 }
 0x2b7   : > { %1854 = vmatpush1.msra.mxu0 %v11780_v42  ;;  %9728 = vmatprep.subr.mxu1 %v11017_v5 }
 0x2b8   : > { %1855 = vmatprep.subr.mxu0 %v11017_v5  ;;  %9729 = vmatpush3.msra.mxu1 %v8432_v38 }
 0x2b9   : > { %1856 = vmatpush1.msra.mxu0 %v11790_v16  ;;  %9730 = vmatprep.subr.mxu1 %v11017_v5 }
 0x2ba   : > { %1871 = vmatprep.subr.mxu0 %v11017_v5  ;;  %9731 = vmatpush3.msra.mxu1 %v8431_v39 }
 0x2bb   : > { %8458 = vmatpush2.msk.msra.mxu0 %vm1362_vm6, %v11800_v24  ;;  %9732 = vmatprep.subr.mxu1 %v11017_v5 }
 0x2bc   : > { %1873 = vmatprep.subr.mxu0 %v11017_v5  ;;  %9734 = vmatprep.mubr.msk.f32.mxu1 %vm11018_vm1, %v11017_v5 }
 0x2bd   : > { %1874 = vmatpush2.msra.mxu0 %v11812_v53  ;;  %9733 = vmatpush3.msra.mxu1 %v8430_v56 }
 0x2be   : > { %1875 = vmatprep.subr.mxu0 %v11017_v5  ;;  %9749 = vmatprep.subr.mxu1 %v11017_v5 }
 0x2bf   : > { %1876 = vmatpush2.msra.mxu0 %v11822_v44 }
 0x2c0   : > { %1877 = vmatprep.subr.mxu0 %v11017_v5 }
 0x2c1   : > { %1878 = vmatpush2.msra.mxu0 %v11832_v29 }
 0x2c2   : > { %1879 = vmatprep.subr.mxu0 %v11017_v5 }
 0x2c3   : > { %1880 = vmatpush2.msra.mxu0 %v11842_v19 }
 0x2c4   : > { %1881 = vmatprep.subr.mxu0 %v11017_v5 }
 0x2c5   : > { %1882 = vmatpush2.msra.mxu0 %v11850_v12 }
 0x2c6   : > { %1883 = vmatprep.subr.mxu0 %v11017_v5 }
 0x2c7   : > { %1884 = vmatpush2.msra.mxu0 %v11857_v13 }
 0x2c8   : > { %1885 = vmatprep.subr.mxu0 %v11017_v5 }
 0x2c9   : > { %1886 = vmatpush2.msra.mxu0 %v11864_v14 }
 0x2ca   : > { %1887 = vmatprep.subr.mxu0 %v11017_v5 }
 0x2cb   : > { %1888 = vmatpush2.msra.mxu0 %v11870_v58 }
 0x2cc   : > { %1890 = vmatmul.mubr.f32.vlgmr.msra.gmra.mxu0 %v8448_v47  ;;  %9811 = vmatprep.subr.mxu0 %v11017_v5  ;;  %v8471_v47 = vld [vmem:[%s15289_s3 + $0xb8] sm:$0xff] }
 0x2cd   : > { %8460 = vmatprep.mubr.msk.f32.mxu0 %vm1346_vm5, %v8451_v48 }
 0x2d0   : > { %1895 = vmatmul.mubr.f32.gmra.mxu0 %v8450_v45  ;;  %v8470_v45 = vld [vmem:[%s15289_s3 + $0xb0] sm:$0xff] }
 0x2d1   : > { %8461 = vmatprep.mubr.msk.f32.mxu0 %vm1346_vm5, %v8453_v51  ;;  %v8469_v51 = vld [vmem:[%s15289_s3 + $0xa8] sm:$0xff] }
 0x2d4   : > { %1900 = vmatmul.mubr.f32.gmra.mxu0 %v8452_v52  ;;  %v8468_v52 = vld [vmem:[%s15289_s3 + $0xa0] sm:$0xff] }
 0x2d5   : > { %8462 = vmatprep.mubr.msk.f32.mxu0 %vm1346_vm5, %v8455_v11  ;;  %v8467_v11 = vld [vmem:[%s15289_s3 + $0x98] sm:$0xff] }
 0x2d8   : > { %1905 = vmatmul.mubr.f32.gmra.mxu0 %v8454_v54  ;;  %v8466_v54 = vld [vmem:[%s15289_s3 + $0x90] sm:$0xff] }
 0x2d9   : > { %8463 = vmatprep.mubr.msk.f32.mxu0 %vm1346_vm5, %v8457_v61  ;;  %v8465_v61 = vld [vmem:[%s15289_s3 + $0x88] sm:$0xff] }
 0x2dc   : > { %1910 = vmatmul.mubr.f32.gmra.mxu0 %v8456_v7  ;;  %v8464_v7 = vld [vmem:[%s15289_s3 + $0x80] sm:$0xff] }
 0x2dd   : > { %9827 = vmatprep.mubr.msk.f32.mxu0 %vm11018_vm1, %v11017_v5 }
 0x35a   : > { %v1556_v17 = vpop.f32.mrf.mxu0 }
 0x35b   : > { %9735 = vmatmul.mubr.msk.f32.vlgmr.msra.gmra.mxu1 %vm932_vm3, %v1556_v17 }
 0x35c   : > { %v1558_v20 = vpop.f32.mrf.mxu0  ;;  %9737 = vmatprep.mubr.msk.f32.mxu1 %vm11018_vm1, %v11017_v5  ;;  %9750 = vmatpush3.msra.mxu1 %v1463_v8  ;;  %v1432_v60 = vpop.f32.mrf.mxu1 }
 0x35d   : > { %9751 = vmatprep.subr.mxu1 %v11017_v5 }
 0x35e   : > { %v1561_v57 = vpop.f32.mrf.mxu0  ;;  %9752 = vmatpush3.msra.mxu1 %v1462_v46  ;;  %v1434_v6 = vpop.f32.mrf.mxu1 }
 0x35f   : > { %9738 = vmatmul.mubr.msk.f32.gmra.mxu1 %vm932_vm3, %v1561_v57  ;;  %9753 = vmatprep.subr.mxu1 %v11017_v5  ;;  %v8478_v6 = vld [vmem:[%s15288_s2 + $0xf8] sm:$0xff] }
 0x360   : > { %v1563_v41 = vpop.f32.mrf.mxu0  ;;  %9740 = vmatprep.mubr.msk.f32.mxu1 %vm11018_vm1, %v11017_v5  ;;  %9754 = vmatpush3.msra.mxu1 %v1461_v23  ;;  %v1437_v63 = vpop.f32.mrf.mxu1 }
 0x361   : > { %9755 = vmatprep.subr.mxu1 %v11017_v5 }
 0x362   : > { %v1566_v30 = vpop.f32.mrf.mxu0  ;;  %9756 = vmatpush3.msra.mxu1 %v1460_v49  ;;  %v1439_v62 = vpop.f32.mrf.mxu1 }
 0x363   : > { %9741 = vmatmul.mubr.msk.f32.gmra.mxu1 %vm932_vm3, %v1566_v30  ;;  %9757 = vmatprep.subr.mxu1 %v11017_v5  ;;  %v8479_v30 = vld [vmem:[%s15288_s2 + $0x100] sm:$0xff]  ;;  %v8482_v62 = vld [vmem:[%s15288_s2 + $0x118] sm:$0xff] }
 0x364   : > { %v1568_v22 = vpop.f32.mrf.mxu0  ;;  %9743 = vmatprep.mubr.msk.f32.mxu1 %vm11018_vm1, %v11017_v5  ;;  %9758 = vmatpush3.msra.mxu1 %v1459_v27  ;;  %v1442_v18 = vpop.f32.mrf.mxu1  ;;  %v8480_v27 = vld [vmem:[%s15288_s2 + $0x108] sm:$0xff] }
 0x365   : > { %9759 = vmatprep.subr.mxu1 %v11017_v5  ;;  %v8484_v22 = vld [vmem:[%s15288_s2 + $0x128] sm:$0xff] }
 0x366   : > { %v1571_v3 = vpop.f32.mrf.mxu0  ;;  %9760 = vmatpush3.msra.mxu1 %v1458_v31  ;;  %v1444_v32 = vpop.f32.mrf.mxu1  ;;  %v8481_v31 = vld [vmem:[%s15288_s2 + $0x110] sm:$0xff] }
 0x367   : > { %9744 = vmatmul.mubr.msk.f32.gmra.mxu1 %vm932_vm3, %v1571_v3  ;;  %9761 = vmatprep.subr.mxu1 %v11017_v5  ;;  %v8485_v3 = vld [vmem:[%s15288_s2 + $0x130] sm:$0xf]  ;;  %v8500_v32 = vld [vmem:[%s15289_s3 + $0xf8] sm:$0xff] }
 0x368   : > { %v1573_v34 = vpop.f32.mrf.mxu0  ;;  %9746 = vmatprep.mubr.msk.f32.mxu1 %vm11018_vm1, %v11017_v5  ;;  %9762 = vmatpush3.msra.mxu1 %v1457_v40  ;;  %v1447_v35 = vpop.f32.mrf.mxu1  ;;  %v8486_v40 = vld [vmem:[%s15288_s2 + $0x138] sm:$0xf] }
 0x369   : > { %9763 = vmatprep.subr.mxu1 %v11017_v5  ;;  %9812 = vmatpush3.msra.mxu0 %v8500_v32  ;;  %v8498_v34 = vld [vmem:[%s15289_s3 + $0xe8] sm:$0xff] }
 0x36a   : > { %v1576_v36 = vpop.f32.mrf.mxu0  ;;  %9764 = vmatpush3.msra.mxu1 %v1456_v33  ;;  %v1449_v37 = vpop.f32.mrf.mxu1  ;;  %v8499_v33 = vld [vmem:[%s15289_s3 + $0xf0] sm:$0xff]  ;;  %9813 = vmatprep.subr.mxu0 %v11017_v5 }
 0x36b   : > { %9747 = vmatmul.mubr.msk.f32.gmra.mxu1 %vm932_vm3, %v1576_v36  ;;  %9780 = vmatprep.subr.mxu1 %v11017_v5  ;;  %v8496_v36 = vld [vmem:[%s15289_s3 + $0xd8] sm:$0xff]  ;;  %v8495_v37 = vld [vmem:[%s15289_s3 + $0xd0] sm:$0xff] }
 0x36c   : > { %9765 = vmatprep.mubr.msk.f32.mxu1 %vm11018_vm1, %v11017_v5  ;;  %v1452_v38 = vpop.f32.mrf.mxu1  ;;  %v1578_v39 = vpop.f32.mrf.mxu0  ;;  %9814 = vmatpush3.msra.mxu0 %v8499_v33 }
 0x36d   : > { %9815 = vmatprep.subr.mxu0 %v11017_v5  ;;  %v8493_v39 = vld [vmem:[%s15289_s3 + $0xc0] sm:$0xff] }
 0x36e   : > { %v1454_v48 = vpop.f32.mrf.mxu1  ;;  %9816 = vmatpush3.msra.mxu0 %v8498_v34 }
 0x36f   : > { %9766 = vmatmul.mubr.msk.f32.vlgmr.msra.gmra.mxu1 %vm932_vm3, %v1432_v60  ;;  %9817 = vmatprep.subr.mxu0 %v11017_v5 }
 0x370   : > { %9768 = vmatprep.mubr.msk.f32.mxu1 %vm11018_vm1, %v11017_v5  ;;  %9781 = vmatpush3.msra.mxu1 %v8471_v47 }
 0x371   : > { %9782 = vmatprep.subr.mxu1 %v11017_v5 }
 0x372   : > { %9783 = vmatpush3.msra.mxu1 %v8470_v45 }
 0x373   : > { %9769 = vmatmul.mubr.msk.f32.gmra.mxu1 %vm932_vm3, %v1437_v63  ;;  %9784 = vmatprep.subr.mxu1 %v11017_v5  ;;  %v8477_v63 = vld [vmem:[%s15288_s2 + $0xf0] sm:$0xff] }
 0x374   : > { %9771 = vmatprep.mubr.msk.f32.mxu1 %vm11018_vm1, %v11017_v5  ;;  %9785 = vmatpush3.msra.mxu1 %v8469_v51 }
 0x375   : > { %9786 = vmatprep.subr.mxu1 %v11017_v5 }
 0x376   : > { %9787 = vmatpush3.msra.mxu1 %v8468_v52 }
 0x377   : > { %9772 = vmatmul.mubr.msk.f32.gmra.mxu1 %vm932_vm3, %v1442_v18  ;;  %9788 = vmatprep.subr.mxu1 %v11017_v5  ;;  %v8483_v18 = vld [vmem:[%s15288_s2 + $0x120] sm:$0xff] }
 0x378   : > { %9774 = vmatprep.mubr.msk.f32.mxu1 %vm11018_vm1, %v11017_v5  ;;  %9789 = vmatpush3.msra.mxu1 %v8467_v11 }
 0x379   : > { %9790 = vmatprep.subr.mxu1 %v11017_v5 }
 0x37a   : > { %9791 = vmatpush3.msra.mxu1 %v8466_v54 }
 0x37b   : > { %9775 = vmatmul.mubr.msk.f32.gmra.mxu1 %vm932_vm3, %v1447_v35  ;;  %9792 = vmatprep.subr.mxu1 %v11017_v5  ;;  %v8497_v35 = vld [vmem:[%s15289_s3 + $0xe0] sm:$0xff] }
 0x37c   : > { %9777 = vmatprep.mubr.msk.f32.mxu1 %vm11018_vm1, %v11017_v5  ;;  %9793 = vmatpush3.msra.mxu1 %v8465_v61 }
 0x37d   : > { %9794 = vmatprep.subr.mxu1 %v11017_v5  ;;  %9818 = vmatpush3.msra.mxu0 %v8497_v35 }
 0x37e   : > { %9795 = vmatpush3.msra.mxu1 %v8464_v7  ;;  %9819 = vmatprep.subr.mxu0 %v11017_v5 }
 0x37f   : > { %9778 = vmatmul.mubr.msk.f32.gmra.mxu1 %vm932_vm3, %v1452_v38  ;;  %2060 = vmatprep.subr.mxu1 %v11017_v5  ;;  %v8494_v38 = vld [vmem:[%s15289_s3 + $0xc8] sm:$0xff] }
 0x380   : > { %9796 = vmatprep.mubr.msk.f32.mxu1 %vm11018_vm1, %v11017_v5  ;;  %9820 = vmatpush3.msra.mxu0 %v8496_v36 }
 0x381   : > { %9821 = vmatprep.subr.mxu0 %v11017_v5 }
 0x382   : > { %9822 = vmatpush3.msra.mxu0 %v8495_v37 }
 0x383   : > { %9823 = vmatprep.subr.mxu0 %v11017_v5 }
 0x384   : > { %9824 = vmatpush3.msra.mxu0 %v8494_v38 }
 0x385   : > { %9825 = vmatprep.subr.mxu0 %v11017_v5 }
 0x386   : > { %9826 = vmatpush3.msra.mxu0 %v8493_v39 }
 0x387   : > { %2295 = vmatprep.subr.mxu0 %v11017_v5 }
 0x38c   : > { %v1891_v56 = vpop.f32.mrf.mxu0 }
 0x38d   : > { %9797 = vmatmul.mubr.msk.f32.vlgmr.msra.gmra.mxu1 %vm932_vm3, %v1891_v56 }
 0x38e   : > { %2061 = vmatpush1.msra.mxu1 %v11642_v25  ;;  %v1893_v8 = vpop.f32.mrf.mxu0  ;;  %9799 = vmatprep.mubr.msk.f32.mxu1 %vm11018_vm1, %v11017_v5 }
 0x38f   : > { %2062 = vmatprep.subr.mxu1 %v11017_v5 }
 0x390   : > { %2063 = vmatpush1.msra.mxu1 %v11650_v26  ;;  %v1896_v17 = vpop.f32.mrf.mxu0 }
 0x391   : > { %2064 = vmatprep.subr.mxu1 %v11017_v5  ;;  %9800 = vmatmul.mubr.msk.f32.gmra.mxu1 %vm932_vm3, %v1896_v17 }
 0x392   : > { %2065 = vmatpush1.msra.mxu1 %v11660_v10  ;;  %v1898_v46 = vpop.f32.mrf.mxu0  ;;  %9802 = vmatprep.mubr.msk.f32.mxu1 %vm11018_vm1, %v11017_v5 }
 0x393   : > { %2066 = vmatprep.subr.mxu1 %v11017_v5 }
 0x394   : > { %2067 = vmatpush1.msra.mxu1 %v11670_v59  ;;  %v1901_v20 = vpop.f32.mrf.mxu0 }
 0x395   : > { %2068 = vmatprep.subr.mxu1 %v11017_v5  ;;  %9803 = vmatmul.mubr.msk.f32.gmra.mxu1 %vm932_vm3, %v1901_v20 }
 0x396   : > { %2069 = vmatpush1.msra.mxu1 %v11680_v50  ;;  %v1903_v60 = vpop.f32.mrf.mxu0  ;;  %9805 = vmatprep.mubr.msk.f32.mxu1 %vm11018_vm1, %v11017_v5 }
 0x397   : > { %2070 = vmatprep.subr.mxu1 %v11017_v5 }
 0x398   : > { %2071 = vmatpush1.msra.mxu1 %v11690_v43  ;;  %v1906_v23 = vpop.f32.mrf.mxu0 }
 0x399   : > { %2072 = vmatprep.subr.mxu1 %v11017_v5  ;;  %9806 = vmatmul.mubr.msk.f32.gmra.mxu1 %vm932_vm3, %v1906_v23 }
 0x39a   : > { %2073 = vmatpush1.msra.mxu1 %v11700_v28  ;;  %v1908_v57 = vpop.f32.mrf.mxu0  ;;  %9808 = vmatprep.mubr.msk.f32.mxu1 %vm11018_vm1, %v11017_v5 }
 0x39b   : > { %2074 = vmatprep.subr.mxu1 %v11017_v5 }
 0x39c   : > { %2075 = vmatpush1.msra.mxu1 %v11710_v21  ;;  %v1911_v49 = vpop.f32.mrf.mxu0 }
 0x39d   : > { %2076 = vmatprep.subr.mxu1 %v11017_v5  ;;  %9809 = vmatmul.mubr.msk.f32.gmra.mxu1 %vm932_vm3, %v1911_v49 }
 0x39e   : > { %2077 = vmatpush1.msra.mxu1 %v11720_v15  ;;  %8488 = vmatprep.mubr.msk.f32.mxu1 %vm1346_vm5, %v8478_v6  ;;  %v1913_v41 = vpop.f32.mrf.mxu0 }
 0x39f   : > { %2078 = vmatprep.subr.mxu1 %v11017_v5 }
 0x3a0   : > { %2079 = vmatpush1.msra.mxu1 %v11730_v9 }
 0x3a1   : > { %2080 = vmatprep.subr.mxu1 %v11017_v5 }
 0x3a2   : > { %2081 = vmatpush1.msra.mxu1 %v11740_v4 }
 0x3a3   : > { %2082 = vmatprep.subr.mxu1 %v11017_v5 }
 0x3a4   : > { %2083 = vmatpush1.msra.mxu1 %v11750_v1 }
 0x3a5   : > { %2084 = vmatprep.subr.mxu1 %v11017_v5 }
 0x3a6   : > { %2085 = vmatpush1.msra.mxu1 %v11760_v2 }
 0x3a7   : > { %2086 = vmatprep.subr.mxu1 %v11017_v5 }
 0x3a8   : > { %2087 = vmatpush1.msra.mxu1 %v11770_v0 }
 0x3a9   : > { %2088 = vmatprep.subr.mxu1 %v11017_v5 }
 0x3aa   : > { %2089 = vmatpush1.msra.mxu1 %v11780_v42 }
 0x3ab   : > { %2090 = vmatprep.subr.mxu1 %v11017_v5 }
 0x3ac   : > { %2091 = vmatpush1.msra.mxu1 %v11790_v16 }
 0x3ad   : > { %2106 = vmatprep.subr.mxu1 %v11017_v5 }
 0x3ae   : > { %8487 = vmatpush2.msk.msra.mxu1 %vm1362_vm6, %v11800_v24 }
 0x3af   : > { %2108 = vmatprep.subr.mxu1 %v11017_v5 }
 0x3b0   : > { %2109 = vmatpush2.msra.mxu1 %v11812_v53 }
 0x3b1   : > { %2110 = vmatprep.subr.mxu1 %v11017_v5 }
 0x3b2   : > { %2111 = vmatpush2.msra.mxu1 %v11822_v44 }
 0x3b3   : > { %2112 = vmatprep.subr.mxu1 %v11017_v5 }
 0x3b4   : > { %2113 = vmatpush2.msra.mxu1 %v11832_v29 }
 0x3b5   : > { %2114 = vmatprep.subr.mxu1 %v11017_v5 }
 0x3b6   : > { %2115 = vmatpush2.msra.mxu1 %v11842_v19 }
 0x3b7   : > { %2116 = vmatprep.subr.mxu1 %v11017_v5 }
 0x3b8   : > { %2117 = vmatpush2.msra.mxu1 %v11850_v12 }
 0x3b9   : > { %2118 = vmatprep.subr.mxu1 %v11017_v5 }
 0x3ba   : > { %2119 = vmatpush2.msra.mxu1 %v11857_v13 }
 0x3bb   : > { %2120 = vmatprep.subr.mxu1 %v11017_v5 }
 0x3bc   : > { %2121 = vmatpush2.msra.mxu1 %v11864_v14 }
 0x3bd   : > { %2122 = vmatprep.subr.mxu1 %v11017_v5 }
 0x3be   : > { %2123 = vmatpush2.msra.mxu1 %v11870_v58 }
 0x3bf   : > { %2125 = vmatmul.mubr.f32.vlgmr.msra.gmra.mxu1 %v8477_v63  ;;  %9842 = vmatprep.subr.mxu1 %v11017_v5 }
 0x3c0   : > { %8489 = vmatprep.mubr.msk.f32.mxu1 %vm1346_vm5, %v8480_v27 }
 0x3c3   : > { %2130 = vmatmul.mubr.f32.gmra.mxu1 %v8479_v30 }
 0x3c4   : > { %8490 = vmatprep.mubr.msk.f32.mxu1 %vm1346_vm5, %v8482_v62 }
 0x3c7   : > { %2135 = vmatmul.mubr.f32.gmra.mxu1 %v8481_v31 }
 0x3c8   : > { %8491 = vmatprep.mubr.msk.f32.mxu1 %vm1346_vm5, %v8484_v22 }
 0x3cb   : > { %2140 = vmatmul.mubr.f32.gmra.mxu1 %v8483_v18 }
 0x3cc   : > { %8492 = vmatprep.mubr.msk.f32.mxu1 %vm1346_vm5, %v8486_v40 }
 0x3cf   : > { %2145 = vmatmul.mubr.f32.gmra.mxu1 %v8485_v3 }
 0x3d0   : > { %9858 = vmatprep.mubr.msk.f32.mxu1 %vm11018_vm1, %v11017_v5 }
 0x41b   : > { %v1670_v47 = vpop.f32.mrf.mxu1 }
 0x41d   : > { %v9736_v48 = vpop.f32.mrf.mxu1 }
 0x41f   : > { %v1675_v45 = vpop.f32.mrf.mxu1 }
 0x421   : > { %v9739_v51 = vpop.f32.mrf.mxu1 }
 0x423   : > { %v1680_v52 = vpop.f32.mrf.mxu1 }
 0x425   : > { %v9742_v11 = vpop.f32.mrf.mxu1 }
 0x427   : > { %v1685_v54 = vpop.f32.mrf.mxu1 }
 0x429   : > { %v9745_v61 = vpop.f32.mrf.mxu1 }
 0x42b   : > { %v1690_v7 = vpop.f32.mrf.mxu1 }
 0x42d   : > { %v9748_v56 = vpop.f32.mrf.mxu1 }
 0x42f   : > { %v1775_v8 = vpop.f32.mrf.mxu1 }
 0x430   : > { %v1776_v17 = vadd.f32 %v1775_v8, %v1670_v47 }
 0x431   : > { %v9767_v46 = vpop.f32.mrf.mxu1 }
 0x433   : > { %v1780_v20 = vpop.f32.mrf.mxu1 }
 0x434   : > { %v1781_v60 = vadd.f32 %v1780_v20, %v1675_v45 }
 0x435   : > { %v9770_v23 = vpop.f32.mrf.mxu1 }
 0x436   : > { %v8509_v23 = vld [vmem:[%s15288_s2 + $0x158] sm:$0xff] }
 0x437   : > { %v1785_v57 = vpop.f32.mrf.mxu1 }
 0x438   : > { %v1786_v6 = vadd.f32 %v1785_v57, %v1680_v52  ;;  %v8508_v57 = vld [vmem:[%s15288_s2 + $0x150] sm:$0xff] }
 0x439   : > { %v9773_v49 = vpop.f32.mrf.mxu1 }
 0x43a   : > { %v8510_v49 = vld [vmem:[%s15288_s2 + $0x160] sm:$0xff] }
 0x43b   : > { %v1790_v41 = vpop.f32.mrf.mxu1 }
 0x43c   : > { %v1791_v63 = vadd.f32 %v1790_v41, %v1685_v54  ;;  %v8513_v41 = vld [vmem:[%s15288_s2 + $0x178] sm:$0xff] }
 0x43d   : > { %v9776_v27 = vpop.f32.mrf.mxu1 }
 0x43e   : > { %v8515_v27 = vld [vmem:[%s15288_s2 + $0x188] sm:$0xf] }
 0x43f   : > { %v1795_v30 = vpop.f32.mrf.mxu1 }
 0x440   : > { %v1796_v62 = vadd.f32 %v1795_v30, %v1690_v7  ;;  %v8514_v30 = vld [vmem:[%s15288_s2 + $0x180] sm:$0xf] }
 0x441   : > { %v9779_v31 = vpop.f32.mrf.mxu1 }
 0x442   : > { %v8528_v31 = vld [vmem:[%s15289_s3 + $0x130] sm:$0xff] }
 0x44d   : > { %v2005_v22 = vpop.f32.mrf.mxu1 }
 0x44e   : > { %v12289_v18 = vadd.f32 %v2005_v22, %v1776_v17  ;;  %v8507_v17 = vld [vmem:[%s15288_s2 + $0x148] sm:$0xff] }
 0x44f   : > { %v9798_v40 = vpop.f32.mrf.mxu1  ;;  %v8527_v22 = vld [vmem:[%s15289_s3 + $0x128] sm:$0xff] }
 0x450   : > { %v8526_v40 = vld [vmem:[%s15289_s3 + $0x120] sm:$0xff] }
 0x451   : > { %v2010_v3 = vpop.f32.mrf.mxu1 }
 0x452   : > { %v12291_v32 = vadd.f32 %v2010_v3, %v1781_v60  ;;  %v8506_v60 = vld [vmem:[%s15288_s2 + $0x140] sm:$0xff]  ;;  %v8525_v3 = vld [vmem:[%s15289_s3 + $0x118] sm:$0xff] }
 0x453   : > { %v9801_v33 = vpop.f32.mrf.mxu1 }
 0x454   : > { %v8524_v33 = vld [vmem:[%s15289_s3 + $0x110] sm:$0xff] }
 0x455   : > { %v2015_v34 = vpop.f32.mrf.mxu1 }
 0x456   : > { %v12293_v35 = vadd.f32 %v2015_v34, %v1786_v6  ;;  %v8511_v6 = vld [vmem:[%s15288_s2 + $0x168] sm:$0xff] }
 0x457   : > { %v9804_v36 = vpop.f32.mrf.mxu1  ;;  %v8523_v34 = vld [vmem:[%s15289_s3 + $0x108] sm:$0xff] }
 0x458   : > { %v8522_v36 = vld [vmem:[%s15289_s3 + $0x100] sm:$0xff] }
 0x459   : > { %v2020_v37 = vpop.f32.mrf.mxu1 }
 0x45a   : > { %v12295_v38 = vadd.f32 %v2020_v37, %v1791_v63  ;;  %v8512_v63 = vld [vmem:[%s15288_s2 + $0x170] sm:$0xff] }
 0x45b   : > { %v9807_v39 = vpop.f32.mrf.mxu1 }
 0x45d   : > { %v2025_v47 = vpop.f32.mrf.mxu1 }
 0x45e   : > { %v12297_v48 = vadd.f32 %v2025_v47, %v1796_v62  ;;  %v8529_v62 = vld [vmem:[%s15289_s3 + $0x138] sm:$0xff] }
 0x45f   : > { %v9810_v45 = vpop.f32.mrf.mxu1  ;;  %9843 = vmatpush3.msra.mxu1 %v8529_v62  ;;  %v8540_v62 = vld [vmem:[%s15288_s2 + $0x1b8] sm:$0xff] }
 0x460   : > { %9844 = vmatprep.subr.mxu1 %v11017_v5 }
 0x461   : > { %9845 = vmatpush3.msra.mxu1 %v8528_v31  ;;  %v8539_v31 = vld [vmem:[%s15288_s2 + $0x1b0] sm:$0xff] }
 0x462   : > { %9846 = vmatprep.subr.mxu1 %v11017_v5 }
 0x463   : > { %9847 = vmatpush3.msra.mxu1 %v8527_v22  ;;  %v8542_v22 = vld [vmem:[%s15288_s2 + $0x1c8] sm:$0xff] }
 0x464   : > { %9848 = vmatprep.subr.mxu1 %v11017_v5 }
 0x465   : > { %9849 = vmatpush3.msra.mxu1 %v8526_v40  ;;  %v8541_v40 = vld [vmem:[%s15288_s2 + $0x1c0] sm:$0xff] }
 0x466   : > { %9850 = vmatprep.subr.mxu1 %v11017_v5 }
 0x467   : > { %9851 = vmatpush3.msra.mxu1 %v8525_v3  ;;  %v8544_v3 = vld [vmem:[%s15288_s2 + $0x1d8] sm:$0xf] }
 0x468   : > { %9852 = vmatprep.subr.mxu1 %v11017_v5 }
 0x469   : > { %9853 = vmatpush3.msra.mxu1 %v8524_v33  ;;  %v8543_v33 = vld [vmem:[%s15288_s2 + $0x1d0] sm:$0xf] }
 0x46a   : > { %9854 = vmatprep.subr.mxu1 %v11017_v5 }
 0x46b   : > { %9855 = vmatpush3.msra.mxu1 %v8523_v34  ;;  %v8558_v34 = vld [vmem:[%s15289_s3 + $0x178] sm:$0xff] }
 0x46c   : > { %9856 = vmatprep.subr.mxu1 %v11017_v5 }
 0x46d   : > { %9857 = vmatpush3.msra.mxu1 %v8522_v36  ;;  %v8557_v36 = vld [vmem:[%s15289_s3 + $0x170] sm:$0xff] }
 0x46e   : > { %2530 = vmatprep.subr.mxu1 %v11017_v5 }
 0x47f   : > { %v2126_v51 = vpop.f32.mrf.mxu1 }
 0x480   : > { %9828 = vmatmul.mubr.msk.f32.vlgmr.msra.gmra.mxu0 %vm932_vm3, %v2126_v51 }
 0x481   : > { %2296 = vmatpush1.msra.mxu0 %v11642_v25  ;;  %v2128_v52 = vpop.f32.mrf.mxu1  ;;  %9830 = vmatprep.mubr.msk.f32.mxu0 %vm11018_vm1, %v11017_v5 }
 0x482   : > { %2297 = vmatprep.subr.mxu0 %v11017_v5 }
 0x483   : > { %2298 = vmatpush1.msra.mxu0 %v11650_v26  ;;  %v2131_v11 = vpop.f32.mrf.mxu1 }
 0x484   : > { %2299 = vmatprep.subr.mxu0 %v11017_v5  ;;  %9831 = vmatmul.mubr.msk.f32.gmra.mxu0 %vm932_vm3, %v2131_v11 }
 0x485   : > { %2300 = vmatpush1.msra.mxu0 %v11660_v10  ;;  %v2133_v54 = vpop.f32.mrf.mxu1  ;;  %9833 = vmatprep.mubr.msk.f32.mxu0 %vm11018_vm1, %v11017_v5 }
 0x486   : > { %2301 = vmatprep.subr.mxu0 %v11017_v5 }
 0x487   : > { %2302 = vmatpush1.msra.mxu0 %v11670_v59  ;;  %v2136_v61 = vpop.f32.mrf.mxu1 }
 0x488   : > { %2303 = vmatprep.subr.mxu0 %v11017_v5  ;;  %9834 = vmatmul.mubr.msk.f32.gmra.mxu0 %vm932_vm3, %v2136_v61 }
 0x489   : > { %2304 = vmatpush1.msra.mxu0 %v11680_v50  ;;  %v2138_v7 = vpop.f32.mrf.mxu1  ;;  %9836 = vmatprep.mubr.msk.f32.mxu0 %vm11018_vm1, %v11017_v5 }
 0x48a   : > { %2305 = vmatprep.subr.mxu0 %v11017_v5 }
 0x48b   : > { %2306 = vmatpush1.msra.mxu0 %v11690_v43  ;;  %v2141_v56 = vpop.f32.mrf.mxu1 }
 0x48c   : > { %2307 = vmatprep.subr.mxu0 %v11017_v5  ;;  %9837 = vmatmul.mubr.msk.f32.gmra.mxu0 %vm932_vm3, %v2141_v56 }
 0x48d   : > { %2308 = vmatpush1.msra.mxu0 %v11700_v28  ;;  %v2143_v8 = vpop.f32.mrf.mxu1  ;;  %9839 = vmatprep.mubr.msk.f32.mxu0 %vm11018_vm1, %v11017_v5 }
 0x48e   : > { %2309 = vmatprep.subr.mxu0 %v11017_v5 }
 0x48f   : > { %2310 = vmatpush1.msra.mxu0 %v11710_v21  ;;  %v2146_v46 = vpop.f32.mrf.mxu1 }
 0x490   : > { %2311 = vmatprep.subr.mxu0 %v11017_v5  ;;  %9840 = vmatmul.mubr.msk.f32.gmra.mxu0 %vm932_vm3, %v2146_v46 }
 0x491   : > { %2312 = vmatpush1.msra.mxu0 %v11720_v15  ;;  %8517 = vmatprep.mubr.msk.f32.mxu0 %vm1346_vm5, %v8507_v17  ;;  %v2148_v20 = vpop.f32.mrf.mxu1 }
 0x492   : > { %2313 = vmatprep.subr.mxu0 %v11017_v5 }
 0x493   : > { %2314 = vmatpush1.msra.mxu0 %v11730_v9 }
 0x494   : > { %2315 = vmatprep.subr.mxu0 %v11017_v5 }
 0x495   : > { %2316 = vmatpush1.msra.mxu0 %v11740_v4 }
 0x496   : > { %2317 = vmatprep.subr.mxu0 %v11017_v5 }
 0x497   : > { %2318 = vmatpush1.msra.mxu0 %v11750_v1 }
 0x498   : > { %2319 = vmatprep.subr.mxu0 %v11017_v5 }
 0x499   : > { %2320 = vmatpush1.msra.mxu0 %v11760_v2 }
 0x49a   : > { %2321 = vmatprep.subr.mxu0 %v11017_v5 }
 0x49b   : > { %2322 = vmatpush1.msra.mxu0 %v11770_v0 }
 0x49c   : > { %2323 = vmatprep.subr.mxu0 %v11017_v5 }
 0x49d   : > { %2324 = vmatpush1.msra.mxu0 %v11780_v42 }
 0x49e   : > { %2325 = vmatprep.subr.mxu0 %v11017_v5 }
 0x49f   : > { %2326 = vmatpush1.msra.mxu0 %v11790_v16 }
 0x4a0   : > { %2341 = vmatprep.subr.mxu0 %v11017_v5 }
 0x4a1   : > { %8516 = vmatpush2.msk.msra.mxu0 %vm1362_vm6, %v11800_v24 }
 0x4a2   : > { %2343 = vmatprep.subr.mxu0 %v11017_v5 }
 0x4a3   : > { %2344 = vmatpush2.msra.mxu0 %v11812_v53 }
 0x4a4   : > { %2345 = vmatprep.subr.mxu0 %v11017_v5 }
 0x4a5   : > { %2346 = vmatpush2.msra.mxu0 %v11822_v44 }
 0x4a6   : > { %2347 = vmatprep.subr.mxu0 %v11017_v5 }
 0x4a7   : > { %2348 = vmatpush2.msra.mxu0 %v11832_v29 }
 0x4a8   : > { %2349 = vmatprep.subr.mxu0 %v11017_v5 }
 0x4a9   : > { %2350 = vmatpush2.msra.mxu0 %v11842_v19 }
 0x4aa   : > { %2351 = vmatprep.subr.mxu0 %v11017_v5 }
 0x4ab   : > { %2352 = vmatpush2.msra.mxu0 %v11850_v12 }
 0x4ac   : > { %2353 = vmatprep.subr.mxu0 %v11017_v5 }
 0x4ad   : > { %2354 = vmatpush2.msra.mxu0 %v11857_v13 }
 0x4ae   : > { %2355 = vmatprep.subr.mxu0 %v11017_v5 }
 0x4af   : > { %2356 = vmatpush2.msra.mxu0 %v11864_v14 }
 0x4b0   : > { %2357 = vmatprep.subr.mxu0 %v11017_v5 }
 0x4b1   : > { %2358 = vmatpush2.msra.mxu0 %v11870_v58 }
 0x4b2   : > { %2360 = vmatmul.mubr.f32.vlgmr.msra.gmra.mxu0 %v8506_v60  ;;  %9873 = vmatprep.subr.mxu0 %v11017_v5 }
 0x4b3   : > { %8518 = vmatprep.mubr.msk.f32.mxu0 %vm1346_vm5, %v8509_v23  ;;  %9874 = vmatpush3.msra.mxu0 %v8558_v34  ;;  %v8569_v34 = vld [vmem:[%s15288_s2 + $0x208] sm:$0xff] }
 0x4b4   : > { %9875 = vmatprep.subr.mxu0 %v11017_v5 }
 0x4b5   : > { %9876 = vmatpush3.msra.mxu0 %v8557_v36  ;;  %v8568_v36 = vld [vmem:[%s15288_s2 + $0x200] sm:$0xff] }
 0x4b6   : > { %2365 = vmatmul.mubr.f32.gmra.mxu0 %v8508_v57  ;;  %9877 = vmatprep.subr.mxu0 %v11017_v5 }
 0x4b7   : > { %8519 = vmatprep.mubr.msk.f32.mxu0 %vm1346_vm5, %v8511_v6  ;;  %v8536_v6 = vld [vmem:[%s15288_s2 + $0x198] sm:$0xff] }
 0x4ba   : > { %2370 = vmatmul.mubr.f32.gmra.mxu0 %v8510_v49 }
 0x4bb   : > { %8520 = vmatprep.mubr.msk.f32.mxu0 %vm1346_vm5, %v8513_v41 }
 0x4be   : > { %2375 = vmatmul.mubr.f32.gmra.mxu0 %v8512_v63  ;;  %v8535_v63 = vld [vmem:[%s15288_s2 + $0x190] sm:$0xff] }
 0x4bf   : > { %8521 = vmatprep.mubr.msk.f32.mxu0 %vm1346_vm5, %v8515_v27  ;;  %v8538_v27 = vld [vmem:[%s15288_s2 + $0x1a8] sm:$0xff] }
 0x4c2   : > { %2380 = vmatmul.mubr.f32.gmra.mxu0 %v8514_v30  ;;  %v8537_v30 = vld [vmem:[%s15288_s2 + $0x1a0] sm:$0xff] }
 0x4c3   : > { %9889 = vmatprep.mubr.msk.f32.mxu0 %vm11018_vm1, %v11017_v5 }
 0x540   : > { %v2240_v37 = vpop.f32.mrf.mxu0 }
 0x541   : > { %v12433_v39 = vadd.f32 %v2240_v37, %v12289_v18  ;;  %v8556_v37 = vld [vmem:[%s15289_s3 + $0x168] sm:$0xff] }
 0x542   : > { %v9829_v47 = vpop.f32.mrf.mxu0  ;;  %9878 = vmatpush3.msra.mxu0 %v8556_v37  ;;  %v8571_v37 = vld [vmem:[%s15288_s2 + $0x218] sm:$0xff] }
 0x543   : > { %v8555_v47 = vld [vmem:[%s15289_s3 + $0x160] sm:$0xff]  ;;  %9879 = vmatprep.subr.mxu0 %v11017_v5 }
 0x544   : > { %v2245_v45 = vpop.f32.mrf.mxu0  ;;  %9880 = vmatpush3.msra.mxu0 %v8555_v47  ;;  %v8570_v47 = vld [vmem:[%s15288_s2 + $0x210] sm:$0xff] }
 0x545   : > { %v12436_v51 = vadd.f32 %v2245_v45, %v12291_v32  ;;  %v8554_v45 = vld [vmem:[%s15289_s3 + $0x158] sm:$0xff]  ;;  %9881 = vmatprep.subr.mxu0 %v11017_v5 }
 0x546   : > { %v9832_v52 = vpop.f32.mrf.mxu0  ;;  %9882 = vmatpush3.msra.mxu0 %v8554_v45  ;;  %v8573_v45 = vld [vmem:[%s15288_s2 + $0x228] sm:$0xf] }
 0x547   : > { %v8553_v52 = vld [vmem:[%s15289_s3 + $0x150] sm:$0xff]  ;;  %9883 = vmatprep.subr.mxu0 %v11017_v5 }
 0x548   : > { %v2250_v11 = vpop.f32.mrf.mxu0  ;;  %9884 = vmatpush3.msra.mxu0 %v8553_v52  ;;  %v8572_v52 = vld [vmem:[%s15288_s2 + $0x220] sm:$0xf] }
 0x549   : > { %v12439_v54 = vadd.f32 %v2250_v11, %v12293_v35  ;;  %v8552_v11 = vld [vmem:[%s15289_s3 + $0x148] sm:$0xff]  ;;  %9885 = vmatprep.subr.mxu0 %v11017_v5 }
 0x54a   : > { %v9835_v61 = vpop.f32.mrf.mxu0  ;;  %9886 = vmatpush3.msra.mxu0 %v8552_v11  ;;  %v8587_v11 = vld [vmem:[%s15289_s3 + $0x1b8] sm:$0xff] }
 0x54b   : > { %v8551_v61 = vld [vmem:[%s15289_s3 + $0x140] sm:$0xff]  ;;  %9887 = vmatprep.subr.mxu0 %v11017_v5 }
 0x54c   : > { %v2255_v7 = vpop.f32.mrf.mxu0  ;;  %9888 = vmatpush3.msra.mxu0 %v8551_v61  ;;  %v8586_v61 = vld [vmem:[%s15289_s3 + $0x1b0] sm:$0xff] }
 0x54d   : > { %v12442_v56 = vadd.f32 %v2255_v7, %v12295_v38  ;;  %2765 = vmatprep.subr.mxu0 %v11017_v5 }
 0x54e   : > { %v9838_v8 = vpop.f32.mrf.mxu0 }
 0x550   : > { %v2260_v17 = vpop.f32.mrf.mxu0 }
 0x551   : > { %v12445_v18 = vadd.f32 %v2260_v17, %v12297_v48 }
 0x552   : > { %v9841_v46 = vpop.f32.mrf.mxu0 }
 0x572   : > { %v2361_v20 = vpop.f32.mrf.mxu0 }
 0x573   : > { %9859 = vmatmul.mubr.msk.f32.vlgmr.msra.gmra.mxu1 %vm932_vm3, %v2361_v20 }
 0x574   : > { %2531 = vmatpush1.msra.mxu1 %v11642_v25  ;;  %v2363_v32 = vpop.f32.mrf.mxu0  ;;  %9861 = vmatprep.mubr.msk.f32.mxu1 %vm11018_vm1, %v11017_v5 }
 0x575   : > { %2532 = vmatprep.subr.mxu1 %v11017_v5 }
 0x576   : > { %2533 = vmatpush1.msra.mxu1 %v11650_v26  ;;  %v2366_v35 = vpop.f32.mrf.mxu0 }
 0x577   : > { %2534 = vmatprep.subr.mxu1 %v11017_v5  ;;  %9862 = vmatmul.mubr.msk.f32.gmra.mxu1 %vm932_vm3, %v2366_v35 }
 0x578   : > { %2535 = vmatpush1.msra.mxu1 %v11660_v10  ;;  %v2368_v38 = vpop.f32.mrf.mxu0  ;;  %9864 = vmatprep.mubr.msk.f32.mxu1 %vm11018_vm1, %v11017_v5 }
 0x579   : > { %2536 = vmatprep.subr.mxu1 %v11017_v5 }
 0x57a   : > { %2537 = vmatpush1.msra.mxu1 %v11670_v59  ;;  %v2371_v48 = vpop.f32.mrf.mxu0 }
 0x57b   : > { %2538 = vmatprep.subr.mxu1 %v11017_v5  ;;  %9865 = vmatmul.mubr.msk.f32.gmra.mxu1 %vm932_vm3, %v2371_v48 }
 0x57c   : > { %2539 = vmatpush1.msra.mxu1 %v11680_v50  ;;  %v2373_v60 = vpop.f32.mrf.mxu0  ;;  %9867 = vmatprep.mubr.msk.f32.mxu1 %vm11018_vm1, %v11017_v5 }
 0x57d   : > { %2540 = vmatprep.subr.mxu1 %v11017_v5 }
 0x57e   : > { %2541 = vmatpush1.msra.mxu1 %v11690_v43  ;;  %v2376_v23 = vpop.f32.mrf.mxu0 }
 0x57f   : > { %2542 = vmatprep.subr.mxu1 %v11017_v5  ;;  %9868 = vmatmul.mubr.msk.f32.gmra.mxu1 %vm932_vm3, %v2376_v23 }
 0x580   : > { %2543 = vmatpush1.msra.mxu1 %v11700_v28  ;;  %v2378_v57 = vpop.f32.mrf.mxu0  ;;  %9870 = vmatprep.mubr.msk.f32.mxu1 %vm11018_vm1, %v11017_v5 }
 0x581   : > { %2544 = vmatprep.subr.mxu1 %v11017_v5 }
 0x582   : > { %2545 = vmatpush1.msra.mxu1 %v11710_v21  ;;  %v2381_v49 = vpop.f32.mrf.mxu0 }
 0x583   : > { %2546 = vmatprep.subr.mxu1 %v11017_v5  ;;  %9871 = vmatmul.mubr.msk.f32.gmra.mxu1 %vm932_vm3, %v2381_v49 }
 0x584   : > { %2547 = vmatpush1.msra.mxu1 %v11720_v15  ;;  %8546 = vmatprep.mubr.msk.f32.mxu1 %vm1346_vm5, %v8536_v6  ;;  %v2383_v41 = vpop.f32.mrf.mxu0 }
 0x585   : > { %2548 = vmatprep.subr.mxu1 %v11017_v5 }
 0x586   : > { %2549 = vmatpush1.msra.mxu1 %v11730_v9 }
 0x587   : > { %2550 = vmatprep.subr.mxu1 %v11017_v5 }
 0x588   : > { %2551 = vmatpush1.msra.mxu1 %v11740_v4 }
 0x589   : > { %2552 = vmatprep.subr.mxu1 %v11017_v5 }
 0x58a   : > { %2553 = vmatpush1.msra.mxu1 %v11750_v1 }
 0x58b   : > { %2554 = vmatprep.subr.mxu1 %v11017_v5 }
 0x58c   : > { %2555 = vmatpush1.msra.mxu1 %v11760_v2 }
 0x58d   : > { %2556 = vmatprep.subr.mxu1 %v11017_v5 }
 0x58e   : > { %2557 = vmatpush1.msra.mxu1 %v11770_v0 }
 0x58f   : > { %2558 = vmatprep.subr.mxu1 %v11017_v5 }
 0x590   : > { %2559 = vmatpush1.msra.mxu1 %v11780_v42 }
 0x591   : > { %2560 = vmatprep.subr.mxu1 %v11017_v5 }
 0x592   : > { %2561 = vmatpush1.msra.mxu1 %v11790_v16 }
 0x593   : > { %2576 = vmatprep.subr.mxu1 %v11017_v5 }
 0x594   : > { %8545 = vmatpush2.msk.msra.mxu1 %vm1362_vm6, %v11800_v24 }
 0x595   : > { %2578 = vmatprep.subr.mxu1 %v11017_v5 }
 0x596   : > { %2579 = vmatpush2.msra.mxu1 %v11812_v53 }
 0x597   : > { %2580 = vmatprep.subr.mxu1 %v11017_v5 }
 0x598   : > { %2581 = vmatpush2.msra.mxu1 %v11822_v44 }
 0x599   : > { %2582 = vmatprep.subr.mxu1 %v11017_v5 }
 0x59a   : > { %2583 = vmatpush2.msra.mxu1 %v11832_v29 }
 0x59b   : > { %2584 = vmatprep.subr.mxu1 %v11017_v5 }
 0x59c   : > { %2585 = vmatpush2.msra.mxu1 %v11842_v19 }
 0x59d   : > { %2586 = vmatprep.subr.mxu1 %v11017_v5 }
 0x59e   : > { %2587 = vmatpush2.msra.mxu1 %v11850_v12 }
 0x59f   : > { %2588 = vmatprep.subr.mxu1 %v11017_v5 }
 0x5a0   : > { %2589 = vmatpush2.msra.mxu1 %v11857_v13 }
 0x5a1   : > { %2590 = vmatprep.subr.mxu1 %v11017_v5 }
 0x5a2   : > { %2591 = vmatpush2.msra.mxu1 %v11864_v14 }
 0x5a3   : > { %2592 = vmatprep.subr.mxu1 %v11017_v5 }
 0x5a4   : > { %2593 = vmatpush2.msra.mxu1 %v11870_v58 }
 0x5a5   : > { %2595 = vmatmul.mubr.f32.vlgmr.msra.gmra.mxu1 %v8535_v63  ;;  %9904 = vmatprep.subr.mxu1 %v11017_v5 }
 0x5a6   : > { %8547 = vmatprep.mubr.msk.f32.mxu1 %vm1346_vm5, %v8538_v27  ;;  %9905 = vmatpush3.msra.mxu1 %v8587_v11  ;;  %v8598_v11 = vld [vmem:[%s15288_s2 + $0x258] sm:$0xff] }
 0x5a7   : > { %9906 = vmatprep.subr.mxu1 %v11017_v5 }
 0x5a8   : > { %9907 = vmatpush3.msra.mxu1 %v8586_v61  ;;  %v8597_v61 = vld [vmem:[%s15288_s2 + $0x250] sm:$0xff] }
 0x5a9   : > { %2600 = vmatmul.mubr.f32.gmra.mxu1 %v8537_v30  ;;  %9908 = vmatprep.subr.mxu1 %v11017_v5 }
 0x5aa   : > { %8548 = vmatprep.mubr.msk.f32.mxu1 %vm1346_vm5, %v8540_v62  ;;  %v8565_v62 = vld [vmem:[%s15288_s2 + $0x1e8] sm:$0xff] }
 0x5ad   : > { %2605 = vmatmul.mubr.f32.gmra.mxu1 %v8539_v31 }
 0x5ae   : > { %8549 = vmatprep.mubr.msk.f32.mxu1 %vm1346_vm5, %v8542_v22 }
 0x5b1   : > { %2610 = vmatmul.mubr.f32.gmra.mxu1 %v8541_v40  ;;  %v8564_v40 = vld [vmem:[%s15288_s2 + $0x1e0] sm:$0xff] }
 0x5b2   : > { %8550 = vmatprep.mubr.msk.f32.mxu1 %vm1346_vm5, %v8544_v3  ;;  %v8567_v3 = vld [vmem:[%s15288_s2 + $0x1f8] sm:$0xff] }
 0x5b5   : > { %2615 = vmatmul.mubr.f32.gmra.mxu1 %v8543_v33  ;;  %v8566_v33 = vld [vmem:[%s15288_s2 + $0x1f0] sm:$0xff] }
 0x5b6   : > { %9920 = vmatprep.mubr.msk.f32.mxu1 %vm11018_vm1, %v11017_v5 }
 0x633   : > { %v2475_v7 = vpop.f32.mrf.mxu1 }
 0x634   : > { %v12581_v8 = vadd.f32 %v2475_v7, %v12433_v39  ;;  %v8585_v7 = vld [vmem:[%s15289_s3 + $0x1a8] sm:$0xff] }
 0x635   : > { %v9860_v17 = vpop.f32.mrf.mxu1  ;;  %9909 = vmatpush3.msra.mxu1 %v8585_v7  ;;  %v8600_v7 = vld [vmem:[%s15288_s2 + $0x268] sm:$0xff] }
 0x636   : > { %v8584_v17 = vld [vmem:[%s15289_s3 + $0x1a0] sm:$0xff]  ;;  %9910 = vmatprep.subr.mxu1 %v11017_v5 }
 0x637   : > { %v2480_v46 = vpop.f32.mrf.mxu1  ;;  %9911 = vmatpush3.msra.mxu1 %v8584_v17  ;;  %v8599_v17 = vld [vmem:[%s15288_s2 + $0x260] sm:$0xff] }
 0x638   : > { %v12584_v20 = vadd.f32 %v2480_v46, %v12436_v51  ;;  %v8583_v46 = vld [vmem:[%s15289_s3 + $0x198] sm:$0xff]  ;;  %9912 = vmatprep.subr.mxu1 %v11017_v5 }
 0x639   : > { %v9863_v32 = vpop.f32.mrf.mxu1  ;;  %9913 = vmatpush3.msra.mxu1 %v8583_v46  ;;  %v8602_v46 = vld [vmem:[%s15288_s2 + $0x278] sm:$0xf] }
 0x63a   : > { %v8582_v32 = vld [vmem:[%s15289_s3 + $0x190] sm:$0xff]  ;;  %9914 = vmatprep.subr.mxu1 %v11017_v5 }
 0x63b   : > { %v2485_v35 = vpop.f32.mrf.mxu1  ;;  %9915 = vmatpush3.msra.mxu1 %v8582_v32  ;;  %v8601_v32 = vld [vmem:[%s15288_s2 + $0x270] sm:$0xf] }
 0x63c   : > { %v12587_v38 = vadd.f32 %v2485_v35, %v12439_v54  ;;  %v8581_v35 = vld [vmem:[%s15289_s3 + $0x188] sm:$0xff]  ;;  %9916 = vmatprep.subr.mxu1 %v11017_v5 }
 0x63d   : > { %v9866_v48 = vpop.f32.mrf.mxu1  ;;  %9917 = vmatpush3.msra.mxu1 %v8581_v35  ;;  %v8616_v35 = vld [vmem:[%s15289_s3 + $0x1f8] sm:$0xff] }
 0x63e   : > { %v8580_v48 = vld [vmem:[%s15289_s3 + $0x180] sm:$0xff]  ;;  %9918 = vmatprep.subr.mxu1 %v11017_v5 }
 0x63f   : > { %v2490_v60 = vpop.f32.mrf.mxu1  ;;  %9919 = vmatpush3.msra.mxu1 %v8580_v48  ;;  %v8615_v48 = vld [vmem:[%s15289_s3 + $0x1f0] sm:$0xff] }
 0x640   : > { %v12590_v23 = vadd.f32 %v2490_v60, %v12442_v56  ;;  %3000 = vmatprep.subr.mxu1 %v11017_v5 }
 0x641   : > { %v9869_v57 = vpop.f32.mrf.mxu1 }
 0x643   : > { %v2495_v6 = vpop.f32.mrf.mxu1 }
 0x644   : > { %v12593_v39 = vadd.f32 %v2495_v6, %v12445_v18 }
 0x645   : > { %v9872_v49 = vpop.f32.mrf.mxu1 }
 0x665   : > { %v2596_v41 = vpop.f32.mrf.mxu1 }
 0x666   : > { %9890 = vmatmul.mubr.msk.f32.vlgmr.msra.gmra.mxu0 %vm932_vm3, %v2596_v41 }
 0x667   : > { %2766 = vmatpush1.msra.mxu0 %v11642_v25  ;;  %v2598_v51 = vpop.f32.mrf.mxu1  ;;  %9892 = vmatprep.mubr.msk.f32.mxu0 %vm11018_vm1, %v11017_v5 }
 0x668   : > { %2767 = vmatprep.subr.mxu0 %v11017_v5 }
 0x669   : > { %2768 = vmatpush1.msra.mxu0 %v11650_v26  ;;  %v2601_v54 = vpop.f32.mrf.mxu1 }
 0x66a   : > { %2769 = vmatprep.subr.mxu0 %v11017_v5  ;;  %9893 = vmatmul.mubr.msk.f32.gmra.mxu0 %vm932_vm3, %v2601_v54 }
 0x66b   : > { %2770 = vmatpush1.msra.mxu0 %v11660_v10  ;;  %v2603_v56 = vpop.f32.mrf.mxu1  ;;  %9895 = vmatprep.mubr.msk.f32.mxu0 %vm11018_vm1, %v11017_v5 }
 0x66c   : > { %2771 = vmatprep.subr.mxu0 %v11017_v5 }
 0x66d   : > { %2772 = vmatpush1.msra.mxu0 %v11670_v59  ;;  %v2606_v18 = vpop.f32.mrf.mxu1 }
 0x66e   : > { %2773 = vmatprep.subr.mxu0 %v11017_v5  ;;  %9896 = vmatmul.mubr.msk.f32.gmra.mxu0 %vm932_vm3, %v2606_v18 }
 0x66f   : > { %2774 = vmatpush1.msra.mxu0 %v11680_v50  ;;  %v2608_v63 = vpop.f32.mrf.mxu1  ;;  %9898 = vmatprep.mubr.msk.f32.mxu0 %vm11018_vm1, %v11017_v5 }
 0x670   : > { %2775 = vmatprep.subr.mxu0 %v11017_v5 }
 0x671   : > { %2776 = vmatpush1.msra.mxu0 %v11690_v43  ;;  %v2611_v27 = vpop.f32.mrf.mxu1 }
 0x672   : > { %2777 = vmatprep.subr.mxu0 %v11017_v5  ;;  %9899 = vmatmul.mubr.msk.f32.gmra.mxu0 %vm932_vm3, %v2611_v27 }
 0x673   : > { %2778 = vmatpush1.msra.mxu0 %v11700_v28  ;;  %v2613_v30 = vpop.f32.mrf.mxu1  ;;  %9901 = vmatprep.mubr.msk.f32.mxu0 %vm11018_vm1, %v11017_v5 }
 0x674   : > { %2779 = vmatprep.subr.mxu0 %v11017_v5 }
 0x675   : > { %2780 = vmatpush1.msra.mxu0 %v11710_v21  ;;  %v2616_v31 = vpop.f32.mrf.mxu1 }
 0x676   : > { %2781 = vmatprep.subr.mxu0 %v11017_v5  ;;  %9902 = vmatmul.mubr.msk.f32.gmra.mxu0 %vm932_vm3, %v2616_v31 }
 0x677   : > { %2782 = vmatpush1.msra.mxu0 %v11720_v15  ;;  %8575 = vmatprep.mubr.msk.f32.mxu0 %vm1346_vm5, %v8565_v62  ;;  %v2618_v22 = vpop.f32.mrf.mxu1 }
 0x678   : > { %2783 = vmatprep.subr.mxu0 %v11017_v5 }
 0x679   : > { %2784 = vmatpush1.msra.mxu0 %v11730_v9 }
 0x67a   : > { %2785 = vmatprep.subr.mxu0 %v11017_v5 }
 0x67b   : > { %2786 = vmatpush1.msra.mxu0 %v11740_v4 }
 0x67c   : > { %2787 = vmatprep.subr.mxu0 %v11017_v5 }
 0x67d   : > { %2788 = vmatpush1.msra.mxu0 %v11750_v1 }
 0x67e   : > { %2789 = vmatprep.subr.mxu0 %v11017_v5 }
 0x67f   : > { %2790 = vmatpush1.msra.mxu0 %v11760_v2 }
 0x680   : > { %2791 = vmatprep.subr.mxu0 %v11017_v5 }
 0x681   : > { %2792 = vmatpush1.msra.mxu0 %v11770_v0 }
 0x682   : > { %2793 = vmatprep.subr.mxu0 %v11017_v5 }
 0x683   : > { %2794 = vmatpush1.msra.mxu0 %v11780_v42 }
 0x684   : > { %2795 = vmatprep.subr.mxu0 %v11017_v5 }
 0x685   : > { %2796 = vmatpush1.msra.mxu0 %v11790_v16 }
 0x686   : > { %2811 = vmatprep.subr.mxu0 %v11017_v5 }
 0x687   : > { %8574 = vmatpush2.msk.msra.mxu0 %vm1362_vm6, %v11800_v24 }
 0x688   : > { %2813 = vmatprep.subr.mxu0 %v11017_v5 }
 0x689   : > { %2814 = vmatpush2.msra.mxu0 %v11812_v53 }
 0x68a   : > { %2815 = vmatprep.subr.mxu0 %v11017_v5 }
 0x68b   : > { %2816 = vmatpush2.msra.mxu0 %v11822_v44 }
 0x68c   : > { %2817 = vmatprep.subr.mxu0 %v11017_v5 }
 0x68d   : > { %2818 = vmatpush2.msra.mxu0 %v11832_v29 }
 0x68e   : > { %2819 = vmatprep.subr.mxu0 %v11017_v5 }
 0x68f   : > { %2820 = vmatpush2.msra.mxu0 %v11842_v19 }
 0x690   : > { %2821 = vmatprep.subr.mxu0 %v11017_v5 }
 0x691   : > { %2822 = vmatpush2.msra.mxu0 %v11850_v12 }
 0x692   : > { %2823 = vmatprep.subr.mxu0 %v11017_v5 }
 0x693   : > { %2824 = vmatpush2.msra.mxu0 %v11857_v13 }
 0x694   : > { %2825 = vmatprep.subr.mxu0 %v11017_v5 }
 0x695   : > { %2826 = vmatpush2.msra.mxu0 %v11864_v14 }
 0x696   : > { %2827 = vmatprep.subr.mxu0 %v11017_v5 }
 0x697   : > { %2828 = vmatpush2.msra.mxu0 %v11870_v58 }
 0x698   : > { %2830 = vmatmul.mubr.f32.vlgmr.msra.gmra.mxu0 %v8564_v40  ;;  %9935 = vmatprep.subr.mxu0 %v11017_v5 }
 0x699   : > { %8576 = vmatprep.mubr.msk.f32.mxu0 %vm1346_vm5, %v8567_v3  ;;  %9936 = vmatpush3.msra.mxu0 %v8616_v35  ;;  %v8627_v35 = vld [vmem:[%s15288_s2 + $0x2a8] sm:$0xff] }
 0x69a   : > { %9937 = vmatprep.subr.mxu0 %v11017_v5 }
 0x69b   : > { %9938 = vmatpush3.msra.mxu0 %v8615_v48  ;;  %v8626_v48 = vld [vmem:[%s15288_s2 + $0x2a0] sm:$0xff] }
 0x69c   : > { %2835 = vmatmul.mubr.f32.gmra.mxu0 %v8566_v33  ;;  %9939 = vmatprep.subr.mxu0 %v11017_v5 }
 0x69d   : > { %8577 = vmatprep.mubr.msk.f32.mxu0 %vm1346_vm5, %v8569_v34  ;;  %v8594_v34 = vld [vmem:[%s15288_s2 + $0x238] sm:$0xff] }
 0x6a0   : > { %2840 = vmatmul.mubr.f32.gmra.mxu0 %v8568_v36 }
 0x6a1   : > { %8578 = vmatprep.mubr.msk.f32.mxu0 %vm1346_vm5, %v8571_v37 }
 0x6a4   : > { %2845 = vmatmul.mubr.f32.gmra.mxu0 %v8570_v47  ;;  %v8593_v47 = vld [vmem:[%s15288_s2 + $0x230] sm:$0xff] }
 0x6a5   : > { %8579 = vmatprep.mubr.msk.f32.mxu0 %vm1346_vm5, %v8573_v45  ;;  %v8596_v45 = vld [vmem:[%s15288_s2 + $0x248] sm:$0xff] }
 0x6a8   : > { %2850 = vmatmul.mubr.f32.gmra.mxu0 %v8572_v52  ;;  %v8595_v52 = vld [vmem:[%s15288_s2 + $0x240] sm:$0xff] }
 0x6a9   : > { %9951 = vmatprep.mubr.msk.f32.mxu0 %vm11018_vm1, %v11017_v5 }
 0x726   : > { %v2710_v60 = vpop.f32.mrf.mxu0 }
 0x727   : > { %v12729_v57 = vadd.f32 %v2710_v60, %v12581_v8  ;;  %v8614_v60 = vld [vmem:[%s15289_s3 + $0x1e8] sm:$0xff] }
 0x728   : > { %v9891_v6 = vpop.f32.mrf.mxu0  ;;  %9940 = vmatpush3.msra.mxu0 %v8614_v60  ;;  %v8629_v60 = vld [vmem:[%s15288_s2 + $0x2b8] sm:$0xff] }
 0x729   : > { %v8613_v6 = vld [vmem:[%s15289_s3 + $0x1e0] sm:$0xff]  ;;  %9941 = vmatprep.subr.mxu0 %v11017_v5 }
 0x72a   : > { %v2715_v49 = vpop.f32.mrf.mxu0  ;;  %9942 = vmatpush3.msra.mxu0 %v8613_v6  ;;  %v8628_v6 = vld [vmem:[%s15288_s2 + $0x2b0] sm:$0xff] }
 0x72b   : > { %v12732_v41 = vadd.f32 %v2715_v49, %v12584_v20  ;;  %v8612_v49 = vld [vmem:[%s15289_s3 + $0x1d8] sm:$0xff]  ;;  %9943 = vmatprep.subr.mxu0 %v11017_v5 }
 0x72c   : > { %v9894_v51 = vpop.f32.mrf.mxu0  ;;  %9944 = vmatpush3.msra.mxu0 %v8612_v49  ;;  %v8631_v49 = vld [vmem:[%s15288_s2 + $0x2c8] sm:$0xf] }
 0x72d   : > { %v8611_v51 = vld [vmem:[%s15289_s3 + $0x1d0] sm:$0xff]  ;;  %9945 = vmatprep.subr.mxu0 %v11017_v5 }
 0x72e   : > { %v2720_v54 = vpop.f32.mrf.mxu0  ;;  %9946 = vmatpush3.msra.mxu0 %v8611_v51  ;;  %v8630_v51 = vld [vmem:[%s15288_s2 + $0x2c0] sm:$0xf] }
 0x72f   : > { %v12735_v56 = vadd.f32 %v2720_v54, %v12587_v38  ;;  %v8610_v54 = vld [vmem:[%s15289_s3 + $0x1c8] sm:$0xff]  ;;  %9947 = vmatprep.subr.mxu0 %v11017_v5 }
 0x730   : > { %v9897_v18 = vpop.f32.mrf.mxu0  ;;  %9948 = vmatpush3.msra.mxu0 %v8610_v54  ;;  %v8645_v54 = vld [vmem:[%s15289_s3 + $0x238] sm:$0xff] }
 0x731   : > { %v8609_v18 = vld [vmem:[%s15289_s3 + $0x1c0] sm:$0xff]  ;;  %9949 = vmatprep.subr.mxu0 %v11017_v5 }
 0x732   : > { %v2725_v63 = vpop.f32.mrf.mxu0  ;;  %9950 = vmatpush3.msra.mxu0 %v8609_v18  ;;  %v8644_v18 = vld [vmem:[%s15289_s3 + $0x230] sm:$0xff] }
 0x733   : > { %v12738_v27 = vadd.f32 %v2725_v63, %v12590_v23  ;;  %3235 = vmatprep.subr.mxu0 %v11017_v5 }
 0x734   : > { %v9900_v30 = vpop.f32.mrf.mxu0 }
 0x736   : > { %v2730_v62 = vpop.f32.mrf.mxu0 }
 0x737   : > { %v12741_v8 = vadd.f32 %v2730_v62, %v12593_v39 }
 0x738   : > { %v9903_v31 = vpop.f32.mrf.mxu0 }
 0x758   : > { %v2831_v22 = vpop.f32.mrf.mxu0 }
 0x759   : > { %9921 = vmatmul.mubr.msk.f32.vlgmr.msra.gmra.mxu1 %vm932_vm3, %v2831_v22 }
 0x75a   : > { %3001 = vmatpush1.msra.mxu1 %v11642_v25  ;;  %v2833_v20 = vpop.f32.mrf.mxu0  ;;  %9923 = vmatprep.mubr.msk.f32.mxu1 %vm11018_vm1, %v11017_v5 }
 0x75b   : > { %3002 = vmatprep.subr.mxu1 %v11017_v5 }
 0x75c   : > { %3003 = vmatpush1.msra.mxu1 %v11650_v26  ;;  %v2836_v38 = vpop.f32.mrf.mxu0 }
 0x75d   : > { %3004 = vmatprep.subr.mxu1 %v11017_v5  ;;  %9924 = vmatmul.mubr.msk.f32.gmra.mxu1 %vm932_vm3, %v2836_v38 }
 0x75e   : > { %3005 = vmatpush1.msra.mxu1 %v11660_v10  ;;  %v2838_v23 = vpop.f32.mrf.mxu0  ;;  %9926 = vmatprep.mubr.msk.f32.mxu1 %vm11018_vm1, %v11017_v5 }
 0x75f   : > { %3006 = vmatprep.subr.mxu1 %v11017_v5 }
 0x760   : > { %3007 = vmatpush1.msra.mxu1 %v11670_v59  ;;  %v2841_v39 = vpop.f32.mrf.mxu0 }
 0x761   : > { %3008 = vmatprep.subr.mxu1 %v11017_v5  ;;  %9927 = vmatmul.mubr.msk.f32.gmra.mxu1 %vm932_vm3, %v2841_v39 }
 0x762   : > { %3009 = vmatpush1.msra.mxu1 %v11680_v50  ;;  %v2843_v40 = vpop.f32.mrf.mxu0  ;;  %9929 = vmatprep.mubr.msk.f32.mxu1 %vm11018_vm1, %v11017_v5 }
 0x763   : > { %3010 = vmatprep.subr.mxu1 %v11017_v5 }
 0x764   : > { %3011 = vmatpush1.msra.mxu1 %v11690_v43  ;;  %v2846_v3 = vpop.f32.mrf.mxu0 }
 0x765   : > { %3012 = vmatprep.subr.mxu1 %v11017_v5  ;;  %9930 = vmatmul.mubr.msk.f32.gmra.mxu1 %vm932_vm3, %v2846_v3 }
 0x766   : > { %3013 = vmatpush1.msra.mxu1 %v11700_v28  ;;  %v2848_v33 = vpop.f32.mrf.mxu0  ;;  %9932 = vmatprep.mubr.msk.f32.mxu1 %vm11018_vm1, %v11017_v5 }
 0x767   : > { %3014 = vmatprep.subr.mxu1 %v11017_v5 }
 0x768   : > { %3015 = vmatpush1.msra.mxu1 %v11710_v21  ;;  %v2851_v36 = vpop.f32.mrf.mxu0 }
 0x769   : > { %3016 = vmatprep.subr.mxu1 %v11017_v5  ;;  %9933 = vmatmul.mubr.msk.f32.gmra.mxu1 %vm932_vm3, %v2851_v36 }
 0x76a   : > { %3017 = vmatpush1.msra.mxu1 %v11720_v15  ;;  %8604 = vmatprep.mubr.msk.f32.mxu1 %vm1346_vm5, %v8594_v34  ;;  %v2853_v37 = vpop.f32.mrf.mxu0 }
 0x76b   : > { %3018 = vmatprep.subr.mxu1 %v11017_v5 }
 0x76c   : > { %3019 = vmatpush1.msra.mxu1 %v11730_v9 }
 0x76d   : > { %3020 = vmatprep.subr.mxu1 %v11017_v5 }
 0x76e   : > { %3021 = vmatpush1.msra.mxu1 %v11740_v4 }
 0x76f   : > { %3022 = vmatprep.subr.mxu1 %v11017_v5 }
 0x770   : > { %3023 = vmatpush1.msra.mxu1 %v11750_v1 }
 0x771   : > { %3024 = vmatprep.subr.mxu1 %v11017_v5 }
 0x772   : > { %3025 = vmatpush1.msra.mxu1 %v11760_v2 }
 0x773   : > { %3026 = vmatprep.subr.mxu1 %v11017_v5 }
 0x774   : > { %3027 = vmatpush1.msra.mxu1 %v11770_v0 }
 0x775   : > { %3028 = vmatprep.subr.mxu1 %v11017_v5 }
 0x776   : > { %3029 = vmatpush1.msra.mxu1 %v11780_v42 }
 0x777   : > { %3030 = vmatprep.subr.mxu1 %v11017_v5 }
 0x778   : > { %3031 = vmatpush1.msra.mxu1 %v11790_v16 }
 0x779   : > { %3046 = vmatprep.subr.mxu1 %v11017_v5 }
 0x77a   : > { %8603 = vmatpush2.msk.msra.mxu1 %vm1362_vm6, %v11800_v24 }
 0x77b   : > { %3048 = vmatprep.subr.mxu1 %v11017_v5 }
 0x77c   : > { %3049 = vmatpush2.msra.mxu1 %v11812_v53 }
 0x77d   : > { %3050 = vmatprep.subr.mxu1 %v11017_v5 }
 0x77e   : > { %3051 = vmatpush2.msra.mxu1 %v11822_v44 }
 0x77f   : > { %3052 = vmatprep.subr.mxu1 %v11017_v5 }
 0x780   : > { %3053 = vmatpush2.msra.mxu1 %v11832_v29 }
 0x781   : > { %3054 = vmatprep.subr.mxu1 %v11017_v5 }
 0x782   : > { %3055 = vmatpush2.msra.mxu1 %v11842_v19 }
 0x783   : > { %3056 = vmatprep.subr.mxu1 %v11017_v5 }
 0x784   : > { %3057 = vmatpush2.msra.mxu1 %v11850_v12 }
 0x785   : > { %3058 = vmatprep.subr.mxu1 %v11017_v5 }
 0x786   : > { %3059 = vmatpush2.msra.mxu1 %v11857_v13 }
 0x787   : > { %3060 = vmatprep.subr.mxu1 %v11017_v5 }
 0x788   : > { %3061 = vmatpush2.msra.mxu1 %v11864_v14 }
 0x789   : > { %3062 = vmatprep.subr.mxu1 %v11017_v5 }
 0x78a   : > { %3063 = vmatpush2.msra.mxu1 %v11870_v58 }
 0x78b   : > { %3065 = vmatmul.mubr.f32.vlgmr.msra.gmra.mxu1 %v8593_v47  ;;  %9966 = vmatprep.subr.mxu1 %v11017_v5 }
 0x78c   : > { %8605 = vmatprep.mubr.msk.f32.mxu1 %vm1346_vm5, %v8596_v45  ;;  %9967 = vmatpush3.msra.mxu1 %v8645_v54  ;;  %v8656_v54 = vld [vmem:[%s15288_s2 + $0x2f8] sm:$0xff] }
 0x78d   : > { %9968 = vmatprep.subr.mxu1 %v11017_v5 }
 0x78e   : > { %9969 = vmatpush3.msra.mxu1 %v8644_v18  ;;  %v8655_v18 = vld [vmem:[%s15288_s2 + $0x2f0] sm:$0xff] }
 0x78f   : > { %3070 = vmatmul.mubr.f32.gmra.mxu1 %v8595_v52  ;;  %9970 = vmatprep.subr.mxu1 %v11017_v5 }
 0x790   : > { %8606 = vmatprep.mubr.msk.f32.mxu1 %vm1346_vm5, %v8598_v11  ;;  %v8623_v11 = vld [vmem:[%s15288_s2 + $0x288] sm:$0xff] }
 0x793   : > { %3075 = vmatmul.mubr.f32.gmra.mxu1 %v8597_v61 }
 0x794   : > { %8607 = vmatprep.mubr.msk.f32.mxu1 %vm1346_vm5, %v8600_v7 }
 0x797   : > { %3080 = vmatmul.mubr.f32.gmra.mxu1 %v8599_v17  ;;  %v8622_v17 = vld [vmem:[%s15288_s2 + $0x280] sm:$0xff] }
 0x798   : > { %8608 = vmatprep.mubr.msk.f32.mxu1 %vm1346_vm5, %v8602_v46  ;;  %v8625_v46 = vld [vmem:[%s15288_s2 + $0x298] sm:$0xff] }
 0x79b   : > { %3085 = vmatmul.mubr.f32.gmra.mxu1 %v8601_v32  ;;  %v8624_v32 = vld [vmem:[%s15288_s2 + $0x290] sm:$0xff] }
 0x79c   : > { %9982 = vmatprep.mubr.msk.f32.mxu1 %vm11018_vm1, %v11017_v5 }
 0x819   : > { %v2945_v63 = vpop.f32.mrf.mxu1 }
 0x81a   : > { %v12877_v30 = vadd.f32 %v2945_v63, %v12729_v57  ;;  %v8643_v63 = vld [vmem:[%s15289_s3 + $0x228] sm:$0xff] }
 0x81b   : > { %v9922_v62 = vpop.f32.mrf.mxu1  ;;  %9971 = vmatpush3.msra.mxu1 %v8643_v63  ;;  %v8658_v63 = vld [vmem:[%s15288_s2 + $0x308] sm:$0xff] }
 0x81c   : > { %v8642_v62 = vld [vmem:[%s15289_s3 + $0x220] sm:$0xff]  ;;  %9972 = vmatprep.subr.mxu1 %v11017_v5 }
 0x81d   : > { %v2950_v31 = vpop.f32.mrf.mxu1  ;;  %9973 = vmatpush3.msra.mxu1 %v8642_v62  ;;  %v8657_v62 = vld [vmem:[%s15288_s2 + $0x300] sm:$0xff] }
 0x81e   : > { %v12880_v22 = vadd.f32 %v2950_v31, %v12732_v41  ;;  %v8641_v31 = vld [vmem:[%s15289_s3 + $0x218] sm:$0xff]  ;;  %9974 = vmatprep.subr.mxu1 %v11017_v5 }
 0x81f   : > { %v9925_v20 = vpop.f32.mrf.mxu1  ;;  %9975 = vmatpush3.msra.mxu1 %v8641_v31  ;;  %v8660_v31 = vld [vmem:[%s15288_s2 + $0x318] sm:$0xf] }
 0x820   : > { %v8640_v20 = vld [vmem:[%s15289_s3 + $0x210] sm:$0xff]  ;;  %9976 = vmatprep.subr.mxu1 %v11017_v5 }
 0x821   : > { %v2955_v38 = vpop.f32.mrf.mxu1  ;;  %9977 = vmatpush3.msra.mxu1 %v8640_v20  ;;  %v8659_v20 = vld [vmem:[%s15288_s2 + $0x310] sm:$0xf] }
 0x822   : > { %v12883_v23 = vadd.f32 %v2955_v38, %v12735_v56  ;;  %v8639_v38 = vld [vmem:[%s15289_s3 + $0x208] sm:$0xff]  ;;  %9978 = vmatprep.subr.mxu1 %v11017_v5 }
 0x823   : > { %v9928_v39 = vpop.f32.mrf.mxu1  ;;  %9979 = vmatpush3.msra.mxu1 %v8639_v38  ;;  %v8674_v38 = vld [vmem:[%s15289_s3 + $0x278] sm:$0xff] }
 0x824   : > { %v8638_v39 = vld [vmem:[%s15289_s3 + $0x200] sm:$0xff]  ;;  %9980 = vmatprep.subr.mxu1 %v11017_v5 }
 0x825   : > { %v2960_v40 = vpop.f32.mrf.mxu1  ;;  %9981 = vmatpush3.msra.mxu1 %v8638_v39  ;;  %v8673_v39 = vld [vmem:[%s15289_s3 + $0x270] sm:$0xff] }
 0x826   : > { %v12886_v3 = vadd.f32 %v2960_v40, %v12738_v27  ;;  %3470 = vmatprep.subr.mxu1 %v11017_v5 }
 0x827   : > { %v9931_v33 = vpop.f32.mrf.mxu1 }
 0x829   : > { %v2965_v34 = vpop.f32.mrf.mxu1 }
 0x82a   : > { %v12889_v57 = vadd.f32 %v2965_v34, %v12741_v8 }
 0x82b   : > { %v9934_v36 = vpop.f32.mrf.mxu1 }
 0x84b   : > { %v3066_v37 = vpop.f32.mrf.mxu1 }
 0x84c   : > { %9952 = vmatmul.mubr.msk.f32.vlgmr.msra.gmra.mxu0 %vm932_vm3, %v3066_v37 }
 0x84d   : > { %3236 = vmatpush1.msra.mxu0 %v11642_v25  ;;  %v3068_v41 = vpop.f32.mrf.mxu1  ;;  %9954 = vmatprep.mubr.msk.f32.mxu0 %vm11018_vm1, %v11017_v5 }
 0x84e   : > { %3237 = vmatprep.subr.mxu0 %v11017_v5 }
 0x84f   : > { %3238 = vmatpush1.msra.mxu0 %v11650_v26  ;;  %v3071_v56 = vpop.f32.mrf.mxu1 }
 0x850   : > { %3239 = vmatprep.subr.mxu0 %v11017_v5  ;;  %9955 = vmatmul.mubr.msk.f32.gmra.mxu0 %vm932_vm3, %v3071_v56 }
 0x851   : > { %3240 = vmatpush1.msra.mxu0 %v11660_v10  ;;  %v3073_v27 = vpop.f32.mrf.mxu1  ;;  %9957 = vmatprep.mubr.msk.f32.mxu0 %vm11018_vm1, %v11017_v5 }
 0x852   : > { %3241 = vmatprep.subr.mxu0 %v11017_v5 }
 0x853   : > { %3242 = vmatpush1.msra.mxu0 %v11670_v59  ;;  %v3076_v8 = vpop.f32.mrf.mxu1 }
 0x854   : > { %3243 = vmatprep.subr.mxu0 %v11017_v5  ;;  %9958 = vmatmul.mubr.msk.f32.gmra.mxu0 %vm932_vm3, %v3076_v8 }
 0x855   : > { %3244 = vmatpush1.msra.mxu0 %v11680_v50  ;;  %v3078_v47 = vpop.f32.mrf.mxu1  ;;  %9960 = vmatprep.mubr.msk.f32.mxu0 %vm11018_vm1, %v11017_v5 }
 0x856   : > { %3245 = vmatprep.subr.mxu0 %v11017_v5 }
 0x857   : > { %3246 = vmatpush1.msra.mxu0 %v11690_v43  ;;  %v3081_v45 = vpop.f32.mrf.mxu1 }
 0x858   : > { %3247 = vmatprep.subr.mxu0 %v11017_v5  ;;  %9961 = vmatmul.mubr.msk.f32.gmra.mxu0 %vm932_vm3, %v3081_v45 }
 0x859   : > { %3248 = vmatpush1.msra.mxu0 %v11700_v28  ;;  %v3083_v52 = vpop.f32.mrf.mxu1  ;;  %9963 = vmatprep.mubr.msk.f32.mxu0 %vm11018_vm1, %v11017_v5 }
 0x85a   : > { %3249 = vmatprep.subr.mxu0 %v11017_v5 }
 0x85b   : > { %3250 = vmatpush1.msra.mxu0 %v11710_v21  ;;  %v3086_v61 = vpop.f32.mrf.mxu1 }
 0x85c   : > { %3251 = vmatprep.subr.mxu0 %v11017_v5  ;;  %9964 = vmatmul.mubr.msk.f32.gmra.mxu0 %vm932_vm3, %v3086_v61 }
 0x85d   : > { %3252 = vmatpush1.msra.mxu0 %v11720_v15  ;;  %8633 = vmatprep.mubr.msk.f32.mxu0 %vm1346_vm5, %v8623_v11  ;;  %v3088_v7 = vpop.f32.mrf.mxu1 }
 0x85e   : > { %3253 = vmatprep.subr.mxu0 %v11017_v5 }
 0x85f   : > { %3254 = vmatpush1.msra.mxu0 %v11730_v9 }
 0x860   : > { %3255 = vmatprep.subr.mxu0 %v11017_v5 }
 0x861   : > { %3256 = vmatpush1.msra.mxu0 %v11740_v4 }
 0x862   : > { %3257 = vmatprep.subr.mxu0 %v11017_v5 }
 0x863   : > { %3258 = vmatpush1.msra.mxu0 %v11750_v1 }
 0x864   : > { %3259 = vmatprep.subr.mxu0 %v11017_v5 }
 0x865   : > { %3260 = vmatpush1.msra.mxu0 %v11760_v2 }
 0x866   : > { %3261 = vmatprep.subr.mxu0 %v11017_v5 }
 0x867   : > { %3262 = vmatpush1.msra.mxu0 %v11770_v0 }
 0x868   : > { %3263 = vmatprep.subr.mxu0 %v11017_v5 }
 0x869   : > { %3264 = vmatpush1.msra.mxu0 %v11780_v42 }
 0x86a   : > { %3265 = vmatprep.subr.mxu0 %v11017_v5 }
 0x86b   : > { %3266 = vmatpush1.msra.mxu0 %v11790_v16 }
 0x86c   : > { %3281 = vmatprep.subr.mxu0 %v11017_v5 }
 0x86d   : > { %8632 = vmatpush2.msk.msra.mxu0 %vm1362_vm6, %v11800_v24 }
 0x86e   : > { %3283 = vmatprep.subr.mxu0 %v11017_v5 }
 0x86f   : > { %3284 = vmatpush2.msra.mxu0 %v11812_v53 }
 0x870   : > { %3285 = vmatprep.subr.mxu0 %v11017_v5 }
 0x871   : > { %3286 = vmatpush2.msra.mxu0 %v11822_v44 }
 0x872   : > { %3287 = vmatprep.subr.mxu0 %v11017_v5 }
 0x873   : > { %3288 = vmatpush2.msra.mxu0 %v11832_v29 }
 0x874   : > { %3289 = vmatprep.subr.mxu0 %v11017_v5 }
 0x875   : > { %3290 = vmatpush2.msra.mxu0 %v11842_v19 }
 0x876   : > { %3291 = vmatprep.subr.mxu0 %v11017_v5 }
 0x877   : > { %3292 = vmatpush2.msra.mxu0 %v11850_v12 }
 0x878   : > { %3293 = vmatprep.subr.mxu0 %v11017_v5 }
 0x879   : > { %3294 = vmatpush2.msra.mxu0 %v11857_v13 }
 0x87a   : > { %3295 = vmatprep.subr.mxu0 %v11017_v5 }
 0x87b   : > { %3296 = vmatpush2.msra.mxu0 %v11864_v14 }
 0x87c   : > { %3297 = vmatprep.subr.mxu0 %v11017_v5 }
 0x87d   : > { %3298 = vmatpush2.msra.mxu0 %v11870_v58 }
 0x87e   : > { %3300 = vmatmul.mubr.f32.vlgmr.msra.gmra.mxu0 %v8622_v17  ;;  %9997 = vmatprep.subr.mxu0 %v11017_v5 }
 0x87f   : > { %8634 = vmatprep.mubr.msk.f32.mxu0 %vm1346_vm5, %v8625_v46  ;;  %9998 = vmatpush3.msra.mxu0 %v8674_v38  ;;  %v8685_v38 = vld [vmem:[%s15288_s2 + $0x348] sm:$0xff] }
 0x880   : > { %9999 = vmatprep.subr.mxu0 %v11017_v5 }
 0x881   : > { %10000 = vmatpush3.msra.mxu0 %v8673_v39  ;;  %v8684_v39 = vld [vmem:[%s15288_s2 + $0x340] sm:$0xff] }
 0x882   : > { %3305 = vmatmul.mubr.f32.gmra.mxu0 %v8624_v32  ;;  %10001 = vmatprep.subr.mxu0 %v11017_v5 }
 0x883   : > { %8635 = vmatprep.mubr.msk.f32.mxu0 %vm1346_vm5, %v8627_v35  ;;  %v8652_v35 = vld [vmem:[%s15288_s2 + $0x2d8] sm:$0xff] }
 0x886   : > { %3310 = vmatmul.mubr.f32.gmra.mxu0 %v8626_v48 }
 0x887   : > { %8636 = vmatprep.mubr.msk.f32.mxu0 %vm1346_vm5, %v8629_v60 }
 0x88a   : > { %3315 = vmatmul.mubr.f32.gmra.mxu0 %v8628_v6  ;;  %v8651_v6 = vld [vmem:[%s15288_s2 + $0x2d0] sm:$0xff] }
 0x88b   : > { %8637 = vmatprep.mubr.msk.f32.mxu0 %vm1346_vm5, %v8631_v49  ;;  %v8654_v49 = vld [vmem:[%s15288_s2 + $0x2e8] sm:$0xff] }
 0x88e   : > { %3320 = vmatmul.mubr.f32.gmra.mxu0 %v8630_v51  ;;  %v8653_v51 = vld [vmem:[%s15288_s2 + $0x2e0] sm:$0xff] }
 0x88f   : > { %10013 = vmatprep.mubr.msk.f32.mxu0 %vm11018_vm1, %v11017_v5 }
 0x90c   : > { %v3180_v40 = vpop.f32.mrf.mxu0 }
 0x90d   : > { %v13025_v33 = vadd.f32 %v3180_v40, %v12877_v30  ;;  %v8672_v40 = vld [vmem:[%s15289_s3 + $0x268] sm:$0xff] }
 0x90e   : > { %v9953_v34 = vpop.f32.mrf.mxu0  ;;  %10002 = vmatpush3.msra.mxu0 %v8672_v40  ;;  %v8687_v40 = vld [vmem:[%s15288_s2 + $0x358] sm:$0xff] }
 0x90f   : > { %v8671_v34 = vld [vmem:[%s15289_s3 + $0x260] sm:$0xff]  ;;  %10003 = vmatprep.subr.mxu0 %v11017_v5 }
 0x910   : > { %v3185_v36 = vpop.f32.mrf.mxu0  ;;  %10004 = vmatpush3.msra.mxu0 %v8671_v34  ;;  %v8686_v34 = vld [vmem:[%s15288_s2 + $0x350] sm:$0xff] }
 0x911   : > { %v13028_v37 = vadd.f32 %v3185_v36, %v12880_v22  ;;  %v8670_v36 = vld [vmem:[%s15289_s3 + $0x258] sm:$0xff]  ;;  %10005 = vmatprep.subr.mxu0 %v11017_v5 }
 0x912   : > { %v9956_v41 = vpop.f32.mrf.mxu0  ;;  %10006 = vmatpush3.msra.mxu0 %v8670_v36  ;;  %v8689_v36 = vld [vmem:[%s15288_s2 + $0x368] sm:$0xf] }
 0x913   : > { %v8669_v41 = vld [vmem:[%s15289_s3 + $0x250] sm:$0xff]  ;;  %10007 = vmatprep.subr.mxu0 %v11017_v5 }
 0x914   : > { %v3190_v56 = vpop.f32.mrf.mxu0  ;;  %10008 = vmatpush3.msra.mxu0 %v8669_v41  ;;  %v8688_v41 = vld [vmem:[%s15288_s2 + $0x360] sm:$0xf] }
 0x915   : > { %v13031_v27 = vadd.f32 %v3190_v56, %v12883_v23  ;;  %v8668_v56 = vld [vmem:[%s15289_s3 + $0x248] sm:$0xff]  ;;  %10009 = vmatprep.subr.mxu0 %v11017_v5 }
 0x916   : > { %v9959_v8 = vpop.f32.mrf.mxu0  ;;  %10010 = vmatpush3.msra.mxu0 %v8668_v56  ;;  %v8703_v56 = vld [vmem:[%s15289_s3 + $0x2b8] sm:$0xff] }
 0x917   : > { %v8667_v8 = vld [vmem:[%s15289_s3 + $0x240] sm:$0xff]  ;;  %10011 = vmatprep.subr.mxu0 %v11017_v5 }
 0x918   : > { %v3195_v47 = vpop.f32.mrf.mxu0  ;;  %10012 = vmatpush3.msra.mxu0 %v8667_v8  ;;  %v8702_v8 = vld [vmem:[%s15289_s3 + $0x2b0] sm:$0xff] }
 0x919   : > { %v13034_v45 = vadd.f32 %v3195_v47, %v12886_v3  ;;  %3705 = vmatprep.subr.mxu0 %v11017_v5 }
 0x91a   : > { %v9962_v52 = vpop.f32.mrf.mxu0 }
 0x91c   : > { %v3200_v11 = vpop.f32.mrf.mxu0 }
 0x91d   : > { %v13037_v30 = vadd.f32 %v3200_v11, %v12889_v57 }
 0x91e   : > { %v9965_v61 = vpop.f32.mrf.mxu0 }
 0x93e   : > { %v3301_v7 = vpop.f32.mrf.mxu0 }
 0x93f   : > { %9983 = vmatmul.mubr.msk.f32.vlgmr.msra.gmra.mxu1 %vm932_vm3, %v3301_v7 }
 0x940   : > { %3471 = vmatpush1.msra.mxu1 %v11642_v25  ;;  %v3303_v22 = vpop.f32.mrf.mxu0  ;;  %9985 = vmatprep.mubr.msk.f32.mxu1 %vm11018_vm1, %v11017_v5 }
 0x941   : > { %3472 = vmatprep.subr.mxu1 %v11017_v5 }
 0x942   : > { %3473 = vmatpush1.msra.mxu1 %v11650_v26  ;;  %v3306_v23 = vpop.f32.mrf.mxu0 }
 0x943   : > { %3474 = vmatprep.subr.mxu1 %v11017_v5  ;;  %9986 = vmatmul.mubr.msk.f32.gmra.mxu1 %vm932_vm3, %v3306_v23 }
 0x944   : > { %3475 = vmatpush1.msra.mxu1 %v11660_v10  ;;  %v3308_v3 = vpop.f32.mrf.mxu0  ;;  %9988 = vmatprep.mubr.msk.f32.mxu1 %vm11018_vm1, %v11017_v5 }
 0x945   : > { %3476 = vmatprep.subr.mxu1 %v11017_v5 }
 0x946   : > { %3477 = vmatpush1.msra.mxu1 %v11670_v59  ;;  %v3311_v57 = vpop.f32.mrf.mxu0 }
 0x947   : > { %3478 = vmatprep.subr.mxu1 %v11017_v5  ;;  %9989 = vmatmul.mubr.msk.f32.gmra.mxu1 %vm932_vm3, %v3311_v57 }
 0x948   : > { %3479 = vmatpush1.msra.mxu1 %v11680_v50  ;;  %v3313_v17 = vpop.f32.mrf.mxu0  ;;  %9991 = vmatprep.mubr.msk.f32.mxu1 %vm11018_vm1, %v11017_v5 }
 0x949   : > { %3480 = vmatprep.subr.mxu1 %v11017_v5 }
 0x94a   : > { %3481 = vmatpush1.msra.mxu1 %v11690_v43  ;;  %v3316_v46 = vpop.f32.mrf.mxu0 }
 0x94b   : > { %3482 = vmatprep.subr.mxu1 %v11017_v5  ;;  %9992 = vmatmul.mubr.msk.f32.gmra.mxu1 %vm932_vm3, %v3316_v46 }
 0x94c   : > { %3483 = vmatpush1.msra.mxu1 %v11700_v28  ;;  %v3318_v32 = vpop.f32.mrf.mxu0  ;;  %9994 = vmatprep.mubr.msk.f32.mxu1 %vm11018_vm1, %v11017_v5 }
 0x94d   : > { %3484 = vmatprep.subr.mxu1 %v11017_v5 }
 0x94e   : > { %3485 = vmatpush1.msra.mxu1 %v11710_v21  ;;  %v3321_v48 = vpop.f32.mrf.mxu0 }
 0x94f   : > { %3486 = vmatprep.subr.mxu1 %v11017_v5  ;;  %9995 = vmatmul.mubr.msk.f32.gmra.mxu1 %vm932_vm3, %v3321_v48 }
 0x950   : > { %3487 = vmatpush1.msra.mxu1 %v11720_v15  ;;  %8662 = vmatprep.mubr.msk.f32.mxu1 %vm1346_vm5, %v8652_v35  ;;  %v3323_v60 = vpop.f32.mrf.mxu0 }
 0x951   : > { %3488 = vmatprep.subr.mxu1 %v11017_v5 }
 0x952   : > { %3489 = vmatpush1.msra.mxu1 %v11730_v9 }
 0x953   : > { %3490 = vmatprep.subr.mxu1 %v11017_v5 }
 0x954   : > { %3491 = vmatpush1.msra.mxu1 %v11740_v4 }
 0x955   : > { %3492 = vmatprep.subr.mxu1 %v11017_v5 }
 0x956   : > { %3493 = vmatpush1.msra.mxu1 %v11750_v1 }
 0x957   : > { %3494 = vmatprep.subr.mxu1 %v11017_v5 }
 0x958   : > { %3495 = vmatpush1.msra.mxu1 %v11760_v2 }
 0x959   : > { %3496 = vmatprep.subr.mxu1 %v11017_v5 }
 0x95a   : > { %3497 = vmatpush1.msra.mxu1 %v11770_v0 }
 0x95b   : > { %3498 = vmatprep.subr.mxu1 %v11017_v5 }
 0x95c   : > { %3499 = vmatpush1.msra.mxu1 %v11780_v42 }
 0x95d   : > { %3500 = vmatprep.subr.mxu1 %v11017_v5 }
 0x95e   : > { %3501 = vmatpush1.msra.mxu1 %v11790_v16 }
 0x95f   : > { %3516 = vmatprep.subr.mxu1 %v11017_v5 }
 0x960   : > { %8661 = vmatpush2.msk.msra.mxu1 %vm1362_vm6, %v11800_v24 }
 0x961   : > { %3518 = vmatprep.subr.mxu1 %v11017_v5 }
 0x962   : > { %3519 = vmatpush2.msra.mxu1 %v11812_v53 }
 0x963   : > { %3520 = vmatprep.subr.mxu1 %v11017_v5 }
 0x964   : > { %3521 = vmatpush2.msra.mxu1 %v11822_v44 }
 0x965   : > { %3522 = vmatprep.subr.mxu1 %v11017_v5 }
 0x966   : > { %3523 = vmatpush2.msra.mxu1 %v11832_v29 }
 0x967   : > { %3524 = vmatprep.subr.mxu1 %v11017_v5 }
 0x968   : > { %3525 = vmatpush2.msra.mxu1 %v11842_v19 }
 0x969   : > { %3526 = vmatprep.subr.mxu1 %v11017_v5 }
 0x96a   : > { %3527 = vmatpush2.msra.mxu1 %v11850_v12 }
 0x96b   : > { %3528 = vmatprep.subr.mxu1 %v11017_v5 }
 0x96c   : > { %3529 = vmatpush2.msra.mxu1 %v11857_v13 }
 0x96d   : > { %3530 = vmatprep.subr.mxu1 %v11017_v5 }
 0x96e   : > { %3531 = vmatpush2.msra.mxu1 %v11864_v14 }
 0x96f   : > { %3532 = vmatprep.subr.mxu1 %v11017_v5 }
 0x970   : > { %3533 = vmatpush2.msra.mxu1 %v11870_v58 }
 0x971   : > { %3535 = vmatmul.mubr.f32.vlgmr.msra.gmra.mxu1 %v8651_v6  ;;  %10028 = vmatprep.subr.mxu1 %v11017_v5 }
 0x972   : > { %8663 = vmatprep.mubr.msk.f32.mxu1 %vm1346_vm5, %v8654_v49  ;;  %10029 = vmatpush3.msra.mxu1 %v8703_v56  ;;  %v8714_v56 = vld [vmem:[%s15288_s2 + $0x398] sm:$0xff] }
 0x973   : > { %10030 = vmatprep.subr.mxu1 %v11017_v5 }
 0x974   : > { %10031 = vmatpush3.msra.mxu1 %v8702_v8  ;;  %v8713_v8 = vld [vmem:[%s15288_s2 + $0x390] sm:$0xff] }
 0x975   : > { %3540 = vmatmul.mubr.f32.gmra.mxu1 %v8653_v51  ;;  %10032 = vmatprep.subr.mxu1 %v11017_v5 }
 0x976   : > { %8664 = vmatprep.mubr.msk.f32.mxu1 %vm1346_vm5, %v8656_v54  ;;  %v8681_v54 = vld [vmem:[%s15288_s2 + $0x328] sm:$0xff] }
 0x979   : > { %3545 = vmatmul.mubr.f32.gmra.mxu1 %v8655_v18 }
 0x97a   : > { %8665 = vmatprep.mubr.msk.f32.mxu1 %vm1346_vm5, %v8658_v63 }
 0x97d   : > { %3550 = vmatmul.mubr.f32.gmra.mxu1 %v8657_v62  ;;  %v8680_v62 = vld [vmem:[%s15288_s2 + $0x320] sm:$0xff] }
 0x97e   : > { %8666 = vmatprep.mubr.msk.f32.mxu1 %vm1346_vm5, %v8660_v31  ;;  %v8683_v31 = vld [vmem:[%s15288_s2 + $0x338] sm:$0xff] }
 0x981   : > { %3555 = vmatmul.mubr.f32.gmra.mxu1 %v8659_v20  ;;  %v8682_v20 = vld [vmem:[%s15288_s2 + $0x330] sm:$0xff] }
 0x982   : > { %10044 = vmatprep.mubr.msk.f32.mxu1 %vm11018_vm1, %v11017_v5 }
 0x9ff   : > { %v3415_v47 = vpop.f32.mrf.mxu1 }
 0xa00   : > { %v13173_v52 = vadd.f32 %v3415_v47, %v13025_v33  ;;  %v8701_v47 = vld [vmem:[%s15289_s3 + $0x2a8] sm:$0xff] }
 0xa01   : > { %v9984_v11 = vpop.f32.mrf.mxu1  ;;  %10033 = vmatpush3.msra.mxu1 %v8701_v47  ;;  %v8716_v47 = vld [vmem:[%s15288_s2 + $0x3a8] sm:$0xff] }
 0xa02   : > { %v8700_v11 = vld [vmem:[%s15289_s3 + $0x2a0] sm:$0xff]  ;;  %10034 = vmatprep.subr.mxu1 %v11017_v5 }
 0xa03   : > { %v3420_v61 = vpop.f32.mrf.mxu1  ;;  %10035 = vmatpush3.msra.mxu1 %v8700_v11  ;;  %v8715_v11 = vld [vmem:[%s15288_s2 + $0x3a0] sm:$0xff] }
 0xa04   : > { %v13176_v7 = vadd.f32 %v3420_v61, %v13028_v37  ;;  %v8699_v61 = vld [vmem:[%s15289_s3 + $0x298] sm:$0xff]  ;;  %10036 = vmatprep.subr.mxu1 %v11017_v5 }
 0xa05   : > { %v9987_v22 = vpop.f32.mrf.mxu1  ;;  %10037 = vmatpush3.msra.mxu1 %v8699_v61  ;;  %v8718_v61 = vld [vmem:[%s15288_s2 + $0x3b8] sm:$0xf] }
 0xa06   : > { %v8698_v22 = vld [vmem:[%s15289_s3 + $0x290] sm:$0xff]  ;;  %10038 = vmatprep.subr.mxu1 %v11017_v5 }
 0xa07   : > { %v3425_v23 = vpop.f32.mrf.mxu1  ;;  %10039 = vmatpush3.msra.mxu1 %v8698_v22  ;;  %v8717_v22 = vld [vmem:[%s15288_s2 + $0x3b0] sm:$0xf] }
 0xa08   : > { %v13179_v3 = vadd.f32 %v3425_v23, %v13031_v27  ;;  %v8697_v23 = vld [vmem:[%s15289_s3 + $0x288] sm:$0xff]  ;;  %10040 = vmatprep.subr.mxu1 %v11017_v5 }
 0xa09   : > { %v9990_v57 = vpop.f32.mrf.mxu1  ;;  %10041 = vmatpush3.msra.mxu1 %v8697_v23  ;;  %v8732_v23 = vld [vmem:[%s15289_s3 + $0x2f8] sm:$0xff] }
 0xa0a   : > { %v8696_v57 = vld [vmem:[%s15289_s3 + $0x280] sm:$0xff]  ;;  %10042 = vmatprep.subr.mxu1 %v11017_v5 }
 0xa0b   : > { %v3430_v17 = vpop.f32.mrf.mxu1  ;;  %10043 = vmatpush3.msra.mxu1 %v8696_v57  ;;  %v8731_v57 = vld [vmem:[%s15289_s3 + $0x2f0] sm:$0xff] }
 0xa0c   : > { %v13182_v46 = vadd.f32 %v3430_v17, %v13034_v45  ;;  %3940 = vmatprep.subr.mxu1 %v11017_v5 }
 0xa0d   : > { %v9993_v32 = vpop.f32.mrf.mxu1 }
 0xa0f   : > { %v3435_v35 = vpop.f32.mrf.mxu1 }
 0xa10   : > { %v13185_v33 = vadd.f32 %v3435_v35, %v13037_v30 }
 0xa11   : > { %v9996_v48 = vpop.f32.mrf.mxu1 }
 0xa31   : > { %v3536_v60 = vpop.f32.mrf.mxu1 }
 0xa32   : > { %10014 = vmatmul.mubr.msk.f32.vlgmr.msra.gmra.mxu0 %vm932_vm3, %v3536_v60 }
 0xa33   : > { %3706 = vmatpush1.msra.mxu0 %v11642_v25  ;;  %v3538_v37 = vpop.f32.mrf.mxu1  ;;  %10016 = vmatprep.mubr.msk.f32.mxu0 %vm11018_vm1, %v11017_v5 }
 0xa34   : > { %3707 = vmatprep.subr.mxu0 %v11017_v5 }
 0xa35   : > { %3708 = vmatpush1.msra.mxu0 %v11650_v26  ;;  %v3541_v27 = vpop.f32.mrf.mxu1 }
 0xa36   : > { %3709 = vmatprep.subr.mxu0 %v11017_v5  ;;  %10017 = vmatmul.mubr.msk.f32.gmra.mxu0 %vm932_vm3, %v3541_v27 }
 0xa37   : > { %3710 = vmatpush1.msra.mxu0 %v11660_v10  ;;  %v3543_v45 = vpop.f32.mrf.mxu1  ;;  %10019 = vmatprep.mubr.msk.f32.mxu0 %vm11018_vm1, %v11017_v5 }
 0xa38   : > { %3711 = vmatprep.subr.mxu0 %v11017_v5 }
 0xa39   : > { %3712 = vmatpush1.msra.mxu0 %v11670_v59  ;;  %v3546_v30 = vpop.f32.mrf.mxu1 }
 0xa3a   : > { %3713 = vmatprep.subr.mxu0 %v11017_v5  ;;  %10020 = vmatmul.mubr.msk.f32.gmra.mxu0 %vm932_vm3, %v3546_v30 }
 0xa3b   : > { %3714 = vmatpush1.msra.mxu0 %v11680_v50  ;;  %v3548_v6 = vpop.f32.mrf.mxu1  ;;  %10022 = vmatprep.mubr.msk.f32.mxu0 %vm11018_vm1, %v11017_v5 }
 0xa3c   : > { %3715 = vmatprep.subr.mxu0 %v11017_v5 }
 0xa3d   : > { %3716 = vmatpush1.msra.mxu0 %v11690_v43  ;;  %v3551_v49 = vpop.f32.mrf.mxu1 }
 0xa3e   : > { %3717 = vmatprep.subr.mxu0 %v11017_v5  ;;  %10023 = vmatmul.mubr.msk.f32.gmra.mxu0 %vm932_vm3, %v3551_v49 }
 0xa3f   : > { %3718 = vmatpush1.msra.mxu0 %v11700_v28  ;;  %v3553_v51 = vpop.f32.mrf.mxu1  ;;  %10025 = vmatprep.mubr.msk.f32.mxu0 %vm11018_vm1, %v11017_v5 }
 0xa40   : > { %3719 = vmatprep.subr.mxu0 %v11017_v5 }
 0xa41   : > { %3720 = vmatpush1.msra.mxu0 %v11710_v21  ;;  %v3556_v18 = vpop.f32.mrf.mxu1 }
 0xa42   : > { %3721 = vmatprep.subr.mxu0 %v11017_v5  ;;  %10026 = vmatmul.mubr.msk.f32.gmra.mxu0 %vm932_vm3, %v3556_v18 }
 0xa43   : > { %3722 = vmatpush1.msra.mxu0 %v11720_v15  ;;  %8691 = vmatprep.mubr.msk.f32.mxu0 %vm1346_vm5, %v8681_v54  ;;  %v3558_v63 = vpop.f32.mrf.mxu1 }
 0xa44   : > { %3723 = vmatprep.subr.mxu0 %v11017_v5 }
 0xa45   : > { %3724 = vmatpush1.msra.mxu0 %v11730_v9 }
 0xa46   : > { %3725 = vmatprep.subr.mxu0 %v11017_v5 }
 0xa47   : > { %3726 = vmatpush1.msra.mxu0 %v11740_v4 }
 0xa48   : > { %3727 = vmatprep.subr.mxu0 %v11017_v5 }
 0xa49   : > { %3728 = vmatpush1.msra.mxu0 %v11750_v1 }
 0xa4a   : > { %3729 = vmatprep.subr.mxu0 %v11017_v5 }
 0xa4b   : > { %3730 = vmatpush1.msra.mxu0 %v11760_v2 }
 0xa4c   : > { %3731 = vmatprep.subr.mxu0 %v11017_v5 }
 0xa4d   : > { %3732 = vmatpush1.msra.mxu0 %v11770_v0 }
 0xa4e   : > { %3733 = vmatprep.subr.mxu0 %v11017_v5 }
 0xa4f   : > { %3734 = vmatpush1.msra.mxu0 %v11780_v42 }
 0xa50   : > { %3735 = vmatprep.subr.mxu0 %v11017_v5 }
 0xa51   : > { %3736 = vmatpush1.msra.mxu0 %v11790_v16 }
 0xa52   : > { %3751 = vmatprep.subr.mxu0 %v11017_v5 }
 0xa53   : > { %8690 = vmatpush2.msk.msra.mxu0 %vm1362_vm6, %v11800_v24 }
 0xa54   : > { %3753 = vmatprep.subr.mxu0 %v11017_v5 }
 0xa55   : > { %3754 = vmatpush2.msra.mxu0 %v11812_v53 }
 0xa56   : > { %3755 = vmatprep.subr.mxu0 %v11017_v5 }
 0xa57   : > { %3756 = vmatpush2.msra.mxu0 %v11822_v44 }
 0xa58   : > { %3757 = vmatprep.subr.mxu0 %v11017_v5 }
 0xa59   : > { %3758 = vmatpush2.msra.mxu0 %v11832_v29 }
 0xa5a   : > { %3759 = vmatprep.subr.mxu0 %v11017_v5 }
 0xa5b   : > { %3760 = vmatpush2.msra.mxu0 %v11842_v19 }
 0xa5c   : > { %3761 = vmatprep.subr.mxu0 %v11017_v5 }
 0xa5d   : > { %3762 = vmatpush2.msra.mxu0 %v11850_v12 }
 0xa5e   : > { %3763 = vmatprep.subr.mxu0 %v11017_v5 }
 0xa5f   : > { %3764 = vmatpush2.msra.mxu0 %v11857_v13 }
 0xa60   : > { %3765 = vmatprep.subr.mxu0 %v11017_v5 }
 0xa61   : > { %3766 = vmatpush2.msra.mxu0 %v11864_v14 }
 0xa62   : > { %3767 = vmatprep.subr.mxu0 %v11017_v5 }
 0xa63   : > { %3768 = vmatpush2.msra.mxu0 %v11870_v58 }
 0xa64   : > { %3770 = vmatmul.mubr.f32.vlgmr.msra.gmra.mxu0 %v8680_v62  ;;  %10059 = vmatprep.subr.mxu0 %v11017_v5 }
 0xa65   : > { %8692 = vmatprep.mubr.msk.f32.mxu0 %vm1346_vm5, %v8683_v31  ;;  %10060 = vmatpush3.msra.mxu0 %v8732_v23  ;;  %v8743_v23 = vld [vmem:[%s15288_s2 + $0x3e8] sm:$0xff] }
 0xa66   : > { %10061 = vmatprep.subr.mxu0 %v11017_v5 }
 0xa67   : > { %10062 = vmatpush3.msra.mxu0 %v8731_v57  ;;  %v8742_v57 = vld [vmem:[%s15288_s2 + $0x3e0] sm:$0xff] }
 0xa68   : > { %3775 = vmatmul.mubr.f32.gmra.mxu0 %v8682_v20  ;;  %10063 = vmatprep.subr.mxu0 %v11017_v5 }
 0xa69   : > { %8693 = vmatprep.mubr.msk.f32.mxu0 %vm1346_vm5, %v8685_v38  ;;  %v8710_v38 = vld [vmem:[%s15288_s2 + $0x378] sm:$0xff] }
 0xa6c   : > { %3780 = vmatmul.mubr.f32.gmra.mxu0 %v8684_v39 }
 0xa6d   : > { %8694 = vmatprep.mubr.msk.f32.mxu0 %vm1346_vm5, %v8687_v40 }
 0xa70   : > { %3785 = vmatmul.mubr.f32.gmra.mxu0 %v8686_v34  ;;  %v8709_v34 = vld [vmem:[%s15288_s2 + $0x370] sm:$0xff] }
 0xa71   : > { %8695 = vmatprep.mubr.msk.f32.mxu0 %vm1346_vm5, %v8689_v36  ;;  %v8712_v36 = vld [vmem:[%s15288_s2 + $0x388] sm:$0xff] }
 0xa74   : > { %3790 = vmatmul.mubr.f32.gmra.mxu0 %v8688_v41  ;;  %v8711_v41 = vld [vmem:[%s15288_s2 + $0x380] sm:$0xff] }
 0xa75   : > { %10075 = vmatprep.mubr.msk.f32.mxu0 %vm11018_vm1, %v11017_v5 }
 0xaf2   : > { %v3650_v17 = vpop.f32.mrf.mxu0 }
 0xaf3   : > { %v13321_v32 = vadd.f32 %v3650_v17, %v13173_v52  ;;  %v8730_v17 = vld [vmem:[%s15289_s3 + $0x2e8] sm:$0xff] }
 0xaf4   : > { %v10015_v35 = vpop.f32.mrf.mxu0  ;;  %10064 = vmatpush3.msra.mxu0 %v8730_v17  ;;  %v8745_v17 = vld [vmem:[%s15288_s2 + $0x3f8] sm:$0xff] }
 0xaf5   : > { %v8729_v35 = vld [vmem:[%s15289_s3 + $0x2e0] sm:$0xff]  ;;  %10065 = vmatprep.subr.mxu0 %v11017_v5 }
 0xaf6   : > { %v3655_v48 = vpop.f32.mrf.mxu0  ;;  %10066 = vmatpush3.msra.mxu0 %v8729_v35  ;;  %v8744_v35 = vld [vmem:[%s15288_s2 + $0x3f0] sm:$0xff] }
 0xaf7   : > { %v13324_v60 = vadd.f32 %v3655_v48, %v13176_v7  ;;  %v8728_v48 = vld [vmem:[%s15289_s3 + $0x2d8] sm:$0xff]  ;;  %10067 = vmatprep.subr.mxu0 %v11017_v5 }
 0xaf8   : > { %v10018_v37 = vpop.f32.mrf.mxu0  ;;  %10068 = vmatpush3.msra.mxu0 %v8728_v48  ;;  %v8747_v48 = vld [vmem:[%s15288_s2 + $0x408] sm:$0xf] }
 0xaf9   : > { %v8727_v37 = vld [vmem:[%s15289_s3 + $0x2d0] sm:$0xff]  ;;  %10069 = vmatprep.subr.mxu0 %v11017_v5 }
 0xafa   : > { %v3660_v27 = vpop.f32.mrf.mxu0  ;;  %10070 = vmatpush3.msra.mxu0 %v8727_v37  ;;  %v8746_v37 = vld [vmem:[%s15288_s2 + $0x400] sm:$0xf] }
 0xafb   : > { %v13327_v45 = vadd.f32 %v3660_v27, %v13179_v3  ;;  %v8726_v27 = vld [vmem:[%s15289_s3 + $0x2c8] sm:$0xff]  ;;  %10071 = vmatprep.subr.mxu0 %v11017_v5 }
 0xafc   : > { %v10021_v30 = vpop.f32.mrf.mxu0  ;;  %10072 = vmatpush3.msra.mxu0 %v8726_v27  ;;  %v8761_v27 = vld [vmem:[%s15289_s3 + $0x338] sm:$0xff] }
 0xafd   : > { %v8725_v30 = vld [vmem:[%s15289_s3 + $0x2c0] sm:$0xff]  ;;  %10073 = vmatprep.subr.mxu0 %v11017_v5 }
 0xafe   : > { %v3665_v6 = vpop.f32.mrf.mxu0  ;;  %10074 = vmatpush3.msra.mxu0 %v8725_v30  ;;  %v8760_v30 = vld [vmem:[%s15289_s3 + $0x330] sm:$0xff] }
 0xaff   : > { %v13330_v49 = vadd.f32 %v3665_v6, %v13182_v46  ;;  %4175 = vmatprep.subr.mxu0 %v11017_v5 }
 0xb00   : > { %v10024_v51 = vpop.f32.mrf.mxu0 }
 0xb02   : > { %v3670_v54 = vpop.f32.mrf.mxu0 }
 0xb03   : > { %v13333_v52 = vadd.f32 %v3670_v54, %v13185_v33 }
 0xb04   : > { %v10027_v18 = vpop.f32.mrf.mxu0 }
 0xb24   : > { %v3771_v63 = vpop.f32.mrf.mxu0 }
 0xb25   : > { %10045 = vmatmul.mubr.msk.f32.vlgmr.msra.gmra.mxu1 %vm932_vm3, %v3771_v63 }
 0xb26   : > { %3941 = vmatpush1.msra.mxu1 %v11642_v25  ;;  %v3773_v7 = vpop.f32.mrf.mxu0  ;;  %10047 = vmatprep.mubr.msk.f32.mxu1 %vm11018_vm1, %v11017_v5 }
 0xb27   : > { %3942 = vmatprep.subr.mxu1 %v11017_v5 }
 0xb28   : > { %3943 = vmatpush1.msra.mxu1 %v11650_v26  ;;  %v3776_v3 = vpop.f32.mrf.mxu0 }
 0xb29   : > { %3944 = vmatprep.subr.mxu1 %v11017_v5  ;;  %10048 = vmatmul.mubr.msk.f32.gmra.mxu1 %vm932_vm3, %v3776_v3 }
 0xb2a   : > { %3945 = vmatpush1.msra.mxu1 %v11660_v10  ;;  %v3778_v46 = vpop.f32.mrf.mxu0  ;;  %10050 = vmatprep.mubr.msk.f32.mxu1 %vm11018_vm1, %v11017_v5 }
 0xb2b   : > { %3946 = vmatprep.subr.mxu1 %v11017_v5 }
 0xb2c   : > { %3947 = vmatpush1.msra.mxu1 %v11670_v59  ;;  %v3781_v33 = vpop.f32.mrf.mxu0 }
 0xb2d   : > { %3948 = vmatprep.subr.mxu1 %v11017_v5  ;;  %10051 = vmatmul.mubr.msk.f32.gmra.mxu1 %vm932_vm3, %v3781_v33 }
 0xb2e   : > { %3949 = vmatpush1.msra.mxu1 %v11680_v50  ;;  %v3783_v62 = vpop.f32.mrf.mxu0  ;;  %10053 = vmatprep.mubr.msk.f32.mxu1 %vm11018_vm1, %v11017_v5 }
 0xb2f   : > { %3950 = vmatprep.subr.mxu1 %v11017_v5 }
 0xb30   : > { %3951 = vmatpush1.msra.mxu1 %v11690_v43  ;;  %v3786_v31 = vpop.f32.mrf.mxu0 }
 0xb31   : > { %3952 = vmatprep.subr.mxu1 %v11017_v5  ;;  %10054 = vmatmul.mubr.msk.f32.gmra.mxu1 %vm932_vm3, %v3786_v31 }
 0xb32   : > { %3953 = vmatpush1.msra.mxu1 %v11700_v28  ;;  %v3788_v20 = vpop.f32.mrf.mxu0  ;;  %10056 = vmatprep.mubr.msk.f32.mxu1 %vm11018_vm1, %v11017_v5 }
 0xb33   : > { %3954 = vmatprep.subr.mxu1 %v11017_v5 }
 0xb34   : > { %3955 = vmatpush1.msra.mxu1 %v11710_v21  ;;  %v3791_v39 = vpop.f32.mrf.mxu0 }
 0xb35   : > { %3956 = vmatprep.subr.mxu1 %v11017_v5  ;;  %10057 = vmatmul.mubr.msk.f32.gmra.mxu1 %vm932_vm3, %v3791_v39 }
 0xb36   : > { %3957 = vmatpush1.msra.mxu1 %v11720_v15  ;;  %8720 = vmatprep.mubr.msk.f32.mxu1 %vm1346_vm5, %v8710_v38  ;;  %v3793_v40 = vpop.f32.mrf.mxu0 }
 0xb37   : > { %3958 = vmatprep.subr.mxu1 %v11017_v5 }
 0xb38   : > { %3959 = vmatpush1.msra.mxu1 %v11730_v9 }
 0xb39   : > { %3960 = vmatprep.subr.mxu1 %v11017_v5 }
 0xb3a   : > { %3961 = vmatpush1.msra.mxu1 %v11740_v4 }
 0xb3b   : > { %3962 = vmatprep.subr.mxu1 %v11017_v5 }
 0xb3c   : > { %3963 = vmatpush1.msra.mxu1 %v11750_v1 }
 0xb3d   : > { %3964 = vmatprep.subr.mxu1 %v11017_v5 }
 0xb3e   : > { %3965 = vmatpush1.msra.mxu1 %v11760_v2 }
 0xb3f   : > { %3966 = vmatprep.subr.mxu1 %v11017_v5 }
 0xb40   : > { %3967 = vmatpush1.msra.mxu1 %v11770_v0 }
 0xb41   : > { %3968 = vmatprep.subr.mxu1 %v11017_v5 }
 0xb42   : > { %3969 = vmatpush1.msra.mxu1 %v11780_v42 }
 0xb43   : > { %3970 = vmatprep.subr.mxu1 %v11017_v5 }
 0xb44   : > { %3971 = vmatpush1.msra.mxu1 %v11790_v16 }
 0xb45   : > { %3986 = vmatprep.subr.mxu1 %v11017_v5 }
 0xb46   : > { %8719 = vmatpush2.msk.msra.mxu1 %vm1362_vm6, %v11800_v24 }
 0xb47   : > { %3988 = vmatprep.subr.mxu1 %v11017_v5 }
 0xb48   : > { %3989 = vmatpush2.msra.mxu1 %v11812_v53 }
 0xb49   : > { %3990 = vmatprep.subr.mxu1 %v11017_v5 }
 0xb4a   : > { %3991 = vmatpush2.msra.mxu1 %v11822_v44 }
 0xb4b   : > { %3992 = vmatprep.subr.mxu1 %v11017_v5 }
 0xb4c   : > { %3993 = vmatpush2.msra.mxu1 %v11832_v29 }
 0xb4d   : > { %3994 = vmatprep.subr.mxu1 %v11017_v5 }
 0xb4e   : > { %3995 = vmatpush2.msra.mxu1 %v11842_v19 }
 0xb4f   : > { %3996 = vmatprep.subr.mxu1 %v11017_v5 }
 0xb50   : > { %3997 = vmatpush2.msra.mxu1 %v11850_v12 }
 0xb51   : > { %3998 = vmatprep.subr.mxu1 %v11017_v5 }
 0xb52   : > { %3999 = vmatpush2.msra.mxu1 %v11857_v13 }
 0xb53   : > { %4000 = vmatprep.subr.mxu1 %v11017_v5 }
 0xb54   : > { %4001 = vmatpush2.msra.mxu1 %v11864_v14 }
 0xb55   : > { %4002 = vmatprep.subr.mxu1 %v11017_v5 }
 0xb56   : > { %4003 = vmatpush2.msra.mxu1 %v11870_v58 }
 0xb57   : > { %4005 = vmatmul.mubr.f32.vlgmr.msra.gmra.mxu1 %v8709_v34  ;;  %10090 = vmatprep.subr.mxu1 %v11017_v5 }
 0xb58   : > { %8721 = vmatprep.mubr.msk.f32.mxu1 %vm1346_vm5, %v8712_v36  ;;  %10091 = vmatpush3.msra.mxu1 %v8761_v27  ;;  %v8772_v27 = vld [vmem:[%s15288_s2 + $0x438] sm:$0xff] }
 0xb59   : > { %10092 = vmatprep.subr.mxu1 %v11017_v5 }
 0xb5a   : > { %10093 = vmatpush3.msra.mxu1 %v8760_v30  ;;  %v8771_v30 = vld [vmem:[%s15288_s2 + $0x430] sm:$0xff] }
 0xb5b   : > { %4010 = vmatmul.mubr.f32.gmra.mxu1 %v8711_v41  ;;  %10094 = vmatprep.subr.mxu1 %v11017_v5 }
 0xb5c   : > { %8722 = vmatprep.mubr.msk.f32.mxu1 %vm1346_vm5, %v8714_v56  ;;  %v8739_v56 = vld [vmem:[%s15288_s2 + $0x3c8] sm:$0xff] }
 0xb5f   : > { %4015 = vmatmul.mubr.f32.gmra.mxu1 %v8713_v8 }
 0xb60   : > { %8723 = vmatprep.mubr.msk.f32.mxu1 %vm1346_vm5, %v8716_v47 }
 0xb63   : > { %4020 = vmatmul.mubr.f32.gmra.mxu1 %v8715_v11  ;;  %v8738_v11 = vld [vmem:[%s15288_s2 + $0x3c0] sm:$0xff] }
 0xb64   : > { %8724 = vmatprep.mubr.msk.f32.mxu1 %vm1346_vm5, %v8718_v61  ;;  %v8741_v61 = vld [vmem:[%s15288_s2 + $0x3d8] sm:$0xff] }
 0xb67   : > { %4025 = vmatmul.mubr.f32.gmra.mxu1 %v8717_v22  ;;  %v8740_v22 = vld [vmem:[%s15288_s2 + $0x3d0] sm:$0xff] }
 0xb68   : > { %10106 = vmatprep.mubr.msk.f32.mxu1 %vm11018_vm1, %v11017_v5 }
 0xbe5   : > { %v3885_v6 = vpop.f32.mrf.mxu1 }
 0xbe6   : > { %v13469_v51 = vadd.f32 %v3885_v6, %v13321_v32  ;;  %v8759_v6 = vld [vmem:[%s15289_s3 + $0x328] sm:$0xff] }
 0xbe7   : > { %v10046_v54 = vpop.f32.mrf.mxu1  ;;  %10095 = vmatpush3.msra.mxu1 %v8759_v6  ;;  %v8774_v6 = vld [vmem:[%s15288_s2 + $0x448] sm:$0xff] }
 0xbe8   : > { %v8758_v54 = vld [vmem:[%s15289_s3 + $0x320] sm:$0xff]  ;;  %10096 = vmatprep.subr.mxu1 %v11017_v5 }
 0xbe9   : > { %v3890_v18 = vpop.f32.mrf.mxu1  ;;  %10097 = vmatpush3.msra.mxu1 %v8758_v54  ;;  %v8773_v54 = vld [vmem:[%s15288_s2 + $0x440] sm:$0xff] }
 0xbea   : > { %v13472_v63 = vadd.f32 %v3890_v18, %v13324_v60  ;;  %v8757_v18 = vld [vmem:[%s15289_s3 + $0x318] sm:$0xff]  ;;  %10098 = vmatprep.subr.mxu1 %v11017_v5 }
 0xbeb   : > { %v10049_v7 = vpop.f32.mrf.mxu1  ;;  %10099 = vmatpush3.msra.mxu1 %v8757_v18  ;;  %v8776_v18 = vld [vmem:[%s15288_s2 + $0x458] sm:$0xf] }
 0xbec   : > { %v8756_v7 = vld [vmem:[%s15289_s3 + $0x310] sm:$0xff]  ;;  %10100 = vmatprep.subr.mxu1 %v11017_v5 }
 0xbed   : > { %v3895_v3 = vpop.f32.mrf.mxu1  ;;  %10101 = vmatpush3.msra.mxu1 %v8756_v7  ;;  %v8775_v7 = vld [vmem:[%s15288_s2 + $0x450] sm:$0xf] }
 0xbee   : > { %v13475_v46 = vadd.f32 %v3895_v3, %v13327_v45  ;;  %v8755_v3 = vld [vmem:[%s15289_s3 + $0x308] sm:$0xff]  ;;  %10102 = vmatprep.subr.mxu1 %v11017_v5 }
 0xbef   : > { %v10052_v33 = vpop.f32.mrf.mxu1  ;;  %10103 = vmatpush3.msra.mxu1 %v8755_v3  ;;  %v8790_v3 = vld [vmem:[%s15289_s3 + $0x378] sm:$0xff] }
 0xbf0   : > { %v8754_v33 = vld [vmem:[%s15289_s3 + $0x300] sm:$0xff]  ;;  %10104 = vmatprep.subr.mxu1 %v11017_v5 }
 0xbf1   : > { %v3900_v62 = vpop.f32.mrf.mxu1  ;;  %10105 = vmatpush3.msra.mxu1 %v8754_v33  ;;  %v8789_v33 = vld [vmem:[%s15289_s3 + $0x370] sm:$0xff] }
 0xbf2   : > { %v13478_v31 = vadd.f32 %v3900_v62, %v13330_v49  ;;  %4410 = vmatprep.subr.mxu1 %v11017_v5 }
 0xbf3   : > { %v10055_v20 = vpop.f32.mrf.mxu1 }
 0xbf5   : > { %v3905_v38 = vpop.f32.mrf.mxu1 }
 0xbf6   : > { %v13481_v32 = vadd.f32 %v3905_v38, %v13333_v52 }
 0xbf7   : > { %v10058_v39 = vpop.f32.mrf.mxu1 }
 0xc17   : > { %v4006_v40 = vpop.f32.mrf.mxu1 }
 0xc18   : > { %10076 = vmatmul.mubr.msk.f32.vlgmr.msra.gmra.mxu0 %vm932_vm3, %v4006_v40 }
 0xc19   : > { %4176 = vmatpush1.msra.mxu0 %v11642_v25  ;;  %v4008_v60 = vpop.f32.mrf.mxu1  ;;  %10078 = vmatprep.mubr.msk.f32.mxu0 %vm11018_vm1, %v11017_v5 }
 0xc1a   : > { %4177 = vmatprep.subr.mxu0 %v11017_v5 }
 0xc1b   : > { %4178 = vmatpush1.msra.mxu0 %v11650_v26  ;;  %v4011_v45 = vpop.f32.mrf.mxu1 }
 0xc1c   : > { %4179 = vmatprep.subr.mxu0 %v11017_v5  ;;  %10079 = vmatmul.mubr.msk.f32.gmra.mxu0 %vm932_vm3, %v4011_v45 }
 0xc1d   : > { %4180 = vmatpush1.msra.mxu0 %v11660_v10  ;;  %v4013_v49 = vpop.f32.mrf.mxu1  ;;  %10081 = vmatprep.mubr.msk.f32.mxu0 %vm11018_vm1, %v11017_v5 }
 0xc1e   : > { %4181 = vmatprep.subr.mxu0 %v11017_v5 }
 0xc1f   : > { %4182 = vmatpush1.msra.mxu0 %v11670_v59  ;;  %v4016_v52 = vpop.f32.mrf.mxu1 }
 0xc20   : > { %4183 = vmatprep.subr.mxu0 %v11017_v5  ;;  %10082 = vmatmul.mubr.msk.f32.gmra.mxu0 %vm932_vm3, %v4016_v52 }
 0xc21   : > { %4184 = vmatpush1.msra.mxu0 %v11680_v50  ;;  %v4018_v34 = vpop.f32.mrf.mxu1  ;;  %10084 = vmatprep.mubr.msk.f32.mxu0 %vm11018_vm1, %v11017_v5 }
 0xc22   : > { %4185 = vmatprep.subr.mxu0 %v11017_v5 }
 0xc23   : > { %4186 = vmatpush1.msra.mxu0 %v11690_v43  ;;  %v4021_v36 = vpop.f32.mrf.mxu1 }
 0xc24   : > { %4187 = vmatprep.subr.mxu0 %v11017_v5  ;;  %10085 = vmatmul.mubr.msk.f32.gmra.mxu0 %vm932_vm3, %v4021_v36 }
 0xc25   : > { %4188 = vmatpush1.msra.mxu0 %v11700_v28  ;;  %v4023_v41 = vpop.f32.mrf.mxu1  ;;  %10087 = vmatprep.mubr.msk.f32.mxu0 %vm11018_vm1, %v11017_v5 }
 0xc26   : > { %4189 = vmatprep.subr.mxu0 %v11017_v5 }
 0xc27   : > { %4190 = vmatpush1.msra.mxu0 %v11710_v21  ;;  %v4026_v8 = vpop.f32.mrf.mxu1 }
 0xc28   : > { %4191 = vmatprep.subr.mxu0 %v11017_v5  ;;  %10088 = vmatmul.mubr.msk.f32.gmra.mxu0 %vm932_vm3, %v4026_v8 }
 0xc29   : > { %4192 = vmatpush1.msra.mxu0 %v11720_v15  ;;  %8749 = vmatprep.mubr.msk.f32.mxu0 %vm1346_vm5, %v8739_v56  ;;  %v4028_v47 = vpop.f32.mrf.mxu1 }
 0xc2a   : > { %4193 = vmatprep.subr.mxu0 %v11017_v5 }
 0xc2b   : > { %4194 = vmatpush1.msra.mxu0 %v11730_v9 }
 0xc2c   : > { %4195 = vmatprep.subr.mxu0 %v11017_v5 }
 0xc2d   : > { %4196 = vmatpush1.msra.mxu0 %v11740_v4 }
 0xc2e   : > { %4197 = vmatprep.subr.mxu0 %v11017_v5 }
 0xc2f   : > { %4198 = vmatpush1.msra.mxu0 %v11750_v1 }
 0xc30   : > { %4199 = vmatprep.subr.mxu0 %v11017_v5 }
 0xc31   : > { %4200 = vmatpush1.msra.mxu0 %v11760_v2 }
 0xc32   : > { %4201 = vmatprep.subr.mxu0 %v11017_v5 }
 0xc33   : > { %4202 = vmatpush1.msra.mxu0 %v11770_v0 }
 0xc34   : > { %4203 = vmatprep.subr.mxu0 %v11017_v5 }
 0xc35   : > { %4204 = vmatpush1.msra.mxu0 %v11780_v42 }
 0xc36   : > { %4205 = vmatprep.subr.mxu0 %v11017_v5 }
 0xc37   : > { %4206 = vmatpush1.msra.mxu0 %v11790_v16 }
 0xc38   : > { %4221 = vmatprep.subr.mxu0 %v11017_v5 }
 0xc39   : > { %8748 = vmatpush2.msk.msra.mxu0 %vm1362_vm6, %v11800_v24 }
 0xc3a   : > { %4223 = vmatprep.subr.mxu0 %v11017_v5 }
 0xc3b   : > { %4224 = vmatpush2.msra.mxu0 %v11812_v53 }
 0xc3c   : > { %4225 = vmatprep.subr.mxu0 %v11017_v5 }
 0xc3d   : > { %4226 = vmatpush2.msra.mxu0 %v11822_v44 }
 0xc3e   : > { %4227 = vmatprep.subr.mxu0 %v11017_v5 }
 0xc3f   : > { %4228 = vmatpush2.msra.mxu0 %v11832_v29 }
 0xc40   : > { %4229 = vmatprep.subr.mxu0 %v11017_v5 }
 0xc41   : > { %4230 = vmatpush2.msra.mxu0 %v11842_v19 }
 0xc42   : > { %4231 = vmatprep.subr.mxu0 %v11017_v5 }
 0xc43   : > { %4232 = vmatpush2.msra.mxu0 %v11850_v12 }
 0xc44   : > { %4233 = vmatprep.subr.mxu0 %v11017_v5 }
 0xc45   : > { %4234 = vmatpush2.msra.mxu0 %v11857_v13 }
 0xc46   : > { %4235 = vmatprep.subr.mxu0 %v11017_v5 }
 0xc47   : > { %4236 = vmatpush2.msra.mxu0 %v11864_v14 }
 0xc48   : > { %4237 = vmatprep.subr.mxu0 %v11017_v5 }
 0xc49   : > { %4238 = vmatpush2.msra.mxu0 %v11870_v58 }
 0xc4a   : > { %4240 = vmatmul.mubr.f32.vlgmr.msra.gmra.mxu0 %v8738_v11  ;;  %10121 = vmatprep.subr.mxu0 %v11017_v5 }
 0xc4b   : > { %8750 = vmatprep.mubr.msk.f32.mxu0 %vm1346_vm5, %v8741_v61  ;;  %10122 = vmatpush3.msra.mxu0 %v8790_v3  ;;  %v8801_v3 = vld [vmem:[%s15288_s2 + $0x488] sm:$0xff] }
 0xc4c   : > { %10123 = vmatprep.subr.mxu0 %v11017_v5 }
 0xc4d   : > { %10124 = vmatpush3.msra.mxu0 %v8789_v33  ;;  %v8800_v33 = vld [vmem:[%s15288_s2 + $0x480] sm:$0xff] }
 0xc4e   : > { %4245 = vmatmul.mubr.f32.gmra.mxu0 %v8740_v22  ;;  %10125 = vmatprep.subr.mxu0 %v11017_v5 }
 0xc4f   : > { %8751 = vmatprep.mubr.msk.f32.mxu0 %vm1346_vm5, %v8743_v23  ;;  %v8768_v23 = vld [vmem:[%s15288_s2 + $0x418] sm:$0xff] }
 0xc52   : > { %4250 = vmatmul.mubr.f32.gmra.mxu0 %v8742_v57 }
 0xc53   : > { %8752 = vmatprep.mubr.msk.f32.mxu0 %vm1346_vm5, %v8745_v17 }
 0xc56   : > { %4255 = vmatmul.mubr.f32.gmra.mxu0 %v8744_v35  ;;  %v8767_v35 = vld [vmem:[%s15288_s2 + $0x410] sm:$0xff] }
 0xc57   : > { %8753 = vmatprep.mubr.msk.f32.mxu0 %vm1346_vm5, %v8747_v48  ;;  %v8770_v48 = vld [vmem:[%s15288_s2 + $0x428] sm:$0xff] }
 0xc5a   : > { %4260 = vmatmul.mubr.f32.gmra.mxu0 %v8746_v37  ;;  %v8769_v37 = vld [vmem:[%s15288_s2 + $0x420] sm:$0xff] }
 0xc5b   : > { %10137 = vmatprep.mubr.msk.f32.mxu0 %vm11018_vm1, %v11017_v5 }
 0xcd8   : > { %v4120_v62 = vpop.f32.mrf.mxu0 }
 0xcd9   : > { %v13617_v20 = vadd.f32 %v4120_v62, %v13469_v51  ;;  %v8788_v62 = vld [vmem:[%s15289_s3 + $0x368] sm:$0xff] }
 0xcda   : > { %v10077_v38 = vpop.f32.mrf.mxu0  ;;  %10126 = vmatpush3.msra.mxu0 %v8788_v62  ;;  %v8803_v62 = vld [vmem:[%s15288_s2 + $0x498] sm:$0xff] }
 0xcdb   : > { %v8787_v38 = vld [vmem:[%s15289_s3 + $0x360] sm:$0xff]  ;;  %10127 = vmatprep.subr.mxu0 %v11017_v5 }
 0xcdc   : > { %v4125_v39 = vpop.f32.mrf.mxu0  ;;  %10128 = vmatpush3.msra.mxu0 %v8787_v38  ;;  %v8802_v38 = vld [vmem:[%s15288_s2 + $0x490] sm:$0xff] }
 0xcdd   : > { %v13620_v40 = vadd.f32 %v4125_v39, %v13472_v63  ;;  %v8786_v39 = vld [vmem:[%s15289_s3 + $0x358] sm:$0xff]  ;;  %10129 = vmatprep.subr.mxu0 %v11017_v5 }
 0xcde   : > { %v10080_v60 = vpop.f32.mrf.mxu0  ;;  %10130 = vmatpush3.msra.mxu0 %v8786_v39  ;;  %v8805_v39 = vld [vmem:[%s15288_s2 + $0x4a8] sm:$0xf] }
 0xcdf   : > { %v8785_v60 = vld [vmem:[%s15289_s3 + $0x350] sm:$0xff]  ;;  %10131 = vmatprep.subr.mxu0 %v11017_v5 }
 0xce0   : > { %v4130_v45 = vpop.f32.mrf.mxu0  ;;  %10132 = vmatpush3.msra.mxu0 %v8785_v60  ;;  %v8804_v60 = vld [vmem:[%s15288_s2 + $0x4a0] sm:$0xf] }
 0xce1   : > { %v13623_v49 = vadd.f32 %v4130_v45, %v13475_v46  ;;  %v8784_v45 = vld [vmem:[%s15289_s3 + $0x348] sm:$0xff]  ;;  %10133 = vmatprep.subr.mxu0 %v11017_v5 }
 0xce2   : > { %v10083_v52 = vpop.f32.mrf.mxu0  ;;  %10134 = vmatpush3.msra.mxu0 %v8784_v45  ;;  %v8819_v45 = vld [vmem:[%s15289_s3 + $0x3b8] sm:$0xff] }
 0xce3   : > { %v8783_v52 = vld [vmem:[%s15289_s3 + $0x340] sm:$0xff]  ;;  %10135 = vmatprep.subr.mxu0 %v11017_v5 }
 0xce4   : > { %v4135_v34 = vpop.f32.mrf.mxu0  ;;  %10136 = vmatpush3.msra.mxu0 %v8783_v52  ;;  %v8818_v52 = vld [vmem:[%s15289_s3 + $0x3b0] sm:$0xff] }
 0xce5   : > { %v13626_v36 = vadd.f32 %v4135_v34, %v13478_v31  ;;  %4645 = vmatprep.subr.mxu0 %v11017_v5 }
 0xce6   : > { %v10086_v41 = vpop.f32.mrf.mxu0 }
 0xce8   : > { %v4140_v56 = vpop.f32.mrf.mxu0 }
 0xce9   : > { %v13629_v51 = vadd.f32 %v4140_v56, %v13481_v32 }
 0xcea   : > { %v10089_v8 = vpop.f32.mrf.mxu0 }
 0xd0a   : > { %v4241_v47 = vpop.f32.mrf.mxu0 }
 0xd0b   : > { %10107 = vmatmul.mubr.msk.f32.vlgmr.msra.gmra.mxu1 %vm932_vm3, %v4241_v47 }
 0xd0c   : > { %4411 = vmatpush1.msra.mxu1 %v11642_v25  ;;  %v4243_v63 = vpop.f32.mrf.mxu0  ;;  %10109 = vmatprep.mubr.msk.f32.mxu1 %vm11018_vm1, %v11017_v5 }
 0xd0d   : > { %4412 = vmatprep.subr.mxu1 %v11017_v5 }
 0xd0e   : > { %4413 = vmatpush1.msra.mxu1 %v11650_v26  ;;  %v4246_v46 = vpop.f32.mrf.mxu0 }
 0xd0f   : > { %4414 = vmatprep.subr.mxu1 %v11017_v5  ;;  %10110 = vmatmul.mubr.msk.f32.gmra.mxu1 %vm932_vm3, %v4246_v46 }
 0xd10   : > { %4415 = vmatpush1.msra.mxu1 %v11660_v10  ;;  %v4248_v31 = vpop.f32.mrf.mxu0  ;;  %10112 = vmatprep.mubr.msk.f32.mxu1 %vm11018_vm1, %v11017_v5 }
 0xd11   : > { %4416 = vmatprep.subr.mxu1 %v11017_v5 }
 0xd12   : > { %4417 = vmatpush1.msra.mxu1 %v11670_v59  ;;  %v4251_v32 = vpop.f32.mrf.mxu0 }
 0xd13   : > { %4418 = vmatprep.subr.mxu1 %v11017_v5  ;;  %10113 = vmatmul.mubr.msk.f32.gmra.mxu1 %vm932_vm3, %v4251_v32 }
 0xd14   : > { %4419 = vmatpush1.msra.mxu1 %v11680_v50  ;;  %v4253_v11 = vpop.f32.mrf.mxu0  ;;  %10115 = vmatprep.mubr.msk.f32.mxu1 %vm11018_vm1, %v11017_v5 }
 0xd15   : > { %4420 = vmatprep.subr.mxu1 %v11017_v5 }
 0xd16   : > { %4421 = vmatpush1.msra.mxu1 %v11690_v43  ;;  %v4256_v61 = vpop.f32.mrf.mxu0 }
 0xd17   : > { %4422 = vmatprep.subr.mxu1 %v11017_v5  ;;  %10116 = vmatmul.mubr.msk.f32.gmra.mxu1 %vm932_vm3, %v4256_v61 }
 0xd18   : > { %4423 = vmatpush1.msra.mxu1 %v11700_v28  ;;  %v4258_v22 = vpop.f32.mrf.mxu0  ;;  %10118 = vmatprep.mubr.msk.f32.mxu1 %vm11018_vm1, %v11017_v5 }
 0xd19   : > { %4424 = vmatprep.subr.mxu1 %v11017_v5 }
 0xd1a   : > { %4425 = vmatpush1.msra.mxu1 %v11710_v21  ;;  %v4261_v57 = vpop.f32.mrf.mxu0 }
 0xd1b   : > { %4426 = vmatprep.subr.mxu1 %v11017_v5  ;;  %10119 = vmatmul.mubr.msk.f32.gmra.mxu1 %vm932_vm3, %v4261_v57 }
 0xd1c   : > { %4427 = vmatpush1.msra.mxu1 %v11720_v15  ;;  %8778 = vmatprep.mubr.msk.f32.mxu1 %vm1346_vm5, %v8768_v23  ;;  %v4263_v17 = vpop.f32.mrf.mxu0 }
 0xd1d   : > { %4428 = vmatprep.subr.mxu1 %v11017_v5 }
 0xd1e   : > { %4429 = vmatpush1.msra.mxu1 %v11730_v9 }
 0xd1f   : > { %4430 = vmatprep.subr.mxu1 %v11017_v5 }
 0xd20   : > { %4431 = vmatpush1.msra.mxu1 %v11740_v4 }
 0xd21   : > { %4432 = vmatprep.subr.mxu1 %v11017_v5 }
 0xd22   : > { %4433 = vmatpush1.msra.mxu1 %v11750_v1 }
 0xd23   : > { %4434 = vmatprep.subr.mxu1 %v11017_v5 }
 0xd24   : > { %4435 = vmatpush1.msra.mxu1 %v11760_v2 }
 0xd25   : > { %4436 = vmatprep.subr.mxu1 %v11017_v5 }
 0xd26   : > { %4437 = vmatpush1.msra.mxu1 %v11770_v0 }
 0xd27   : > { %4438 = vmatprep.subr.mxu1 %v11017_v5 }
 0xd28   : > { %4439 = vmatpush1.msra.mxu1 %v11780_v42 }
 0xd29   : > { %4440 = vmatprep.subr.mxu1 %v11017_v5 }
 0xd2a   : > { %4441 = vmatpush1.msra.mxu1 %v11790_v16 }
 0xd2b   : > { %4456 = vmatprep.subr.mxu1 %v11017_v5 }
 0xd2c   : > { %8777 = vmatpush2.msk.msra.mxu1 %vm1362_vm6, %v11800_v24 }
 0xd2d   : > { %4458 = vmatprep.subr.mxu1 %v11017_v5 }
 0xd2e   : > { %4459 = vmatpush2.msra.mxu1 %v11812_v53 }
 0xd2f   : > { %4460 = vmatprep.subr.mxu1 %v11017_v5 }
 0xd30   : > { %4461 = vmatpush2.msra.mxu1 %v11822_v44 }
 0xd31   : > { %4462 = vmatprep.subr.mxu1 %v11017_v5 }
 0xd32   : > { %4463 = vmatpush2.msra.mxu1 %v11832_v29 }
 0xd33   : > { %4464 = vmatprep.subr.mxu1 %v11017_v5 }
 0xd34   : > { %4465 = vmatpush2.msra.mxu1 %v11842_v19 }
 0xd35   : > { %4466 = vmatprep.subr.mxu1 %v11017_v5 }
 0xd36   : > { %4467 = vmatpush2.msra.mxu1 %v11850_v12 }
 0xd37   : > { %4468 = vmatprep.subr.mxu1 %v11017_v5 }
 0xd38   : > { %4469 = vmatpush2.msra.mxu1 %v11857_v13 }
 0xd39   : > { %4470 = vmatprep.subr.mxu1 %v11017_v5 }
 0xd3a   : > { %4471 = vmatpush2.msra.mxu1 %v11864_v14 }
 0xd3b   : > { %4472 = vmatprep.subr.mxu1 %v11017_v5 }
 0xd3c   : > { %4473 = vmatpush2.msra.mxu1 %v11870_v58 }
 0xd3d   : > { %4475 = vmatmul.mubr.f32.vlgmr.msra.gmra.mxu1 %v8767_v35  ;;  %10152 = vmatprep.subr.mxu1 %v11017_v5 }
 0xd3e   : > { %8779 = vmatprep.mubr.msk.f32.mxu1 %vm1346_vm5, %v8770_v48  ;;  %10153 = vmatpush3.msra.mxu1 %v8819_v45 }
 0xd3f   : > { %10154 = vmatprep.subr.mxu1 %v11017_v5 }
 0xd40   : > { %10155 = vmatpush3.msra.mxu1 %v8818_v52 }
 0xd41   : > { %4480 = vmatmul.mubr.f32.gmra.mxu1 %v8769_v37  ;;  %10156 = vmatprep.subr.mxu1 %v11017_v5 }
 0xd42   : > { %8780 = vmatprep.mubr.msk.f32.mxu1 %vm1346_vm5, %v8772_v27  ;;  %v8797_v27 = vld [vmem:[%s15288_s2 + $0x468] sm:$0xff] }
 0xd45   : > { %4485 = vmatmul.mubr.f32.gmra.mxu1 %v8771_v30 }
 0xd46   : > { %8781 = vmatprep.mubr.msk.f32.mxu1 %vm1346_vm5, %v8774_v6 }
 0xd49   : > { %4490 = vmatmul.mubr.f32.gmra.mxu1 %v8773_v54  ;;  %v8796_v54 = vld [vmem:[%s15288_s2 + $0x460] sm:$0xff] }
 0xd4a   : > { %8782 = vmatprep.mubr.msk.f32.mxu1 %vm1346_vm5, %v8776_v18  ;;  %v8799_v18 = vld [vmem:[%s15288_s2 + $0x478] sm:$0xff] }
 0xd4d   : > { %4495 = vmatmul.mubr.f32.gmra.mxu1 %v8775_v7  ;;  %v8798_v7 = vld [vmem:[%s15288_s2 + $0x470] sm:$0xff] }
 0xd4e   : > { %10168 = vmatprep.mubr.msk.f32.mxu1 %vm11018_vm1, %v11017_v5 }
 0xdcb   : > { %v4355_v34 = vpop.f32.mrf.mxu1 }
 0xdcc   : > { %v13765_v41 = vadd.f32 %v4355_v34, %v13617_v20  ;;  %v8817_v34 = vld [vmem:[%s15289_s3 + $0x3a8] sm:$0xff] }
 0xdcd   : > { %v10108_v56 = vpop.f32.mrf.mxu1  ;;  %10157 = vmatpush3.msra.mxu1 %v8817_v34 }
 0xdce   : > { %v8816_v56 = vld [vmem:[%s15289_s3 + $0x3a0] sm:$0xff]  ;;  %10158 = vmatprep.subr.mxu1 %v11017_v5 }
 0xdcf   : > { %v4360_v8 = vpop.f32.mrf.mxu1  ;;  %10159 = vmatpush3.msra.mxu1 %v8816_v56 }
 0xdd0   : > { %v13768_v47 = vadd.f32 %v4360_v8, %v13620_v40  ;;  %v8815_v8 = vld [vmem:[%s15289_s3 + $0x398] sm:$0xff]  ;;  %10160 = vmatprep.subr.mxu1 %v11017_v5 }
 0xdd1   : > { %v10111_v63 = vpop.f32.mrf.mxu1  ;;  %10161 = vmatpush3.msra.mxu1 %v8815_v8 }
 0xdd2   : > { %v8814_v63 = vld [vmem:[%s15289_s3 + $0x390] sm:$0xff]  ;;  %10162 = vmatprep.subr.mxu1 %v11017_v5 }
 0xdd3   : > { %v4365_v46 = vpop.f32.mrf.mxu1  ;;  %10163 = vmatpush3.msra.mxu1 %v8814_v63 }
 0xdd4   : > { %v13771_v31 = vadd.f32 %v4365_v46, %v13623_v49  ;;  %v8813_v46 = vld [vmem:[%s15289_s3 + $0x388] sm:$0xff]  ;;  %10164 = vmatprep.subr.mxu1 %v11017_v5 }
 0xdd5   : > { %v10114_v32 = vpop.f32.mrf.mxu1  ;;  %10165 = vmatpush3.msra.mxu1 %v8813_v46  ;;  %v14075_v46 = vld [vmem:[%s15259_s9 + $0x38] sm:$0xff] }
 0xdd6   : > { %v8812_v32 = vld [vmem:[%s15289_s3 + $0x380] sm:$0xff]  ;;  %10166 = vmatprep.subr.mxu1 %v11017_v5 }
 0xdd7   : > { %v4370_v11 = vpop.f32.mrf.mxu1  ;;  %10167 = vmatpush3.msra.mxu1 %v8812_v32 }
 0xdd8   : > { %v13774_v61 = vadd.f32 %v4370_v11, %v13626_v36  ;;  %4880 = vmatprep.subr.mxu1 %v11017_v5 }
 0xdd9   : > { %v10117_v22 = vpop.f32.mrf.mxu1 }
 0xddb   : > { %v4375_v23 = vpop.f32.mrf.mxu1 }
 0xddc   : > { %v13777_v20 = vadd.f32 %v4375_v23, %v13629_v51 }
 0xddd   : > { %v10120_v57 = vpop.f32.mrf.mxu1 }
 0xdfd   : > { %v4476_v17 = vpop.f32.mrf.mxu1 }
 0xdfe   : > { %10138 = vmatmul.mubr.msk.f32.vlgmr.msra.gmra.mxu0 %vm932_vm3, %v4476_v17 }
 0xdff   : > { %4646 = vmatpush1.msra.mxu0 %v11642_v25  ;;  %v4478_v40 = vpop.f32.mrf.mxu1  ;;  %10140 = vmatprep.mubr.msk.f32.mxu0 %vm11018_vm1, %v11017_v5 }
 0xe00   : > { %4647 = vmatprep.subr.mxu0 %v11017_v5 }
 0xe01   : > { %4648 = vmatpush1.msra.mxu0 %v11650_v26  ;;  %v4481_v49 = vpop.f32.mrf.mxu1 }
 0xe02   : > { %4649 = vmatprep.subr.mxu0 %v11017_v5  ;;  %10141 = vmatmul.mubr.msk.f32.gmra.mxu0 %vm932_vm3, %v4481_v49 }
 0xe03   : > { %4650 = vmatpush1.msra.mxu0 %v11660_v10  ;;  %v4483_v36 = vpop.f32.mrf.mxu1  ;;  %10143 = vmatprep.mubr.msk.f32.mxu0 %vm11018_vm1, %v11017_v5 }
 0xe04   : > { %4651 = vmatprep.subr.mxu0 %v11017_v5 }
 0xe05   : > { %4652 = vmatpush1.msra.mxu0 %v11670_v59  ;;  %v4486_v51 = vpop.f32.mrf.mxu1 }
 0xe06   : > { %4653 = vmatprep.subr.mxu0 %v11017_v5  ;;  %10144 = vmatmul.mubr.msk.f32.gmra.mxu0 %vm932_vm3, %v4486_v51 }
 0xe07   : > { %4654 = vmatpush1.msra.mxu0 %v11680_v50  ;;  %v4488_v35 = vpop.f32.mrf.mxu1  ;;  %10146 = vmatprep.mubr.msk.f32.mxu0 %vm11018_vm1, %v11017_v5 }
 0xe08   : > { %4655 = vmatprep.subr.mxu0 %v11017_v5 }
 0xe09   : > { %4656 = vmatpush1.msra.mxu0 %v11690_v43  ;;  %v4491_v48 = vpop.f32.mrf.mxu1 }
 0xe0a   : > { %4657 = vmatprep.subr.mxu0 %v11017_v5  ;;  %10147 = vmatmul.mubr.msk.f32.gmra.mxu0 %vm932_vm3, %v4491_v48 }
 0xe0b   : > { %4658 = vmatpush1.msra.mxu0 %v11700_v28  ;;  %v4493_v37 = vpop.f32.mrf.mxu1  ;;  %10149 = vmatprep.mubr.msk.f32.mxu0 %vm11018_vm1, %v11017_v5 }
 0xe0c   : > { %4659 = vmatprep.subr.mxu0 %v11017_v5 }
 0xe0d   : > { %4660 = vmatpush1.msra.mxu0 %v11710_v21  ;;  %v4496_v30 = vpop.f32.mrf.mxu1 }
 0xe0e   : > { %4661 = vmatprep.subr.mxu0 %v11017_v5  ;;  %10150 = vmatmul.mubr.msk.f32.gmra.mxu0 %vm932_vm3, %v4496_v30 }
 0xe0f   : > { %4662 = vmatpush1.msra.mxu0 %v11720_v15  ;;  %8807 = vmatprep.mubr.msk.f32.mxu0 %vm1346_vm5, %v8797_v27  ;;  %v4498_v6 = vpop.f32.mrf.mxu1 }
 0xe10   : > { %4663 = vmatprep.subr.mxu0 %v11017_v5 }
 0xe11   : > { %4664 = vmatpush1.msra.mxu0 %v11730_v9 }
 0xe12   : > { %4665 = vmatprep.subr.mxu0 %v11017_v5 }
 0xe13   : > { %4666 = vmatpush1.msra.mxu0 %v11740_v4 }
 0xe14   : > { %4667 = vmatprep.subr.mxu0 %v11017_v5 }
 0xe15   : > { %4668 = vmatpush1.msra.mxu0 %v11750_v1 }
 0xe16   : > { %4669 = vmatprep.subr.mxu0 %v11017_v5 }
 0xe17   : > { %4670 = vmatpush1.msra.mxu0 %v11760_v2 }
 0xe18   : > { %4671 = vmatprep.subr.mxu0 %v11017_v5 }
 0xe19   : > { %4672 = vmatpush1.msra.mxu0 %v11770_v0 }
 0xe1a   : > { %4673 = vmatprep.subr.mxu0 %v11017_v5 }
 0xe1b   : > { %4674 = vmatpush1.msra.mxu0 %v11780_v42 }
 0xe1c   : > { %4675 = vmatprep.subr.mxu0 %v11017_v5 }
 0xe1d   : > { %4676 = vmatpush1.msra.mxu0 %v11790_v16 }
 0xe1e   : > { %4691 = vmatprep.subr.mxu0 %v11017_v5 }
 0xe1f   : > { %8806 = vmatpush2.msk.msra.mxu0 %vm1362_vm6, %v11800_v24 }
 0xe20   : > { %4693 = vmatprep.subr.mxu0 %v11017_v5 }
 0xe21   : > { %4694 = vmatpush2.msra.mxu0 %v11812_v53 }
 0xe22   : > { %4695 = vmatprep.subr.mxu0 %v11017_v5 }
 0xe23   : > { %4696 = vmatpush2.msra.mxu0 %v11822_v44 }
 0xe24   : > { %4697 = vmatprep.subr.mxu0 %v11017_v5 }
 0xe25   : > { %4698 = vmatpush2.msra.mxu0 %v11832_v29 }
 0xe26   : > { %4699 = vmatprep.subr.mxu0 %v11017_v5 }
 0xe27   : > { %4700 = vmatpush2.msra.mxu0 %v11842_v19 }
 0xe28   : > { %4701 = vmatprep.subr.mxu0 %v11017_v5 }
 0xe29   : > { %4702 = vmatpush2.msra.mxu0 %v11850_v12 }
 0xe2a   : > { %4703 = vmatprep.subr.mxu0 %v11017_v5 }
 0xe2b   : > { %4704 = vmatpush2.msra.mxu0 %v11857_v13 }
 0xe2c   : > { %4705 = vmatprep.subr.mxu0 %v11017_v5 }
 0xe2d   : > { %4706 = vmatpush2.msra.mxu0 %v11864_v14 }
 0xe2e   : > { %4707 = vmatprep.subr.mxu0 %v11017_v5 }
 0xe2f   : > { %4708 = vmatpush2.msra.mxu0 %v11870_v58 }
 0xe30   : > { %4710 = vmatmul.mubr.f32.vlgmr.msra.gmra.mxu0 %v8796_v54  ;;  %10183 = vmatprep.subr.mxu0 %v11017_v5 }
 0xe31   : > { %8808 = vmatprep.mubr.msk.f32.mxu0 %vm1346_vm5, %v8799_v18 }
 0xe34   : > { %4715 = vmatmul.mubr.f32.gmra.mxu0 %v8798_v7 }
 0xe35   : > { %8809 = vmatprep.mubr.msk.f32.mxu0 %vm1346_vm5, %v8801_v3 }
 0xe38   : > { %4720 = vmatmul.mubr.f32.gmra.mxu0 %v8800_v33 }
 0xe39   : > { %8810 = vmatprep.mubr.msk.f32.mxu0 %vm1346_vm5, %v8803_v62 }
 0xe3c   : > { %4725 = vmatmul.mubr.f32.gmra.mxu0 %v8802_v38 }
 0xe3d   : > { %8811 = vmatprep.mubr.msk.f32.mxu0 %vm1346_vm5, %v8805_v39 }
 0xe40   : > { %4730 = vmatmul.mubr.f32.gmra.mxu0 %v8804_v60 }
 0xe41   : > { %10199 = vmatprep.mubr.msk.f32.mxu0 %vm11018_vm1, %v11017_v5 }
 0xebe   : > { %v4590_v11 = vpop.f32.mrf.mxu0 }
 0xebf   : > { %v13913_v22 = vadd.f32 %v4590_v11, %v13765_v41  ;;  %v14082_v11 = vld [vmem:[%s15259_s9 + $0x30] sm:$0xff] }
 0xec0   : > { %v10139_v23 = vpop.f32.mrf.mxu0 }
 0xec1   : > { %v14092_v23 = vld [vmem:[%s15259_s9 + $0x28] sm:$0xff] }
 0xec2   : > { %v4595_v57 = vpop.f32.mrf.mxu0 }
 0xec3   : > { %v13916_v17 = vadd.f32 %v4595_v57, %v13768_v47 }
 0xec4   : > { %v10142_v40 = vpop.f32.mrf.mxu0 }
 0xec6   : > { %v4600_v49 = vpop.f32.mrf.mxu0 }
 0xec7   : > { %v13919_v36 = vadd.f32 %v4600_v49, %v13771_v31  ;;  %v14109_v49 = vld [vmem:[%s15259_s9 + $0x18] sm:$0xff] }
 0xec8   : > { %v10145_v51 = vpop.f32.mrf.mxu0 }
 0xec9   : > { %v14116_v51 = vld [vmem:[%s15259_s9 + $0x10] sm:$0xff] }
 0xeca   : > { %v4605_v35 = vpop.f32.mrf.mxu0 }
 0xecb   : > { %v13922_v48 = vadd.f32 %v4605_v35, %v13774_v61 }
 0xecc   : > { %v10148_v37 = vpop.f32.mrf.mxu0 }
 0xece   : > { %v4610_v27 = vpop.f32.mrf.mxu0 }
 0xecf   : > { %v13925_v41 = vadd.f32 %v4610_v27, %v13777_v20  ;;  %v14133_v27 = vld [vmem:[%s15259_s9] sm:$0xff] }
 0xed0   : > { %v10151_v30 = vpop.f32.mrf.mxu0 }
 0xef0   : > { %v4711_v6 = vpop.f32.mrf.mxu0 }
 0xef1   : > { %10169 = vmatmul.mubr.msk.f32.vlgmr.msra.gmra.mxu1 %vm932_vm3, %v4711_v6 }
 0xef2   : > { %4881 = vmatpush1.msra.mxu1 %v11642_v25  ;;  %v4713_v47 = vpop.f32.mrf.mxu0  ;;  %10171 = vmatprep.mubr.msk.f32.mxu1 %vm11018_vm1, %v11017_v5 }
 0xef3   : > { %4882 = vmatprep.subr.mxu1 %v11017_v5 }
 0xef4   : > { %4883 = vmatpush1.msra.mxu1 %v11650_v26  ;;  %v4716_v31 = vpop.f32.mrf.mxu0 }
 0xef5   : > { %4884 = vmatprep.subr.mxu1 %v11017_v5  ;;  %10172 = vmatmul.mubr.msk.f32.gmra.mxu1 %vm932_vm3, %v4716_v31 }
 0xef6   : > { %4885 = vmatpush1.msra.mxu1 %v11660_v10  ;;  %v4718_v61 = vpop.f32.mrf.mxu0  ;;  %10174 = vmatprep.mubr.msk.f32.mxu1 %vm11018_vm1, %v11017_v5 }
 0xef7   : > { %4886 = vmatprep.subr.mxu1 %v11017_v5 }
 0xef8   : > { %4887 = vmatpush1.msra.mxu1 %v11670_v59  ;;  %v4721_v25 = vpop.f32.mrf.mxu0 }
 0xef9   : > { %4888 = vmatprep.subr.mxu1 %v11017_v5  ;;  %10175 = vmatmul.mubr.msk.f32.gmra.mxu1 %vm932_vm3, %v4721_v25 }
 0xefa   : > { %4889 = vmatpush1.msra.mxu1 %v11680_v50  ;;  %v4723_v26 = vpop.f32.mrf.mxu0  ;;  %10177 = vmatprep.mubr.msk.f32.mxu1 %vm11018_vm1, %v11017_v5  ;;  %v8826_v50 = vld [vmem:[%s15288_s2 + $0x4b8] sm:$0xff] }
 0xefb   : > { %4890 = vmatprep.subr.mxu1 %v11017_v5  ;;  %v8855_v26 = vld [vmem:[%s15256_s6 + $0x1] ss:$0 sm:$0xff] }
 0xefc   : > { %4891 = vmatpush1.msra.mxu1 %v11690_v43  ;;  %v4726_v10 = vpop.f32.mrf.mxu0 }
 0xefd   : > { %4892 = vmatprep.subr.mxu1 %v11017_v5  ;;  %10178 = vmatmul.mubr.msk.f32.gmra.mxu1 %vm932_vm3, %v4726_v10 }
 0xefe   : > { %4893 = vmatpush1.msra.mxu1 %v11700_v28  ;;  %v4728_v59 = vpop.f32.mrf.mxu0  ;;  %10180 = vmatprep.mubr.msk.f32.mxu1 %vm11018_vm1, %v11017_v5 }
 0xeff   : > { %4894 = vmatprep.subr.mxu1 %v11017_v5 }
 0xf00   : > { %4895 = vmatpush1.msra.mxu1 %v11710_v21  ;;  %v4731_v43 = vpop.f32.mrf.mxu0  ;;  %v8825_v21 = vld [vmem:[%s15288_s2 + $0x4b0] sm:$0xff] }
 0xf01   : > { %4896 = vmatprep.subr.mxu1 %v11017_v5  ;;  %10181 = vmatmul.mubr.msk.f32.gmra.mxu1 %vm932_vm3, %v4731_v43 }
 0xf02   : > { %4897 = vmatpush1.msra.mxu1 %v11720_v15  ;;  %8836 = vmatprep.mubr.msk.f32.mxu1 %vm1346_vm5, %v8826_v50  ;;  %v4733_v28 = vpop.f32.mrf.mxu0  ;;  %v8828_v15 = vld [vmem:[%s15288_s2 + $0x4c8] sm:$0xff] }
 0xf03   : > { %4898 = vmatprep.subr.mxu1 %v11017_v5 }
 0xf04   : > { %4899 = vmatpush1.msra.mxu1 %v11730_v9  ;;  %v8827_v9 = vld [vmem:[%s15288_s2 + $0x4c0] sm:$0xff] }
 0xf05   : > { %4900 = vmatprep.subr.mxu1 %v11017_v5 }
 0xf06   : > { %4901 = vmatpush1.msra.mxu1 %v11740_v4  ;;  %v8830_v4 = vld [vmem:[%s15288_s2 + $0x4d8] sm:$0xff] }
 0xf07   : > { %4902 = vmatprep.subr.mxu1 %v11017_v5 }
 0xf08   : > { %4903 = vmatpush1.msra.mxu1 %v11750_v1  ;;  %v8829_v1 = vld [vmem:[%s15288_s2 + $0x4d0] sm:$0xff] }
 0xf09   : > { %4904 = vmatprep.subr.mxu1 %v11017_v5 }
 0xf0a   : > { %4905 = vmatpush1.msra.mxu1 %v11760_v2  ;;  %v8832_v2 = vld [vmem:[%s15288_s2 + $0x4e8] sm:$0xff] }
 0xf0b   : > { %4906 = vmatprep.subr.mxu1 %v11017_v5 }
 0xf0c   : > { %4907 = vmatpush1.msra.mxu1 %v11770_v0  ;;  %v8831_v0 = vld [vmem:[%s15288_s2 + $0x4e0] sm:$0xff] }
 0xf0d   : > { %4908 = vmatprep.subr.mxu1 %v11017_v5 }
 0xf0e   : > { %4909 = vmatpush1.msra.mxu1 %v11780_v42  ;;  %v8834_v42 = vld [vmem:[%s15288_s2 + $0x4f8] sm:$0xf] }
 0xf0f   : > { %4910 = vmatprep.subr.mxu1 %v11017_v5 }
 0xf10   : > { %4911 = vmatpush1.msra.mxu1 %v11790_v16  ;;  %v8833_v16 = vld [vmem:[%s15288_s2 + $0x4f0] sm:$0xf] }
 0xf11   : > { %4926 = vmatprep.subr.mxu1 %v11017_v5 }
 0xf12   : > { %8835 = vmatpush2.msk.msra.mxu1 %vm1362_vm6, %v11800_v24  ;;  %v8848_v24 = vld [vmem:[%s15289_s3 + $0x3f8] sm:$0xff] }
 0xf13   : > { %4928 = vmatprep.subr.mxu1 %v11017_v5  ;;  %10184 = vmatpush3.msra.mxu0 %v8848_v24 }
 0xf14   : > { %4929 = vmatpush2.msra.mxu1 %v11812_v53  ;;  %v8847_v53 = vld [vmem:[%s15289_s3 + $0x3f0] sm:$0xff]  ;;  %10185 = vmatprep.subr.mxu0 %v11017_v5 }
 0xf15   : > { %4930 = vmatprep.subr.mxu1 %v11017_v5  ;;  %10186 = vmatpush3.msra.mxu0 %v8847_v53 }
 0xf16   : > { %4931 = vmatpush2.msra.mxu1 %v11822_v44  ;;  %v8846_v44 = vld [vmem:[%s15289_s3 + $0x3e8] sm:$0xff]  ;;  %10187 = vmatprep.subr.mxu0 %v11017_v5 }
 0xf17   : > { %4932 = vmatprep.subr.mxu1 %v11017_v5  ;;  %10188 = vmatpush3.msra.mxu0 %v8846_v44 }
 0xf18   : > { %4933 = vmatpush2.msra.mxu1 %v11832_v29  ;;  %v8845_v29 = vld [vmem:[%s15289_s3 + $0x3e0] sm:$0xff]  ;;  %10189 = vmatprep.subr.mxu0 %v11017_v5 }
 0xf19   : > { %4934 = vmatprep.subr.mxu1 %v11017_v5  ;;  %10190 = vmatpush3.msra.mxu0 %v8845_v29 }
 0xf1a   : > { %4935 = vmatpush2.msra.mxu1 %v11842_v19  ;;  %v8844_v19 = vld [vmem:[%s15289_s3 + $0x3d8] sm:$0xff]  ;;  %10191 = vmatprep.subr.mxu0 %v11017_v5 }
 0xf1b   : > { %4936 = vmatprep.subr.mxu1 %v11017_v5  ;;  %10192 = vmatpush3.msra.mxu0 %v8844_v19 }
 0xf1c   : > { %4937 = vmatpush2.msra.mxu1 %v11850_v12  ;;  %v8843_v12 = vld [vmem:[%s15289_s3 + $0x3d0] sm:$0xff]  ;;  %10193 = vmatprep.subr.mxu0 %v11017_v5 }
 0xf1d   : > { %4938 = vmatprep.subr.mxu1 %v11017_v5  ;;  %10194 = vmatpush3.msra.mxu0 %v8843_v12 }
 0xf1e   : > { %4939 = vmatpush2.msra.mxu1 %v11857_v13  ;;  %v8842_v13 = vld [vmem:[%s15289_s3 + $0x3c8] sm:$0xff]  ;;  %10195 = vmatprep.subr.mxu0 %v11017_v5 }
 0xf1f   : > { %4940 = vmatprep.subr.mxu1 %v11017_v5  ;;  %10196 = vmatpush3.msra.mxu0 %v8842_v13 }
 0xf20   : > { %4941 = vmatpush2.msra.mxu1 %v11864_v14  ;;  %10197 = vmatprep.subr.mxu0 %v11017_v5  ;;  %v8841_v14 = vld [vmem:[%s15289_s3 + $0x3c0] sm:$0xff] }
 0xf21   : > { %4942 = vmatprep.subr.mxu1 %v11017_v5  ;;  %10198 = vmatpush3.msra.mxu0 %v8841_v14 }
 0xf22   : > { %4943 = vmatpush2.msra.mxu1 %v11870_v58  ;;  %10214 = vmatprep.subr.mxu0 %v11017_v5 }
 0xf23   : > { %4945 = vmatmul.mubr.f32.vlgmr.msra.gmra.mxu1 %v8825_v21  ;;  %10252 = vmatprep.subr.mxu1 %v11017_v5 }
 0xf24   : > { %8837 = vmatprep.mubr.msk.f32.mxu1 %vm1346_vm5, %v8828_v15 }
 0xf27   : > { %4950 = vmatmul.mubr.f32.gmra.mxu1 %v8827_v9 }
 0xf28   : > { %8838 = vmatprep.mubr.msk.f32.mxu1 %vm1346_vm5, %v8830_v4 }
 0xf2b   : > { %4955 = vmatmul.mubr.f32.gmra.mxu1 %v8829_v1 }
 0xf2c   : > { %8839 = vmatprep.mubr.msk.f32.mxu1 %vm1346_vm5, %v8832_v2 }
 0xf2f   : > { %4960 = vmatmul.mubr.f32.gmra.mxu1 %v8831_v0 }
 0xf30   : > { %8840 = vmatprep.mubr.msk.f32.mxu1 %vm1346_vm5, %v8834_v42 }
 0xf33   : > { %4965 = vmatmul.mubr.f32.gmra.mxu1 %v8833_v16 }
 0xf34   : > { %10262 = vmatprep.mubr.msk.f32.mxu1 %vm11018_vm1, %v11017_v5 }
 0xfb1   : > { %v4825_v58 = vpop.f32.mrf.mxu1 }
 0xfb2   : > { %v4849_v20 = vadd.f32 %v4825_v58, %v13913_v22 }
 0xfb3   : > { %v10170_v54 = vpop.f32.mrf.mxu1 }
 0xfb5   : > { %v4830_v18 = vpop.f32.mrf.mxu1 }
 0xfb6   : > { %v4850_v7 = vadd.f32 %v4830_v18, %v13916_v17  ;;  %v14099_v17 = vld [vmem:[%s15259_s9 + $0x20] sm:$0xff] }
 0xfb7   : > { %v10173_v3 = vpop.f32.mrf.mxu1 }
 0xfb9   : > { %v4835_v33 = vpop.f32.mrf.mxu1 }
 0xfba   : > { %v4851_v62 = vadd.f32 %v4835_v33, %v13919_v36 }
 0xfbb   : > { %v10176_v38 = vpop.f32.mrf.mxu1 }
 0xfbd   : > { %v4840_v39 = vpop.f32.mrf.mxu1 }
 0xfbe   : > { %v14064_v60 = vadd.f32 %v4840_v39, %v13922_v48  ;;  %v14126_v48 = vld [vmem:[%s15259_s9 + $0x8] sm:$0xff] }
 0xfbf   : > { %v10179_v45 = vpop.f32.mrf.mxu1 }
 0xfc1   : > { %v4845_v52 = vpop.f32.mrf.mxu1 }
 0xfc2   : > { %v14067_v34 = vadd.f32 %v4845_v52, %v13925_v41 }
 0xfc3   : > { %v10182_v56 = vpop.f32.mrf.mxu1 }
 0xfe3   : > { %v4946_v8 = vpop.f32.mrf.mxu1 }
 0xfe4   : > { %10200 = vmatmul.mubr.msk.f32.vlgmr.msra.gmra.mxu0 %vm932_vm3, %v4946_v8 }
 0xfe5   : > { %v4948_v63 = vpop.f32.mrf.mxu1  ;;  %10202 = vmatprep.mubr.msk.f32.mxu0 %vm11018_vm1, %v11017_v5  ;;  %10215 = vmatpush3.msra.mxu0 %v14075_v46 }
 0xfe6   : > { %10216 = vmatprep.subr.mxu0 %v11017_v5 }
 0xfe7   : > { %v4951_v32 = vpop.f32.mrf.mxu1  ;;  %10217 = vmatpush3.msra.mxu0 %v14082_v11 }
 0xfe8   : > { %10203 = vmatmul.mubr.msk.f32.gmra.mxu0 %vm932_vm3, %v4951_v32  ;;  %10218 = vmatprep.subr.mxu0 %v11017_v5 }
 0xfe9   : > { %v4953_v22 = vpop.f32.mrf.mxu1  ;;  %10205 = vmatprep.mubr.msk.f32.mxu0 %vm11018_vm1, %v11017_v5  ;;  %10219 = vmatpush3.msra.mxu0 %v14092_v23 }
 0xfea   : > { %10220 = vmatprep.subr.mxu0 %v11017_v5 }
 0xfeb   : > { %v4956_v57 = vpop.f32.mrf.mxu1  ;;  %10221 = vmatpush3.msra.mxu0 %v14099_v17 }
 0xfec   : > { %10206 = vmatmul.mubr.msk.f32.gmra.mxu0 %vm932_vm3, %v4956_v57  ;;  %10222 = vmatprep.subr.mxu0 %v11017_v5 }
 0xfed   : > { %v4958_v40 = vpop.f32.mrf.mxu1  ;;  %10208 = vmatprep.mubr.msk.f32.mxu0 %vm11018_vm1, %v11017_v5  ;;  %10223 = vmatpush3.msra.mxu0 %v14109_v49 }
 0xfee   : > { %10224 = vmatprep.subr.mxu0 %v11017_v5 }
 0xfef   : > { %v4961_v36 = vpop.f32.mrf.mxu1  ;;  %10225 = vmatpush3.msra.mxu0 %v14116_v51 }
 0xff0   : > { %10209 = vmatmul.mubr.msk.f32.gmra.mxu0 %vm932_vm3, %v4961_v36  ;;  %10226 = vmatprep.subr.mxu0 %v11017_v5 }
 0xff1   : > { %v4963_v35 = vpop.f32.mrf.mxu1  ;;  %10211 = vmatprep.mubr.msk.f32.mxu0 %vm11018_vm1, %v11017_v5  ;;  %10227 = vmatpush3.msra.mxu0 %v14126_v48 }
 0xff2   : > { %10228 = vmatprep.subr.mxu0 %v11017_v5 }
 0xff3   : > { %v4966_v37 = vpop.f32.mrf.mxu1  ;;  %10229 = vmatpush3.msra.mxu0 %v14133_v27 }
 0xff4   : > { %10212 = vmatmul.mubr.msk.f32.gmra.mxu0 %vm932_vm3, %v4966_v37  ;;  %10233 = vmatprep.subr.mxu0 %v11017_v5 }
 0xff5   : > { %v4968_v41 = vpop.f32.mrf.mxu1  ;;  %10230 = vmatprep.mubr.msk.f32.mxu0 %vm11018_vm1, %v11017_v5 }
0x10a4   : > { %v5060_v30 = vpop.f32.mrf.mxu0 }
0x10a5   : > { %v5084_v61 = vadd.f32 %v5060_v30, %v4849_v20 }
0x10a6   : > { %v10201_v6 = vpop.f32.mrf.mxu0 }
0x10a7   : > { %v14145_v43 = vadd.f32 %v8855_v26, %v5084_v61 }
0x10a8   : > { %v5065_v47 = vpop.f32.mrf.mxu0 }
0x10a9   : > { %v5085_v31 = vadd.f32 %v5065_v47, %v4850_v7  ;;  %v5106_v2 = vsel %vm932_vm3, %v14145_v43, 0.0  ;;  %v5121_v42 = vmul.f32 %v14145_v43, %v14145_v43 }
0x10aa   : > { %v10204_v25 = vpop.f32.mrf.mxu0 }
0x10ab   : > { %v14143_v59 = vadd.f32 %v8855_v26, %v5085_v31  ;;  %v5126_v54 = vsel %vm932_vm3, %v5121_v42, 0.0 }
0x10ac   : > { %v5070_v10 = vpop.f32.mrf.mxu0 }
0x10ad   : > { %v5086_v50 = vadd.f32 %v5070_v10, %v4851_v62  ;;  %v5107_v9 = vsel %vm932_vm3, %v14143_v59, 0.0  ;;  %v5122_v4 = vmul.f32 %v14143_v59, %v14143_v59 }
0x10ae   : > { %v10207_v28 = vpop.f32.mrf.mxu0  ;;  %v5108_v44 = vadd.f32 %v5107_v9, %v5106_v2  ;;  %v8860_v9 = vld [vmem:[%s15258_s8 + $0x1] ss:$0 sm:$0xff] }
0x10af   : > { %v14147_v21 = vadd.f32 %v8855_v26, %v5086_v50  ;;  %v5127_v19 = vsel %vm932_vm3, %v5122_v4, 0.0 }
0x10b0   : > { %v5075_v15 = vpop.f32.mrf.mxu0  ;;  %v5128_v3 = vadd.f32 %v5127_v19, %v5126_v54  ;;  %v8873_v54 = vld [vmem:[%s15255_s5 + $0x78] sm:$0xff] }
0x10b1   : > { %v5087_v1 = vadd.f32 %v5075_v15, %v14064_v60  ;;  %v5109_v16 = vsel %vm932_vm3, %v14147_v21, 0.0  ;;  %v5123_v24 = vmul.f32 %v14147_v21, %v14147_v21 }
0x10b2   : > { %v10210_v0 = vpop.f32.mrf.mxu0  ;;  %v5110_v58 = vadd.f32 %v5109_v16, %v5108_v44 }
0x10b3   : > { %v14162_v53 = vadd.f32 %v8855_v26, %v5087_v1  ;;  %v5129_v18 = vsel %vm932_vm3, %v5123_v24, 0.0 }
0x10b4   : > { %v5080_v29 = vpop.f32.mrf.mxu0  ;;  %v5130_v60 = vadd.f32 %v5129_v18, %v5128_v3  ;;  %v8872_v18 = vld [vmem:[%s15255_s5 + $0x70] sm:$0xff]  ;;  %v8870_v3 = vld [vmem:[%s15255_s5 + $0x60] sm:$0xff] }
0x10b5   : > { %v5111_v12 = vsel %vm932_vm3, %v14162_v53, 0.0  ;;  %v5124_v13 = vmul.f32 %v14162_v53, %v14162_v53  ;;  %v5088_v14 = vadd.f32 %v5080_v29, %v14067_v34 }
0x10b6   : > { %v10213_v20 = vpop.f32.mrf.mxu0  ;;  %v5112_v33 = vadd.f32 %v5111_v12, %v5110_v58  ;;  %v8863_v58 = vld [vmem:[%s15290_s4 + $0x4] sm:$0xf] }
0x10b7   : > { %v14172_v7 = vadd.f32 %v8855_v26, %v5088_v14  ;;  %v5131_v62 = vsel %vm932_vm3, %v5124_v13, 0.0  ;;  %v5328_v20 = vld [vmem:[%s15290_s4] sm:$0xf] }
0x10b8   : > { %v5132_v34 = vadd.f32 %v5131_v62, %v5130_v60  ;;  %v8868_v62 = vld [vmem:[%s15255_s5 + $0x50] sm:$0xff]  ;;  %v5413_v60 = vld [vmem:[%s15255_s5 + $0x38] sm:$0xff] }
0x10b9   : > { %v5113_v38 = vsel %vm980_vm4, %v14172_v7, 0.0  ;;  %v5125_v39 = vmul.f32 %v14172_v7, %v14172_v7 }
0x10ba   : > { %v5114_v45 = vadd.f32 %v5113_v38, %v5112_v33  ;;  %v8869_v33 = vld [vmem:[%s15255_s5 + $0x58] sm:$0xff]  ;;  %v8867_v38 = vld [vmem:[%s15255_s5 + $0x48] sm:$0xff] }
0x10bb   : > { %v5133_v52 = vsel %vm980_vm4, %v5125_v39, 0.0  ;;  %v8866_v39 = vld [vmem:[%s15255_s5 + $0x40] sm:$0xff] }
0x10bc   : > { %v5115_v56 = vrot.slane %v5114_v45, 4  ;;  %v5134_v63 = vadd.f32 %v5133_v52, %v5132_v34  ;;  %v5411_v52 = vld [vmem:[%s15255_s5 + $0x28] sm:$0xff]  ;;  %v5410_v34 = vld [vmem:[%s15255_s5 + $0x20] sm:$0xff] }
0x10be   : > { %v5116_v8 = vadd.f32 %v5115_v56, %v5114_v45  ;;  %v5135_v57 = vrot.slane %v5134_v63, 4  ;;  %v5412_v45 = vld [vmem:[%s15255_s5 + $0x30] sm:$0xff]  ;;  %v5409_v56 = vld [vmem:[%s15255_s5 + $0x18] sm:$0xff] }
0x10c0   : > { %v5117_v32 = vrot.slane %v5116_v8, 2  ;;  %v5136_v35 = vadd.f32 %v5135_v57, %v5134_v63  ;;  %v5407_v63 = vld [vmem:[%s15255_s5 + $0x8] sm:$0xff] }
0x10c2   : > { %v5118_v22 = vadd.f32 %v5117_v32, %v5116_v8  ;;  %v5137_v37 = vrot.slane %v5136_v35, 2  ;;  %v5408_v8 = vld [vmem:[%s15255_s5 + $0x10] sm:$0xff]  ;;  %v5406_v32 = vld [vmem:[%s15255_s5] sm:$0xff] }
0x10c4   : > { %v5119_v40 = vrot.slane %v5118_v22, 1  ;;  %v5138_v41 = vadd.f32 %v5137_v37, %v5136_v35  ;;  %v8885_v35 = vld [vmem:[%s15255_s5 + $0xb0] sm:$0xff] }
0x10c6   : > { %v5120_v36 = vadd.f32 %v5119_v40, %v5118_v22  ;;  %v8886_v40 = vld [vmem:[%s15255_s5 + $0xb8] sm:$0xff] }
0x10c8   : > { %10231 = vmatmul.mubr.msk.f32.vlgmr.msra.gmra.mxu0 %vm932_vm3, %v5120_v36 }
0x10c9   : > { %10234 = vmatpush3.msra.mxu0 %v14075_v46  ;;  %10249 = vmatprep.mubr.msk.f32.mxu0 %vm11018_vm1, %v11017_v5  ;;  %v5139_v46 = vrot.slane %v5138_v41, 1 }
0x10ca   : > { %10235 = vmatprep.subr.mxu0 %v11017_v5 }
0x10cb   : > { %10236 = vmatpush3.msra.mxu0 %v14082_v11  ;;  %v5140_v11 = vadd.f32 %v5139_v46, %v5138_v41  ;;  %v8884_v41 = vld [vmem:[%s15255_s5 + $0xa8] sm:$0xff]  ;;  %v8883_v46 = vld [vmem:[%s15255_s5 + $0xa0] sm:$0xff] }
0x10cc   : > { %10237 = vmatprep.subr.mxu0 %v11017_v5 }
0x10cd   : > { %10238 = vmatpush3.msra.mxu0 %v14092_v23 }
0x10ce   : > { %10239 = vmatprep.subr.mxu0 %v11017_v5 }
0x10cf   : > { %10240 = vmatpush3.msra.mxu0 %v14099_v17 }
0x10d0   : > { %10241 = vmatprep.subr.mxu0 %v11017_v5 }
0x10d1   : > { %10242 = vmatpush3.msra.mxu0 %v14109_v49 }
0x10d2   : > { %10243 = vmatprep.subr.mxu0 %v11017_v5 }
0x10d3   : > { %10244 = vmatpush3.msra.mxu0 %v14116_v51 }
0x10d4   : > { %10245 = vmatprep.subr.mxu0 %v11017_v5 }
0x10d5   : > { %10246 = vmatpush3.msra.mxu0 %v14126_v48 }
0x10d6   : > { %10247 = vmatprep.subr.mxu0 %v11017_v5 }
0x10d7   : > { %10248 = vmatpush3.msra.mxu0 %v14133_v27  ;;  %v8856_v27 = vld [vmem:[%s15257_s7 + $0x1] sm:$0x1] }
0x10d8   : > { %10250 = vmatmul.mubr.msk.f32.vlgmr.msra.gmra.mxu0 %vm932_vm3, %v5140_v11  ;;  %10265 = vmatprep.subr.mxu0 %v11017_v5  ;;  %v8876_v11 = vld [vmem:[%s15290_s4 + $0x8] sm:$0xf] }
0x10d9   : > { %10275 = vmatprep.mubr.msk.f32.mxu0 %vm11018_vm1, %v11017_v5 }
0x1188   : > { %v5210_v23 = vpop.f32.mrf.mxu0 }
0x1189   : > { %v5287_v49 = vmul.f32 0.013888889, %v5210_v23  ;;  %v8882_v23 = vld [vmem:[%s15255_s5 + $0x98] sm:$0xff] }
0x118a   : > { %v10232_v17 = vpop.f32.mrf.mxu0 }
0x118b   : > { %v5289_v30 = vmul.f32 %v5287_v49, %v5287_v49  ;;  %v5296_v61 = vrot.slane %v5287_v49, %v11610_v55  ;;  %v8881_v17 = vld [vmem:[%s15255_s5 + $0x90] sm:$0xff]  ;;  %v8888_v49 = vld [vmem:[%s15290_s4 + $0xc] sm:$0xf] }
0x118d   : > { %v5300_v10 = vsub.f32 %v14162_v53, %v5296_v61  ;;  %v5299_v28 = vsub.f32 %v14147_v21, %v5296_v61  ;;  %v5301_v15 = vsub.f32 %v14172_v7, %v5296_v61  ;;  %v5298_v1 = vsub.f32 %v14143_v59, %v5296_v61  ;;  %v8871_v7 = vld [vmem:[%s15255_s5 + $0x68] sm:$0xff] }
0x118e   : > { %v5297_v42 = vsub.f32 %v14145_v43, %v5296_v61  ;;  %v8893_v61 = vld [vmem:[%s15255_s5 + $0xd0] sm:$0xff] }
0x1198   : > { %v5283_v51 = vpop.f32.mrf.mxu0 }
0x1199   : > { %v5288_v6 = vmul.f32 0.013888889, %v5283_v51  ;;  %v8898_v51 = vld [vmem:[%s15255_s5 + $0xf8] sm:$0xff] }
0x119a   : > { %v10251_v47 = vpop.f32.mrf.mxu0 }
0x119b   : > { %v5290_v48 = vsub.f32 %v5288_v6, %v5289_v30  ;;  %v8880_v30 = vld [vmem:[%s15255_s5 + $0x88] sm:$0xff]  ;;  %v8897_v6 = vld [vmem:[%s15255_s5 + $0xf0] sm:$0xff]  ;;  %v8879_v47 = vld [vmem:[%s15255_s5 + $0x80] sm:$0xff] }
0x119d   : > { %v5291_v31 = vadd.f32 1e-05, %v5290_v48  ;;  %v8896_v48 = vld [vmem:[%s15255_s5 + $0xe8] sm:$0xff] }
0x119f   : > { %10881 = vrsqrt.f32 %v5291_v31  ;;  %v8895_v31 = vld [vmem:[%s15255_s5 + $0xe0] sm:$0xff] }
0x11ac   : > { %v10882_v25 = vpop.eup %10881 }
0x11ad   : > { %v5302_v26 = vmul.f32 %v10882_v25, %v8856_v27  ;;  %v8894_v27 = vld [vmem:[%s15255_s5 + $0xd8] sm:$0xff]  ;;  %v8892_v25 = vld [vmem:[%s15255_s5 + $0xc8] sm:$0xff] }
0x11af   : > { %v5306_v50 = vrot.slane %v5302_v26, %v11610_v55  ;;  %v8891_v26 = vld [vmem:[%s15255_s5 + $0xc0] sm:$0xff] }
0x11b1   : > { %v5310_v4 = vmul.f32 %v5306_v50, %v5300_v10  ;;  %v5309_v2 = vmul.f32 %v5306_v50, %v5299_v28  ;;  %v5311_v0 = vmul.f32 %v5306_v50, %v5301_v15  ;;  %v5308_v16 = vmul.f32 %v5306_v50, %v5298_v1 }
0x11b2   : > { %v5307_v44 = vmul.f32 %v5306_v50, %v5297_v42  ;;  %v8910_v42 = vld [vmem:[%s15255_s5 + $0x138] sm:$0xff] }
0x11b3   : > { %v5321_v24 = vadd.f32 %v8860_v9, %v5310_v4  ;;  %v5322_v53 = vadd.f32 %v8860_v9, %v5311_v0  ;;  %v5320_v29 = vadd.f32 %v8860_v9, %v5309_v2  ;;  %v5319_v21 = vadd.f32 %v8860_v9, %v5308_v16  ;;  %v8900_v2 = vld [vmem:[%s15290_s4 + $0x10] sm:$0xf] }
0x11b4   : > { %v5318_v59 = vadd.f32 %v8860_v9, %v5307_v44  ;;  %v8912_v44 = vld [vmem:[%s15290_s4 + $0x14] sm:$0xf] }
0x11b5   : > { %v14215_v19 = vmax.f32 %v5322_v53, 0.0  ;;  %v14217_v12 = vmax.f32 %v5321_v24, 0.0  ;;  %v14225_v43 = vmax.f32 %v5320_v29, 0.0  ;;  %v14231_v13 = vmax.f32 %v5319_v21, 0.0  ;;  %v8909_v24 = vld [vmem:[%s15255_s5 + $0x130] sm:$0xff]  ;;  %v8908_v53 = vld [vmem:[%s15255_s5 + $0x128] sm:$0xff] }
0x11b6   : > { %v14237_v14 = vmax.f32 %v5318_v59, 0.0  ;;  %v8907_v29 = vld [vmem:[%s15255_s5 + $0x120] sm:$0xff]  ;;  %v8906_v21 = vld [vmem:[%s15255_s5 + $0x118] sm:$0xff] }
0x11b7   : > { %10253 = vmatpush3.msk.msra.mxu1 %vm1362_vm6, %v14215_v19  ;;  %10266 = vmatpush3.msk.msra.mxu0 %vm1362_vm6, %v14215_v19  ;;  %v8922_v59 = vld [vmem:[%s15255_s5 + $0x178] sm:$0xff] }
0x11b8   : > { %10254 = vmatprep.subr.mxu1 %v11017_v5  ;;  %10267 = vmatprep.subr.mxu0 %v11017_v5 }
0x11b9   : > { %10255 = vmatpush3.msra.mxu1 %v14217_v12  ;;  %10268 = vmatpush3.msra.mxu0 %v14217_v12 }
0x11ba   : > { %10256 = vmatprep.subr.mxu1 %v11017_v5  ;;  %10269 = vmatprep.subr.mxu0 %v11017_v5 }
0x11bb   : > { %10257 = vmatpush3.msra.mxu1 %v14225_v43  ;;  %10270 = vmatpush3.msra.mxu0 %v14225_v43 }
0x11bc   : > { %10258 = vmatprep.subr.mxu1 %v11017_v5  ;;  %10271 = vmatprep.subr.mxu0 %v11017_v5 }
0x11bd   : > { %10259 = vmatpush3.msra.mxu1 %v14231_v13  ;;  %10272 = vmatpush3.msra.mxu0 %v14231_v13 }
0x11be   : > { %10260 = vmatprep.subr.mxu1 %v11017_v5  ;;  %10273 = vmatprep.subr.mxu0 %v11017_v5 }
0x11bf   : > { %10261 = vmatpush3.msra.mxu1 %v14237_v14  ;;  %10274 = vmatpush3.msra.mxu0 %v14237_v14 }
0x11c0   : > { %10276 = vmatmul.mubr.msk.f32.vlgmr.msra.gmra.mxu0 %vm5329_vm7, %v8863_v58  ;;  %10263 = vmatmul.mubr.msk.f32.vlgmr.msra.gmra.mxu1 %vm5329_vm7, %v5328_v20  ;;  %v8921_v58 = vld [vmem:[%s15255_s5 + $0x170] sm:$0xff] }
0x11c1   : > { %10278 = vmatprep.subr.mxu1 %v11017_v5  ;;  %10294 = vmatprep.mubr.msk.f32.mxu1 %vm11018_vm1, %v11017_v5  ;;  %v8905_v20 = vld [vmem:[%s15255_s5 + $0x110] sm:$0xff] }
0x11c2   : > { %10279 = vmatpush3.msra.mxu1 %v8873_v54  ;;  %10297 = vmatprep.subr.mxu0 %v11017_v5  ;;  %v8920_v54 = vld [vmem:[%s15255_s5 + $0x168] sm:$0xff] }
0x11c3   : > { %10280 = vmatprep.subr.mxu1 %v11017_v5  ;;  %10313 = vmatprep.mubr.msk.f32.mxu0 %vm11018_vm1, %v11017_v5 }
0x11c4   : > { %10281 = vmatpush3.msra.mxu1 %v8872_v18  ;;  %10298 = vmatpush3.msra.mxu0 %v5413_v60  ;;  %v8904_v18 = vld [vmem:[%s15255_s5 + $0x108] sm:$0xff] }
0x11c5   : > { %10282 = vmatprep.subr.mxu1 %v11017_v5  ;;  %10299 = vmatprep.subr.mxu0 %v11017_v5 }
0x11c6   : > { %10283 = vmatpush3.msra.mxu1 %v8871_v7  ;;  %10300 = vmatpush3.msra.mxu0 %v5412_v45  ;;  %v8903_v7 = vld [vmem:[%s15255_s5 + $0x100] sm:$0xff] }
0x11c7   : > { %10284 = vmatprep.subr.mxu1 %v11017_v5  ;;  %10301 = vmatprep.subr.mxu0 %v11017_v5 }
0x11c8   : > { %10285 = vmatpush3.msra.mxu1 %v8870_v3  ;;  %10302 = vmatpush3.msra.mxu0 %v5411_v52  ;;  %v8919_v3 = vld [vmem:[%s15255_s5 + $0x160] sm:$0xff] }
0x11c9   : > { %10286 = vmatprep.subr.mxu1 %v11017_v5  ;;  %10303 = vmatprep.subr.mxu0 %v11017_v5 }
0x11ca   : > { %10287 = vmatpush3.msra.mxu1 %v8869_v33  ;;  %10304 = vmatpush3.msra.mxu0 %v5410_v34  ;;  %v8918_v33 = vld [vmem:[%s15255_s5 + $0x158] sm:$0xff] }
0x11cb   : > { %10288 = vmatprep.subr.mxu1 %v11017_v5  ;;  %10305 = vmatprep.subr.mxu0 %v11017_v5 }
0x11cc   : > { %10289 = vmatpush3.msra.mxu1 %v8868_v62  ;;  %10306 = vmatpush3.msra.mxu0 %v5409_v56  ;;  %v8917_v62 = vld [vmem:[%s15255_s5 + $0x150] sm:$0xff] }
0x11cd   : > { %10290 = vmatprep.subr.mxu1 %v11017_v5  ;;  %10307 = vmatprep.subr.mxu0 %v11017_v5 }
0x11ce   : > { %10291 = vmatpush3.msra.mxu1 %v8867_v38  ;;  %10308 = vmatpush3.msra.mxu0 %v5408_v8  ;;  %v8916_v38 = vld [vmem:[%s15255_s5 + $0x148] sm:$0xff] }
0x11cf   : > { %10292 = vmatprep.subr.mxu1 %v11017_v5  ;;  %10309 = vmatprep.subr.mxu0 %v11017_v5 }
0x11d0   : > { %10293 = vmatpush3.msra.mxu1 %v8866_v39  ;;  %10310 = vmatpush3.msra.mxu0 %v5407_v63  ;;  %v8915_v39 = vld [vmem:[%s15255_s5 + $0x140] sm:$0xff] }
0x11d1   : > { %10316 = vmatprep.subr.mxu1 %v11017_v5  ;;  %10311 = vmatprep.subr.mxu0 %v11017_v5 }
0x11d2   : > { %10312 = vmatpush3.msra.mxu0 %v5406_v32 }
0x11d3   : > { %10329 = vmatprep.subr.mxu0 %v11017_v5 }
0x1280   : > { %v5485_v22 = vpop.f32.mrf.mxu0  ;;  %v5402_v57 = vpop.f32.mrf.mxu1 }
0x1281   : > { %10295 = vmatmul.mubr.msk.f32.vlgmr.msra.gmra.mxu1 %vm932_vm3, %v5485_v22  ;;  %10314 = vmatmul.mubr.msk.f32.vlgmr.msra.gmra.mxu0 %vm932_vm3, %v5402_v57  ;;  %v8924_v22 = vld [vmem:[%s15290_s4 + $0x18] sm:$0xf] }
0x1282   : > { %10317 = vmatpush3.msk.msra.mxu1 %vm1362_vm6, %v14215_v19  ;;  %10326 = vmatprep.mubr.msk.f32.mxu1 %vm11018_vm1, %v11017_v5  ;;  %v10277_v36 = vpop.f32.mrf.mxu0  ;;  %v10264_v37 = vpop.f32.mrf.mxu1 }
0x1283   : > { %10318 = vmatprep.subr.mxu1 %v11017_v5  ;;  %10330 = vmatpush3.msra.mxu0 %v8886_v40  ;;  %v8934_v40 = vld [vmem:[%s15255_s5 + $0x1b8] sm:$0xff]  ;;  %v8932_v37 = vld [vmem:[%s15255_s5 + $0x1a8] sm:$0xff] }
0x1284   : > { %10319 = vmatpush3.msra.mxu1 %v14217_v12  ;;  %10331 = vmatprep.subr.mxu0 %v11017_v5 }
0x1285   : > { %10320 = vmatprep.subr.mxu1 %v11017_v5  ;;  %10332 = vmatpush3.msra.mxu0 %v8885_v35  ;;  %v8933_v35 = vld [vmem:[%s15255_s5 + $0x1b0] sm:$0xff] }
0x1286   : > { %10321 = vmatpush3.msra.mxu1 %v14225_v43  ;;  %10333 = vmatprep.subr.mxu0 %v11017_v5 }
0x1287   : > { %10322 = vmatprep.subr.mxu1 %v11017_v5  ;;  %10334 = vmatpush3.msra.mxu0 %v8884_v41  ;;  %v8936_v41 = vld [vmem:[%s15290_s4 + $0x1c] sm:$0xf] }
0x1288   : > { %10323 = vmatpush3.msra.mxu1 %v14231_v13  ;;  %10335 = vmatprep.subr.mxu0 %v11017_v5 }
0x1289   : > { %10324 = vmatprep.subr.mxu1 %v11017_v5  ;;  %10336 = vmatpush3.msra.mxu0 %v8883_v46  ;;  %v8931_v46 = vld [vmem:[%s15255_s5 + $0x1a0] sm:$0xff] }
0x128a   : > { %10325 = vmatpush3.msra.mxu1 %v14237_v14  ;;  %10337 = vmatprep.subr.mxu0 %v11017_v5 }
0x128b   : > { %10327 = vmatmul.mubr.msk.f32.vlgmr.msra.gmra.mxu1 %vm5329_vm7, %v8876_v11  ;;  %10348 = vmatprep.subr.mxu1 %v11017_v5  ;;  %v8930_v11 = vld [vmem:[%s15255_s5 + $0x198] sm:$0xff] }
0x128c   : > { %10349 = vmatpush3.msk.msra.mxu1 %vm1362_vm6, %v14215_v19  ;;  %10358 = vmatprep.mubr.msk.f32.mxu1 %vm11018_vm1, %v11017_v5 }
0x128d   : > { %10350 = vmatprep.subr.mxu1 %v11017_v5  ;;  %10338 = vmatpush3.msra.mxu0 %v8882_v23  ;;  %v8946_v23 = vld [vmem:[%s15255_s5 + $0x1f8] sm:$0xff] }
0x128e   : > { %10351 = vmatpush3.msra.mxu1 %v14217_v12  ;;  %10339 = vmatprep.subr.mxu0 %v11017_v5 }
0x128f   : > { %10352 = vmatprep.subr.mxu1 %v11017_v5  ;;  %10340 = vmatpush3.msra.mxu0 %v8881_v17  ;;  %v8929_v17 = vld [vmem:[%s15255_s5 + $0x190] sm:$0xff] }
0x1290   : > { %10353 = vmatpush3.msra.mxu1 %v14225_v43  ;;  %10341 = vmatprep.subr.mxu0 %v11017_v5 }
0x1291   : > { %10354 = vmatprep.subr.mxu1 %v11017_v5  ;;  %10345 = vmatprep.mubr.msk.f32.mxu0 %vm11018_vm1, %v11017_v5 }
0x1292   : > { %10355 = vmatpush3.msra.mxu1 %v14231_v13  ;;  %10342 = vmatpush3.msra.mxu0 %v8880_v30  ;;  %v8928_v30 = vld [vmem:[%s15255_s5 + $0x188] sm:$0xff] }
0x1293   : > { %10356 = vmatprep.subr.mxu1 %v11017_v5  ;;  %10343 = vmatprep.subr.mxu0 %v11017_v5 }
0x1294   : > { %10357 = vmatpush3.msra.mxu1 %v14237_v14  ;;  %10344 = vmatpush3.msra.mxu0 %v8879_v47  ;;  %v8943_v47 = vld [vmem:[%s15255_s5 + $0x1e0] sm:$0xff] }
0x1295   : > { %10359 = vmatmul.mubr.msk.f32.vlgmr.msra.gmra.mxu1 %vm5329_vm7, %v8888_v49  ;;  %10361 = vmatprep.subr.mxu1 %v11017_v5  ;;  %v8945_v49 = vld [vmem:[%s15255_s5 + $0x1f0] sm:$0xff] }
0x1296   : > { %10362 = vmatpush3.msra.mxu1 %v8898_v51  ;;  %10377 = vmatprep.mubr.msk.f32.mxu1 %vm11018_vm1, %v11017_v5  ;;  %v8944_v51 = vld [vmem:[%s15255_s5 + $0x1e8] sm:$0xff] }
0x1297   : > { %10363 = vmatprep.subr.mxu1 %v11017_v5  ;;  %10380 = vmatprep.subr.mxu0 %v11017_v5 }
0x1298   : > { %10364 = vmatpush3.msra.mxu1 %v8897_v6  ;;  %v8927_v6 = vld [vmem:[%s15255_s5 + $0x180] sm:$0xff] }
0x1299   : > { %10365 = vmatprep.subr.mxu1 %v11017_v5 }
0x129a   : > { %10366 = vmatpush3.msra.mxu1 %v8896_v48  ;;  %v8942_v48 = vld [vmem:[%s15255_s5 + $0x1d8] sm:$0xff] }
0x129b   : > { %10367 = vmatprep.subr.mxu1 %v11017_v5 }
0x129c   : > { %10368 = vmatpush3.msra.mxu1 %v8895_v31  ;;  %v8941_v31 = vld [vmem:[%s15255_s5 + $0x1d0] sm:$0xff] }
0x129d   : > { %10369 = vmatprep.subr.mxu1 %v11017_v5 }
0x129e   : > { %10370 = vmatpush3.msra.mxu1 %v8894_v27  ;;  %v8940_v27 = vld [vmem:[%s15255_s5 + $0x1c8] sm:$0xff] }
0x129f   : > { %10371 = vmatprep.subr.mxu1 %v11017_v5 }
0x12a0   : > { %10372 = vmatpush3.msra.mxu1 %v8893_v61  ;;  %v8939_v61 = vld [vmem:[%s15255_s5 + $0x1c0] sm:$0xff] }
0x12a1   : > { %10373 = vmatprep.subr.mxu1 %v11017_v5 }
0x12a2   : > { %10374 = vmatpush3.msra.mxu1 %v8892_v25 }
0x12a3   : > { %10375 = vmatprep.subr.mxu1 %v11017_v5 }
0x12a4   : > { %10376 = vmatpush3.msra.mxu1 %v8891_v26 }
0x12a5   : > { %10412 = vmatprep.subr.mxu1 %v11017_v5 }
0x1341   : > { %v5567_v10 = vpop.f32.mrf.mxu1  ;;  %v5640_v50 = vpop.f32.mrf.mxu0 }
0x1342   : > { %v14427_v28 = vadd.f32 %v5640_v50, %v5567_v10 }
0x1343   : > { %v10296_v15 = vpop.f32.mrf.mxu1  ;;  %v10315_v9 = vpop.f32.mrf.mxu0 }
0x134b   : > { %v5715_v4 = vpop.f32.mrf.mxu1 }
0x134c   : > { %10346 = vmatmul.mubr.msk.f32.vlgmr.msra.gmra.mxu0 %vm932_vm3, %v5715_v4 }
0x134d   : > { %10381 = vmatpush3.msk.msra.mxu0 %vm1362_vm6, %v14215_v19  ;;  %v10328_v1 = vpop.f32.mrf.mxu1  ;;  %10390 = vmatprep.mubr.msk.f32.mxu0 %vm11018_vm1, %v11017_v5 }
0x134e   : > { %10382 = vmatprep.subr.mxu0 %v11017_v5  ;;  %v8948_v1 = vld [vmem:[%s15290_s4 + $0x20] sm:$0xf] }
0x134f   : > { %10383 = vmatpush3.msra.mxu0 %v14217_v12 }
0x1350   : > { %10384 = vmatprep.subr.mxu0 %v11017_v5 }
0x1351   : > { %10385 = vmatpush3.msra.mxu0 %v14225_v43 }
0x1352   : > { %10386 = vmatprep.subr.mxu0 %v11017_v5 }
0x1353   : > { %10387 = vmatpush3.msra.mxu0 %v14231_v13 }
0x1354   : > { %10388 = vmatprep.subr.mxu0 %v11017_v5 }
0x1355   : > { %10389 = vmatpush3.msra.mxu0 %v14237_v14  ;;  %v5873_v0 = vpop.f32.mrf.mxu1 }
0x1356   : > { %10391 = vmatmul.mubr.msk.f32.vlgmr.msra.gmra.mxu0 %vm5329_vm7, %v8900_v2  ;;  %10378 = vmatmul.mubr.msk.f32.vlgmr.msra.gmra.mxu1 %vm932_vm3, %v5873_v0  ;;  %v8958_v0 = vld [vmem:[%s15255_s5 + $0x238] sm:$0xff] }
0x1357   : > { %10413 = vmatpush3.msk.msra.mxu1 %vm1362_vm6, %v14215_v19  ;;  %10422 = vmatprep.mubr.msk.f32.mxu1 %vm11018_vm1, %v11017_v5  ;;  %v10360_v16 = vpop.f32.mrf.mxu1 }
0x1358   : > { %10414 = vmatprep.subr.mxu1 %v11017_v5  ;;  %10393 = vmatprep.subr.mxu0 %v11017_v5  ;;  %v8957_v16 = vld [vmem:[%s15255_s5 + $0x230] sm:$0xff] }
0x1359   : > { %10415 = vmatpush3.msra.mxu1 %v14217_v12  ;;  %10394 = vmatpush3.msra.mxu0 %v8910_v42 }
0x135a   : > { %10416 = vmatprep.subr.mxu1 %v11017_v5  ;;  %10395 = vmatprep.subr.mxu0 %v11017_v5 }
0x135b   : > { %10417 = vmatpush3.msra.mxu1 %v14225_v43  ;;  %10396 = vmatpush3.msra.mxu0 %v8909_v24  ;;  %v8956_v24 = vld [vmem:[%s15255_s5 + $0x228] sm:$0xff] }
0x135c   : > { %10418 = vmatprep.subr.mxu1 %v11017_v5  ;;  %10397 = vmatprep.subr.mxu0 %v11017_v5 }
0x135d   : > { %10419 = vmatpush3.msra.mxu1 %v14231_v13  ;;  %10398 = vmatpush3.msra.mxu0 %v8908_v53  ;;  %v8960_v53 = vld [vmem:[%s15290_s4 + $0x24] sm:$0xf] }
0x135e   : > { %10420 = vmatprep.subr.mxu1 %v11017_v5  ;;  %10399 = vmatprep.subr.mxu0 %v11017_v5 }
0x135f   : > { %10421 = vmatpush3.msra.mxu1 %v14237_v14  ;;  %10409 = vmatprep.mubr.msk.f32.mxu0 %vm11018_vm1, %v11017_v5 }
0x1360   : > { %10423 = vmatmul.mubr.msk.f32.vlgmr.msra.gmra.mxu1 %vm5329_vm7, %v8912_v44  ;;  %10425 = vmatprep.subr.mxu1 %v11017_v5  ;;  %v8955_v44 = vld [vmem:[%s15255_s5 + $0x220] sm:$0xff] }
0x1361   : > { %10441 = vmatprep.mubr.msk.f32.mxu1 %vm11018_vm1, %v11017_v5  ;;  %10400 = vmatpush3.msra.mxu0 %v8907_v29  ;;  %v8954_v29 = vld [vmem:[%s15255_s5 + $0x218] sm:$0xff] }
0x1362   : > { %10401 = vmatprep.subr.mxu0 %v11017_v5  ;;  %10426 = vmatpush3.msra.mxu1 %v8922_v59  ;;  %v8953_v59 = vld [vmem:[%s15255_s5 + $0x210] sm:$0xff] }
0x1363   : > { %10402 = vmatpush3.msra.mxu0 %v8906_v21  ;;  %10427 = vmatprep.subr.mxu1 %v11017_v5  ;;  %v8970_v21 = vld [vmem:[%s15255_s5 + $0x278] sm:$0xff] }
0x1364   : > { %10403 = vmatprep.subr.mxu0 %v11017_v5  ;;  %10428 = vmatpush3.msra.mxu1 %v8921_v58  ;;  %v8969_v58 = vld [vmem:[%s15255_s5 + $0x270] sm:$0xff] }
0x1365   : > { %10404 = vmatpush3.msra.mxu0 %v8905_v20  ;;  %10429 = vmatprep.subr.mxu1 %v11017_v5  ;;  %v8968_v20 = vld [vmem:[%s15255_s5 + $0x268] sm:$0xff] }
0x1366   : > { %10405 = vmatprep.subr.mxu0 %v11017_v5  ;;  %10430 = vmatpush3.msra.mxu1 %v8920_v54  ;;  %v8952_v54 = vld [vmem:[%s15255_s5 + $0x208] sm:$0xff] }
0x1367   : > { %10406 = vmatpush3.msra.mxu0 %v8904_v18  ;;  %10431 = vmatprep.subr.mxu1 %v11017_v5  ;;  %v8951_v18 = vld [vmem:[%s15255_s5 + $0x200] sm:$0xff] }
0x1368   : > { %10407 = vmatprep.subr.mxu0 %v11017_v5  ;;  %10432 = vmatpush3.msra.mxu1 %v8919_v3  ;;  %v8966_v3 = vld [vmem:[%s15255_s5 + $0x258] sm:$0xff] }
0x1369   : > { %10408 = vmatpush3.msra.mxu0 %v8903_v7  ;;  %10433 = vmatprep.subr.mxu1 %v11017_v5  ;;  %v8967_v7 = vld [vmem:[%s15255_s5 + $0x260] sm:$0xff] }
0x136a   : > { %10444 = vmatprep.subr.mxu0 %v11017_v5  ;;  %10434 = vmatpush3.msra.mxu1 %v8918_v33  ;;  %v8965_v33 = vld [vmem:[%s15255_s5 + $0x250] sm:$0xff] }
0x136b   : > { %10435 = vmatprep.subr.mxu1 %v11017_v5 }
0x136c   : > { %10436 = vmatpush3.msra.mxu1 %v8917_v62  ;;  %v8964_v62 = vld [vmem:[%s15255_s5 + $0x248] sm:$0xff] }
0x136d   : > { %10437 = vmatprep.subr.mxu1 %v11017_v5 }
0x136e   : > { %10438 = vmatpush3.msra.mxu1 %v8916_v38  ;;  %v8963_v38 = vld [vmem:[%s15255_s5 + $0x240] sm:$0xff] }
0x136f   : > { %10439 = vmatprep.subr.mxu1 %v11017_v5 }
0x1370   : > { %10440 = vmatpush3.msra.mxu1 %v8915_v39 }
0x1371   : > { %10476 = vmatprep.subr.mxu1 %v11017_v5 }
0x140c   : > { %v5797_v60 = vpop.f32.mrf.mxu0 }
0x140d   : > { %v5801_v45 = vadd.f32 %v5797_v60, %v14427_v28 }
0x140e   : > { %v10347_v52 = vpop.f32.mrf.mxu0 }
0x1416   : > { %v6031_v34 = vpop.f32.mrf.mxu0  ;;  %v5955_v56 = vpop.f32.mrf.mxu1 }
0x1417   : > { %v14534_v8 = vadd.f32 %v5955_v56, %v5801_v45  ;;  %10410 = vmatmul.mubr.msk.f32.vlgmr.msra.gmra.mxu0 %vm932_vm3, %v6031_v34 }
0x1418   : > { %10445 = vmatpush3.msk.msra.mxu0 %vm1362_vm6, %v14215_v19  ;;  %v10379_v63 = vpop.f32.mrf.mxu1  ;;  %10454 = vmatprep.mubr.msk.f32.mxu0 %vm11018_vm1, %v11017_v5  ;;  %v10392_v32 = vpop.f32.mrf.mxu0 }
0x1419   : > { %10446 = vmatprep.subr.mxu0 %v11017_v5  ;;  %v8972_v32 = vld [vmem:[%s15290_s4 + $0x28] sm:$0xf] }
0x141a   : > { %10447 = vmatpush3.msra.mxu0 %v14217_v12 }
0x141b   : > { %10448 = vmatprep.subr.mxu0 %v11017_v5 }
0x141c   : > { %10449 = vmatpush3.msra.mxu0 %v14225_v43 }
0x141d   : > { %10450 = vmatprep.subr.mxu0 %v11017_v5 }
0x141e   : > { %10451 = vmatpush3.msra.mxu0 %v14231_v13 }
0x141f   : > { %10452 = vmatprep.subr.mxu0 %v11017_v5 }
0x1420   : > { %10453 = vmatpush3.msra.mxu0 %v14237_v14  ;;  %v6189_v57 = vpop.f32.mrf.mxu1 }
0x1421   : > { %10455 = vmatmul.mubr.msk.f32.vlgmr.msra.gmra.mxu0 %vm5329_vm7, %v8924_v22  ;;  %10442 = vmatmul.mubr.msk.f32.vlgmr.msra.gmra.mxu1 %vm932_vm3, %v6189_v57  ;;  %v8982_v57 = vld [vmem:[%s15255_s5 + $0x2b8] sm:$0xff] }
0x1422   : > { %10477 = vmatpush3.msk.msra.mxu1 %vm1362_vm6, %v14215_v19  ;;  %10486 = vmatprep.mubr.msk.f32.mxu1 %vm11018_vm1, %v11017_v5  ;;  %v10424_v36 = vpop.f32.mrf.mxu1 }
0x1423   : > { %10478 = vmatprep.subr.mxu1 %v11017_v5  ;;  %10457 = vmatprep.subr.mxu0 %v11017_v5  ;;  %v8981_v36 = vld [vmem:[%s15255_s5 + $0x2b0] sm:$0xff] }
0x1424   : > { %10479 = vmatpush3.msra.mxu1 %v14217_v12  ;;  %10458 = vmatpush3.msra.mxu0 %v8934_v40 }
0x1425   : > { %10480 = vmatprep.subr.mxu1 %v11017_v5  ;;  %10459 = vmatprep.subr.mxu0 %v11017_v5 }
0x1426   : > { %10481 = vmatpush3.msra.mxu1 %v14225_v43  ;;  %10460 = vmatpush3.msra.mxu0 %v8933_v35  ;;  %v8980_v35 = vld [vmem:[%s15255_s5 + $0x2a8] sm:$0xff] }
0x1427   : > { %10482 = vmatprep.subr.mxu1 %v11017_v5  ;;  %10461 = vmatprep.subr.mxu0 %v11017_v5 }
0x1428   : > { %10483 = vmatpush3.msra.mxu1 %v14231_v13  ;;  %10462 = vmatpush3.msra.mxu0 %v8932_v37  ;;  %v8984_v37 = vld [vmem:[%s15290_s4 + $0x2c] sm:$0xf] }
0x1429   : > { %10484 = vmatprep.subr.mxu1 %v11017_v5  ;;  %10463 = vmatprep.subr.mxu0 %v11017_v5 }
0x142a   : > { %10485 = vmatpush3.msra.mxu1 %v14237_v14  ;;  %10473 = vmatprep.mubr.msk.f32.mxu0 %vm11018_vm1, %v11017_v5 }
0x142b   : > { %10487 = vmatmul.mubr.msk.f32.vlgmr.msra.gmra.mxu1 %vm5329_vm7, %v8936_v41  ;;  %10489 = vmatprep.subr.mxu1 %v11017_v5  ;;  %v8979_v41 = vld [vmem:[%s15255_s5 + $0x2a0] sm:$0xff] }
0x142c   : > { %10505 = vmatprep.mubr.msk.f32.mxu1 %vm11018_vm1, %v11017_v5  ;;  %10464 = vmatpush3.msra.mxu0 %v8931_v46  ;;  %v8978_v46 = vld [vmem:[%s15255_s5 + $0x298] sm:$0xff] }
0x142d   : > { %10465 = vmatprep.subr.mxu0 %v11017_v5  ;;  %10490 = vmatpush3.msra.mxu1 %v8946_v23  ;;  %v8977_v23 = vld [vmem:[%s15255_s5 + $0x290] sm:$0xff] }
0x142e   : > { %10466 = vmatpush3.msra.mxu0 %v8930_v11  ;;  %10491 = vmatprep.subr.mxu1 %v11017_v5  ;;  %v8994_v11 = vld [vmem:[%s15255_s5 + $0x2f8] sm:$0xff] }
0x142f   : > { %10467 = vmatprep.subr.mxu0 %v11017_v5  ;;  %10492 = vmatpush3.msra.mxu1 %v8945_v49  ;;  %v8992_v49 = vld [vmem:[%s15255_s5 + $0x2e8] sm:$0xff] }
0x1430   : > { %10468 = vmatpush3.msra.mxu0 %v8929_v17  ;;  %10493 = vmatprep.subr.mxu1 %v11017_v5  ;;  %v8993_v17 = vld [vmem:[%s15255_s5 + $0x2f0] sm:$0xff] }
0x1431   : > { %10469 = vmatprep.subr.mxu0 %v11017_v5  ;;  %10494 = vmatpush3.msra.mxu1 %v8944_v51  ;;  %v8976_v51 = vld [vmem:[%s15255_s5 + $0x288] sm:$0xff] }
0x1432   : > { %10470 = vmatpush3.msra.mxu0 %v8928_v30  ;;  %10495 = vmatprep.subr.mxu1 %v11017_v5  ;;  %v8975_v30 = vld [vmem:[%s15255_s5 + $0x280] sm:$0xff] }
0x1433   : > { %10471 = vmatprep.subr.mxu0 %v11017_v5  ;;  %10496 = vmatpush3.msra.mxu1 %v8943_v47  ;;  %v8990_v47 = vld [vmem:[%s15255_s5 + $0x2d8] sm:$0xff] }
0x1434   : > { %10472 = vmatpush3.msra.mxu0 %v8927_v6  ;;  %10497 = vmatprep.subr.mxu1 %v11017_v5  ;;  %v8991_v6 = vld [vmem:[%s15255_s5 + $0x2e0] sm:$0xff] }
0x1435   : > { %10508 = vmatprep.subr.mxu0 %v11017_v5  ;;  %10498 = vmatpush3.msra.mxu1 %v8942_v48  ;;  %v8989_v48 = vld [vmem:[%s15255_s5 + $0x2d0] sm:$0xff] }
0x1436   : > { %10499 = vmatprep.subr.mxu1 %v11017_v5 }
0x1437   : > { %10500 = vmatpush3.msra.mxu1 %v8941_v31  ;;  %v8988_v31 = vld [vmem:[%s15255_s5 + $0x2c8] sm:$0xff] }
0x1438   : > { %10501 = vmatprep.subr.mxu1 %v11017_v5 }
0x1439   : > { %10502 = vmatpush3.msra.mxu1 %v8940_v27  ;;  %v8987_v27 = vld [vmem:[%s15255_s5 + $0x2c0] sm:$0xff] }
0x143a   : > { %10503 = vmatprep.subr.mxu1 %v11017_v5 }
0x143b   : > { %10504 = vmatpush3.msra.mxu1 %v8939_v61 }
0x143c   : > { %10540 = vmatprep.subr.mxu1 %v11017_v5 }
0x14d7   : > { %v6113_v25 = vpop.f32.mrf.mxu0 }
0x14d8   : > { %v6117_v26 = vadd.f32 %v6113_v25, %v14534_v8 }
0x14d9   : > { %v10411_v10 = vpop.f32.mrf.mxu0 }
0x14e1   : > { %v6347_v50 = vpop.f32.mrf.mxu0  ;;  %v6271_v28 = vpop.f32.mrf.mxu1 }
0x14e2   : > { %v14641_v15 = vadd.f32 %v6271_v28, %v6117_v26  ;;  %10474 = vmatmul.mubr.msk.f32.vlgmr.msra.gmra.mxu0 %vm932_vm3, %v6347_v50 }
0x14e3   : > { %10509 = vmatpush3.msk.msra.mxu0 %vm1362_vm6, %v14215_v19  ;;  %v10443_v9 = vpop.f32.mrf.mxu1  ;;  %10518 = vmatprep.mubr.msk.f32.mxu0 %vm11018_vm1, %v11017_v5  ;;  %v10456_v4 = vpop.f32.mrf.mxu0 }
0x14e4   : > { %10510 = vmatprep.subr.mxu0 %v11017_v5  ;;  %v8996_v4 = vld [vmem:[%s15290_s4 + $0x30] sm:$0xf] }
0x14e5   : > { %10511 = vmatpush3.msra.mxu0 %v14217_v12 }
0x14e6   : > { %10512 = vmatprep.subr.mxu0 %v11017_v5 }
0x14e7   : > { %10513 = vmatpush3.msra.mxu0 %v14225_v43 }
0x14e8   : > { %10514 = vmatprep.subr.mxu0 %v11017_v5 }
0x14e9   : > { %10515 = vmatpush3.msra.mxu0 %v14231_v13 }
0x14ea   : > { %10516 = vmatprep.subr.mxu0 %v11017_v5 }
0x14eb   : > { %10517 = vmatpush3.msra.mxu0 %v14237_v14  ;;  %v6505_v2 = vpop.f32.mrf.mxu1 }
0x14ec   : > { %10519 = vmatmul.mubr.msk.f32.vlgmr.msra.gmra.mxu0 %vm5329_vm7, %v8948_v1  ;;  %10506 = vmatmul.mubr.msk.f32.vlgmr.msra.gmra.mxu1 %vm932_vm3, %v6505_v2  ;;  %v9006_v2 = vld [vmem:[%s15255_s5 + $0x338] sm:$0xff] }
0x14ed   : > { %10541 = vmatpush3.msk.msra.mxu1 %vm1362_vm6, %v14215_v19  ;;  %10550 = vmatprep.mubr.msk.f32.mxu1 %vm11018_vm1, %v11017_v5  ;;  %v10488_v42 = vpop.f32.mrf.mxu1 }
0x14ee   : > { %10542 = vmatprep.subr.mxu1 %v11017_v5  ;;  %10521 = vmatprep.subr.mxu0 %v11017_v5  ;;  %v9005_v42 = vld [vmem:[%s15255_s5 + $0x330] sm:$0xff] }
0x14ef   : > { %10543 = vmatpush3.msra.mxu1 %v14217_v12  ;;  %10522 = vmatpush3.msra.mxu0 %v8958_v0 }
0x14f0   : > { %10544 = vmatprep.subr.mxu1 %v11017_v5  ;;  %10523 = vmatprep.subr.mxu0 %v11017_v5 }
0x14f1   : > { %10545 = vmatpush3.msra.mxu1 %v14225_v43  ;;  %10524 = vmatpush3.msra.mxu0 %v8957_v16  ;;  %v9004_v16 = vld [vmem:[%s15255_s5 + $0x328] sm:$0xff] }
0x14f2   : > { %10546 = vmatprep.subr.mxu1 %v11017_v5  ;;  %10525 = vmatprep.subr.mxu0 %v11017_v5 }
0x14f3   : > { %10547 = vmatpush3.msra.mxu1 %v14231_v13  ;;  %10526 = vmatpush3.msra.mxu0 %v8956_v24  ;;  %v9008_v24 = vld [vmem:[%s15290_s4 + $0x34] sm:$0xf] }
0x14f4   : > { %10548 = vmatprep.subr.mxu1 %v11017_v5  ;;  %10527 = vmatprep.subr.mxu0 %v11017_v5 }
0x14f5   : > { %10549 = vmatpush3.msra.mxu1 %v14237_v14  ;;  %10537 = vmatprep.mubr.msk.f32.mxu0 %vm11018_vm1, %v11017_v5 }
0x14f6   : > { %10551 = vmatmul.mubr.msk.f32.vlgmr.msra.gmra.mxu1 %vm5329_vm7, %v8960_v53  ;;  %10553 = vmatprep.subr.mxu1 %v11017_v5  ;;  %v9003_v53 = vld [vmem:[%s15255_s5 + $0x320] sm:$0xff] }
0x14f7   : > { %10569 = vmatprep.mubr.msk.f32.mxu1 %vm11018_vm1, %v11017_v5  ;;  %10528 = vmatpush3.msra.mxu0 %v8955_v44  ;;  %v9002_v44 = vld [vmem:[%s15255_s5 + $0x318] sm:$0xff] }
0x14f8   : > { %10529 = vmatprep.subr.mxu0 %v11017_v5  ;;  %10554 = vmatpush3.msra.mxu1 %v8970_v21  ;;  %v9001_v21 = vld [vmem:[%s15255_s5 + $0x310] sm:$0xff] }
0x14f9   : > { %10530 = vmatpush3.msra.mxu0 %v8954_v29  ;;  %10555 = vmatprep.subr.mxu1 %v11017_v5  ;;  %v9018_v29 = vld [vmem:[%s15255_s5 + $0x378] sm:$0xff] }
0x14fa   : > { %10531 = vmatprep.subr.mxu0 %v11017_v5  ;;  %10556 = vmatpush3.msra.mxu1 %v8969_v58  ;;  %v9016_v58 = vld [vmem:[%s15255_s5 + $0x368] sm:$0xff] }
0x14fb   : > { %10532 = vmatpush3.msra.mxu0 %v8953_v59  ;;  %10557 = vmatprep.subr.mxu1 %v11017_v5  ;;  %v9017_v59 = vld [vmem:[%s15255_s5 + $0x370] sm:$0xff] }
0x14fc   : > { %10533 = vmatprep.subr.mxu0 %v11017_v5  ;;  %10558 = vmatpush3.msra.mxu1 %v8968_v20  ;;  %v9000_v20 = vld [vmem:[%s15255_s5 + $0x308] sm:$0xff] }
0x14fd   : > { %10534 = vmatpush3.msra.mxu0 %v8952_v54  ;;  %10559 = vmatprep.subr.mxu1 %v11017_v5  ;;  %v8999_v54 = vld [vmem:[%s15255_s5 + $0x300] sm:$0xff] }
0x14fe   : > { %10535 = vmatprep.subr.mxu0 %v11017_v5  ;;  %10560 = vmatpush3.msra.mxu1 %v8967_v7  ;;  %v9014_v7 = vld [vmem:[%s15255_s5 + $0x358] sm:$0xff] }
0x14ff   : > { %10536 = vmatpush3.msra.mxu0 %v8951_v18  ;;  %10561 = vmatprep.subr.mxu1 %v11017_v5  ;;  %v9015_v18 = vld [vmem:[%s15255_s5 + $0x360] sm:$0xff] }
0x1500   : > { %10572 = vmatprep.subr.mxu0 %v11017_v5  ;;  %10562 = vmatpush3.msra.mxu1 %v8966_v3  ;;  %v9013_v3 = vld [vmem:[%s15255_s5 + $0x350] sm:$0xff] }
0x1501   : > { %10563 = vmatprep.subr.mxu1 %v11017_v5 }
0x1502   : > { %10564 = vmatpush3.msra.mxu1 %v8965_v33  ;;  %v9012_v33 = vld [vmem:[%s15255_s5 + $0x348] sm:$0xff] }
0x1503   : > { %10565 = vmatprep.subr.mxu1 %v11017_v5 }
0x1504   : > { %10566 = vmatpush3.msra.mxu1 %v8964_v62  ;;  %v9011_v62 = vld [vmem:[%s15255_s5 + $0x340] sm:$0xff] }
0x1505   : > { %10567 = vmatprep.subr.mxu1 %v11017_v5 }
0x1506   : > { %10568 = vmatpush3.msra.mxu1 %v8963_v38 }
0x1507   : > { %10604 = vmatprep.subr.mxu1 %v11017_v5 }
0x15a2   : > { %v6429_v39 = vpop.f32.mrf.mxu0 }
0x15a3   : > { %v6433_v60 = vadd.f32 %v6429_v39, %v14641_v15 }
0x15a4   : > { %v10475_v45 = vpop.f32.mrf.mxu0 }
0x15ac   : > { %v6663_v52 = vpop.f32.mrf.mxu0  ;;  %v6587_v34 = vpop.f32.mrf.mxu1 }
0x15ad   : > { %v14748_v56 = vadd.f32 %v6587_v34, %v6433_v60  ;;  %10538 = vmatmul.mubr.msk.f32.vlgmr.msra.gmra.mxu0 %vm932_vm3, %v6663_v52 }
0x15ae   : > { %10573 = vmatpush3.msk.msra.mxu0 %vm1362_vm6, %v14215_v19  ;;  %v10507_v8 = vpop.f32.mrf.mxu1  ;;  %10582 = vmatprep.mubr.msk.f32.mxu0 %vm11018_vm1, %v11017_v5  ;;  %v10520_v63 = vpop.f32.mrf.mxu0 }
0x15af   : > { %10574 = vmatprep.subr.mxu0 %v11017_v5  ;;  %v9020_v63 = vld [vmem:[%s15290_s4 + $0x38] sm:$0xf] }
0x15b0   : > { %10575 = vmatpush3.msra.mxu0 %v14217_v12 }
0x15b1   : > { %10576 = vmatprep.subr.mxu0 %v11017_v5 }
0x15b2   : > { %10577 = vmatpush3.msra.mxu0 %v14225_v43 }
0x15b3   : > { %10578 = vmatprep.subr.mxu0 %v11017_v5 }
0x15b4   : > { %10579 = vmatpush3.msra.mxu0 %v14231_v13 }
0x15b5   : > { %10580 = vmatprep.subr.mxu0 %v11017_v5 }
0x15b6   : > { %10581 = vmatpush3.msra.mxu0 %v14237_v14  ;;  %v6821_v22 = vpop.f32.mrf.mxu1 }
0x15b7   : > { %10583 = vmatmul.mubr.msk.f32.vlgmr.msra.gmra.mxu0 %vm5329_vm7, %v8972_v32  ;;  %10570 = vmatmul.mubr.msk.f32.vlgmr.msra.gmra.mxu1 %vm932_vm3, %v6821_v22  ;;  %v9030_v22 = vld [vmem:[%s15255_s5 + $0x3b8] sm:$0xff] }
0x15b8   : > { %10605 = vmatpush3.msk.msra.mxu1 %vm1362_vm6, %v14215_v19  ;;  %10614 = vmatprep.mubr.msk.f32.mxu1 %vm11018_vm1, %v11017_v5  ;;  %v10552_v40 = vpop.f32.mrf.mxu1 }
0x15b9   : > { %10606 = vmatprep.subr.mxu1 %v11017_v5  ;;  %10585 = vmatprep.subr.mxu0 %v11017_v5  ;;  %v9029_v40 = vld [vmem:[%s15255_s5 + $0x3b0] sm:$0xff] }
0x15ba   : > { %10607 = vmatpush3.msra.mxu1 %v14217_v12  ;;  %10586 = vmatpush3.msra.mxu0 %v8982_v57 }
0x15bb   : > { %10608 = vmatprep.subr.mxu1 %v11017_v5  ;;  %10587 = vmatprep.subr.mxu0 %v11017_v5 }
0x15bc   : > { %10609 = vmatpush3.msra.mxu1 %v14225_v43  ;;  %10588 = vmatpush3.msra.mxu0 %v8981_v36  ;;  %v9041_v36 = vld [vmem:[%s15255_s5 + $0x3f0] sm:$0xff] }
0x15bd   : > { %10610 = vmatprep.subr.mxu1 %v11017_v5  ;;  %10589 = vmatprep.subr.mxu0 %v11017_v5 }
0x15be   : > { %10611 = vmatpush3.msra.mxu1 %v14231_v13  ;;  %10590 = vmatpush3.msra.mxu0 %v8980_v35  ;;  %v9025_v35 = vld [vmem:[%s15255_s5 + $0x390] sm:$0xff] }
0x15bf   : > { %10612 = vmatprep.subr.mxu1 %v11017_v5  ;;  %10591 = vmatprep.subr.mxu0 %v11017_v5 }
0x15c0   : > { %10613 = vmatpush3.msra.mxu1 %v14237_v14  ;;  %10601 = vmatprep.mubr.msk.f32.mxu0 %vm11018_vm1, %v11017_v5 }
0x15c1   : > { %10615 = vmatmul.mubr.msk.f32.vlgmr.msra.gmra.mxu1 %vm5329_vm7, %v8984_v37  ;;  %10617 = vmatprep.subr.mxu1 %v11017_v5  ;;  %v9024_v37 = vld [vmem:[%s15255_s5 + $0x388] sm:$0xff] }
0x15c2   : > { %10633 = vmatprep.mubr.msk.f32.mxu1 %vm11018_vm1, %v11017_v5  ;;  %10592 = vmatpush3.msra.mxu0 %v8979_v41  ;;  %v9023_v41 = vld [vmem:[%s15255_s5 + $0x380] sm:$0xff] }
0x15c3   : > { %10593 = vmatprep.subr.mxu0 %v11017_v5  ;;  %10618 = vmatpush3.msra.mxu1 %v8994_v11  ;;  %v9039_v11 = vld [vmem:[%s15255_s5 + $0x3e0] sm:$0xff] }
0x15c4   : > { %10594 = vmatpush3.msra.mxu0 %v8978_v46  ;;  %10619 = vmatprep.subr.mxu1 %v11017_v5  ;;  %v9040_v46 = vld [vmem:[%s15255_s5 + $0x3e8] sm:$0xff] }
0x15c5   : > { %10595 = vmatprep.subr.mxu0 %v11017_v5  ;;  %10620 = vmatpush3.msra.mxu1 %v8993_v17  ;;  %v9037_v17 = vld [vmem:[%s15255_s5 + $0x3d0] sm:$0xff] }
0x15c6   : > { %10596 = vmatpush3.msra.mxu0 %v8977_v23  ;;  %10621 = vmatprep.subr.mxu1 %v11017_v5  ;;  %v9038_v23 = vld [vmem:[%s15255_s5 + $0x3d8] sm:$0xff] }
0x15c7   : > { %10597 = vmatprep.subr.mxu0 %v11017_v5  ;;  %10622 = vmatpush3.msra.mxu1 %v8992_v49  ;;  %v9036_v49 = vld [vmem:[%s15255_s5 + $0x3c8] sm:$0xff] }
0x15c8   : > { %10598 = vmatpush3.msra.mxu0 %v8976_v51  ;;  %10623 = vmatprep.subr.mxu1 %v11017_v5  ;;  %v9035_v51 = vld [vmem:[%s15255_s5 + $0x3c0] sm:$0xff] }
0x15c9   : > { %10599 = vmatprep.subr.mxu0 %v11017_v5  ;;  %10624 = vmatpush3.msra.mxu1 %v8991_v6 }
0x15ca   : > { %10600 = vmatpush3.msra.mxu0 %v8975_v30  ;;  %10625 = vmatprep.subr.mxu1 %v11017_v5 }
0x15cb   : > { %10636 = vmatprep.subr.mxu0 %v11017_v5  ;;  %10626 = vmatpush3.msra.mxu1 %v8990_v47 }
0x15cc   : > { %10627 = vmatprep.subr.mxu1 %v11017_v5 }
0x15cd   : > { %10628 = vmatpush3.msra.mxu1 %v8989_v48 }
0x15ce   : > { %10629 = vmatprep.subr.mxu1 %v11017_v5 }
0x15cf   : > { %10630 = vmatpush3.msra.mxu1 %v8988_v31 }
0x15d0   : > { %10631 = vmatprep.subr.mxu1 %v11017_v5 }
0x15d1   : > { %10632 = vmatpush3.msra.mxu1 %v8987_v27 }
0x15d2   : > { %10668 = vmatprep.subr.mxu1 %v11017_v5 }
0x166d   : > { %v6745_v61 = vpop.f32.mrf.mxu0 }
0x166e   : > { %v6749_v25 = vadd.f32 %v6745_v61, %v14748_v56 }
0x166f   : > { %v10539_v26 = vpop.f32.mrf.mxu0 }
0x1670   : > { %v10897_v26 = vld [vmem:[%s15259_s9 + $0x38] sm:$0xff] }
0x1677   : > { %v6979_v10 = vpop.f32.mrf.mxu0  ;;  %v6903_v50 = vpop.f32.mrf.mxu1 }
0x1678   : > { %v14855_v28 = vadd.f32 %v6903_v50, %v6749_v25  ;;  %10602 = vmatmul.mubr.msk.f32.vlgmr.msra.gmra.mxu0 %vm932_vm3, %v6979_v10  ;;  %v10898_v10 = vld [vmem:[%s15259_s9 + $0x30] sm:$0xff]  ;;  %v10899_v50 = vld [vmem:[%s15259_s9 + $0x28] sm:$0xff] }
0x1679   : > { %10637 = vmatpush3.msk.msra.mxu0 %vm1362_vm6, %v14215_v19  ;;  %v10571_v15 = vpop.f32.mrf.mxu1  ;;  %10646 = vmatprep.mubr.msk.f32.mxu0 %vm11018_vm1, %v11017_v5  ;;  %v10584_v9 = vpop.f32.mrf.mxu0 }
0x167a   : > { %10638 = vmatprep.subr.mxu0 %v11017_v5  ;;  %v10901_v9 = vld [vmem:[%s15259_s9 + $0x18] sm:$0xff] }
0x167b   : > { %10639 = vmatpush3.msra.mxu0 %v14217_v12 }
0x167c   : > { %10640 = vmatprep.subr.mxu0 %v11017_v5 }
0x167d   : > { %10641 = vmatpush3.msra.mxu0 %v14225_v43 }
0x167e   : > { %10642 = vmatprep.subr.mxu0 %v11017_v5 }
0x167f   : > { %10643 = vmatpush3.msra.mxu0 %v14231_v13 }
0x1680   : > { %10644 = vmatprep.subr.mxu0 %v11017_v5 }
0x1681   : > { %10645 = vmatpush3.msra.mxu0 %v14237_v14  ;;  %v7137_v1 = vpop.f32.mrf.mxu1 }
0x1682   : > { %10647 = vmatmul.mubr.msk.f32.vlgmr.msra.gmra.mxu0 %vm5329_vm7, %v8996_v4  ;;  %10634 = vmatmul.mubr.msk.f32.vlgmr.msra.gmra.mxu1 %vm932_vm3, %v7137_v1  ;;  %v10902_v1 = vld [vmem:[%s15259_s9 + $0x10] sm:$0xff] }
0x1683   : > { %10669 = vmatpush3.msk.msra.mxu1 %vm1362_vm6, %v14215_v19  ;;  %10678 = vmatprep.mubr.msk.f32.mxu1 %vm11018_vm1, %v11017_v5  ;;  %v10616_v0 = vpop.f32.mrf.mxu1 }
0x1684   : > { %10670 = vmatprep.subr.mxu1 %v11017_v5  ;;  %10649 = vmatprep.subr.mxu0 %v11017_v5  ;;  %v10904_v0 = vld [vmem:[%s15259_s9] sm:$0xff] }
0x1685   : > { %10671 = vmatpush3.msra.mxu1 %v14217_v12  ;;  %10650 = vmatpush3.msra.mxu0 %v9006_v2  ;;  %v10903_v2 = vld [vmem:[%s15259_s9 + $0x8] sm:$0xff] }
0x1686   : > { %10672 = vmatprep.subr.mxu1 %v11017_v5  ;;  %10651 = vmatprep.subr.mxu0 %v11017_v5 }
0x1687   : > { %10673 = vmatpush3.msra.mxu1 %v14225_v43  ;;  %10652 = vmatpush3.msra.mxu0 %v9005_v42 }
0x1688   : > { %10674 = vmatprep.subr.mxu1 %v11017_v5  ;;  %10653 = vmatprep.subr.mxu0 %v11017_v5 }
0x1689   : > { %10675 = vmatpush3.msra.mxu1 %v14231_v13  ;;  %10654 = vmatpush3.msra.mxu0 %v9004_v16 }
0x168a   : > { %10676 = vmatprep.subr.mxu1 %v11017_v5  ;;  %10655 = vmatprep.subr.mxu0 %v11017_v5 }
0x168b   : > { %10677 = vmatpush3.msra.mxu1 %v14237_v14  ;;  %10665 = vmatprep.mubr.msk.f32.mxu0 %vm11018_vm1, %v11017_v5 }
0x168c   : > { %10679 = vmatmul.mubr.msk.f32.vlgmr.msra.gmra.mxu1 %vm5329_vm7, %v9008_v24  ;;  %10681 = vmatprep.subr.mxu1 %v11017_v5 }
0x168d   : > { %10697 = vmatprep.mubr.msk.f32.mxu1 %vm11018_vm1, %v11017_v5  ;;  %10656 = vmatpush3.msra.mxu0 %v9003_v53 }
0x168e   : > { %10657 = vmatprep.subr.mxu0 %v11017_v5  ;;  %10682 = vmatpush3.msra.mxu1 %v9018_v29 }
0x168f   : > { %10658 = vmatpush3.msra.mxu0 %v9002_v44  ;;  %10683 = vmatprep.subr.mxu1 %v11017_v5  ;;  %v9045_v44 = vld [vmem:[%s15256_s6 + $0x2] ss:$0 sm:$0xff] }
0x1690   : > { %10659 = vmatprep.subr.mxu0 %v11017_v5  ;;  %10684 = vmatpush3.msra.mxu1 %v9017_v59 }
0x1691   : > { %10660 = vmatpush3.msra.mxu0 %v9001_v21  ;;  %10685 = vmatprep.subr.mxu1 %v11017_v5 }
0x1692   : > { %10661 = vmatprep.subr.mxu0 %v11017_v5  ;;  %10686 = vmatpush3.msra.mxu1 %v9016_v58 }
0x1693   : > { %10662 = vmatpush3.msra.mxu0 %v9000_v20  ;;  %10687 = vmatprep.subr.mxu1 %v11017_v5 }
0x1694   : > { %10663 = vmatprep.subr.mxu0 %v11017_v5  ;;  %10688 = vmatpush3.msra.mxu1 %v9015_v18 }
0x1695   : > { %10664 = vmatpush3.msra.mxu0 %v8999_v54  ;;  %10689 = vmatprep.subr.mxu1 %v11017_v5 }
0x1696   : > { %10700 = vmatprep.subr.mxu0 %v11017_v5  ;;  %10690 = vmatpush3.msra.mxu1 %v9014_v7 }
0x1697   : > { %10691 = vmatprep.subr.mxu1 %v11017_v5 }
0x1698   : > { %10692 = vmatpush3.msra.mxu1 %v9013_v3 }
0x1699   : > { %10693 = vmatprep.subr.mxu1 %v11017_v5 }
0x169a   : > { %10694 = vmatpush3.msra.mxu1 %v9012_v33 }
0x169b   : > { %10695 = vmatprep.subr.mxu1 %v11017_v5 }
0x169c   : > { %10696 = vmatpush3.msra.mxu1 %v9011_v62 }
0x169d   : > { %10732 = vmatprep.subr.mxu1 %v11017_v5 }
0x1738   : > { %v7061_v38 = vpop.f32.mrf.mxu0 }
0x1739   : > { %v7065_v39 = vadd.f32 %v7061_v38, %v14855_v28  ;;  %v10900_v28 = vld [vmem:[%s15259_s9 + $0x20] sm:$0xff] }
0x173a   : > { %v10603_v60 = vpop.f32.mrf.mxu0  ;;  %v7876_v38 = vld [vmem:[%s15260_s10] sm:$0x1] }
0x1742   : > { %v7295_v45 = vpop.f32.mrf.mxu0  ;;  %v7219_v52 = vpop.f32.mrf.mxu1 }
0x1743   : > { %v14962_v34 = vadd.f32 %v7219_v52, %v7065_v39  ;;  %10666 = vmatmul.mubr.msk.f32.vlgmr.msra.gmra.mxu0 %vm932_vm3, %v7295_v45  ;;  %v9046_v45 = vld [vmem:[%s15260_s10 + $0x1] sm:$0x1] }
0x1744   : > { %10701 = vmatpush3.msk.msra.mxu0 %vm1362_vm6, %v14215_v19  ;;  %v10635_v56 = vpop.f32.mrf.mxu1  ;;  %10710 = vmatprep.mubr.msk.f32.mxu0 %vm11018_vm1, %v11017_v5  ;;  %v10648_v8 = vpop.f32.mrf.mxu0 }
0x1745   : > { %10702 = vmatprep.subr.mxu0 %v11017_v5  ;;  %v9047_v56 = vld [vmem:[%s15260_s10 + $0x2] sm:$0x1] }
0x1746   : > { %10703 = vmatpush3.msra.mxu0 %v14217_v12 }
0x1747   : > { %10704 = vmatprep.subr.mxu0 %v11017_v5 }
0x1748   : > { %10705 = vmatpush3.msra.mxu0 %v14225_v43 }
0x1749   : > { %10706 = vmatprep.subr.mxu0 %v11017_v5 }
0x174a   : > { %10707 = vmatpush3.msra.mxu0 %v14231_v13 }
0x174b   : > { %10708 = vmatprep.subr.mxu0 %v11017_v5 }
0x174c   : > { %10709 = vmatpush3.msra.mxu0 %v14237_v14  ;;  %v7453_v32 = vpop.f32.mrf.mxu1 }
0x174d   : > { %10711 = vmatmul.mubr.msk.f32.vlgmr.msra.gmra.mxu0 %vm5329_vm7, %v9020_v63  ;;  %10698 = vmatmul.mubr.msk.f32.vlgmr.msra.gmra.mxu1 %vm932_vm3, %v7453_v32 }
0x174e   : > { %10733 = vmatpush3.msk.msra.mxu1 %vm1362_vm6, %v14215_v19  ;;  %10742 = vmatprep.mubr.msk.f32.mxu1 %vm11018_vm1, %v11017_v5  ;;  %v10680_v57 = vpop.f32.mrf.mxu1  ;;  %v9028_v19 = vld [vmem:[%s15255_s5 + $0x3a8] sm:$0xff] }
0x174f   : > { %10734 = vmatprep.subr.mxu1 %v11017_v5  ;;  %10713 = vmatprep.subr.mxu0 %v11017_v5 }
0x1750   : > { %10735 = vmatpush3.msra.mxu1 %v14217_v12  ;;  %10714 = vmatpush3.msra.mxu0 %v9030_v22  ;;  %v9032_v12 = vld [vmem:[%s15290_s4 + $0x3c] sm:$0xf]  ;;  %v7890_v22 = vstv %s9048_s14  ;;  %s11019_s14 = smov [#allocation7]  }
0x1751   : > { %10736 = vmatprep.subr.mxu1 %v11017_v5  ;;  %10715 = vmatprep.subr.mxu0 %v11017_v5 }
0x1752   : > { %10737 = vmatpush3.msra.mxu1 %v14225_v43  ;;  %10716 = vmatpush3.msra.mxu0 %v9029_v40  ;;  %v9027_v43 = vld [vmem:[%s15255_s5 + $0x3a0] sm:$0xff] }
0x1753   : > { %10738 = vmatprep.subr.mxu1 %v11017_v5  ;;  %10717 = vmatprep.subr.mxu0 %v11017_v5 }
0x1754   : > { %10739 = vmatpush3.msra.mxu1 %v14231_v13  ;;  %10718 = vmatpush3.msra.mxu0 %v9028_v19  ;;  %v9026_v13 = vld [vmem:[%s15255_s5 + $0x398] sm:$0xff] }
0x1755   : > { %10740 = vmatprep.subr.mxu1 %v11017_v5  ;;  %10719 = vmatprep.subr.mxu0 %v11017_v5 }
0x1756   : > { %10741 = vmatpush3.msra.mxu1 %v14237_v14  ;;  %10729 = vmatprep.mubr.msk.f32.mxu0 %vm11018_vm1, %v11017_v5  ;;  %v9042_v14 = vld [vmem:[%s15255_s5 + $0x3f8] sm:$0xff] }
0x1757   : > { %10743 = vmatmul.mubr.msk.f32.vlgmr.msra.gmra.mxu1 %vm5329_vm7, %v9032_v12  ;;  %10745 = vmatprep.subr.mxu1 %v11017_v5 }
0x1758   : > { %10761 = vmatprep.mubr.msk.f32.mxu1 %vm11018_vm1, %v11017_v5  ;;  %10720 = vmatpush3.msra.mxu0 %v9027_v43 }
0x1759   : > { %10721 = vmatprep.subr.mxu0 %v11017_v5  ;;  %10746 = vmatpush3.msra.mxu1 %v9042_v14  ;;  %v7903_v14 = vstv %s7901_s18  ;;  %s10924_s18 = sshll.u32 %s11019_s14, 4  ;;  %s10925_s18 = int_to_ptr.vmem [resolvable:$false] %s10924_s18 }
0x175a   : > { %10722 = vmatpush3.msra.mxu0 %v9026_v13  ;;  %10747 = vmatprep.subr.mxu1 %v11017_v5  ;;  %p10927_p0 = scmp.lt.s32.totalorder %s8256_s26, %s10925_s18 }
0x175b   : > { %10723 = vmatprep.subr.mxu0 %v11017_v5  ;;  %10748 = vmatpush3.msra.mxu1 %v9041_v36 }
0x175c   : > { %10724 = vmatpush3.msra.mxu0 %v9025_v35  ;;  %10749 = vmatprep.subr.mxu1 %v11017_v5  ;;  %v7905_v35 = vstv %s9049_s19  ;;  %s10926_s19 = scalar_lea.vmem %s10925_s18, 32 }
0x175d   : > { %10725 = vmatprep.subr.mxu0 %v11017_v5  ;;  %10750 = vmatpush3.msra.mxu1 %v9040_v46  ;;  %p10928_p1 = scmp.lt.s32.totalorder %s10926_s19, %s10920_s27 }
0x175e   : > { %10726 = vmatpush3.msra.mxu0 %v9024_v37  ;;  %10751 = vmatprep.subr.mxu1 %v11017_v5 }
0x175f   : > { %10727 = vmatprep.subr.mxu0 %v11017_v5  ;;  %10752 = vmatpush3.msra.mxu1 %v9039_v11  ;;  %p10929_p2 = por %p10928_p1, %p10927_p0 }
0x1760   : > { %10728 = vmatpush3.msra.mxu0 %v9023_v41  ;;  %10753 = vmatprep.subr.mxu1 %v11017_v5 }
0x1761   : > { %10764 = vmatprep.subr.mxu0 %v11017_v5  ;;  %10754 = vmatpush3.msra.mxu1 %v9038_v23  ;;  %p10930_p3 = pnand %p10929_p2, %p10923_p13 }
0x1762   : > { %10755 = vmatprep.subr.mxu1 %v11017_v5 }
0x1763   : > { %10756 = vmatpush3.msra.mxu1 %v9037_v17  ;;  %v7910_v17 = vld [vmem:[%s11187_s29] sm:$0xf] }
0x1764   : > { %10757 = vmatprep.subr.mxu1 %v11017_v5 }
0x1765   : > { %10758 = vmatpush3.msra.mxu1 %v9036_v49 }
0x1766   : > { %10759 = vmatprep.subr.mxu1 %v11017_v5 }
0x1767   : > { %10760 = vmatpush3.msra.mxu1 %v9035_v51 }
0x1768   : > { %10783 = vmatprep.subr.mxu1 %v11017_v5 }
0x1803   : > { %v7377_v30 = vpop.f32.mrf.mxu0 }
0x1804   : > { %v7381_v6 = vadd.f32 %v7377_v30, %v14962_v34 }
0x1805   : > { %v10667_v47 = vpop.f32.mrf.mxu0 }
0x180d   : > { %v7611_v48 = vpop.f32.mrf.mxu0  ;;  %v7535_v31 = vpop.f32.mrf.mxu1 }
0x180e   : > { %v7539_v27 = vadd.f32 %v7535_v31, %v7381_v6  ;;  %10730 = vmatmul.mubr.msk.f32.vlgmr.msra.gmra.mxu0 %vm932_vm3, %v7611_v48 }
0x180f   : > { %v10699_v61 = vpop.f32.mrf.mxu1  ;;  %v10712_v25 = vpop.f32.mrf.mxu0  ;;  %10765 = vmatpush3.msra.mxu0 %v10897_v26  ;;  %10780 = vmatprep.mubr.msk.f32.mxu0 %vm11018_vm1, %v11017_v5 }
0x1810   : > { %10766 = vmatprep.subr.mxu0 %v11017_v5 }
0x1811   : > { %10767 = vmatpush3.msra.mxu0 %v10898_v10 }
0x1812   : > { %10768 = vmatprep.subr.mxu0 %v11017_v5 }
0x1813   : > { %10769 = vmatpush3.msra.mxu0 %v10899_v50 }
0x1814   : > { %10770 = vmatprep.subr.mxu0 %v11017_v5 }
0x1815   : > { %10771 = vmatpush3.msra.mxu0 %v10900_v28 }
0x1816   : > { %10772 = vmatprep.subr.mxu0 %v11017_v5 }
0x1817   : > { %v7769_v15 = vpop.f32.mrf.mxu1  ;;  %10773 = vmatpush3.msra.mxu0 %v10901_v9 }
0x1818   : > { %10762 = vmatmul.mubr.msk.f32.vlgmr.msra.gmra.mxu1 %vm932_vm3, %v7769_v15  ;;  %10774 = vmatprep.subr.mxu0 %v11017_v5 }
0x1819   : > { %v10744_v4 = vpop.f32.mrf.mxu1  ;;  %10784 = vmatpush3.msra.mxu1 %v10897_v26  ;;  %10775 = vmatpush3.msra.mxu0 %v10902_v1 }
0x181a   : > { %10785 = vmatprep.subr.mxu1 %v11017_v5  ;;  %10776 = vmatprep.subr.mxu0 %v11017_v5 }
0x181b   : > { %10786 = vmatpush3.msra.mxu1 %v10898_v10  ;;  %10777 = vmatpush3.msra.mxu0 %v10903_v2 }
0x181c   : > { %10787 = vmatprep.subr.mxu1 %v11017_v5  ;;  %10778 = vmatprep.subr.mxu0 %v11017_v5 }
0x181d   : > { %10788 = vmatpush3.msra.mxu1 %v10899_v50  ;;  %10779 = vmatpush3.msra.mxu0 %v10904_v0 }
0x181e   : > { %10789 = vmatprep.subr.mxu1 %v11017_v5  ;;  %10799 = vmatprep.mubr.msk.f32.mxu1 %vm11018_vm1, %v11017_v5 }
0x181f   : > { %10790 = vmatpush3.msra.mxu1 %v10900_v28  ;;  %10802 = vmatprep.subr.mxu0 %v11017_v5 }
0x1820   : > { %10791 = vmatprep.subr.mxu1 %v11017_v5 }
0x1821   : > { %10792 = vmatpush3.msra.mxu1 %v10901_v9  ;;  %v9051_v9 = vld [vmem:[%s11187_s29 + $0x8] sm:$0xf] }
0x1822   : > { %10793 = vmatprep.subr.mxu1 %v11017_v5 }
0x1823   : > { %10794 = vmatpush3.msra.mxu1 %v10902_v1 }
0x1824   : > { %10795 = vmatprep.subr.mxu1 %v11017_v5 }
0x1825   : > { %10796 = vmatpush3.msra.mxu1 %v10903_v2 }
0x1826   : > { %10797 = vmatprep.subr.mxu1 %v11017_v5 }
0x1827   : > { %10798 = vmatpush3.msra.mxu1 %v10904_v0 }
0x18ce   : > { %v7693_v42 = vpop.f32.mrf.mxu0 }
0x18cf   : > { %v7697_v24 = vadd.f32 %v7693_v42, %v7539_v27  ;;  %v9050_v27 = vld [vmem:[%s11187_s29 + $0x4] sm:$0xf] }
0x18d0   : > { %v10731_v16 = vpop.f32.mrf.mxu0 }
0x18d8   : > { %v7851_v53 = vpop.f32.mrf.mxu1 }
0x18d9   : > { %v7855_v29 = vadd.f32 %v7851_v53, %v7697_v24  ;;  %v9052_v53 = vld [vmem:[%s11187_s29 + $0xc] sm:$0xf]  ;;  %s15271_s29 = sshll.u32 %s11127_s25, 4 }
0x18da   : > { %v10763_v21 = vpop.f32.mrf.mxu1  ;;  %s8253_s28 = scalar_lea.hbm %s15266_s16, %s15271_s29 }
0x18db   : > { %v7864_v59 = vadd.f32 %v9045_v44, %v7855_v29 }
0x18dd   : > { %v7865_v58 = vsel %vm980_vm4, %v7864_v59, 0.0  ;;  %v7904_v36 = vmul.f32 %v7903_v14, %v7864_v59 }
0x18de   : > { %v7866_v20 = vrot.slane %v7865_v58, 4 }
0x18df   : > { %v7906_v37 = vadd.f32 %v7905_v35, %v7904_v36 }
0x18e0   : > { %v7867_v54 = vadd.f32 %v7866_v20, %v7865_v58 }
0x18e1   : > { %v7907_v41 = vmax.f32 %v7906_v37, 0.0 }
0x18e2   : > { %v7868_v18 = vrot.slane %v7867_v54, 2 }
0x18e3   : > { %v7908_v11 = vmul.f32 1.5, %v7907_v41 }
0x18e4   : > { %v7869_v7 = vadd.f32 %v7868_v18, %v7867_v54 }
0x18e5   : > { %v7909_v51 = vadd.f32 %v7908_v11, %v7864_v59 }
0x18e6   : > { %v7870_v3 = vrot.slane %v7869_v7, 1 }
0x18e8   : > { %v7871_v33 = vadd.f32 %v7870_v3, %v7869_v7 }
0x18ea   : > { %v7872_v62 = vsel %vm932_vm3, %v7871_v33, 0.0 }
0x18eb   : > { %7873 = vadd.xlane.f32.xlu0 %v7872_v62 }
0x1974   : > { %v7874_v39 = vpop.xlane.xlu0 %7873 }
0x1975   : > { %v7875_v60 = vmul.f32 0.00390625, %v7874_v39 }
0x1977   : > { %v7877_v52 = vmul.f32 %v7876_v38, %v7875_v60 }
0x1979   : > { %v7880_v34 = vadd.f32 %v9046_v45, %v7877_v52 }
0x197b   : > { %v7881_v8 = vmax.f32 %v7880_v34, 0.0 }
0x197d   : > { %v7884_v63 = vmul.f32 %v9047_v56, %v7881_v8  ;;  %v8149_v8 = vld [vmem:[%s15261_s11 + $0x38] sm:$0xff] }
0x197f   : > { %v7886_v32 = vsel %vm7885_vm8, %v7884_v63, 0.0  ;;  %v8148_v63 = vld [vmem:[%s15261_s11 + $0x30] sm:$0xff] }
0x1980   : > { %7887 = vadd.xlane.f32.xlu0 %v7886_v32  ;;  %v8147_v32 = vld [vmem:[%s15261_s11 + $0x28] sm:$0xff] }
0x1a09   : > { %v7888_v57 = vpop.xlane.xlu0 %7887 }
0x1a0a   : > { %v7891_v40 = vadd.f32 %v7890_v22, %v7888_v57  ;;  %v8146_v22 = vld [vmem:[%s15261_s11 + $0x20] sm:$0xff]  ;;  %v8145_v57 = vld [vmem:[%s15261_s11 + $0x18] sm:$0xff] }
0x1a0c   : > { %v7892_v19 = vsub.f32 0.0, %v7891_v40  ;;  %v8144_v40 = vld [vmem:[%s15261_s11 + $0x10] sm:$0xff] }
0x1a0e   : > { %v7893_v12 = vmul.f32 1.442695, %v7892_v19  ;;  %v8143_v19 = vld [vmem:[%s15261_s11 + $0x8] sm:$0xff] }
0x1a10   : > { %10883 = vpow2.f32 %v7893_v12  ;;  %v8142_v12 = vld [vmem:[%s15261_s11] sm:$0xff] }
0x1a1d   : > { %v10884_v43 = vpop.eup %10883 }
0x1a1e   : > { %v7895_v13 = vadd.f32 1.0, %v10884_v43 }
0x1a20   : > { %10885 = vrcp.f32 %v7895_v13 }
0x1a2d   : > { %v10886_v46 = vpop.eup %10885 }
0x1a2e   : > { %v7900_v23 = vmul.f32 612.37244, %v10886_v46  ;;  %7899 = vst.msk [vmem:[%s612_s20] sm:$0x1] %vm7898_vm9, %v10886_v46 }
0x1a30   : > { %v7914_v49 = vrot.slane %v7900_v23, %v11610_v55  ;;  %v9053_v23 = vld [vmem:[%s15257_s7 + $0x2] sm:$0x1] }
0x1a32   : > { %v7915_v30 = vmul.f32 %v7914_v49, %v7910_v17  ;;  %v7924_v26 = vmul.f32 %v9050_v27, %v7914_v49  ;;  %v7933_v1 = vmul.f32 %v9051_v9, %v7914_v49  ;;  %v7942_v21 = vmul.f32 %v9052_v53, %v7914_v49 }
0x1a34   : > { %v7916_v6 = vadd.f32 %v7915_v30, %v7909_v51 }
0x1a36   : > { %v7917_v47 = vmul.f32 %v7916_v6, %v7903_v14 }
0x1a38   : > { %v7918_v48 = vadd.f32 %v7917_v47, %v7905_v35 }
0x1a3a   : > { %v7919_v31 = vmax.f32 %v7918_v48, 0.0 }
0x1a3c   : > { %v7920_v61 = vmul.f32 1.5, %v7919_v31 }
0x1a3e   : > { %v7921_v25 = vadd.f32 %v7920_v61, %v7916_v6  ;;  %v9057_v6 = vld [vmem:[%s15258_s8 + $0x2] ss:$0 sm:$0xff] }
0x1a40   : > { %v7925_v10 = vadd.f32 %v7924_v26, %v7921_v25 }
0x1a42   : > { %v7926_v50 = vmul.f32 %v7925_v10, %v7903_v14 }
0x1a44   : > { %v7927_v28 = vadd.f32 %v7926_v50, %v7905_v35 }
0x1a46   : > { %v7928_v15 = vmax.f32 %v7927_v28, 0.0 }
0x1a48   : > { %v7929_v4 = vmul.f32 1.5, %v7928_v15 }
0x1a4a   : > { %v7930_v2 = vadd.f32 %v7929_v4, %v7925_v10 }
0x1a4c   : > { %v7934_v0 = vadd.f32 %v7933_v1, %v7930_v2 }
0x1a4e   : > { %v7935_v42 = vmul.f32 %v7934_v0, %v7903_v14 }
0x1a50   : > { %v7936_v16 = vadd.f32 %v7935_v42, %v7905_v35 }
0x1a52   : > { %v7937_v24 = vmax.f32 %v7936_v16, 0.0 }
0x1a54   : > { %v7938_v44 = vmul.f32 1.5, %v7937_v24 }
0x1a56   : > { %v7939_v29 = vadd.f32 %v7938_v44, %v7934_v0 }
0x1a58   : > { %v7943_v59 = vadd.f32 %v7942_v21, %v7939_v29 }
0x1a5a   : > { %v7948_v58 = vsel %vm980_vm4, %v7943_v59, 0.0  ;;  %v7955_v20 = vmul.f32 %v7943_v59, %v7943_v59 }
0x1a5b   : > { %v7949_v54 = vrot.slane %v7948_v58, 4 }
0x1a5c   : > { %v7956_v18 = vsel %vm980_vm4, %v7955_v20, 0.0 }
0x1a5d   : > { %v7950_v7 = vadd.f32 %v7949_v54, %v7948_v58  ;;  %v7957_v3 = vrot.slane %v7956_v18, 4 }
0x1a5f   : > { %v7951_v33 = vrot.slane %v7950_v7, 2  ;;  %v7958_v62 = vadd.f32 %v7957_v3, %v7956_v18 }
0x1a61   : > { %v7952_v38 = vadd.f32 %v7951_v33, %v7950_v7  ;;  %v7959_v39 = vrot.slane %v7958_v62, 2 }
0x1a63   : > { %v7953_v60 = vrot.slane %v7952_v38, 1  ;;  %v7960_v45 = vadd.f32 %v7959_v39, %v7958_v62 }
0x1a65   : > { %v7954_v52 = vadd.f32 %v7953_v60, %v7952_v38  ;;  %v7961_v34 = vrot.slane %v7960_v45, 1 }
0x1a67   : > { %10781 = vmatmul.mubr.msk.f32.vlgmr.msra.gmra.mxu0 %vm932_vm3, %v7954_v52  ;;  %v7962_v56 = vadd.f32 %v7961_v34, %v7960_v45 }
0x1a68   : > { %10818 = vmatprep.mubr.msk.f32.mxu0 %vm11018_vm1, %v11017_v5  ;;  %10803 = vmatpush3.msra.mxu0 %v8149_v8 }
0x1a69   : > { %10800 = vmatmul.mubr.msk.f32.vlgmr.msra.gmra.mxu1 %vm932_vm3, %v7962_v56  ;;  %10804 = vmatprep.subr.mxu0 %v11017_v5 }
0x1a6a   : > { %10805 = vmatpush3.msra.mxu0 %v8148_v63 }
0x1a6b   : > { %10806 = vmatprep.subr.mxu0 %v11017_v5 }
0x1a6c   : > { %10807 = vmatpush3.msra.mxu0 %v8147_v32 }
0x1a6d   : > { %10808 = vmatprep.subr.mxu0 %v11017_v5 }
0x1a6e   : > { %10809 = vmatpush3.msra.mxu0 %v8146_v22 }
0x1a6f   : > { %10810 = vmatprep.subr.mxu0 %v11017_v5 }
0x1a70   : > { %10811 = vmatpush3.msra.mxu0 %v8145_v57 }
0x1a71   : > { %10812 = vmatprep.subr.mxu0 %v11017_v5 }
0x1a72   : > { %10813 = vmatpush3.msra.mxu0 %v8144_v40 }
0x1a73   : > { %10814 = vmatprep.subr.mxu0 %v11017_v5 }
0x1a74   : > { %10815 = vmatpush3.msra.mxu0 %v8143_v19 }
0x1a75   : > { %10816 = vmatprep.subr.mxu0 %v11017_v5 }
0x1a76   : > { %10817 = vmatpush3.msra.mxu0 %v8142_v12 }
0x1b27   : > { %v8032_v43 = vpop.f32.mrf.mxu0 }
0x1b28   : > { %v8109_v13 = vmul.f32 0.125, %v8032_v43 }
0x1b29   : > { %v10782_v14 = vpop.f32.mrf.mxu0  ;;  %v8105_v36 = vpop.f32.mrf.mxu1 }
0x1b2a   : > { %v8111_v35 = vmul.f32 %v8109_v13, %v8109_v13  ;;  %v8110_v37 = vmul.f32 0.125, %v8105_v36  ;;  %v8118_v17 = vrot.slane %v8109_v13, %v11610_v55 }
0x1b2b   : > { %v10801_v41 = vpop.f32.mrf.mxu1 }
0x1b2c   : > { %v8112_v46 = vsub.f32 %v8110_v37, %v8111_v35  ;;  %v8119_v5 = vsub.f32 %v7943_v59, %v8118_v17 }
0x1b2e   : > { %v8113_v11 = vadd.f32 1e-05, %v8112_v46 }
0x1b30   : > { %10887 = vrsqrt.f32 %v8113_v11 }
0x1b3d   : > { %v10888_v49 = vpop.eup %10887 }
0x1b3e   : > { %v8120_v51 = vmul.f32 %v10888_v49, %v9053_v23 }
0x1b40   : > { %v8124_v30 = vrot.slane %v8120_v51, %v11610_v55 }
0x1b42   : > { %v8125_v47 = vmul.f32 %v8124_v30, %v8119_v5 }
0x1b44   : > { %v8132_v48 = vadd.f32 %v9057_v6, %v8125_v47 }
0x1b46   : > { %v8133_v31 = vmax.f32 %v8132_v48, 0.0 }
0x1b48   : > { %v8134_v27 = vsel %vm980_vm4, %v8133_v31, 0.0 }
0x1b49   : > { %v8135_v61 = vrot.slane %v8134_v27, 4 }
0x1b4b   : > { %v8136_v25 = vadd.f32 %v8135_v61, %v8134_v27 }
0x1b4d   : > { %v8137_v26 = vrot.slane %v8136_v25, 2 }
0x1b4f   : > { %v8138_v10 = vadd.f32 %v8137_v26, %v8136_v25 }
0x1b51   : > { %v8139_v50 = vrot.slane %v8138_v10, 1 }
0x1b53   : > { %v8140_v28 = vadd.f32 %v8139_v50, %v8138_v10 }
0x1b55   : > { %v8141_v15 = vmul.f32 0.25, %v8140_v28 }
0x1b57   : > { %10819 = vmatmul.mubr.msk.f32.vlgmr.msra.gmra.mxu0 %vm932_vm3, %v8141_v15 }
0x1b58   : > { %10933 = shalt.err (!%p10930_p3)
}
0x1b59   : > { %s10934_s1 = scalar_lea.hbm %s8253_s28, 16  ;;  %s10938_s29 = scalar_lea.hbm %s15266_s16, 32 }
0x1b5a   : > { %p10935_p4 = scmp.ne.s32.totalorder %s8253_s28, %s10934_s1  ;;  %p10939_p9 = scmp.lt.s32.totalorder %s8253_s28, %s15266_s16 }
0x1b5b   : > { %p10940_p5 = scmp.lt.s32.totalorder %s10938_s29, %s10934_s1 }
0x1b5c   : > { %p10936_p7 = pnand %p10935_p4, %p15291_p11 }
0x1b5d   : > { %p10941_p10 = por %p10940_p5, %p10939_p9 }
0x1b5e   : > { %p10937_p8 = pneg %p10936_p7 }
0x1b60   : > { %p10942_p12 = pnand %p10941_p10, %p10937_p8 }
0x1b62   : > { %10945 = shalt.err (!%p10942_p12)
}
0x1b63   : > { %10827 = dma.vmem_to_hbm [thread:$0]  (%p15291_p11), %s8256_s26, 16, %s8253_s28, %s8230_s30   ;;  %v8150_v55 = vld [vmem:[%s15262_s12] sm:$0x1] }
0x1b64   : > { %s606_s18 = scalar_lea.vmem [#allocation6], %s11184_s0  ;;  %s15292_s3 = sshll.u32 %s11127_s25, 4 }
0x1b65   : > { %s8242_s19 = sshll.u32 %s606_s18, 4  ;;  %s15213_s1 = scalar_lea.hbm %s15265_s15, %s15292_s3  ;;  %s8243_s19 = int_to_ptr.vmem [resolvable:$true] %s8242_s19 }
0x1b66   : > { %s8226_s20 = scalar_lea.sflag [#allocation4], %s11184_s0  ;;  %s10946_s2 = scalar_lea.vmem %s8243_s19, 16 }
0x1b67   : > { %p10947_p13 = scmp.ne.s32.totalorder %s8243_s19, %s10946_s2  ;;  %s11020_s28 = smov [#allocation6]  }
0x1b68   : > { %s10950_s26 = sshll.u32 %s11020_s28, 4  ;;  %s10951_s26 = int_to_ptr.vmem [resolvable:$false] %s10950_s26 }
0x1b69   : > { %p10948_p0 = pnand %p10947_p13, %p15291_p11  ;;  %s10952_s30 = scalar_lea.vmem %s10951_s26, 32 }
0x1b6a   : > { %p10953_p2 = scmp.lt.s32.totalorder %s8243_s19, %s10951_s26  ;;  %p10954_p3 = scmp.lt.s32.totalorder %s10952_s30, %s10946_s2 }
0x1b6b   : > { %p10949_p1 = pneg %p10948_p0 }
0x1b6c   : > { %p10955_p4 = por %p10954_p3, %p10953_p2 }
0x1b6e   : > { %p10956_p7 = pnand %p10955_p4, %p10949_p1 }
0x1c17   : > { %v8220_v9 = vpop.f32.mrf.mxu0 }
0x1c18   : > { %v8221_v4 = vadd.f32 %v8220_v9, %v8150_v55 }
0x1c19   : > { %v10820_v1 = vpop.f32.mrf.mxu0 }
0x1c1a   : > { %8224 = vst [vmem:[%s606_s18] sm:$0x1] %v8221_v4 }
0x1c1b   : > { %10959 = shalt.err (!%p10956_p7)
}
0x1c1c   : > { %s10960_s25 = scalar_lea.hbm %s15213_s1, 16  ;;  %s10964_s14 = scalar_lea.hbm %s15265_s15, 32 }
0x1c1d   : > { %p10961_p8 = scmp.ne.s32.totalorder %s15213_s1, %s10960_s25  ;;  %p10965_p10 = scmp.lt.s32.totalorder %s15213_s1, %s15265_s15 }
0x1c1e   : > { %p10966_p12 = scmp.lt.s32.totalorder %s10964_s14, %s10960_s25 }
0x1c1f   : > { %p10962_p9 = pnand %p10961_p8, %p15291_p11 }
0x1c20   : > { %p10967_p13 = por %p10966_p12, %p10965_p10 }
0x1c21   : > { %p10963_p5 = pneg %p10962_p9 }
0x1c23   : > { %p10968_p0 = pnand %p10967_p13, %p10963_p5 }
0x1c25   : > { %10971 = shalt.err (!%p10968_p0)
}
0x1c26   : > { %10826 = dma.vmem_to_hbm [thread:$0]  (%p15291_p11), %s8243_s19, 16, %s15213_s1, %s8226_s20  }
0x1c27 PF: > { %s15293_s4 = sld [smem:[#allocation14_spill]]  ;;  %s8267_s29 = sand.u32 1, %s11002_s21  }
0x1c28   : > { %s8268_s2 = scalar_lea.sflag [#allocation4], %s8267_s29 }
0x1c2d   : > { %p15294_p1 = scmp.ne.s32.totalorder %s15293_s4, 0 }
0x1c2f   : > { %p10835_p2 = pnand %p8371_p6, %p15294_p1 }
0x1c31   : > { %p10836_p3 = pneg %p10835_p2 }
0x1c33   : > { %10993 = dma.done.wait (%p10836_p3), %s8268_s2, 16  }
0x1c34   : > { %10995 = vsyncadd (%p10836_p3), %s8268_s2, 4294967280  ;;  %s8276_s28 = scalar_lea.sflag [#allocation8], %s8267_s29 }
0x1c35   : > { %10997 = dma.done.wait (%p10836_p3), %s8276_s28, 16  }
0x1c36   : > { %10999 = vsyncadd (%p10836_p3), %s8276_s28, 4294967280  ;;  %s15295_s24 = sld [smem:[#allocation12_spill]]  ;;  %s15297_s21 = smov %s11006_s22 }
0x1c37   : > { %s15296_s17 = sld [smem:[#allocation13_spill]]  ;;  %s15298_s22 = smov %s11010_s23 }
0x1c3c   : > { %p31_p11 = scmp.ge.s32.totalorder %s15295_s24, 4  }
0x1c3d   : > { %s15299_s23 = smov %s15296_s17 }
0x1c3e   :  { %33 = sbr.rel (!%p31_p11) target bundleno = 13 (0xd), region = 257 }
0x1c43   :  { %8280 = vsyncpa [#allocation4], 1 }
0x1c44   :  { %8282 = vsyncpa [#allocation4 + $0x1], 1 }
0x1c45   :  { %8283 = vsyncpa [#allocation8], 1 }
0x1c46   :  { %8285 = vsyncpa [#allocation8 + $0x1], 1 }
0x1c47   :  { %8286 = vsyncpa [#allocation5], 1 }
0x1c48   :  { %8288 = vsyncpa [#allocation5 + $0x1], 1 }

</bundles_post_ra>
